<compile_context>
chip_gen: v7x
topology: tpu7x:2x2x1
jax: 0.10.0
libtpu: 0.0.40
codegen_flags: <defaults>
</compile_context>

<pallas_src>
import functools

import numpy as np
import jax
import jax.numpy as jnp
from jax.experimental import pallas as pl
from jax.experimental.pallas import tpu as pltpu

BN_EPS = 1e-5
BN_SCALE = float(1.0 / np.sqrt(1.0 + BN_EPS))   # eval-mode BN affine (shift = 0)
PAD_CIN = 8                                     # first-layer input channels padded 3 -> 8


# ----------------------------------------------------------------------------
# fused whole-network kernel (one batch element per grid step)
# ----------------------------------------------------------------------------
def _featurenet_kernel(x_ref,
                       m3f_ref, m3h_ref, m3q_ref, m5f_ref, m5h_ref,
                       d1_ref, d2_ref, e1_ref, e2_ref,
                       w00_ref, w01_ref, w10_ref, w11_ref, w12_ref,
                       w20_ref, w21_ref, w22_ref,
                       wd1t_ref, wd1c_ref, wd2t_ref, wd2c_ref,
                       wo1_ref, wo2_ref, wo3_ref,
                       o1_ref, o2_ref, o3_ref,
                       act_ref, cols_ref,
                       *, H, W, C, G, ones3, ones5):
    H2, W2, H4, W4 = H // 2, W // 2, H // 4, W // 4
    HW, HW2, HW4 = H * W, H2 * W2, H4 * W4

    def stage(HWc, cin, writes, zero_interior=False):
        """Stage activations for the next conv.  Only the guard lanes (and,
        when requested, the interior for zero-stuffed inputs) are zeroed."""
        zg = jnp.zeros((cin, G), jnp.float32)
        act_ref[0:cin, 0:G] = zg
        act_ref[0:cin, G + HWc:G + HWc + G] = zg
        if zero_interior:
            act_ref[0:cin, G:G + HWc] = jnp.zeros((cin, HWc), jnp.float32)
        for roff, loff, val in writes:
            r, wd = val.shape
            act_ref[roff:roff + r, G + loff:G + loff + wd] = val

    def conv(w_ref, mask_ref, ones, cin, Hc, Wc, k):
        """SAME conv at (Hc, Wc): build a bf16 (k*k*cin, Hc*Wc) patch matrix
        from masked shifted lane slices of the guarded act scratch (H boundary
        handled by the zero guard, only W-boundary taps are masked), then one
        bf16 MXU matmul (f32 acc) + ReLU."""
        HWc = Hc * Wc
        p = (k - 1) // 2
        group = 2 if cin < 16 else 1           # keep bf16 stores 16-row aligned
        t = 0
        while t < k * k:
            g = min(group, k * k - t)
            blocks = []
            for u in range(t, t + g):
                di, dj = u // k, u % k
                delta = (di - p) * Wc + (dj - p)
                tap = act_ref[0:cin, G + delta:G + delta + HWc].astype(jnp.bfloat16)
                if not ones[u]:                # skip all-ones (dj == p) masks
                    tap = tap * mask_ref[u:u + 1, 0:HWc]
                blocks.append(tap)
            val = blocks[0] if g == 1 else jnp.concatenate(blocks, axis=0)
            cols_ref[t * cin:(t + g) * cin, 0:HWc] = val
            t += g
        K = k * k * cin
        out = jnp.dot(w_ref[...], cols_ref[0:K, 0:HWc],
                      preferred_element_type=jnp.float32)
        return jnp.maximum(out, 0.0)

    def down_writes(y, Wf, Ho, Wo, dmat_ref):
        """Stride-2 decimation of a full-res conv output y (Cout, Hf*Wf):
        keep even rows (static slices) and even columns (tiny (Wf, Wo) 0/1
        matmul) -> staging writes at the coarse resolution."""
        dmat = dmat_ref[...]
        ws = []
        for a in range(Ho):
            row = y[:, (2 * a) * Wf:(2 * a) * Wf + Wf].astype(jnp.bfloat16)
            ws.append((0, a * Wo,
                       jnp.dot(row, dmat, preferred_element_type=jnp.float32)))
        return ws

    def up_writes(xc, Wo, Hc, Wf, emat_ref):
        """Zero-stuffing upsample of xc (Cin, Hc*Wo): each coarse row goes
        through a tiny (Wo, Wf) 0/1 column-stuffing matmul and lands on fine
        row 2a; odd rows/columns stay zero (interior pre-zeroed)."""
        emat = emat_ref[...]
        ws = []
        for a in range(Hc):
            row = xc[:, a * Wo:(a + 1) * Wo].astype(jnp.bfloat16)
            ws.append((0, (2 * a) * Wf,
                       jnp.dot(row, emat, preferred_element_type=jnp.float32)))
        return ws

    x = x_ref[...]                                              # (PAD_CIN, HW) f32

    # ---------------- encoder, level 0 ----------------
    stage(HW, PAD_CIN, [(0, 0, x)])
    h = conv(w00_ref, m3f_ref, ones3, PAD_CIN, H, W, 3)
    stage(HW, C, [(0, 0, h)])
    conv0 = conv(w01_ref, m3f_ref, ones3, C, H, W, 3)           # (C, HW)

    # ---------------- encoder, level 1 ----------------
    stage(HW, C, [(0, 0, conv0)])
    y = conv(w10_ref, m5f_ref, ones5, C, H, W, 5)               # stride-2 as full-res conv
    stage(HW2, 2 * C, down_writes(y, W, H2, W2, d1_ref))
    h = conv(w11_ref, m3h_ref, ones3, 2 * C, H2, W2, 3)
    stage(HW2, 2 * C, [(0, 0, h)])
    conv1 = conv(w12_ref, m3h_ref, ones3, 2 * C, H2, W2, 3)     # (2C, HW/4)

    # ---------------- encoder, level 2 ----------------
    stage(HW2, 2 * C, [(0, 0, conv1)])
    y = conv(w20_ref, m5h_ref, ones5, 2 * C, H2, W2, 5)
    stage(HW4, 4 * C, down_writes(y, W2, H4, W4, d2_ref))
    h = conv(w21_ref, m3q_ref, ones3, 4 * C, H4, W4, 3)
    stage(HW4, 4 * C, [(0, 0, h)])
    conv2 = conv(w22_ref, m3q_ref, ones3, 4 * C, H4, W4, 3)     # (4C, HW/16)

    # ---------------- stage 1 head ----------------
    o1_ref[...] = jnp.dot(wo1_ref[...], conv2.astype(jnp.bfloat16),
                          preferred_element_type=jnp.float32)

    # ---------------- decoder, stage 2 ----------------
    stage(HW2, 4 * C, up_writes(conv2, W4, H4, W2, e1_ref), zero_interior=True)
    y = conv(wd1t_ref, m3h_ref, ones3, 4 * C, H2, W2, 3)        # (2C, HW/4)
    stage(HW2, 4 * C, [(0, 0, y), (2 * C, 0, conv1)])
    intra = conv(wd1c_ref, m3h_ref, ones3, 4 * C, H2, W2, 3)    # (2C, HW/4)
    o2_ref[...] = jnp.dot(wo2_ref[...], intra.astype(jnp.bfloat16),
                          preferred_element_type=jnp.float32)

    # ---------------- decoder, stage 3 ----------------
    stage(HW, 2 * C, up_writes(intra, W2, H2, W, e2_ref), zero_interior=True)
    y = conv(wd2t_ref, m3f_ref, ones3, 2 * C, H, W, 3)          # (C, HW)
    stage(HW, 2 * C, [(0, 0, y), (C, 0, conv0)])
    intra = conv(wd2c_ref, m3f_ref, ones3, 2 * C, H, W, 3)      # (C, HW)
    o3_ref[...] = jnp.dot(wo3_ref[...], intra.astype(jnp.bfloat16),
                          preferred_element_type=jnp.float32)


# ----------------------------------------------------------------------------
# wrapper-side constant builders (all trace-time numpy, O(W^2) at most)
# ----------------------------------------------------------------------------
def _col_mask(Hc, Wc, k):
    """(k*k, Hc*Wc) bf16 column-validity mask for SAME conv tap extraction on a
    flattened image (the H boundary is handled by the zero guard), plus a
    static per-tap "all ones" flag so those multiplies can be skipped."""
    p = (k - 1) // 2
    j = np.arange(Hc * Wc) % Wc
    rows, ones = [], []
    for t in range(k * k):
        dj = t % k
        ok = ((j + dj - p >= 0) & (j + dj - p < Wc)).astype(np.float32)
        rows.append(ok)
        ones.append(bool(ok.min() >= 1.0))
    return jnp.asarray(np.stack(rows, axis=0), dtype=jnp.bfloat16), tuple(ones)


def _decim_mat(Wf):
    """(Wf, Wf/2) 0/1 column-decimation (keep even columns of one image row)."""
    Wo = Wf // 2
    m = np.zeros((Wf, Wo), np.float32)
    m[2 * np.arange(Wo), np.arange(Wo)] = 1.0
    return jnp.asarray(m, dtype=jnp.bfloat16)


def _stuff_mat(Wo):
    """(Wo, 2*Wo) 0/1 column zero-stuffing (coarse row -> even fine columns)."""
    m = np.zeros((Wo, 2 * Wo), np.float32)
    m[np.arange(Wo), 2 * np.arange(Wo)] = 1.0
    return jnp.asarray(m, dtype=jnp.bfloat16)


def _pack_conv(w, scale=1.0):
    """PyTorch (Cout, Cin, kh, kw) -> bf16 (Cout, kh*kw*Cin), BN scale folded."""
    cout, cin, kh, kw = w.shape
    m = jnp.transpose(w, (0, 2, 3, 1)).reshape(cout, kh * kw * cin) * scale
    return m.astype(jnp.bfloat16)


def _pack_deconv(wt, scale=1.0):
    """ConvTranspose2d(k3,s2,p1,op1) == zero-stuffed upsample + SAME conv with
    the spatially flipped kernel; wt is PyTorch (Cin, Cout, kh, kw)."""
    w_eq = jnp.transpose(jnp.flip(wt, axis=(2, 3)), (1, 0, 2, 3))
    return _pack_conv(w_eq, scale)


# ----------------------------------------------------------------------------
# parameter construction (deterministic, synthetic, PyTorch layouts)
# ----------------------------------------------------------------------------
def _conv_w(key, cout, cin, k):
    bound = 1.0 / np.sqrt(cin * k * k)
    return jax.random.uniform(key, (cout, cin, k, k), jnp.float32, -bound, bound)


def _deconv_w(key, cin, cout, k):
    bound = 1.0 / np.sqrt(cin * k * k)
    return jax.random.uniform(key, (cin, cout, k, k), jnp.float32, -bound, bound)


def init_featurenet_params(key, base_channels):
    C = base_channels
    keys = jax.random.split(key, 16)
    p = {}
    p["conv0_0"] = _conv_w(keys[0], C, 3, 3)
    p["conv0_1"] = _conv_w(keys[1], C, C, 3)
    p["conv1_0"] = _conv_w(keys[2], 2 * C, C, 5)
    p["conv1_1"] = _conv_w(keys[3], 2 * C, 2 * C, 3)
    p["conv1_2"] = _conv_w(keys[4], 2 * C, 2 * C, 3)
    p["conv2_0"] = _conv_w(keys[5], 4 * C, 2 * C, 5)
    p["conv2_1"] = _conv_w(keys[6], 4 * C, 4 * C, 3)
    p["conv2_2"] = _conv_w(keys[7], 4 * C, 4 * C, 3)
    p["out1"] = _conv_w(keys[8], 4 * C, 4 * C, 1)
    p["deconv1_t"] = _deconv_w(keys[9], 4 * C, 2 * C, 3)
    p["deconv1_c"] = _conv_w(keys[10], 2 * C, 4 * C, 3)
    p["out2"] = _conv_w(keys[11], 2 * C, 2 * C, 1)
    p["deconv2_t"] = _deconv_w(keys[12], 2 * C, C, 3)
    p["deconv2_c"] = _conv_w(keys[13], C, 2 * C, 3)
    p["out3"] = _conv_w(keys[14], C, C, 1)
    return p


# ----------------------------------------------------------------------------
# FeatureNet forward (unet, num_stage=3)
# ----------------------------------------------------------------------------
@functools.partial(jax.jit, static_argnums=2)
def featurenet_forward(x_nchw, params, base_channels):
    C = base_channels
    assert C % 8 == 0, "base_channels must be a multiple of 8 (sublane alignment)"
    N, cin_img, H, W = x_nchw.shape
    assert cin_img == 3 and H % 4 == 0 and W % 4 == 0
    HW = H * W
    H2, W2, H4, W4 = H // 2, W // 2, H // 4, W // 4

    # NCHW is already the (channels, flattened-spatial) lane-dense layout we
    # want: just flatten spatial and zero-pad the 3 input channels to 8.
    x = x_nchw.astype(jnp.float32).reshape(N, 3, HW)
    x = jnp.concatenate([x, jnp.zeros((N, PAD_CIN - 3, HW), jnp.float32)], axis=1)

    s = BN_SCALE
    w00 = jnp.zeros((C, PAD_CIN, 3, 3), jnp.float32).at[:, :3].set(params["conv0_0"])
    weights = [
        _pack_conv(w00, s),
        _pack_conv(params["conv0_1"], s),
        _pack_conv(params["conv1_0"], s),
        _pack_conv(params["conv1_1"], s),
        _pack_conv(params["conv1_2"], s),
        _pack_conv(params["conv2_0"], s),
        _pack_conv(params["conv2_1"], s),
        _pack_conv(params["conv2_2"], s),
        _pack_deconv(params["deconv1_t"], s),
        _pack_conv(params["deconv1_c"], s),
        _pack_deconv(params["deconv2_t"], s),
        _pack_conv(params["deconv2_c"], s),
        params["out1"][:, :, 0, 0].astype(jnp.bfloat16),    # 1x1 heads, bias=False
        params["out2"][:, :, 0, 0].astype(jnp.bfloat16),
        params["out3"][:, :, 0, 0].astype(jnp.bfloat16),
    ]

    m3f, ones3 = _col_mask(H, W, 3)
    m3h, _ = _col_mask(H2, W2, 3)
    m3q, _ = _col_mask(H4, W4, 3)
    m5f, ones5 = _col_mask(H, W, 5)
    m5h, _ = _col_mask(H2, W2, 5)

    shared = [m3f, m3h, m3q, m5f, m5h,
              _decim_mat(W), _decim_mat(W2),
              _stuff_mat(W4), _stuff_mat(W2)] + weights

    # lane guard for the widest tap (5x5 at full resolution), kept 128-aligned
    G = ((2 * W + 2 + 127) // 128) * 128
    act_rows = max(PAD_CIN, 4 * C)
    cols_rows = max(9 * PAD_CIN, 50 * C, 36 * C)

    kernel = functools.partial(_featurenet_kernel, H=H, W=W, C=C, G=G,
                               ones3=ones3, ones5=ones5)
    o1, o2, o3 = pl.pallas_call(
        kernel,
        out_shape=(
            jax.ShapeDtypeStruct((N, 4 * C, H4 * W4), jnp.float32),
            jax.ShapeDtypeStruct((N, 2 * C, H2 * W2), jnp.float32),
            jax.ShapeDtypeStruct((N, C, HW), jnp.float32),
        ),
        grid=(N,),
        in_specs=[pl.BlockSpec((None, PAD_CIN, HW), lambda n: (n, 0, 0))]
                 + [pl.BlockSpec(a.shape, lambda n: (0, 0)) for a in shared],
        out_specs=(
            pl.BlockSpec((None, 4 * C, H4 * W4), lambda n: (n, 0, 0)),
            pl.BlockSpec((None, 2 * C, H2 * W2), lambda n: (n, 0, 0)),
            pl.BlockSpec((None, C, HW), lambda n: (n, 0, 0)),
        ),
        scratch_shapes=[
            pltpu.VMEM((act_rows, 2 * G + HW), jnp.float32),   # guarded activations
            pltpu.VMEM((cols_rows, HW), jnp.bfloat16),         # bf16 im2col patches
        ],
        compiler_params=pltpu.CompilerParams(
            dimension_semantics=("parallel",),
            vmem_limit_bytes=48 * 1024 * 1024,
        ),
    )(x, *shared)

    return {
        "stage1": o1.reshape(N, 4 * C, H4, W4),
        "stage2": o2.reshape(N, 2 * C, H2, W2),
        "stage3": o3.reshape(N, C, H, W),
    }


# ----------------------------------------------------------------------------
if __name__ == "__main__":
    key = jax.random.PRNGKey(0)
    kp, kx = jax.random.split(key)
    base_channels = 8
    params = init_featurenet_params(kp, base_channels)

    # x: (N=2, C=3, H=16, W=16) NCHW, like the PyTorch module
    x = jax.random.normal(kx, (2, 3, 16, 16), jnp.float32)

    outputs = featurenet_forward(x, params, base_channels)
    for v in outputs.values():
        jax.block_until_ready(v)

    assert outputs["stage1"].shape == (2, 4 * base_channels, 4, 4)
    assert outputs["stage2"].shape == (2, 2 * base_channels, 8, 8)
    assert outputs["stage3"].shape == (2, base_channels, 16, 16)
    print("KERNEL_OK")
</pallas_src>

<mosaic_0001>
module attributes {stable_mosaic.version = 11 : i64} {
  func.func @_featurenet_kernel(%arg0: i32, %arg1: memref<1x8x256xf32, #tpu.memory_space<vmem>>, %arg2: memref<9x256xbf16, #tpu.memory_space<vmem>>, %arg3: memref<9x64xbf16, #tpu.memory_space<vmem>>, %arg4: memref<9x16xbf16, #tpu.memory_space<vmem>>, %arg5: memref<25x256xbf16, #tpu.memory_space<vmem>>, %arg6: memref<25x64xbf16, #tpu.memory_space<vmem>>, %arg7: memref<16x8xbf16, #tpu.memory_space<vmem>>, %arg8: memref<8x4xbf16, #tpu.memory_space<vmem>>, %arg9: memref<4x8xbf16, #tpu.memory_space<vmem>>, %arg10: memref<8x16xbf16, #tpu.memory_space<vmem>>, %arg11: memref<8x72xbf16, #tpu.memory_space<vmem>>, %arg12: memref<8x72xbf16, #tpu.memory_space<vmem>>, %arg13: memref<16x200xbf16, #tpu.memory_space<vmem>>, %arg14: memref<16x144xbf16, #tpu.memory_space<vmem>>, %arg15: memref<16x144xbf16, #tpu.memory_space<vmem>>, %arg16: memref<32x400xbf16, #tpu.memory_space<vmem>>, %arg17: memref<32x288xbf16, #tpu.memory_space<vmem>>, %arg18: memref<32x288xbf16, #tpu.memory_space<vmem>>, %arg19: memref<16x288xbf16, #tpu.memory_space<vmem>>, %arg20: memref<16x288xbf16, #tpu.memory_space<vmem>>, %arg21: memref<8x144xbf16, #tpu.memory_space<vmem>>, %arg22: memref<8x144xbf16, #tpu.memory_space<vmem>>, %arg23: memref<32x32xbf16, #tpu.memory_space<vmem>>, %arg24: memref<16x16xbf16, #tpu.memory_space<vmem>>, %arg25: memref<8x8xbf16, #tpu.memory_space<vmem>>, %arg26: memref<1x32x16xf32, #tpu.memory_space<vmem>>, %arg27: memref<1x16x64xf32, #tpu.memory_space<vmem>>, %arg28: memref<1x8x256xf32, #tpu.memory_space<vmem>>, %arg29: memref<32x512xf32, #tpu.memory_space<vmem>>, %arg30: memref<400x256xbf16, #tpu.memory_space<vmem>>) attributes {dimension_semantics = [#tpu.dimension_semantics<parallel>], iteration_bounds = array<i64: 2>, scalar_prefetch = 0 : i64, scratch_operands = 2 : i64, tpu.core_type = #tpu.core_type<tc>, window_params = [{transform_indices = @transform_0, window_bounds = array<i64: 1, 8, 256>}, {pipeline_mode = #tpu.pipeline_mode<synchronous>, transform_indices = @transform_1, window_bounds = array<i64: 9, 256>}, {pipeline_mode = #tpu.pipeline_mode<synchronous>, transform_indices = @transform_2, window_bounds = array<i64: 9, 64>}, {pipeline_mode = #tpu.pipeline_mode<synchronous>, transform_indices = @transform_3, window_bounds = array<i64: 9, 16>}, {pipeline_mode = #tpu.pipeline_mode<synchronous>, transform_indices = @transform_4, window_bounds = array<i64: 25, 256>}, {pipeline_mode = #tpu.pipeline_mode<synchronous>, transform_indices = @transform_5, window_bounds = array<i64: 25, 64>}, {pipeline_mode = #tpu.pipeline_mode<synchronous>, transform_indices = @transform_6, window_bounds = array<i64: 16, 8>}, {pipeline_mode = #tpu.pipeline_mode<synchronous>, transform_indices = @transform_7, window_bounds = array<i64: 8, 4>}, {pipeline_mode = #tpu.pipeline_mode<synchronous>, transform_indices = @transform_8, window_bounds = array<i64: 4, 8>}, {pipeline_mode = #tpu.pipeline_mode<synchronous>, transform_indices = @transform_9, window_bounds = array<i64: 8, 16>}, {pipeline_mode = #tpu.pipeline_mode<synchronous>, transform_indices = @transform_10, window_bounds = array<i64: 8, 72>}, {pipeline_mode = #tpu.pipeline_mode<synchronous>, transform_indices = @transform_11, window_bounds = array<i64: 8, 72>}, {pipeline_mode = #tpu.pipeline_mode<synchronous>, transform_indices = @transform_12, window_bounds = array<i64: 16, 200>}, {pipeline_mode = #tpu.pipeline_mode<synchronous>, transform_indices = @transform_13, window_bounds = array<i64: 16, 144>}, {pipeline_mode = #tpu.pipeline_mode<synchronous>, transform_indices = @transform_14, window_bounds = array<i64: 16, 144>}, {pipeline_mode = #tpu.pipeline_mode<synchronous>, transform_indices = @transform_15, window_bounds = array<i64: 32, 400>}, {pipeline_mode = #tpu.pipeline_mode<synchronous>, transform_indices = @transform_16, window_bounds = array<i64: 32, 288>}, {pipeline_mode = #tpu.pipeline_mode<synchronous>, transform_indices = @transform_17, window_bounds = array<i64: 32, 288>}, {pipeline_mode = #tpu.pipeline_mode<synchronous>, transform_indices = @transform_18, window_bounds = array<i64: 16, 288>}, {pipeline_mode = #tpu.pipeline_mode<synchronous>, transform_indices = @transform_19, window_bounds = array<i64: 16, 288>}, {pipeline_mode = #tpu.pipeline_mode<synchronous>, transform_indices = @transform_20, window_bounds = array<i64: 8, 144>}, {pipeline_mode = #tpu.pipeline_mode<synchronous>, transform_indices = @transform_21, window_bounds = array<i64: 8, 144>}, {pipeline_mode = #tpu.pipeline_mode<synchronous>, transform_indices = @transform_22, window_bounds = array<i64: 32, 32>}, {pipeline_mode = #tpu.pipeline_mode<synchronous>, transform_indices = @transform_23, window_bounds = array<i64: 16, 16>}, {pipeline_mode = #tpu.pipeline_mode<synchronous>, transform_indices = @transform_24, window_bounds = array<i64: 8, 8>}, {transform_indices = @transform_25, window_bounds = array<i64: 1, 32, 16>}, {transform_indices = @transform_26, window_bounds = array<i64: 1, 16, 64>}, {transform_indices = @transform_27, window_bounds = array<i64: 1, 8, 256>}]} {
    %c0 = arith.constant 0 : index
    %c0_0 = arith.constant 0 : index
    %c0_1 = arith.constant 0 : index
    %0 = vector.load %arg1[%c0, %c0_0, %c0_1] : memref<1x8x256xf32, #tpu.memory_space<vmem>>, vector<1x8x256xf32>
    %1 = vector.shape_cast %0 : vector<1x8x256xf32> to vector<8x256xf32>
    %cst = arith.constant 0.000000e+00 : f32
    %2 = vector.broadcast %cst : f32 to vector<8x128xf32>
    %c0_2 = arith.constant 0 : index
    %c0_3 = arith.constant 0 : index
    %3 = vector.load %arg29[%c0_2, %c0_3] : memref<32x512xf32, #tpu.memory_space<vmem>>, vector<8x128xf32>
    tpu.vector_store %arg29[%c0_2, %c0_3], %2 {strides = array<i32>} : memref<32x512xf32, #tpu.memory_space<vmem>>, vector<8x128xf32>,
    %c0_4 = arith.constant 0 : index
    %c384 = arith.constant 384 : index
    %4 = vector.load %arg29[%c0_4, %c384] : memref<32x512xf32, #tpu.memory_space<vmem>>, vector<8x128xf32>
    tpu.vector_store %arg29[%c0_4, %c384], %2 {strides = array<i32>} : memref<32x512xf32, #tpu.memory_space<vmem>>, vector<8x128xf32>,
    %c0_5 = arith.constant 0 : index
    %c128 = arith.constant 128 : index
    %5 = vector.load %arg29[%c0_5, %c128] : memref<32x512xf32, #tpu.memory_space<vmem>>, vector<8x256xf32>
    tpu.vector_store %arg29[%c0_5, %c128], %1 {strides = array<i32>} : memref<32x512xf32, #tpu.memory_space<vmem>>, vector<8x256xf32>,
    %c0_6 = arith.constant 0 : index
    %c111 = arith.constant 111 : index
    %6 = vector.load %arg29[%c0_6, %c111] : memref<32x512xf32, #tpu.memory_space<vmem>>, vector<8x256xf32>
    %7 = arith.truncf %6 : vector<8x256xf32> to vector<8x256xbf16>
    %c0_7 = arith.constant 0 : index
    %c0_8 = arith.constant 0 : index
    %8 = vector.load %arg2[%c0_7, %c0_8] : memref<9x256xbf16, #tpu.memory_space<vmem>>, vector<1x256xbf16>
    %9 = vector.broadcast %8 : vector<1x256xbf16> to vector<8x256xbf16>
    %10 = arith.mulf %7, %9 : vector<8x256xbf16>
    %c0_9 = arith.constant 0 : index
    %c112 = arith.constant 112 : index
    %11 = vector.load %arg29[%c0_9, %c112] : memref<32x512xf32, #tpu.memory_space<vmem>>, vector<8x256xf32>
    %12 = arith.truncf %11 : vector<8x256xf32> to vector<8x256xbf16>
    %13 = tpu.concatenate %10, %12 in 0 : vector<8x256xbf16>, vector<8x256xbf16> -> vector<16x256xbf16>
    %c0_10 = arith.constant 0 : index
    %c0_11 = arith.constant 0 : index
    %14 = vector.load %arg30[%c0_10, %c0_11] : memref<400x256xbf16, #tpu.memory_space<vmem>>, vector<16x256xbf16>
    tpu.vector_store %arg30[%c0_10, %c0_11], %13 {strides = array<i32>} : memref<400x256xbf16, #tpu.memory_space<vmem>>, vector<16x256xbf16>,
    %c0_12 = arith.constant 0 : index
    %c113 = arith.constant 113 : index
    %15 = vector.load %arg29[%c0_12, %c113] : memref<32x512xf32, #tpu.memory_space<vmem>>, vector<8x256xf32>
    %16 = arith.truncf %15 : vector<8x256xf32> to vector<8x256xbf16>
    %c2 = arith.constant 2 : index
    %c0_13 = arith.constant 0 : index
    %17 = vector.load %arg2[%c2, %c0_13] : memref<9x256xbf16, #tpu.memory_space<vmem>>, vector<1x256xbf16>
    %18 = vector.broadcast %17 : vector<1x256xbf16> to vector<8x256xbf16>
    %19 = arith.mulf %16, %18 : vector<8x256xbf16>
    %c0_14 = arith.constant 0 : index
    %c127 = arith.constant 127 : index
    %20 = vector.load %arg29[%c0_14, %c127] : memref<32x512xf32, #tpu.memory_space<vmem>>, vector<8x256xf32>
    %21 = arith.truncf %20 : vector<8x256xf32> to vector<8x256xbf16>
    %c3 = arith.constant 3 : index
    %c0_15 = arith.constant 0 : index
    %22 = vector.load %arg2[%c3, %c0_15] : memref<9x256xbf16, #tpu.memory_space<vmem>>, vector<1x256xbf16>
    %23 = vector.broadcast %22 : vector<1x256xbf16> to vector<8x256xbf16>
    %24 = arith.mulf %21, %23 : vector<8x256xbf16>
    %25 = tpu.concatenate %19, %24 in 0 : vector<8x256xbf16>, vector<8x256xbf16> -> vector<16x256xbf16>
    %c16 = arith.constant 16 : index
    %c0_16 = arith.constant 0 : index
    %26 = vector.load %arg30[%c16, %c0_16] : memref<400x256xbf16, #tpu.memory_space<vmem>>, vector<16x256xbf16>
    tpu.vector_store %arg30[%c16, %c0_16], %25 {strides = array<i32>} : memref<400x256xbf16, #tpu.memory_space<vmem>>, vector<16x256xbf16>,
    %c0_17 = arith.constant 0 : index
    %c128_18 = arith.constant 128 : index
    %27 = vector.load %arg29[%c0_17, %c128_18] : memref<32x512xf32, #tpu.memory_space<vmem>>, vector<8x256xf32>
    %28 = arith.truncf %27 : vector<8x256xf32> to vector<8x256xbf16>
    %c0_19 = arith.constant 0 : index
    %c129 = arith.constant 129 : index
    %29 = vector.load %arg29[%c0_19, %c129] : memref<32x512xf32, #tpu.memory_space<vmem>>, vector<8x256xf32>
    %30 = arith.truncf %29 : vector<8x256xf32> to vector<8x256xbf16>
    %c5 = arith.constant 5 : index
    %c0_20 = arith.constant 0 : index
    %31 = vector.load %arg2[%c5, %c0_20] : memref<9x256xbf16, #tpu.memory_space<vmem>>, vector<1x256xbf16>
    %32 = vector.broadcast %31 : vector<1x256xbf16> to vector<8x256xbf16>
    %33 = arith.mulf %30, %32 : vector<8x256xbf16>
    %34 = tpu.concatenate %28, %33 in 0 : vector<8x256xbf16>, vector<8x256xbf16> -> vector<16x256xbf16>
    %c32 = arith.constant 32 : index
    %c0_21 = arith.constant 0 : index
    %35 = vector.load %arg30[%c32, %c0_21] : memref<400x256xbf16, #tpu.memory_space<vmem>>, vector<16x256xbf16>
    tpu.vector_store %arg30[%c32, %c0_21], %34 {strides = array<i32>} : memref<400x256xbf16, #tpu.memory_space<vmem>>, vector<16x256xbf16>,
    %c0_22 = arith.constant 0 : index
    %c143 = arith.constant 143 : index
    %36 = vector.load %arg29[%c0_22, %c143] : memref<32x512xf32, #tpu.memory_space<vmem>>, vector<8x256xf32>
    %37 = arith.truncf %36 : vector<8x256xf32> to vector<8x256xbf16>
    %c6 = arith.constant 6 : index
    %c0_23 = arith.constant 0 : index
    %38 = vector.load %arg2[%c6, %c0_23] : memref<9x256xbf16, #tpu.memory_space<vmem>>, vector<1x256xbf16>
    %39 = vector.broadcast %38 : vector<1x256xbf16> to vector<8x256xbf16>
    %40 = arith.mulf %37, %39 : vector<8x256xbf16>
    %c0_24 = arith.constant 0 : index
    %c144 = arith.constant 144 : index
    %41 = vector.load %arg29[%c0_24, %c144] : memref<32x512xf32, #tpu.memory_space<vmem>>, vector<8x256xf32>
    %42 = arith.truncf %41 : vector<8x256xf32> to vector<8x256xbf16>
    %43 = tpu.concatenate %40, %42 in 0 : vector<8x256xbf16>, vector<8x256xbf16> -> vector<16x256xbf16>
    %c48 = arith.constant 48 : index
    %c0_25 = arith.constant 0 : index
    %44 = vector.load %arg30[%c48, %c0_25] : memref<400x256xbf16, #tpu.memory_space<vmem>>, vector<16x256xbf16>
    tpu.vector_store %arg30[%c48, %c0_25], %43 {strides = array<i32>} : memref<400x256xbf16, #tpu.memory_space<vmem>>, vector<16x256xbf16>,
    %c0_26 = arith.constant 0 : index
    %c145 = arith.constant 145 : index
    %45 = vector.load %arg29[%c0_26, %c145] : memref<32x512xf32, #tpu.memory_space<vmem>>, vector<8x256xf32>
    %46 = arith.truncf %45 : vector<8x256xf32> to vector<8x256xbf16>
    %c8 = arith.constant 8 : index
    %c0_27 = arith.constant 0 : index
    %47 = vector.load %arg2[%c8, %c0_27] : memref<9x256xbf16, #tpu.memory_space<vmem>>, vector<1x256xbf16>
    %48 = vector.broadcast %47 : vector<1x256xbf16> to vector<8x256xbf16>
    %49 = arith.mulf %46, %48 : vector<8x256xbf16>
    %c64 = arith.constant 64 : index
    %c0_28 = arith.constant 0 : index
    %50 = vector.load %arg30[%c64, %c0_28] : memref<400x256xbf16, #tpu.memory_space<vmem>>, vector<8x256xbf16>
    tpu.vector_store %arg30[%c64, %c0_28], %49 {strides = array<i32>} : memref<400x256xbf16, #tpu.memory_space<vmem>>, vector<8x256xbf16>,
    %c0_29 = arith.constant 0 : index
    %c0_30 = arith.constant 0 : index
    %51 = vector.load %arg11[%c0_29, %c0_30] : memref<8x72xbf16, #tpu.memory_space<vmem>>, vector<8x72xbf16>
    %c0_31 = arith.constant 0 : index
    %c0_32 = arith.constant 0 : index
    %52 = vector.load %arg30[%c0_31, %c0_32] : memref<400x256xbf16, #tpu.memory_space<vmem>>, vector<72x256xbf16>
    %cst_33 = arith.constant dense<0.000000e+00> : vector<8x256xf32>
    %53 = tpu.matmul %51, %52, %cst_33 {dimension_numbers = #tpu.dot_dimension_numbers<[1], [0], [0], [1], [0, 0, 1, 1], [], []>} : vector<8x72xbf16>, vector<72x256xbf16>, vector<8x256xf32> -> vector<8x256xf32>
    %cst_34 = arith.constant 0.000000e+00 : f32
    %54 = vector.broadcast %cst_34 : f32 to vector<8x256xf32>
    %55 = arith.maximumf %53, %54 : vector<8x256xf32>
    %cst_35 = arith.constant 0.000000e+00 : f32
    %56 = vector.broadcast %cst_35 : f32 to vector<8x128xf32>
    %c0_36 = arith.constant 0 : index
    %c0_37 = arith.constant 0 : index
    %57 = vector.load %arg29[%c0_36, %c0_37] : memref<32x512xf32, #tpu.memory_space<vmem>>, vector<8x128xf32>
    tpu.vector_store %arg29[%c0_36, %c0_37], %56 {strides = array<i32>} : memref<32x512xf32, #tpu.memory_space<vmem>>, vector<8x128xf32>,
    %c0_38 = arith.constant 0 : index
    %c384_39 = arith.constant 384 : index
    %58 = vector.load %arg29[%c0_38, %c384_39] : memref<32x512xf32, #tpu.memory_space<vmem>>, vector<8x128xf32>
    tpu.vector_store %arg29[%c0_38, %c384_39], %56 {strides = array<i32>} : memref<32x512xf32, #tpu.memory_space<vmem>>, vector<8x128xf32>,
    %c0_40 = arith.constant 0 : index
    %c128_41 = arith.constant 128 : index
    %59 = vector.load %arg29[%c0_40, %c128_41] : memref<32x512xf32, #tpu.memory_space<vmem>>, vector<8x256xf32>
    tpu.vector_store %arg29[%c0_40, %c128_41], %55 {strides = array<i32>} : memref<32x512xf32, #tpu.memory_space<vmem>>, vector<8x256xf32>,
    %c0_42 = arith.constant 0 : index
    %c111_43 = arith.constant 111 : index
    %60 = vector.load %arg29[%c0_42, %c111_43] : memref<32x512xf32, #tpu.memory_space<vmem>>, vector<8x256xf32>
    %61 = arith.truncf %60 : vector<8x256xf32> to vector<8x256xbf16>
    %c0_44 = arith.constant 0 : index
    %c0_45 = arith.constant 0 : index
    %62 = vector.load %arg2[%c0_44, %c0_45] : memref<9x256xbf16, #tpu.memory_space<vmem>>, vector<1x256xbf16>
    %63 = vector.broadcast %62 : vector<1x256xbf16> to vector<8x256xbf16>
    %64 = arith.mulf %61, %63 : vector<8x256xbf16>
    %c0_46 = arith.constant 0 : index
    %c112_47 = arith.constant 112 : index
    %65 = vector.load %arg29[%c0_46, %c112_47] : memref<32x512xf32, #tpu.memory_space<vmem>>, vector<8x256xf32>
    %66 = arith.truncf %65 : vector<8x256xf32> to vector<8x256xbf16>
    %67 = tpu.concatenate %64, %66 in 0 : vector<8x256xbf16>, vector<8x256xbf16> -> vector<16x256xbf16>
    %c0_48 = arith.constant 0 : index
    %c0_49 = arith.constant 0 : index
    %68 = vector.load %arg30[%c0_48, %c0_49] : memref<400x256xbf16, #tpu.memory_space<vmem>>, vector<16x256xbf16>
    tpu.vector_store %arg30[%c0_48, %c0_49], %67 {strides = array<i32>} : memref<400x256xbf16, #tpu.memory_space<vmem>>, vector<16x256xbf16>,
    %c0_50 = arith.constant 0 : index
    %c113_51 = arith.constant 113 : index
    %69 = vector.load %arg29[%c0_50, %c113_51] : memref<32x512xf32, #tpu.memory_space<vmem>>, vector<8x256xf32>
    %70 = arith.truncf %69 : vector<8x256xf32> to vector<8x256xbf16>
    %c2_52 = arith.constant 2 : index
    %c0_53 = arith.constant 0 : index
    %71 = vector.load %arg2[%c2_52, %c0_53] : memref<9x256xbf16, #tpu.memory_space<vmem>>, vector<1x256xbf16>
    %72 = vector.broadcast %71 : vector<1x256xbf16> to vector<8x256xbf16>
    %73 = arith.mulf %70, %72 : vector<8x256xbf16>
    %c0_54 = arith.constant 0 : index
    %c127_55 = arith.constant 127 : index
    %74 = vector.load %arg29[%c0_54, %c127_55] : memref<32x512xf32, #tpu.memory_space<vmem>>, vector<8x256xf32>
    %75 = arith.truncf %74 : vector<8x256xf32> to vector<8x256xbf16>
    %c3_56 = arith.constant 3 : index
    %c0_57 = arith.constant 0 : index
    %76 = vector.load %arg2[%c3_56, %c0_57] : memref<9x256xbf16, #tpu.memory_space<vmem>>, vector<1x256xbf16>
    %77 = vector.broadcast %76 : vector<1x256xbf16> to vector<8x256xbf16>
    %78 = arith.mulf %75, %77 : vector<8x256xbf16>
    %79 = tpu.concatenate %73, %78 in 0 : vector<8x256xbf16>, vector<8x256xbf16> -> vector<16x256xbf16>
    %c16_58 = arith.constant 16 : index
    %c0_59 = arith.constant 0 : index
    %80 = vector.load %arg30[%c16_58, %c0_59] : memref<400x256xbf16, #tpu.memory_space<vmem>>, vector<16x256xbf16>
    tpu.vector_store %arg30[%c16_58, %c0_59], %79 {strides = array<i32>} : memref<400x256xbf16, #tpu.memory_space<vmem>>, vector<16x256xbf16>,
    %c0_60 = arith.constant 0 : index
    %c128_61 = arith.constant 128 : index
    %81 = vector.load %arg29[%c0_60, %c128_61] : memref<32x512xf32, #tpu.memory_space<vmem>>, vector<8x256xf32>
    %82 = arith.truncf %81 : vector<8x256xf32> to vector<8x256xbf16>
    %c0_62 = arith.constant 0 : index
    %c129_63 = arith.constant 129 : index
    %83 = vector.load %arg29[%c0_62, %c129_63] : memref<32x512xf32, #tpu.memory_space<vmem>>, vector<8x256xf32>
    %84 = arith.truncf %83 : vector<8x256xf32> to vector<8x256xbf16>
    %c5_64 = arith.constant 5 : index
    %c0_65 = arith.constant 0 : index
    %85 = vector.load %arg2[%c5_64, %c0_65] : memref<9x256xbf16, #tpu.memory_space<vmem>>, vector<1x256xbf16>
    %86 = vector.broadcast %85 : vector<1x256xbf16> to vector<8x256xbf16>
    %87 = arith.mulf %84, %86 : vector<8x256xbf16>
    %88 = tpu.concatenate %82, %87 in 0 : vector<8x256xbf16>, vector<8x256xbf16> -> vector<16x256xbf16>
    %c32_66 = arith.constant 32 : index
    %c0_67 = arith.constant 0 : index
    %89 = vector.load %arg30[%c32_66, %c0_67] : memref<400x256xbf16, #tpu.memory_space<vmem>>, vector<16x256xbf16>
    tpu.vector_store %arg30[%c32_66, %c0_67], %88 {strides = array<i32>} : memref<400x256xbf16, #tpu.memory_space<vmem>>, vector<16x256xbf16>,
    %c0_68 = arith.constant 0 : index
    %c143_69 = arith.constant 143 : index
    %90 = vector.load %arg29[%c0_68, %c143_69] : memref<32x512xf32, #tpu.memory_space<vmem>>, vector<8x256xf32>
    %91 = arith.truncf %90 : vector<8x256xf32> to vector<8x256xbf16>
    %c6_70 = arith.constant 6 : index
    %c0_71 = arith.constant 0 : index
    %92 = vector.load %arg2[%c6_70, %c0_71] : memref<9x256xbf16, #tpu.memory_space<vmem>>, vector<1x256xbf16>
    %93 = vector.broadcast %92 : vector<1x256xbf16> to vector<8x256xbf16>
    %94 = arith.mulf %91, %93 : vector<8x256xbf16>
    %c0_72 = arith.constant 0 : index
    %c144_73 = arith.constant 144 : index
    %95 = vector.load %arg29[%c0_72, %c144_73] : memref<32x512xf32, #tpu.memory_space<vmem>>, vector<8x256xf32>
    %96 = arith.truncf %95 : vector<8x256xf32> to vector<8x256xbf16>
    %97 = tpu.concatenate %94, %96 in 0 : vector<8x256xbf16>, vector<8x256xbf16> -> vector<16x256xbf16>
    %c48_74 = arith.constant 48 : index
    %c0_75 = arith.constant 0 : index
    %98 = vector.load %arg30[%c48_74, %c0_75] : memref<400x256xbf16, #tpu.memory_space<vmem>>, vector<16x256xbf16>
    tpu.vector_store %arg30[%c48_74, %c0_75], %97 {strides = array<i32>} : memref<400x256xbf16, #tpu.memory_space<vmem>>, vector<16x256xbf16>,
    %c0_76 = arith.constant 0 : index
    %c145_77 = arith.constant 145 : index
    %99 = vector.load %arg29[%c0_76, %c145_77] : memref<32x512xf32, #tpu.memory_space<vmem>>, vector<8x256xf32>
    %100 = arith.truncf %99 : vector<8x256xf32> to vector<8x256xbf16>
    %c8_78 = arith.constant 8 : index
    %c0_79 = arith.constant 0 : index
    %101 = vector.load %arg2[%c8_78, %c0_79] : memref<9x256xbf16, #tpu.memory_space<vmem>>, vector<1x256xbf16>
    %102 = vector.broadcast %101 : vector<1x256xbf16> to vector<8x256xbf16>
    %103 = arith.mulf %100, %102 : vector<8x256xbf16>
    %c64_80 = arith.constant 64 : index
    %c0_81 = arith.constant 0 : index
    %104 = vector.load %arg30[%c64_80, %c0_81] : memref<400x256xbf16, #tpu.memory_space<vmem>>, vector<8x256xbf16>
    tpu.vector_store %arg30[%c64_80, %c0_81], %103 {strides = array<i32>} : memref<400x256xbf16, #tpu.memory_space<vmem>>, vector<8x256xbf16>,
    %c0_82 = arith.constant 0 : index
    %c0_83 = arith.constant 0 : index
    %105 = vector.load %arg12[%c0_82, %c0_83] : memref<8x72xbf16, #tpu.memory_space<vmem>>, vector<8x72xbf16>
    %c0_84 = arith.constant 0 : index
    %c0_85 = arith.constant 0 : index
    %106 = vector.load %arg30[%c0_84, %c0_85] : memref<400x256xbf16, #tpu.memory_space<vmem>>, vector<72x256xbf16>
    %cst_86 = arith.constant dense<0.000000e+00> : vector<8x256xf32>
    %107 = tpu.matmul %105, %106, %cst_86 {dimension_numbers = #tpu.dot_dimension_numbers<[1], [0], [0], [1], [0, 0, 1, 1], [], []>} : vector<8x72xbf16>, vector<72x256xbf16>, vector<8x256xf32> -> vector<8x256xf32>
    %cst_87 = arith.constant 0.000000e+00 : f32
    %108 = vector.broadcast %cst_87 : f32 to vector<8x256xf32>
    %109 = arith.maximumf %107, %108 : vector<8x256xf32>
    %cst_88 = arith.constant 0.000000e+00 : f32
    %110 = vector.broadcast %cst_88 : f32 to vector<8x128xf32>
    %c0_89 = arith.constant 0 : index
    %c0_90 = arith.constant 0 : index
    %111 = vector.load %arg29[%c0_89, %c0_90] : memref<32x512xf32, #tpu.memory_space<vmem>>, vector<8x128xf32>
    tpu.vector_store %arg29[%c0_89, %c0_90], %110 {strides = array<i32>} : memref<32x512xf32, #tpu.memory_space<vmem>>, vector<8x128xf32>,
    %c0_91 = arith.constant 0 : index
    %c384_92 = arith.constant 384 : index
    %112 = vector.load %arg29[%c0_91, %c384_92] : memref<32x512xf32, #tpu.memory_space<vmem>>, vector<8x128xf32>
    tpu.vector_store %arg29[%c0_91, %c384_92], %110 {strides = array<i32>} : memref<32x512xf32, #tpu.memory_space<vmem>>, vector<8x128xf32>,
    %c0_93 = arith.constant 0 : index
    %c128_94 = arith.constant 128 : index
    %113 = vector.load %arg29[%c0_93, %c128_94] : memref<32x512xf32, #tpu.memory_space<vmem>>, vector<8x256xf32>
    tpu.vector_store %arg29[%c0_93, %c128_94], %109 {strides = array<i32>} : memref<32x512xf32, #tpu.memory_space<vmem>>, vector<8x256xf32>,
    %c0_95 = arith.constant 0 : index
    %c94 = arith.constant 94 : index
    %114 = vector.load %arg29[%c0_95, %c94] : memref<32x512xf32, #tpu.memory_space<vmem>>, vector<8x256xf32>
    %115 = arith.truncf %114 : vector<8x256xf32> to vector<8x256xbf16>
    %c0_96 = arith.constant 0 : index
    %c0_97 = arith.constant 0 : index
    %116 = vector.load %arg5[%c0_96, %c0_97] : memref<25x256xbf16, #tpu.memory_space<vmem>>, vector<1x256xbf16>
    %117 = vector.broadcast %116 : vector<1x256xbf16> to vector<8x256xbf16>
    %118 = arith.mulf %115, %117 : vector<8x256xbf16>
    %c0_98 = arith.constant 0 : index
    %c95 = arith.constant 95 : index
    %119 = vector.load %arg29[%c0_98, %c95] : memref<32x512xf32, #tpu.memory_space<vmem>>, vector<8x256xf32>
    %120 = arith.truncf %119 : vector<8x256xf32> to vector<8x256xbf16>
    %c1 = arith.constant 1 : index
    %c0_99 = arith.constant 0 : index
    %121 = vector.load %arg5[%c1, %c0_99] : memref<25x256xbf16, #tpu.memory_space<vmem>>, vector<1x256xbf16>
    %122 = vector.broadcast %121 : vector<1x256xbf16> to vector<8x256xbf16>
    %123 = arith.mulf %120, %122 : vector<8x256xbf16>
    %124 = tpu.concatenate %118, %123 in 0 : vector<8x256xbf16>, vector<8x256xbf16> -> vector<16x256xbf16>
    %c0_100 = arith.constant 0 : index
    %c0_101 = arith.constant 0 : index
    %125 = vector.load %arg30[%c0_100, %c0_101] : memref<400x256xbf16, #tpu.memory_space<vmem>>, vector<16x256xbf16>
    tpu.vector_store %arg30[%c0_100, %c0_101], %124 {strides = array<i32>} : memref<400x256xbf16, #tpu.memory_space<vmem>>, vector<16x256xbf16>,
    %c0_102 = arith.constant 0 : index
    %c96 = arith.constant 96 : index
    %126 = vector.load %arg29[%c0_102, %c96] : memref<32x512xf32, #tpu.memory_space<vmem>>, vector<8x256xf32>
    %127 = arith.truncf %126 : vector<8x256xf32> to vector<8x256xbf16>
    %c0_103 = arith.constant 0 : index
    %c97 = arith.constant 97 : index
    %128 = vector.load %arg29[%c0_103, %c97] : memref<32x512xf32, #tpu.memory_space<vmem>>, vector<8x256xf32>
    %129 = arith.truncf %128 : vector<8x256xf32> to vector<8x256xbf16>
    %c3_104 = arith.constant 3 : index
    %c0_105 = arith.constant 0 : index
    %130 = vector.load %arg5[%c3_104, %c0_105] : memref<25x256xbf16, #tpu.memory_space<vmem>>, vector<1x256xbf16>
    %131 = vector.broadcast %130 : vector<1x256xbf16> to vector<8x256xbf16>
    %132 = arith.mulf %129, %131 : vector<8x256xbf16>
    %133 = tpu.concatenate %127, %132 in 0 : vector<8x256xbf16>, vector<8x256xbf16> -> vector<16x256xbf16>
    %c16_106 = arith.constant 16 : index
    %c0_107 = arith.constant 0 : index
    %134 = vector.load %arg30[%c16_106, %c0_107] : memref<400x256xbf16, #tpu.memory_space<vmem>>, vector<16x256xbf16>
    tpu.vector_store %arg30[%c16_106, %c0_107], %133 {strides = array<i32>} : memref<400x256xbf16, #tpu.memory_space<vmem>>, vector<16x256xbf16>,
    %c0_108 = arith.constant 0 : index
    %c98 = arith.constant 98 : index
    %135 = vector.load %arg29[%c0_108, %c98] : memref<32x512xf32, #tpu.memory_space<vmem>>, vector<8x256xf32>
    %136 = arith.truncf %135 : vector<8x256xf32> to vector<8x256xbf16>
    %c4 = arith.constant 4 : index
    %c0_109 = arith.constant 0 : index
    %137 = vector.load %arg5[%c4, %c0_109] : memref<25x256xbf16, #tpu.memory_space<vmem>>, vector<1x256xbf16>
    %138 = vector.broadcast %137 : vector<1x256xbf16> to vector<8x256xbf16>
    %139 = arith.mulf %136, %138 : vector<8x256xbf16>
    %c0_110 = arith.constant 0 : index
    %c110 = arith.constant 110 : index
    %140 = vector.load %arg29[%c0_110, %c110] : memref<32x512xf32, #tpu.memory_space<vmem>>, vector<8x256xf32>
    %141 = arith.truncf %140 : vector<8x256xf32> to vector<8x256xbf16>
    %c5_111 = arith.constant 5 : index
    %c0_112 = arith.constant 0 : index
    %142 = vector.load %arg5[%c5_111, %c0_112] : memref<25x256xbf16, #tpu.memory_space<vmem>>, vector<1x256xbf16>
    %143 = vector.broadcast %142 : vector<1x256xbf16> to vector<8x256xbf16>
    %144 = arith.mulf %141, %143 : vector<8x256xbf16>
    %145 = tpu.concatenate %139, %144 in 0 : vector<8x256xbf16>, vector<8x256xbf16> -> vector<16x256xbf16>
    %c32_113 = arith.constant 32 : index
    %c0_114 = arith.constant 0 : index
    %146 = vector.load %arg30[%c32_113, %c0_114] : memref<400x256xbf16, #tpu.memory_space<vmem>>, vector<16x256xbf16>
    tpu.vector_store %arg30[%c32_113, %c0_114], %145 {strides = array<i32>} : memref<400x256xbf16, #tpu.memory_space<vmem>>, vector<16x256xbf16>,
    %c0_115 = arith.constant 0 : index
    %c111_116 = arith.constant 111 : index
    %147 = vector.load %arg29[%c0_115, %c111_116] : memref<32x512xf32, #tpu.memory_space<vmem>>, vector<8x256xf32>
    %148 = arith.truncf %147 : vector<8x256xf32> to vector<8x256xbf16>
    %c6_117 = arith.constant 6 : index
    %c0_118 = arith.constant 0 : index
    %149 = vector.load %arg5[%c6_117, %c0_118] : memref<25x256xbf16, #tpu.memory_space<vmem>>, vector<1x256xbf16>
    %150 = vector.broadcast %149 : vector<1x256xbf16> to vector<8x256xbf16>
    %151 = arith.mulf %148, %150 : vector<8x256xbf16>
    %c0_119 = arith.constant 0 : index
    %c112_120 = arith.constant 112 : index
    %152 = vector.load %arg29[%c0_119, %c112_120] : memref<32x512xf32, #tpu.memory_space<vmem>>, vector<8x256xf32>
    %153 = arith.truncf %152 : vector<8x256xf32> to vector<8x256xbf16>
    %154 = tpu.concatenate %151, %153 in 0 : vector<8x256xbf16>, vector<8x256xbf16> -> vector<16x256xbf16>
    %c48_121 = arith.constant 48 : index
    %c0_122 = arith.constant 0 : index
    %155 = vector.load %arg30[%c48_121, %c0_122] : memref<400x256xbf16, #tpu.memory_space<vmem>>, vector<16x256xbf16>
    tpu.vector_store %arg30[%c48_121, %c0_122], %154 {strides = array<i32>} : memref<400x256xbf16, #tpu.memory_space<vmem>>, vector<16x256xbf16>,
    %c0_123 = arith.constant 0 : index
    %c113_124 = arith.constant 113 : index
    %156 = vector.load %arg29[%c0_123, %c113_124] : memref<32x512xf32, #tpu.memory_space<vmem>>, vector<8x256xf32>
    %157 = arith.truncf %156 : vector<8x256xf32> to vector<8x256xbf16>
    %c8_125 = arith.constant 8 : index
    %c0_126 = arith.constant 0 : index
    %158 = vector.load %arg5[%c8_125, %c0_126] : memref<25x256xbf16, #tpu.memory_space<vmem>>, vector<1x256xbf16>
    %159 = vector.broadcast %158 : vector<1x256xbf16> to vector<8x256xbf16>
    %160 = arith.mulf %157, %159 : vector<8x256xbf16>
    %c0_127 = arith.constant 0 : index
    %c114 = arith.constant 114 : index
    %161 = vector.load %arg29[%c0_127, %c114] : memref<32x512xf32, #tpu.memory_space<vmem>>, vector<8x256xf32>
    %162 = arith.truncf %161 : vector<8x256xf32> to vector<8x256xbf16>
    %c9 = arith.constant 9 : index
    %c0_128 = arith.constant 0 : index
    %163 = vector.load %arg5[%c9, %c0_128] : memref<25x256xbf16, #tpu.memory_space<vmem>>, vector<1x256xbf16>
    %164 = vector.broadcast %163 : vector<1x256xbf16> to vector<8x256xbf16>
    %165 = arith.mulf %162, %164 : vector<8x256xbf16>
    %166 = tpu.concatenate %160, %165 in 0 : vector<8x256xbf16>, vector<8x256xbf16> -> vector<16x256xbf16>
    %c64_129 = arith.constant 64 : index
    %c0_130 = arith.constant 0 : index
    %167 = vector.load %arg30[%c64_129, %c0_130] : memref<400x256xbf16, #tpu.memory_space<vmem>>, vector<16x256xbf16>
    tpu.vector_store %arg30[%c64_129, %c0_130], %166 {strides = array<i32>} : memref<400x256xbf16, #tpu.memory_space<vmem>>, vector<16x256xbf16>,
    %c0_131 = arith.constant 0 : index
    %c126 = arith.constant 126 : index
    %168 = vector.load %arg29[%c0_131, %c126] : memref<32x512xf32, #tpu.memory_space<vmem>>, vector<8x256xf32>
    %169 = arith.truncf %168 : vector<8x256xf32> to vector<8x256xbf16>
    %c10 = arith.constant 10 : index
    %c0_132 = arith.constant 0 : index
    %170 = vector.load %arg5[%c10, %c0_132] : memref<25x256xbf16, #tpu.memory_space<vmem>>, vector<1x256xbf16>
    %171 = vector.broadcast %170 : vector<1x256xbf16> to vector<8x256xbf16>
    %172 = arith.mulf %169, %171 : vector<8x256xbf16>
    %c0_133 = arith.constant 0 : index
    %c127_134 = arith.constant 127 : index
    %173 = vector.load %arg29[%c0_133, %c127_134] : memref<32x512xf32, #tpu.memory_space<vmem>>, vector<8x256xf32>
    %174 = arith.truncf %173 : vector<8x256xf32> to vector<8x256xbf16>
    %c11 = arith.constant 11 : index
    %c0_135 = arith.constant 0 : index
    %175 = vector.load %arg5[%c11, %c0_135] : memref<25x256xbf16, #tpu.memory_space<vmem>>, vector<1x256xbf16>
    %176 = vector.broadcast %175 : vector<1x256xbf16> to vector<8x256xbf16>
    %177 = arith.mulf %174, %176 : vector<8x256xbf16>
    %178 = tpu.concatenate %172, %177 in 0 : vector<8x256xbf16>, vector<8x256xbf16> -> vector<16x256xbf16>
    %c80 = arith.constant 80 : index
    %c0_136 = arith.constant 0 : index
    %179 = vector.load %arg30[%c80, %c0_136] : memref<400x256xbf16, #tpu.memory_space<vmem>>, vector<16x256xbf16>
    tpu.vector_store %arg30[%c80, %c0_136], %178 {strides = array<i32>} : memref<400x256xbf16, #tpu.memory_space<vmem>>, vector<16x256xbf16>,
    %c0_137 = arith.constant 0 : index
    %c128_138 = arith.constant 128 : index
    %180 = vector.load %arg29[%c0_137, %c128_138] : memref<32x512xf32, #tpu.memory_space<vmem>>, vector<8x256xf32>
    %181 = arith.truncf %180 : vector<8x256xf32> to vector<8x256xbf16>
    %c0_139 = arith.constant 0 : index
    %c129_140 = arith.constant 129 : index
    %182 = vector.load %arg29[%c0_139, %c129_140] : memref<32x512xf32, #tpu.memory_space<vmem>>, vector<8x256xf32>
    %183 = arith.truncf %182 : vector<8x256xf32> to vector<8x256xbf16>
    %c13 = arith.constant 13 : index
    %c0_141 = arith.constant 0 : index
    %184 = vector.load %arg5[%c13, %c0_141] : memref<25x256xbf16, #tpu.memory_space<vmem>>, vector<1x256xbf16>
    %185 = vector.broadcast %184 : vector<1x256xbf16> to vector<8x256xbf16>
    %186 = arith.mulf %183, %185 : vector<8x256xbf16>
    %187 = tpu.concatenate %181, %186 in 0 : vector<8x256xbf16>, vector<8x256xbf16> -> vector<16x256xbf16>
    %c96_142 = arith.constant 96 : index
    %c0_143 = arith.constant 0 : index
    %188 = vector.load %arg30[%c96_142, %c0_143] : memref<400x256xbf16, #tpu.memory_space<vmem>>, vector<16x256xbf16>
    tpu.vector_store %arg30[%c96_142, %c0_143], %187 {strides = array<i32>} : memref<400x256xbf16, #tpu.memory_space<vmem>>, vector<16x256xbf16>,
    %c0_144 = arith.constant 0 : index
    %c130 = arith.constant 130 : index
    %189 = vector.load %arg29[%c0_144, %c130] : memref<32x512xf32, #tpu.memory_space<vmem>>, vector<8x256xf32>
    %190 = arith.truncf %189 : vector<8x256xf32> to vector<8x256xbf16>
    %c14 = arith.constant 14 : index
    %c0_145 = arith.constant 0 : index
    %191 = vector.load %arg5[%c14, %c0_145] : memref<25x256xbf16, #tpu.memory_space<vmem>>, vector<1x256xbf16>
    %192 = vector.broadcast %191 : vector<1x256xbf16> to vector<8x256xbf16>
    %193 = arith.mulf %190, %192 : vector<8x256xbf16>
    %c0_146 = arith.constant 0 : index
    %c142 = arith.constant 142 : index
    %194 = vector.load %arg29[%c0_146, %c142] : memref<32x512xf32, #tpu.memory_space<vmem>>, vector<8x256xf32>
    %195 = arith.truncf %194 : vector<8x256xf32> to vector<8x256xbf16>
    %c15 = arith.constant 15 : index
    %c0_147 = arith.constant 0 : index
    %196 = vector.load %arg5[%c15, %c0_147] : memref<25x256xbf16, #tpu.memory_space<vmem>>, vector<1x256xbf16>
    %197 = vector.broadcast %196 : vector<1x256xbf16> to vector<8x256xbf16>
    %198 = arith.mulf %195, %197 : vector<8x256xbf16>
    %199 = tpu.concatenate %193, %198 in 0 : vector<8x256xbf16>, vector<8x256xbf16> -> vector<16x256xbf16>
    %c112_148 = arith.constant 112 : index
    %c0_149 = arith.constant 0 : index
    %200 = vector.load %arg30[%c112_148, %c0_149] : memref<400x256xbf16, #tpu.memory_space<vmem>>, vector<16x256xbf16>
    tpu.vector_store %arg30[%c112_148, %c0_149], %199 {strides = array<i32>} : memref<400x256xbf16, #tpu.memory_space<vmem>>, vector<16x256xbf16>,
    %c0_150 = arith.constant 0 : index
    %c143_151 = arith.constant 143 : index
    %201 = vector.load %arg29[%c0_150, %c143_151] : memref<32x512xf32, #tpu.memory_space<vmem>>, vector<8x256xf32>
    %202 = arith.truncf %201 : vector<8x256xf32> to vector<8x256xbf16>
    %c16_152 = arith.constant 16 : index
    %c0_153 = arith.constant 0 : index
    %203 = vector.load %arg5[%c16_152, %c0_153] : memref<25x256xbf16, #tpu.memory_space<vmem>>, vector<1x256xbf16>
    %204 = vector.broadcast %203 : vector<1x256xbf16> to vector<8x256xbf16>
    %205 = arith.mulf %202, %204 : vector<8x256xbf16>
    %c0_154 = arith.constant 0 : index
    %c144_155 = arith.constant 144 : index
    %206 = vector.load %arg29[%c0_154, %c144_155] : memref<32x512xf32, #tpu.memory_space<vmem>>, vector<8x256xf32>
    %207 = arith.truncf %206 : vector<8x256xf32> to vector<8x256xbf16>
    %208 = tpu.concatenate %205, %207 in 0 : vector<8x256xbf16>, vector<8x256xbf16> -> vector<16x256xbf16>
    %c128_156 = arith.constant 128 : index
    %c0_157 = arith.constant 0 : index
    %209 = vector.load %arg30[%c128_156, %c0_157] : memref<400x256xbf16, #tpu.memory_space<vmem>>, vector<16x256xbf16>
    tpu.vector_store %arg30[%c128_156, %c0_157], %208 {strides = array<i32>} : memref<400x256xbf16, #tpu.memory_space<vmem>>, vector<16x256xbf16>,
    %c0_158 = arith.constant 0 : index
    %c145_159 = arith.constant 145 : index
    %210 = vector.load %arg29[%c0_158, %c145_159] : memref<32x512xf32, #tpu.memory_space<vmem>>, vector<8x256xf32>
    %211 = arith.truncf %210 : vector<8x256xf32> to vector<8x256xbf16>
    %c18 = arith.constant 18 : index
    %c0_160 = arith.constant 0 : index
    %212 = vector.load %arg5[%c18, %c0_160] : memref<25x256xbf16, #tpu.memory_space<vmem>>, vector<1x256xbf16>
    %213 = vector.broadcast %212 : vector<1x256xbf16> to vector<8x256xbf16>
    %214 = arith.mulf %211, %213 : vector<8x256xbf16>
    %c0_161 = arith.constant 0 : index
    %c146 = arith.constant 146 : index
    %215 = vector.load %arg29[%c0_161, %c146] : memref<32x512xf32, #tpu.memory_space<vmem>>, vector<8x256xf32>
    %216 = arith.truncf %215 : vector<8x256xf32> to vector<8x256xbf16>
    %c19 = arith.constant 19 : index
    %c0_162 = arith.constant 0 : index
    %217 = vector.load %arg5[%c19, %c0_162] : memref<25x256xbf16, #tpu.memory_space<vmem>>, vector<1x256xbf16>
    %218 = vector.broadcast %217 : vector<1x256xbf16> to vector<8x256xbf16>
    %219 = arith.mulf %216, %218 : vector<8x256xbf16>
    %220 = tpu.concatenate %214, %219 in 0 : vector<8x256xbf16>, vector<8x256xbf16> -> vector<16x256xbf16>
    %c144_163 = arith.constant 144 : index
    %c0_164 = arith.constant 0 : index
    %221 = vector.load %arg30[%c144_163, %c0_164] : memref<400x256xbf16, #tpu.memory_space<vmem>>, vector<16x256xbf16>
    tpu.vector_store %arg30[%c144_163, %c0_164], %220 {strides = array<i32>} : memref<400x256xbf16, #tpu.memory_space<vmem>>, vector<16x256xbf16>,
    %c0_165 = arith.constant 0 : index
    %c158 = arith.constant 158 : index
    %222 = vector.load %arg29[%c0_165, %c158] : memref<32x512xf32, #tpu.memory_space<vmem>>, vector<8x256xf32>
    %223 = arith.truncf %222 : vector<8x256xf32> to vector<8x256xbf16>
    %c20 = arith.constant 20 : index
    %c0_166 = arith.constant 0 : index
    %224 = vector.load %arg5[%c20, %c0_166] : memref<25x256xbf16, #tpu.memory_space<vmem>>, vector<1x256xbf16>
    %225 = vector.broadcast %224 : vector<1x256xbf16> to vector<8x256xbf16>
    %226 = arith.mulf %223, %225 : vector<8x256xbf16>
    %c0_167 = arith.constant 0 : index
    %c159 = arith.constant 159 : index
    %227 = vector.load %arg29[%c0_167, %c159] : memref<32x512xf32, #tpu.memory_space<vmem>>, vector<8x256xf32>
    %228 = arith.truncf %227 : vector<8x256xf32> to vector<8x256xbf16>
    %c21 = arith.constant 21 : index
    %c0_168 = arith.constant 0 : index
    %229 = vector.load %arg5[%c21, %c0_168] : memref<25x256xbf16, #tpu.memory_space<vmem>>, vector<1x256xbf16>
    %230 = vector.broadcast %229 : vector<1x256xbf16> to vector<8x256xbf16>
    %231 = arith.mulf %228, %230 : vector<8x256xbf16>
    %232 = tpu.concatenate %226, %231 in 0 : vector<8x256xbf16>, vector<8x256xbf16> -> vector<16x256xbf16>
    %c160 = arith.constant 160 : index
    %c0_169 = arith.constant 0 : index
    %233 = vector.load %arg30[%c160, %c0_169] : memref<400x256xbf16, #tpu.memory_space<vmem>>, vector<16x256xbf16>
    tpu.vector_store %arg30[%c160, %c0_169], %232 {strides = array<i32>} : memref<400x256xbf16, #tpu.memory_space<vmem>>, vector<16x256xbf16>,
    %c0_170 = arith.constant 0 : index
    %c160_171 = arith.constant 160 : index
    %234 = vector.load %arg29[%c0_170, %c160_171] : memref<32x512xf32, #tpu.memory_space<vmem>>, vector<8x256xf32>
    %235 = arith.truncf %234 : vector<8x256xf32> to vector<8x256xbf16>
    %c0_172 = arith.constant 0 : index
    %c161 = arith.constant 161 : index
    %236 = vector.load %arg29[%c0_172, %c161] : memref<32x512xf32, #tpu.memory_space<vmem>>, vector<8x256xf32>
    %237 = arith.truncf %236 : vector<8x256xf32> to vector<8x256xbf16>
    %c23 = arith.constant 23 : index
    %c0_173 = arith.constant 0 : index
    %238 = vector.load %arg5[%c23, %c0_173] : memref<25x256xbf16, #tpu.memory_space<vmem>>, vector<1x256xbf16>
    %239 = vector.broadcast %238 : vector<1x256xbf16> to vector<8x256xbf16>
    %240 = arith.mulf %237, %239 : vector<8x256xbf16>
    %241 = tpu.concatenate %235, %240 in 0 : vector<8x256xbf16>, vector<8x256xbf16> -> vector<16x256xbf16>
    %c176 = arith.constant 176 : index
    %c0_174 = arith.constant 0 : index
    %242 = vector.load %arg30[%c176, %c0_174] : memref<400x256xbf16, #tpu.memory_space<vmem>>, vector<16x256xbf16>
    tpu.vector_store %arg30[%c176, %c0_174], %241 {strides = array<i32>} : memref<400x256xbf16, #tpu.memory_space<vmem>>, vector<16x256xbf16>,
    %c0_175 = arith.constant 0 : index
    %c162 = arith.constant 162 : index
    %243 = vector.load %arg29[%c0_175, %c162] : memref<32x512xf32, #tpu.memory_space<vmem>>, vector<8x256xf32>
    %244 = arith.truncf %243 : vector<8x256xf32> to vector<8x256xbf16>
    %c24 = arith.constant 24 : index
    %c0_176 = arith.constant 0 : index
    %245 = vector.load %arg5[%c24, %c0_176] : memref<25x256xbf16, #tpu.memory_space<vmem>>, vector<1x256xbf16>
    %246 = vector.broadcast %245 : vector<1x256xbf16> to vector<8x256xbf16>
    %247 = arith.mulf %244, %246 : vector<8x256xbf16>
    %c192 = arith.constant 192 : index
    %c0_177 = arith.constant 0 : index
    %248 = vector.load %arg30[%c192, %c0_177] : memref<400x256xbf16, #tpu.memory_space<vmem>>, vector<8x256xbf16>
    tpu.vector_store %arg30[%c192, %c0_177], %247 {strides = array<i32>} : memref<400x256xbf16, #tpu.memory_space<vmem>>, vector<8x256xbf16>,
    %c0_178 = arith.constant 0 : index
    %c0_179 = arith.constant 0 : index
    %249 = vector.load %arg13[%c0_178, %c0_179] : memref<16x200xbf16, #tpu.memory_space<vmem>>, vector<16x200xbf16>
    %c0_180 = arith.constant 0 : index
    %c0_181 = arith.constant 0 : index
    %250 = vector.load %arg30[%c0_180, %c0_181] : memref<400x256xbf16, #tpu.memory_space<vmem>>, vector<200x256xbf16>
    %cst_182 = arith.constant dense<0.000000e+00> : vector<16x256xf32>
    %251 = tpu.matmul %249, %250, %cst_182 {dimension_numbers = #tpu.dot_dimension_numbers<[1], [0], [0], [1], [0, 0, 1, 1], [], []>} : vector<16x200xbf16>, vector<200x256xbf16>, vector<16x256xf32> -> vector<16x256xf32>
    %cst_183 = arith.constant 0.000000e+00 : f32
    %252 = vector.broadcast %cst_183 : f32 to vector<16x256xf32>
    %253 = arith.maximumf %251, %252 : vector<16x256xf32>
    %c0_184 = arith.constant 0 : index
    %c0_185 = arith.constant 0 : index
    %254 = vector.load %arg7[%c0_184, %c0_185] : memref<16x8xbf16, #tpu.memory_space<vmem>>, vector<16x8xbf16>
    %255 = vector.extract_strided_slice %253 {offsets = [0, 0], sizes = [16, 16], strides = [1, 1]} : vector<16x256xf32> to vector<16x16xf32>
    %256 = arith.truncf %255 : vector<16x16xf32> to vector<16x16xbf16>
    %cst_186 = arith.constant dense<0.000000e+00> : vector<16x8xf32>
    %257 = tpu.matmul %256, %254, %cst_186 {dimension_numbers = #tpu.dot_dimension_numbers<[1], [0], [0], [1], [0, 0, 1, 1], [], []>} : vector<16x16xbf16>, vector<16x8xbf16>, vector<16x8xf32> -> vector<16x8xf32>
    %258 = vector.extract_strided_slice %253 {offsets = [0, 32], sizes = [16, 16], strides = [1, 1]} : vector<16x256xf32> to vector<16x16xf32>
    %259 = arith.truncf %258 : vector<16x16xf32> to vector<16x16xbf16>
    %cst_187 = arith.constant dense<0.000000e+00> : vector<16x8xf32>
    %260 = tpu.matmul %259, %254, %cst_187 {dimension_numbers = #tpu.dot_dimension_numbers<[1], [0], [0], [1], [0, 0, 1, 1], [], []>} : vector<16x16xbf16>, vector<16x8xbf16>, vector<16x8xf32> -> vector<16x8xf32>
    %261 = vector.extract_strided_slice %253 {offsets = [0, 64], sizes = [16, 16], strides = [1, 1]} : vector<16x256xf32> to vector<16x16xf32>
    %262 = arith.truncf %261 : vector<16x16xf32> to vector<16x16xbf16>
    %cst_188 = arith.constant dense<0.000000e+00> : vector<16x8xf32>
    %263 = tpu.matmul %262, %254, %cst_188 {dimension_numbers = #tpu.dot_dimension_numbers<[1], [0], [0], [1], [0, 0, 1, 1], [], []>} : vector<16x16xbf16>, vector<16x8xbf16>, vector<16x8xf32> -> vector<16x8xf32>
    %264 = vector.extract_strided_slice %253 {offsets = [0, 96], sizes = [16, 16], strides = [1, 1]} : vector<16x256xf32> to vector<16x16xf32>
    %265 = arith.truncf %264 : vector<16x16xf32> to vector<16x16xbf16>
    %cst_189 = arith.constant dense<0.000000e+00> : vector<16x8xf32>
    %266 = tpu.matmul %265, %254, %cst_189 {dimension_numbers = #tpu.dot_dimension_numbers<[1], [0], [0], [1], [0, 0, 1, 1], [], []>} : vector<16x16xbf16>, vector<16x8xbf16>, vector<16x8xf32> -> vector<16x8xf32>
    %267 = vector.extract_strided_slice %253 {offsets = [0, 128], sizes = [16, 16], strides = [1, 1]} : vector<16x256xf32> to vector<16x16xf32>
    %268 = arith.truncf %267 : vector<16x16xf32> to vector<16x16xbf16>
    %cst_190 = arith.constant dense<0.000000e+00> : vector<16x8xf32>
    %269 = tpu.matmul %268, %254, %cst_190 {dimension_numbers = #tpu.dot_dimension_numbers<[1], [0], [0], [1], [0, 0, 1, 1], [], []>} : vector<16x16xbf16>, vector<16x8xbf16>, vector<16x8xf32> -> vector<16x8xf32>
    %270 = vector.extract_strided_slice %253 {offsets = [0, 160], sizes = [16, 16], strides = [1, 1]} : vector<16x256xf32> to vector<16x16xf32>
    %271 = arith.truncf %270 : vector<16x16xf32> to vector<16x16xbf16>
    %cst_191 = arith.constant dense<0.000000e+00> : vector<16x8xf32>
    %272 = tpu.matmul %271, %254, %cst_191 {dimension_numbers = #tpu.dot_dimension_numbers<[1], [0], [0], [1], [0, 0, 1, 1], [], []>} : vector<16x16xbf16>, vector<16x8xbf16>, vector<16x8xf32> -> vector<16x8xf32>
    %273 = vector.extract_strided_slice %253 {offsets = [0, 192], sizes = [16, 16], strides = [1, 1]} : vector<16x256xf32> to vector<16x16xf32>
    %274 = arith.truncf %273 : vector<16x16xf32> to vector<16x16xbf16>
    %cst_192 = arith.constant dense<0.000000e+00> : vector<16x8xf32>
    %275 = tpu.matmul %274, %254, %cst_192 {dimension_numbers = #tpu.dot_dimension_numbers<[1], [0], [0], [1], [0, 0, 1, 1], [], []>} : vector<16x16xbf16>, vector<16x8xbf16>, vector<16x8xf32> -> vector<16x8xf32>
    %276 = vector.extract_strided_slice %253 {offsets = [0, 224], sizes = [16, 16], strides = [1, 1]} : vector<16x256xf32> to vector<16x16xf32>
    %277 = arith.truncf %276 : vector<16x16xf32> to vector<16x16xbf16>
    %cst_193 = arith.constant dense<0.000000e+00> : vector<16x8xf32>
    %278 = tpu.matmul %277, %254, %cst_193 {dimension_numbers = #tpu.dot_dimension_numbers<[1], [0], [0], [1], [0, 0, 1, 1], [], []>} : vector<16x16xbf16>, vector<16x8xbf16>, vector<16x8xf32> -> vector<16x8xf32>
    %cst_194 = arith.constant 0.000000e+00 : f32
    %279 = vector.broadcast %cst_194 : f32 to vector<16x128xf32>
    %c0_195 = arith.constant 0 : index
    %c0_196 = arith.constant 0 : index
    %280 = vector.load %arg29[%c0_195, %c0_196] : memref<32x512xf32, #tpu.memory_space<vmem>>, vector<16x128xf32>
    tpu.vector_store %arg29[%c0_195, %c0_196], %279 {strides = array<i32>} : memref<32x512xf32, #tpu.memory_space<vmem>>, vector<16x128xf32>,
    %c0_197 = arith.constant 0 : index
    %c192_198 = arith.constant 192 : index
    %281 = vector.load %arg29[%c0_197, %c192_198] : memref<32x512xf32, #tpu.memory_space<vmem>>, vector<16x128xf32>
    tpu.vector_store %arg29[%c0_197, %c192_198], %279 {strides = array<i32>} : memref<32x512xf32, #tpu.memory_space<vmem>>, vector<16x128xf32>,
    %c0_199 = arith.constant 0 : index
    %c128_200 = arith.constant 128 : index
    %282 = vector.load %arg29[%c0_199, %c128_200] : memref<32x512xf32, #tpu.memory_space<vmem>>, vector<16x8xf32>
    tpu.vector_store %arg29[%c0_199, %c128_200], %257 {strides = array<i32>} : memref<32x512xf32, #tpu.memory_space<vmem>>, vector<16x8xf32>,
    %c0_201 = arith.constant 0 : index
    %c136 = arith.constant 136 : index
    %283 = vector.load %arg29[%c0_201, %c136] : memref<32x512xf32, #tpu.memory_space<vmem>>, vector<16x8xf32>
    tpu.vector_store %arg29[%c0_201, %c136], %260 {strides = array<i32>} : memref<32x512xf32, #tpu.memory_space<vmem>>, vector<16x8xf32>,
    %c0_202 = arith.constant 0 : index
    %c144_203 = arith.constant 144 : index
    %284 = vector.load %arg29[%c0_202, %c144_203] : memref<32x512xf32, #tpu.memory_space<vmem>>, vector<16x8xf32>
    tpu.vector_store %arg29[%c0_202, %c144_203], %263 {strides = array<i32>} : memref<32x512xf32, #tpu.memory_space<vmem>>, vector<16x8xf32>,
    %c0_204 = arith.constant 0 : index
    %c152 = arith.constant 152 : index
    %285 = vector.load %arg29[%c0_204, %c152] : memref<32x512xf32, #tpu.memory_space<vmem>>, vector<16x8xf32>
    tpu.vector_store %arg29[%c0_204, %c152], %266 {strides = array<i32>} : memref<32x512xf32, #tpu.memory_space<vmem>>, vector<16x8xf32>,
    %c0_205 = arith.constant 0 : index
    %c160_206 = arith.constant 160 : index
    %286 = vector.load %arg29[%c0_205, %c160_206] : memref<32x512xf32, #tpu.memory_space<vmem>>, vector<16x8xf32>
    tpu.vector_store %arg29[%c0_205, %c160_206], %269 {strides = array<i32>} : memref<32x512xf32, #tpu.memory_space<vmem>>, vector<16x8xf32>,
    %c0_207 = arith.constant 0 : index
    %c168 = arith.constant 168 : index
    %287 = vector.load %arg29[%c0_207, %c168] : memref<32x512xf32, #tpu.memory_space<vmem>>, vector<16x8xf32>
    tpu.vector_store %arg29[%c0_207, %c168], %272 {strides = array<i32>} : memref<32x512xf32, #tpu.memory_space<vmem>>, vector<16x8xf32>,
    %c0_208 = arith.constant 0 : index
    %c176_209 = arith.constant 176 : index
    %288 = vector.load %arg29[%c0_208, %c176_209] : memref<32x512xf32, #tpu.memory_space<vmem>>, vector<16x8xf32>
    tpu.vector_store %arg29[%c0_208, %c176_209], %275 {strides = array<i32>} : memref<32x512xf32, #tpu.memory_space<vmem>>, vector<16x8xf32>,
    %c0_210 = arith.constant 0 : index
    %c184 = arith.constant 184 : index
    %289 = vector.load %arg29[%c0_210, %c184] : memref<32x512xf32, #tpu.memory_space<vmem>>, vector<16x8xf32>
    tpu.vector_store %arg29[%c0_210, %c184], %278 {strides = array<i32>} : memref<32x512xf32, #tpu.memory_space<vmem>>, vector<16x8xf32>,
    %c0_211 = arith.constant 0 : index
    %c119 = arith.constant 119 : index
    %290 = vector.load %arg29[%c0_211, %c119] : memref<32x512xf32, #tpu.memory_space<vmem>>, vector<16x64xf32>
    %291 = arith.truncf %290 : vector<16x64xf32> to vector<16x64xbf16>
    %c0_212 = arith.constant 0 : index
    %c0_213 = arith.constant 0 : index
    %292 = vector.load %arg3[%c0_212, %c0_213] : memref<9x64xbf16, #tpu.memory_space<vmem>>, vector<1x64xbf16>
    %293 = vector.broadcast %292 : vector<1x64xbf16> to vector<16x64xbf16>
    %294 = arith.mulf %291, %293 : vector<16x64xbf16>
    %c0_214 = arith.constant 0 : index
    %c0_215 = arith.constant 0 : index
    %295 = vector.load %arg30[%c0_214, %c0_215] : memref<400x256xbf16, #tpu.memory_space<vmem>>, vector<16x64xbf16>
    tpu.vector_store %arg30[%c0_214, %c0_215], %294 {strides = array<i32>} : memref<400x256xbf16, #tpu.memory_space<vmem>>, vector<16x64xbf16>,
    %c0_216 = arith.constant 0 : index
    %c120 = arith.constant 120 : index
    %296 = vector.load %arg29[%c0_216, %c120] : memref<32x512xf32, #tpu.memory_space<vmem>>, vector<16x64xf32>
    %297 = arith.truncf %296 : vector<16x64xf32> to vector<16x64xbf16>
    %c16_217 = arith.constant 16 : index
    %c0_218 = arith.constant 0 : index
    %298 = vector.load %arg30[%c16_217, %c0_218] : memref<400x256xbf16, #tpu.memory_space<vmem>>, vector<16x64xbf16>
    tpu.vector_store %arg30[%c16_217, %c0_218], %297 {strides = array<i32>} : memref<400x256xbf16, #tpu.memory_space<vmem>>, vector<16x64xbf16>,
    %c0_219 = arith.constant 0 : index
    %c121 = arith.constant 121 : index
    %299 = vector.load %arg29[%c0_219, %c121] : memref<32x512xf32, #tpu.memory_space<vmem>>, vector<16x64xf32>
    %300 = arith.truncf %299 : vector<16x64xf32> to vector<16x64xbf16>
    %c2_220 = arith.constant 2 : index
    %c0_221 = arith.constant 0 : index
    %301 = vector.load %arg3[%c2_220, %c0_221] : memref<9x64xbf16, #tpu.memory_space<vmem>>, vector<1x64xbf16>
    %302 = vector.broadcast %301 : vector<1x64xbf16> to vector<16x64xbf16>
    %303 = arith.mulf %300, %302 : vector<16x64xbf16>
    %c32_222 = arith.constant 32 : index
    %c0_223 = arith.constant 0 : index
    %304 = vector.load %arg30[%c32_222, %c0_223] : memref<400x256xbf16, #tpu.memory_space<vmem>>, vector<16x64xbf16>
    tpu.vector_store %arg30[%c32_222, %c0_223], %303 {strides = array<i32>} : memref<400x256xbf16, #tpu.memory_space<vmem>>, vector<16x64xbf16>,
    %c0_224 = arith.constant 0 : index
    %c127_225 = arith.constant 127 : index
    %305 = vector.load %arg29[%c0_224, %c127_225] : memref<32x512xf32, #tpu.memory_space<vmem>>, vector<16x64xf32>
    %306 = arith.truncf %305 : vector<16x64xf32> to vector<16x64xbf16>
    %c3_226 = arith.constant 3 : index
    %c0_227 = arith.constant 0 : index
    %307 = vector.load %arg3[%c3_226, %c0_227] : memref<9x64xbf16, #tpu.memory_space<vmem>>, vector<1x64xbf16>
    %308 = vector.broadcast %307 : vector<1x64xbf16> to vector<16x64xbf16>
    %309 = arith.mulf %306, %308 : vector<16x64xbf16>
    %c48_228 = arith.constant 48 : index
    %c0_229 = arith.constant 0 : index
    %310 = vector.load %arg30[%c48_228, %c0_229] : memref<400x256xbf16, #tpu.memory_space<vmem>>, vector<16x64xbf16>
    tpu.vector_store %arg30[%c48_228, %c0_229], %309 {strides = array<i32>} : memref<400x256xbf16, #tpu.memory_space<vmem>>, vector<16x64xbf16>,
    %c0_230 = arith.constant 0 : index
    %c128_231 = arith.constant 128 : index
    %311 = vector.load %arg29[%c0_230, %c128_231] : memref<32x512xf32, #tpu.memory_space<vmem>>, vector<16x64xf32>
    %312 = arith.truncf %311 : vector<16x64xf32> to vector<16x64xbf16>
    %c64_232 = arith.constant 64 : index
    %c0_233 = arith.constant 0 : index
    %313 = vector.load %arg30[%c64_232, %c0_233] : memref<400x256xbf16, #tpu.memory_space<vmem>>, vector<16x64xbf16>
    tpu.vector_store %arg30[%c64_232, %c0_233], %312 {strides = array<i32>} : memref<400x256xbf16, #tpu.memory_space<vmem>>, vector<16x64xbf16>,
    %c0_234 = arith.constant 0 : index
    %c129_235 = arith.constant 129 : index
    %314 = vector.load %arg29[%c0_234, %c129_235] : memref<32x512xf32, #tpu.memory_space<vmem>>, vector<16x64xf32>
    %315 = arith.truncf %314 : vector<16x64xf32> to vector<16x64xbf16>
    %c5_236 = arith.constant 5 : index
    %c0_237 = arith.constant 0 : index
    %316 = vector.load %arg3[%c5_236, %c0_237] : memref<9x64xbf16, #tpu.memory_space<vmem>>, vector<1x64xbf16>
    %317 = vector.broadcast %316 : vector<1x64xbf16> to vector<16x64xbf16>
    %318 = arith.mulf %315, %317 : vector<16x64xbf16>
    %c80_238 = arith.constant 80 : index
    %c0_239 = arith.constant 0 : index
    %319 = vector.load %arg30[%c80_238, %c0_239] : memref<400x256xbf16, #tpu.memory_space<vmem>>, vector<16x64xbf16>
    tpu.vector_store %arg30[%c80_238, %c0_239], %318 {strides = array<i32>} : memref<400x256xbf16, #tpu.memory_space<vmem>>, vector<16x64xbf16>,
    %c0_240 = arith.constant 0 : index
    %c135 = arith.constant 135 : index
    %320 = vector.load %arg29[%c0_240, %c135] : memref<32x512xf32, #tpu.memory_space<vmem>>, vector<16x64xf32>
    %321 = arith.truncf %320 : vector<16x64xf32> to vector<16x64xbf16>
    %c6_241 = arith.constant 6 : index
    %c0_242 = arith.constant 0 : index
    %322 = vector.load %arg3[%c6_241, %c0_242] : memref<9x64xbf16, #tpu.memory_space<vmem>>, vector<1x64xbf16>
    %323 = vector.broadcast %322 : vector<1x64xbf16> to vector<16x64xbf16>
    %324 = arith.mulf %321, %323 : vector<16x64xbf16>
    %c96_243 = arith.constant 96 : index
    %c0_244 = arith.constant 0 : index
    %325 = vector.load %arg30[%c96_243, %c0_244] : memref<400x256xbf16, #tpu.memory_space<vmem>>, vector<16x64xbf16>
    tpu.vector_store %arg30[%c96_243, %c0_244], %324 {strides = array<i32>} : memref<400x256xbf16, #tpu.memory_space<vmem>>, vector<16x64xbf16>,
    %c0_245 = arith.constant 0 : index
    %c136_246 = arith.constant 136 : index
    %326 = vector.load %arg29[%c0_245, %c136_246] : memref<32x512xf32, #tpu.memory_space<vmem>>, vector<16x64xf32>
    %327 = arith.truncf %326 : vector<16x64xf32> to vector<16x64xbf16>
    %c112_247 = arith.constant 112 : index
    %c0_248 = arith.constant 0 : index
    %328 = vector.load %arg30[%c112_247, %c0_248] : memref<400x256xbf16, #tpu.memory_space<vmem>>, vector<16x64xbf16>
    tpu.vector_store %arg30[%c112_247, %c0_248], %327 {strides = array<i32>} : memref<400x256xbf16, #tpu.memory_space<vmem>>, vector<16x64xbf16>,
    %c0_249 = arith.constant 0 : index
    %c137 = arith.constant 137 : index
    %329 = vector.load %arg29[%c0_249, %c137] : memref<32x512xf32, #tpu.memory_space<vmem>>, vector<16x64xf32>
    %330 = arith.truncf %329 : vector<16x64xf32> to vector<16x64xbf16>
    %c8_250 = arith.constant 8 : index
    %c0_251 = arith.constant 0 : index
    %331 = vector.load %arg3[%c8_250, %c0_251] : memref<9x64xbf16, #tpu.memory_space<vmem>>, vector<1x64xbf16>
    %332 = vector.broadcast %331 : vector<1x64xbf16> to vector<16x64xbf16>
    %333 = arith.mulf %330, %332 : vector<16x64xbf16>
    %c128_252 = arith.constant 128 : index
    %c0_253 = arith.constant 0 : index
    %334 = vector.load %arg30[%c128_252, %c0_253] : memref<400x256xbf16, #tpu.memory_space<vmem>>, vector<16x64xbf16>
    tpu.vector_store %arg30[%c128_252, %c0_253], %333 {strides = array<i32>} : memref<400x256xbf16, #tpu.memory_space<vmem>>, vector<16x64xbf16>,
    %c0_254 = arith.constant 0 : index
    %c0_255 = arith.constant 0 : index
    %335 = vector.load %arg14[%c0_254, %c0_255] : memref<16x144xbf16, #tpu.memory_space<vmem>>, vector<16x144xbf16>
    %c0_256 = arith.constant 0 : index
    %c0_257 = arith.constant 0 : index
    %336 = vector.load %arg30[%c0_256, %c0_257] : memref<400x256xbf16, #tpu.memory_space<vmem>>, vector<144x64xbf16>
    %cst_258 = arith.constant dense<0.000000e+00> : vector<16x64xf32>
    %337 = tpu.matmul %335, %336, %cst_258 {dimension_numbers = #tpu.dot_dimension_numbers<[1], [0], [0], [1], [0, 0, 1, 1], [], []>} : vector<16x144xbf16>, vector<144x64xbf16>, vector<16x64xf32> -> vector<16x64xf32>
    %cst_259 = arith.constant 0.000000e+00 : f32
    %338 = vector.broadcast %cst_259 : f32 to vector<16x64xf32>
    %339 = arith.maximumf %337, %338 : vector<16x64xf32>
    %cst_260 = arith.constant 0.000000e+00 : f32
    %340 = vector.broadcast %cst_260 : f32 to vector<16x128xf32>
    %c0_261 = arith.constant 0 : index
    %c0_262 = arith.constant 0 : index
    %341 = vector.load %arg29[%c0_261, %c0_262] : memref<32x512xf32, #tpu.memory_space<vmem>>, vector<16x128xf32>
    tpu.vector_store %arg29[%c0_261, %c0_262], %340 {strides = array<i32>} : memref<32x512xf32, #tpu.memory_space<vmem>>, vector<16x128xf32>,
    %c0_263 = arith.constant 0 : index
    %c192_264 = arith.constant 192 : index
    %342 = vector.load %arg29[%c0_263, %c192_264] : memref<32x512xf32, #tpu.memory_space<vmem>>, vector<16x128xf32>
    tpu.vector_store %arg29[%c0_263, %c192_264], %340 {strides = array<i32>} : memref<32x512xf32, #tpu.memory_space<vmem>>, vector<16x128xf32>,
    %c0_265 = arith.constant 0 : index
    %c128_266 = arith.constant 128 : index
    %343 = vector.load %arg29[%c0_265, %c128_266] : memref<32x512xf32, #tpu.memory_space<vmem>>, vector<16x64xf32>
    tpu.vector_store %arg29[%c0_265, %c128_266], %339 {strides = array<i32>} : memref<32x512xf32, #tpu.memory_space<vmem>>, vector<16x64xf32>,
    %c0_267 = arith.constant 0 : index
    %c119_268 = arith.constant 119 : index
    %344 = vector.load %arg29[%c0_267, %c119_268] : memref<32x512xf32, #tpu.memory_space<vmem>>, vector<16x64xf32>
    %345 = arith.truncf %344 : vector<16x64xf32> to vector<16x64xbf16>
    %c0_269 = arith.constant 0 : index
    %c0_270 = arith.constant 0 : index
    %346 = vector.load %arg3[%c0_269, %c0_270] : memref<9x64xbf16, #tpu.memory_space<vmem>>, vector<1x64xbf16>
    %347 = vector.broadcast %346 : vector<1x64xbf16> to vector<16x64xbf16>
    %348 = arith.mulf %345, %347 : vector<16x64xbf16>
    %c0_271 = arith.constant 0 : index
    %c0_272 = arith.constant 0 : index
    %349 = vector.load %arg30[%c0_271, %c0_272] : memref<400x256xbf16, #tpu.memory_space<vmem>>, vector<16x64xbf16>
    tpu.vector_store %arg30[%c0_271, %c0_272], %348 {strides = array<i32>} : memref<400x256xbf16, #tpu.memory_space<vmem>>, vector<16x64xbf16>,
    %c0_273 = arith.constant 0 : index
    %c120_274 = arith.constant 120 : index
    %350 = vector.load %arg29[%c0_273, %c120_274] : memref<32x512xf32, #tpu.memory_space<vmem>>, vector<16x64xf32>
    %351 = arith.truncf %350 : vector<16x64xf32> to vector<16x64xbf16>
    %c16_275 = arith.constant 16 : index
    %c0_276 = arith.constant 0 : index
    %352 = vector.load %arg30[%c16_275, %c0_276] : memref<400x256xbf16, #tpu.memory_space<vmem>>, vector<16x64xbf16>
    tpu.vector_store %arg30[%c16_275, %c0_276], %351 {strides = array<i32>} : memref<400x256xbf16, #tpu.memory_space<vmem>>, vector<16x64xbf16>,
    %c0_277 = arith.constant 0 : index
    %c121_278 = arith.constant 121 : index
    %353 = vector.load %arg29[%c0_277, %c121_278] : memref<32x512xf32, #tpu.memory_space<vmem>>, vector<16x64xf32>
    %354 = arith.truncf %353 : vector<16x64xf32> to vector<16x64xbf16>
    %c2_279 = arith.constant 2 : index
    %c0_280 = arith.constant 0 : index
    %355 = vector.load %arg3[%c2_279, %c0_280] : memref<9x64xbf16, #tpu.memory_space<vmem>>, vector<1x64xbf16>
    %356 = vector.broadcast %355 : vector<1x64xbf16> to vector<16x64xbf16>
    %357 = arith.mulf %354, %356 : vector<16x64xbf16>
    %c32_281 = arith.constant 32 : index
    %c0_282 = arith.constant 0 : index
    %358 = vector.load %arg30[%c32_281, %c0_282] : memref<400x256xbf16, #tpu.memory_space<vmem>>, vector<16x64xbf16>
    tpu.vector_store %arg30[%c32_281, %c0_282], %357 {strides = array<i32>} : memref<400x256xbf16, #tpu.memory_space<vmem>>, vector<16x64xbf16>,
    %c0_283 = arith.constant 0 : index
    %c127_284 = arith.constant 127 : index
    %359 = vector.load %arg29[%c0_283, %c127_284] : memref<32x512xf32, #tpu.memory_space<vmem>>, vector<16x64xf32>
    %360 = arith.truncf %359 : vector<16x64xf32> to vector<16x64xbf16>
    %c3_285 = arith.constant 3 : index
    %c0_286 = arith.constant 0 : index
    %361 = vector.load %arg3[%c3_285, %c0_286] : memref<9x64xbf16, #tpu.memory_space<vmem>>, vector<1x64xbf16>
    %362 = vector.broadcast %361 : vector<1x64xbf16> to vector<16x64xbf16>
    %363 = arith.mulf %360, %362 : vector<16x64xbf16>
    %c48_287 = arith.constant 48 : index
    %c0_288 = arith.constant 0 : index
    %364 = vector.load %arg30[%c48_287, %c0_288] : memref<400x256xbf16, #tpu.memory_space<vmem>>, vector<16x64xbf16>
    tpu.vector_store %arg30[%c48_287, %c0_288], %363 {strides = array<i32>} : memref<400x256xbf16, #tpu.memory_space<vmem>>, vector<16x64xbf16>,
    %c0_289 = arith.constant 0 : index
    %c128_290 = arith.constant 128 : index
    %365 = vector.load %arg29[%c0_289, %c128_290] : memref<32x512xf32, #tpu.memory_space<vmem>>, vector<16x64xf32>
    %366 = arith.truncf %365 : vector<16x64xf32> to vector<16x64xbf16>
    %c64_291 = arith.constant 64 : index
    %c0_292 = arith.constant 0 : index
    %367 = vector.load %arg30[%c64_291, %c0_292] : memref<400x256xbf16, #tpu.memory_space<vmem>>, vector<16x64xbf16>
    tpu.vector_store %arg30[%c64_291, %c0_292], %366 {strides = array<i32>} : memref<400x256xbf16, #tpu.memory_space<vmem>>, vector<16x64xbf16>,
    %c0_293 = arith.constant 0 : index
    %c129_294 = arith.constant 129 : index
    %368 = vector.load %arg29[%c0_293, %c129_294] : memref<32x512xf32, #tpu.memory_space<vmem>>, vector<16x64xf32>
    %369 = arith.truncf %368 : vector<16x64xf32> to vector<16x64xbf16>
    %c5_295 = arith.constant 5 : index
    %c0_296 = arith.constant 0 : index
    %370 = vector.load %arg3[%c5_295, %c0_296] : memref<9x64xbf16, #tpu.memory_space<vmem>>, vector<1x64xbf16>
    %371 = vector.broadcast %370 : vector<1x64xbf16> to vector<16x64xbf16>
    %372 = arith.mulf %369, %371 : vector<16x64xbf16>
    %c80_297 = arith.constant 80 : index
    %c0_298 = arith.constant 0 : index
    %373 = vector.load %arg30[%c80_297, %c0_298] : memref<400x256xbf16, #tpu.memory_space<vmem>>, vector<16x64xbf16>
    tpu.vector_store %arg30[%c80_297, %c0_298], %372 {strides = array<i32>} : memref<400x256xbf16, #tpu.memory_space<vmem>>, vector<16x64xbf16>,
    %c0_299 = arith.constant 0 : index
    %c135_300 = arith.constant 135 : index
    %374 = vector.load %arg29[%c0_299, %c135_300] : memref<32x512xf32, #tpu.memory_space<vmem>>, vector<16x64xf32>
    %375 = arith.truncf %374 : vector<16x64xf32> to vector<16x64xbf16>
    %c6_301 = arith.constant 6 : index
    %c0_302 = arith.constant 0 : index
    %376 = vector.load %arg3[%c6_301, %c0_302] : memref<9x64xbf16, #tpu.memory_space<vmem>>, vector<1x64xbf16>
    %377 = vector.broadcast %376 : vector<1x64xbf16> to vector<16x64xbf16>
    %378 = arith.mulf %375, %377 : vector<16x64xbf16>
    %c96_303 = arith.constant 96 : index
    %c0_304 = arith.constant 0 : index
    %379 = vector.load %arg30[%c96_303, %c0_304] : memref<400x256xbf16, #tpu.memory_space<vmem>>, vector<16x64xbf16>
    tpu.vector_store %arg30[%c96_303, %c0_304], %378 {strides = array<i32>} : memref<400x256xbf16, #tpu.memory_space<vmem>>, vector<16x64xbf16>,
    %c0_305 = arith.constant 0 : index
    %c136_306 = arith.constant 136 : index
    %380 = vector.load %arg29[%c0_305, %c136_306] : memref<32x512xf32, #tpu.memory_space<vmem>>, vector<16x64xf32>
    %381 = arith.truncf %380 : vector<16x64xf32> to vector<16x64xbf16>
    %c112_307 = arith.constant 112 : index
    %c0_308 = arith.constant 0 : index
    %382 = vector.load %arg30[%c112_307, %c0_308] : memref<400x256xbf16, #tpu.memory_space<vmem>>, vector<16x64xbf16>
    tpu.vector_store %arg30[%c112_307, %c0_308], %381 {strides = array<i32>} : memref<400x256xbf16, #tpu.memory_space<vmem>>, vector<16x64xbf16>,
    %c0_309 = arith.constant 0 : index
    %c137_310 = arith.constant 137 : index
    %383 = vector.load %arg29[%c0_309, %c137_310] : memref<32x512xf32, #tpu.memory_space<vmem>>, vector<16x64xf32>
    %384 = arith.truncf %383 : vector<16x64xf32> to vector<16x64xbf16>
    %c8_311 = arith.constant 8 : index
    %c0_312 = arith.constant 0 : index
    %385 = vector.load %arg3[%c8_311, %c0_312] : memref<9x64xbf16, #tpu.memory_space<vmem>>, vector<1x64xbf16>
    %386 = vector.broadcast %385 : vector<1x64xbf16> to vector<16x64xbf16>
    %387 = arith.mulf %384, %386 : vector<16x64xbf16>
    %c128_313 = arith.constant 128 : index
    %c0_314 = arith.constant 0 : index
    %388 = vector.load %arg30[%c128_313, %c0_314] : memref<400x256xbf16, #tpu.memory_space<vmem>>, vector<16x64xbf16>
    tpu.vector_store %arg30[%c128_313, %c0_314], %387 {strides = array<i32>} : memref<400x256xbf16, #tpu.memory_space<vmem>>, vector<16x64xbf16>,
    %c0_315 = arith.constant 0 : index
    %c0_316 = arith.constant 0 : index
    %389 = vector.load %arg15[%c0_315, %c0_316] : memref<16x144xbf16, #tpu.memory_space<vmem>>, vector<16x144xbf16>
    %c0_317 = arith.constant 0 : index
    %c0_318 = arith.constant 0 : index
    %390 = vector.load %arg30[%c0_317, %c0_318] : memref<400x256xbf16, #tpu.memory_space<vmem>>, vector<144x64xbf16>
    %cst_319 = arith.constant dense<0.000000e+00> : vector<16x64xf32>
    %391 = tpu.matmul %389, %390, %cst_319 {dimension_numbers = #tpu.dot_dimension_numbers<[1], [0], [0], [1], [0, 0, 1, 1], [], []>} : vector<16x144xbf16>, vector<144x64xbf16>, vector<16x64xf32> -> vector<16x64xf32>
    %cst_320 = arith.constant 0.000000e+00 : f32
    %392 = vector.broadcast %cst_320 : f32 to vector<16x64xf32>
    %393 = arith.maximumf %391, %392 : vector<16x64xf32>
    %cst_321 = arith.constant 0.000000e+00 : f32
    %394 = vector.broadcast %cst_321 : f32 to vector<16x128xf32>
    %c0_322 = arith.constant 0 : index
    %c0_323 = arith.constant 0 : index
    %395 = vector.load %arg29[%c0_322, %c0_323] : memref<32x512xf32, #tpu.memory_space<vmem>>, vector<16x128xf32>
    tpu.vector_store %arg29[%c0_322, %c0_323], %394 {strides = array<i32>} : memref<32x512xf32, #tpu.memory_space<vmem>>, vector<16x128xf32>,
    %c0_324 = arith.constant 0 : index
    %c192_325 = arith.constant 192 : index
    %396 = vector.load %arg29[%c0_324, %c192_325] : memref<32x512xf32, #tpu.memory_space<vmem>>, vector<16x128xf32>
    tpu.vector_store %arg29[%c0_324, %c192_325], %394 {strides = array<i32>} : memref<32x512xf32, #tpu.memory_space<vmem>>, vector<16x128xf32>,
    %c0_326 = arith.constant 0 : index
    %c128_327 = arith.constant 128 : index
    %397 = vector.load %arg29[%c0_326, %c128_327] : memref<32x512xf32, #tpu.memory_space<vmem>>, vector<16x64xf32>
    tpu.vector_store %arg29[%c0_326, %c128_327], %393 {strides = array<i32>} : memref<32x512xf32, #tpu.memory_space<vmem>>, vector<16x64xf32>,
    %c0_328 = arith.constant 0 : index
    %c110_329 = arith.constant 110 : index
    %398 = vector.load %arg29[%c0_328, %c110_329] : memref<32x512xf32, #tpu.memory_space<vmem>>, vector<16x64xf32>
    %399 = arith.truncf %398 : vector<16x64xf32> to vector<16x64xbf16>
    %c0_330 = arith.constant 0 : index
    %c0_331 = arith.constant 0 : index
    %400 = vector.load %arg6[%c0_330, %c0_331] : memref<25x64xbf16, #tpu.memory_space<vmem>>, vector<1x64xbf16>
    %401 = vector.broadcast %400 : vector<1x64xbf16> to vector<16x64xbf16>
    %402 = arith.mulf %399, %401 : vector<16x64xbf16>
    %c0_332 = arith.constant 0 : index
    %c0_333 = arith.constant 0 : index
    %403 = vector.load %arg30[%c0_332, %c0_333] : memref<400x256xbf16, #tpu.memory_space<vmem>>, vector<16x64xbf16>
    tpu.vector_store %arg30[%c0_332, %c0_333], %402 {strides = array<i32>} : memref<400x256xbf16, #tpu.memory_space<vmem>>, vector<16x64xbf16>,
    %c0_334 = arith.constant 0 : index
    %c111_335 = arith.constant 111 : index
    %404 = vector.load %arg29[%c0_334, %c111_335] : memref<32x512xf32, #tpu.memory_space<vmem>>, vector<16x64xf32>
    %405 = arith.truncf %404 : vector<16x64xf32> to vector<16x64xbf16>
    %c1_336 = arith.constant 1 : index
    %c0_337 = arith.constant 0 : index
    %406 = vector.load %arg6[%c1_336, %c0_337] : memref<25x64xbf16, #tpu.memory_space<vmem>>, vector<1x64xbf16>
    %407 = vector.broadcast %406 : vector<1x64xbf16> to vector<16x64xbf16>
    %408 = arith.mulf %405, %407 : vector<16x64xbf16>
    %c16_338 = arith.constant 16 : index
    %c0_339 = arith.constant 0 : index
    %409 = vector.load %arg30[%c16_338, %c0_339] : memref<400x256xbf16, #tpu.memory_space<vmem>>, vector<16x64xbf16>
    tpu.vector_store %arg30[%c16_338, %c0_339], %408 {strides = array<i32>} : memref<400x256xbf16, #tpu.memory_space<vmem>>, vector<16x64xbf16>,
    %c0_340 = arith.constant 0 : index
    %c112_341 = arith.constant 112 : index
    %410 = vector.load %arg29[%c0_340, %c112_341] : memref<32x512xf32, #tpu.memory_space<vmem>>, vector<16x64xf32>
    %411 = arith.truncf %410 : vector<16x64xf32> to vector<16x64xbf16>
    %c32_342 = arith.constant 32 : index
    %c0_343 = arith.constant 0 : index
    %412 = vector.load %arg30[%c32_342, %c0_343] : memref<400x256xbf16, #tpu.memory_space<vmem>>, vector<16x64xbf16>
    tpu.vector_store %arg30[%c32_342, %c0_343], %411 {strides = array<i32>} : memref<400x256xbf16, #tpu.memory_space<vmem>>, vector<16x64xbf16>,
    %c0_344 = arith.constant 0 : index
    %c113_345 = arith.constant 113 : index
    %413 = vector.load %arg29[%c0_344, %c113_345] : memref<32x512xf32, #tpu.memory_space<vmem>>, vector<16x64xf32>
    %414 = arith.truncf %413 : vector<16x64xf32> to vector<16x64xbf16>
    %c3_346 = arith.constant 3 : index
    %c0_347 = arith.constant 0 : index
    %415 = vector.load %arg6[%c3_346, %c0_347] : memref<25x64xbf16, #tpu.memory_space<vmem>>, vector<1x64xbf16>
    %416 = vector.broadcast %415 : vector<1x64xbf16> to vector<16x64xbf16>
    %417 = arith.mulf %414, %416 : vector<16x64xbf16>
    %c48_348 = arith.constant 48 : index
    %c0_349 = arith.constant 0 : index
    %418 = vector.load %arg30[%c48_348, %c0_349] : memref<400x256xbf16, #tpu.memory_space<vmem>>, vector<16x64xbf16>
    tpu.vector_store %arg30[%c48_348, %c0_349], %417 {strides = array<i32>} : memref<400x256xbf16, #tpu.memory_space<vmem>>, vector<16x64xbf16>,
    %c0_350 = arith.constant 0 : index
    %c114_351 = arith.constant 114 : index
    %419 = vector.load %arg29[%c0_350, %c114_351] : memref<32x512xf32, #tpu.memory_space<vmem>>, vector<16x64xf32>
    %420 = arith.truncf %419 : vector<16x64xf32> to vector<16x64xbf16>
    %c4_352 = arith.constant 4 : index
    %c0_353 = arith.constant 0 : index
    %421 = vector.load %arg6[%c4_352, %c0_353] : memref<25x64xbf16, #tpu.memory_space<vmem>>, vector<1x64xbf16>
    %422 = vector.broadcast %421 : vector<1x64xbf16> to vector<16x64xbf16>
    %423 = arith.mulf %420, %422 : vector<16x64xbf16>
    %c64_354 = arith.constant 64 : index
    %c0_355 = arith.constant 0 : index
    %424 = vector.load %arg30[%c64_354, %c0_355] : memref<400x256xbf16, #tpu.memory_space<vmem>>, vector<16x64xbf16>
    tpu.vector_store %arg30[%c64_354, %c0_355], %423 {strides = array<i32>} : memref<400x256xbf16, #tpu.memory_space<vmem>>, vector<16x64xbf16>,
    %c0_356 = arith.constant 0 : index
    %c118 = arith.constant 118 : index
    %425 = vector.load %arg29[%c0_356, %c118] : memref<32x512xf32, #tpu.memory_space<vmem>>, vector<16x64xf32>
    %426 = arith.truncf %425 : vector<16x64xf32> to vector<16x64xbf16>
    %c5_357 = arith.constant 5 : index
    %c0_358 = arith.constant 0 : index
    %427 = vector.load %arg6[%c5_357, %c0_358] : memref<25x64xbf16, #tpu.memory_space<vmem>>, vector<1x64xbf16>
    %428 = vector.broadcast %427 : vector<1x64xbf16> to vector<16x64xbf16>
    %429 = arith.mulf %426, %428 : vector<16x64xbf16>
    %c80_359 = arith.constant 80 : index
    %c0_360 = arith.constant 0 : index
    %430 = vector.load %arg30[%c80_359, %c0_360] : memref<400x256xbf16, #tpu.memory_space<vmem>>, vector<16x64xbf16>
    tpu.vector_store %arg30[%c80_359, %c0_360], %429 {strides = array<i32>} : memref<400x256xbf16, #tpu.memory_space<vmem>>, vector<16x64xbf16>,
    %c0_361 = arith.constant 0 : index
    %c119_362 = arith.constant 119 : index
    %431 = vector.load %arg29[%c0_361, %c119_362] : memref<32x512xf32, #tpu.memory_space<vmem>>, vector<16x64xf32>
    %432 = arith.truncf %431 : vector<16x64xf32> to vector<16x64xbf16>
    %c6_363 = arith.constant 6 : index
    %c0_364 = arith.constant 0 : index
    %433 = vector.load %arg6[%c6_363, %c0_364] : memref<25x64xbf16, #tpu.memory_space<vmem>>, vector<1x64xbf16>
    %434 = vector.broadcast %433 : vector<1x64xbf16> to vector<16x64xbf16>
    %435 = arith.mulf %432, %434 : vector<16x64xbf16>
    %c96_365 = arith.constant 96 : index
    %c0_366 = arith.constant 0 : index
    %436 = vector.load %arg30[%c96_365, %c0_366] : memref<400x256xbf16, #tpu.memory_space<vmem>>, vector<16x64xbf16>
    tpu.vector_store %arg30[%c96_365, %c0_366], %435 {strides = array<i32>} : memref<400x256xbf16, #tpu.memory_space<vmem>>, vector<16x64xbf16>,
    %c0_367 = arith.constant 0 : index
    %c120_368 = arith.constant 120 : index
    %437 = vector.load %arg29[%c0_367, %c120_368] : memref<32x512xf32, #tpu.memory_space<vmem>>, vector<16x64xf32>
    %438 = arith.truncf %437 : vector<16x64xf32> to vector<16x64xbf16>
    %c112_369 = arith.constant 112 : index
    %c0_370 = arith.constant 0 : index
    %439 = vector.load %arg30[%c112_369, %c0_370] : memref<400x256xbf16, #tpu.memory_space<vmem>>, vector<16x64xbf16>
    tpu.vector_store %arg30[%c112_369, %c0_370], %438 {strides = array<i32>} : memref<400x256xbf16, #tpu.memory_space<vmem>>, vector<16x64xbf16>,
    %c0_371 = arith.constant 0 : index
    %c121_372 = arith.constant 121 : index
    %440 = vector.load %arg29[%c0_371, %c121_372] : memref<32x512xf32, #tpu.memory_space<vmem>>, vector<16x64xf32>
    %441 = arith.truncf %440 : vector<16x64xf32> to vector<16x64xbf16>
    %c8_373 = arith.constant 8 : index
    %c0_374 = arith.constant 0 : index
    %442 = vector.load %arg6[%c8_373, %c0_374] : memref<25x64xbf16, #tpu.memory_space<vmem>>, vector<1x64xbf16>
    %443 = vector.broadcast %442 : vector<1x64xbf16> to vector<16x64xbf16>
    %444 = arith.mulf %441, %443 : vector<16x64xbf16>
    %c128_375 = arith.constant 128 : index
    %c0_376 = arith.constant 0 : index
    %445 = vector.load %arg30[%c128_375, %c0_376] : memref<400x256xbf16, #tpu.memory_space<vmem>>, vector<16x64xbf16>
    tpu.vector_store %arg30[%c128_375, %c0_376], %444 {strides = array<i32>} : memref<400x256xbf16, #tpu.memory_space<vmem>>, vector<16x64xbf16>,
    %c0_377 = arith.constant 0 : index
    %c122 = arith.constant 122 : index
    %446 = vector.load %arg29[%c0_377, %c122] : memref<32x512xf32, #tpu.memory_space<vmem>>, vector<16x64xf32>
    %447 = arith.truncf %446 : vector<16x64xf32> to vector<16x64xbf16>
    %c9_378 = arith.constant 9 : index
    %c0_379 = arith.constant 0 : index
    %448 = vector.load %arg6[%c9_378, %c0_379] : memref<25x64xbf16, #tpu.memory_space<vmem>>, vector<1x64xbf16>
    %449 = vector.broadcast %448 : vector<1x64xbf16> to vector<16x64xbf16>
    %450 = arith.mulf %447, %449 : vector<16x64xbf16>
    %c144_380 = arith.constant 144 : index
    %c0_381 = arith.constant 0 : index
    %451 = vector.load %arg30[%c144_380, %c0_381] : memref<400x256xbf16, #tpu.memory_space<vmem>>, vector<16x64xbf16>
    tpu.vector_store %arg30[%c144_380, %c0_381], %450 {strides = array<i32>} : memref<400x256xbf16, #tpu.memory_space<vmem>>, vector<16x64xbf16>,
    %c0_382 = arith.constant 0 : index
    %c126_383 = arith.constant 126 : index
    %452 = vector.load %arg29[%c0_382, %c126_383] : memref<32x512xf32, #tpu.memory_space<vmem>>, vector<16x64xf32>
    %453 = arith.truncf %452 : vector<16x64xf32> to vector<16x64xbf16>
    %c10_384 = arith.constant 10 : index
    %c0_385 = arith.constant 0 : index
    %454 = vector.load %arg6[%c10_384, %c0_385] : memref<25x64xbf16, #tpu.memory_space<vmem>>, vector<1x64xbf16>
    %455 = vector.broadcast %454 : vector<1x64xbf16> to vector<16x64xbf16>
    %456 = arith.mulf %453, %455 : vector<16x64xbf16>
    %c160_386 = arith.constant 160 : index
    %c0_387 = arith.constant 0 : index
    %457 = vector.load %arg30[%c160_386, %c0_387] : memref<400x256xbf16, #tpu.memory_space<vmem>>, vector<16x64xbf16>
    tpu.vector_store %arg30[%c160_386, %c0_387], %456 {strides = array<i32>} : memref<400x256xbf16, #tpu.memory_space<vmem>>, vector<16x64xbf16>,
    %c0_388 = arith.constant 0 : index
    %c127_389 = arith.constant 127 : index
    %458 = vector.load %arg29[%c0_388, %c127_389] : memref<32x512xf32, #tpu.memory_space<vmem>>, vector<16x64xf32>
    %459 = arith.truncf %458 : vector<16x64xf32> to vector<16x64xbf16>
    %c11_390 = arith.constant 11 : index
    %c0_391 = arith.constant 0 : index
    %460 = vector.load %arg6[%c11_390, %c0_391] : memref<25x64xbf16, #tpu.memory_space<vmem>>, vector<1x64xbf16>
    %461 = vector.broadcast %460 : vector<1x64xbf16> to vector<16x64xbf16>
    %462 = arith.mulf %459, %461 : vector<16x64xbf16>
    %c176_392 = arith.constant 176 : index
    %c0_393 = arith.constant 0 : index
    %463 = vector.load %arg30[%c176_392, %c0_393] : memref<400x256xbf16, #tpu.memory_space<vmem>>, vector<16x64xbf16>
    tpu.vector_store %arg30[%c176_392, %c0_393], %462 {strides = array<i32>} : memref<400x256xbf16, #tpu.memory_space<vmem>>, vector<16x64xbf16>,
    %c0_394 = arith.constant 0 : index
    %c128_395 = arith.constant 128 : index
    %464 = vector.load %arg29[%c0_394, %c128_395] : memref<32x512xf32, #tpu.memory_space<vmem>>, vector<16x64xf32>
    %465 = arith.truncf %464 : vector<16x64xf32> to vector<16x64xbf16>
    %c192_396 = arith.constant 192 : index
    %c0_397 = arith.constant 0 : index
    %466 = vector.load %arg30[%c192_396, %c0_397] : memref<400x256xbf16, #tpu.memory_space<vmem>>, vector<16x64xbf16>
    tpu.vector_store %arg30[%c192_396, %c0_397], %465 {strides = array<i32>} : memref<400x256xbf16, #tpu.memory_space<vmem>>, vector<16x64xbf16>,
    %c0_398 = arith.constant 0 : index
    %c129_399 = arith.constant 129 : index
    %467 = vector.load %arg29[%c0_398, %c129_399] : memref<32x512xf32, #tpu.memory_space<vmem>>, vector<16x64xf32>
    %468 = arith.truncf %467 : vector<16x64xf32> to vector<16x64xbf16>
    %c13_400 = arith.constant 13 : index
    %c0_401 = arith.constant 0 : index
    %469 = vector.load %arg6[%c13_400, %c0_401] : memref<25x64xbf16, #tpu.memory_space<vmem>>, vector<1x64xbf16>
    %470 = vector.broadcast %469 : vector<1x64xbf16> to vector<16x64xbf16>
    %471 = arith.mulf %468, %470 : vector<16x64xbf16>
    %c208 = arith.constant 208 : index
    %c0_402 = arith.constant 0 : index
    %472 = vector.load %arg30[%c208, %c0_402] : memref<400x256xbf16, #tpu.memory_space<vmem>>, vector<16x64xbf16>
    tpu.vector_store %arg30[%c208, %c0_402], %471 {strides = array<i32>} : memref<400x256xbf16, #tpu.memory_space<vmem>>, vector<16x64xbf16>,
    %c0_403 = arith.constant 0 : index
    %c130_404 = arith.constant 130 : index
    %473 = vector.load %arg29[%c0_403, %c130_404] : memref<32x512xf32, #tpu.memory_space<vmem>>, vector<16x64xf32>
    %474 = arith.truncf %473 : vector<16x64xf32> to vector<16x64xbf16>
    %c14_405 = arith.constant 14 : index
    %c0_406 = arith.constant 0 : index
    %475 = vector.load %arg6[%c14_405, %c0_406] : memref<25x64xbf16, #tpu.memory_space<vmem>>, vector<1x64xbf16>
    %476 = vector.broadcast %475 : vector<1x64xbf16> to vector<16x64xbf16>
    %477 = arith.mulf %474, %476 : vector<16x64xbf16>
    %c224 = arith.constant 224 : index
    %c0_407 = arith.constant 0 : index
    %478 = vector.load %arg30[%c224, %c0_407] : memref<400x256xbf16, #tpu.memory_space<vmem>>, vector<16x64xbf16>
    tpu.vector_store %arg30[%c224, %c0_407], %477 {strides = array<i32>} : memref<400x256xbf16, #tpu.memory_space<vmem>>, vector<16x64xbf16>,
    %c0_408 = arith.constant 0 : index
    %c134 = arith.constant 134 : index
    %479 = vector.load %arg29[%c0_408, %c134] : memref<32x512xf32, #tpu.memory_space<vmem>>, vector<16x64xf32>
    %480 = arith.truncf %479 : vector<16x64xf32> to vector<16x64xbf16>
    %c15_409 = arith.constant 15 : index
    %c0_410 = arith.constant 0 : index
    %481 = vector.load %arg6[%c15_409, %c0_410] : memref<25x64xbf16, #tpu.memory_space<vmem>>, vector<1x64xbf16>
    %482 = vector.broadcast %481 : vector<1x64xbf16> to vector<16x64xbf16>
    %483 = arith.mulf %480, %482 : vector<16x64xbf16>
    %c240 = arith.constant 240 : index
    %c0_411 = arith.constant 0 : index
    %484 = vector.load %arg30[%c240, %c0_411] : memref<400x256xbf16, #tpu.memory_space<vmem>>, vector<16x64xbf16>
    tpu.vector_store %arg30[%c240, %c0_411], %483 {strides = array<i32>} : memref<400x256xbf16, #tpu.memory_space<vmem>>, vector<16x64xbf16>,
    %c0_412 = arith.constant 0 : index
    %c135_413 = arith.constant 135 : index
    %485 = vector.load %arg29[%c0_412, %c135_413] : memref<32x512xf32, #tpu.memory_space<vmem>>, vector<16x64xf32>
    %486 = arith.truncf %485 : vector<16x64xf32> to vector<16x64xbf16>
    %c16_414 = arith.constant 16 : index
    %c0_415 = arith.constant 0 : index
    %487 = vector.load %arg6[%c16_414, %c0_415] : memref<25x64xbf16, #tpu.memory_space<vmem>>, vector<1x64xbf16>
    %488 = vector.broadcast %487 : vector<1x64xbf16> to vector<16x64xbf16>
    %489 = arith.mulf %486, %488 : vector<16x64xbf16>
    %c256 = arith.constant 256 : index
    %c0_416 = arith.constant 0 : index
    %490 = vector.load %arg30[%c256, %c0_416] : memref<400x256xbf16, #tpu.memory_space<vmem>>, vector<16x64xbf16>
    tpu.vector_store %arg30[%c256, %c0_416], %489 {strides = array<i32>} : memref<400x256xbf16, #tpu.memory_space<vmem>>, vector<16x64xbf16>,
    %c0_417 = arith.constant 0 : index
    %c136_418 = arith.constant 136 : index
    %491 = vector.load %arg29[%c0_417, %c136_418] : memref<32x512xf32, #tpu.memory_space<vmem>>, vector<16x64xf32>
    %492 = arith.truncf %491 : vector<16x64xf32> to vector<16x64xbf16>
    %c272 = arith.constant 272 : index
    %c0_419 = arith.constant 0 : index
    %493 = vector.load %arg30[%c272, %c0_419] : memref<400x256xbf16, #tpu.memory_space<vmem>>, vector<16x64xbf16>
    tpu.vector_store %arg30[%c272, %c0_419], %492 {strides = array<i32>} : memref<400x256xbf16, #tpu.memory_space<vmem>>, vector<16x64xbf16>,
    %c0_420 = arith.constant 0 : index
    %c137_421 = arith.constant 137 : index
    %494 = vector.load %arg29[%c0_420, %c137_421] : memref<32x512xf32, #tpu.memory_space<vmem>>, vector<16x64xf32>
    %495 = arith.truncf %494 : vector<16x64xf32> to vector<16x64xbf16>
    %c18_422 = arith.constant 18 : index
    %c0_423 = arith.constant 0 : index
    %496 = vector.load %arg6[%c18_422, %c0_423] : memref<25x64xbf16, #tpu.memory_space<vmem>>, vector<1x64xbf16>
    %497 = vector.broadcast %496 : vector<1x64xbf16> to vector<16x64xbf16>
    %498 = arith.mulf %495, %497 : vector<16x64xbf16>
    %c288 = arith.constant 288 : index
    %c0_424 = arith.constant 0 : index
    %499 = vector.load %arg30[%c288, %c0_424] : memref<400x256xbf16, #tpu.memory_space<vmem>>, vector<16x64xbf16>
    tpu.vector_store %arg30[%c288, %c0_424], %498 {strides = array<i32>} : memref<400x256xbf16, #tpu.memory_space<vmem>>, vector<16x64xbf16>,
    %c0_425 = arith.constant 0 : index
    %c138 = arith.constant 138 : index
    %500 = vector.load %arg29[%c0_425, %c138] : memref<32x512xf32, #tpu.memory_space<vmem>>, vector<16x64xf32>
    %501 = arith.truncf %500 : vector<16x64xf32> to vector<16x64xbf16>
    %c19_426 = arith.constant 19 : index
    %c0_427 = arith.constant 0 : index
    %502 = vector.load %arg6[%c19_426, %c0_427] : memref<25x64xbf16, #tpu.memory_space<vmem>>, vector<1x64xbf16>
    %503 = vector.broadcast %502 : vector<1x64xbf16> to vector<16x64xbf16>
    %504 = arith.mulf %501, %503 : vector<16x64xbf16>
    %c304 = arith.constant 304 : index
    %c0_428 = arith.constant 0 : index
    %505 = vector.load %arg30[%c304, %c0_428] : memref<400x256xbf16, #tpu.memory_space<vmem>>, vector<16x64xbf16>
    tpu.vector_store %arg30[%c304, %c0_428], %504 {strides = array<i32>} : memref<400x256xbf16, #tpu.memory_space<vmem>>, vector<16x64xbf16>,
    %c0_429 = arith.constant 0 : index
    %c142_430 = arith.constant 142 : index
    %506 = vector.load %arg29[%c0_429, %c142_430] : memref<32x512xf32, #tpu.memory_space<vmem>>, vector<16x64xf32>
    %507 = arith.truncf %506 : vector<16x64xf32> to vector<16x64xbf16>
    %c20_431 = arith.constant 20 : index
    %c0_432 = arith.constant 0 : index
    %508 = vector.load %arg6[%c20_431, %c0_432] : memref<25x64xbf16, #tpu.memory_space<vmem>>, vector<1x64xbf16>
    %509 = vector.broadcast %508 : vector<1x64xbf16> to vector<16x64xbf16>
    %510 = arith.mulf %507, %509 : vector<16x64xbf16>
    %c320 = arith.constant 320 : index
    %c0_433 = arith.constant 0 : index
    %511 = vector.load %arg30[%c320, %c0_433] : memref<400x256xbf16, #tpu.memory_space<vmem>>, vector<16x64xbf16>
    tpu.vector_store %arg30[%c320, %c0_433], %510 {strides = array<i32>} : memref<400x256xbf16, #tpu.memory_space<vmem>>, vector<16x64xbf16>,
    %c0_434 = arith.constant 0 : index
    %c143_435 = arith.constant 143 : index
    %512 = vector.load %arg29[%c0_434, %c143_435] : memref<32x512xf32, #tpu.memory_space<vmem>>, vector<16x64xf32>
    %513 = arith.truncf %512 : vector<16x64xf32> to vector<16x64xbf16>
    %c21_436 = arith.constant 21 : index
    %c0_437 = arith.constant 0 : index
    %514 = vector.load %arg6[%c21_436, %c0_437] : memref<25x64xbf16, #tpu.memory_space<vmem>>, vector<1x64xbf16>
    %515 = vector.broadcast %514 : vector<1x64xbf16> to vector<16x64xbf16>
    %516 = arith.mulf %513, %515 : vector<16x64xbf16>
    %c336 = arith.constant 336 : index
    %c0_438 = arith.constant 0 : index
    %517 = vector.load %arg30[%c336, %c0_438] : memref<400x256xbf16, #tpu.memory_space<vmem>>, vector<16x64xbf16>
    tpu.vector_store %arg30[%c336, %c0_438], %516 {strides = array<i32>} : memref<400x256xbf16, #tpu.memory_space<vmem>>, vector<16x64xbf16>,
    %c0_439 = arith.constant 0 : index
    %c144_440 = arith.constant 144 : index
    %518 = vector.load %arg29[%c0_439, %c144_440] : memref<32x512xf32, #tpu.memory_space<vmem>>, vector<16x64xf32>
    %519 = arith.truncf %518 : vector<16x64xf32> to vector<16x64xbf16>
    %c352 = arith.constant 352 : index
    %c0_441 = arith.constant 0 : index
    %520 = vector.load %arg30[%c352, %c0_441] : memref<400x256xbf16, #tpu.memory_space<vmem>>, vector<16x64xbf16>
    tpu.vector_store %arg30[%c352, %c0_441], %519 {strides = array<i32>} : memref<400x256xbf16, #tpu.memory_space<vmem>>, vector<16x64xbf16>,
    %c0_442 = arith.constant 0 : index
    %c145_443 = arith.constant 145 : index
    %521 = vector.load %arg29[%c0_442, %c145_443] : memref<32x512xf32, #tpu.memory_space<vmem>>, vector<16x64xf32>
    %522 = arith.truncf %521 : vector<16x64xf32> to vector<16x64xbf16>
    %c23_444 = arith.constant 23 : index
    %c0_445 = arith.constant 0 : index
    %523 = vector.load %arg6[%c23_444, %c0_445] : memref<25x64xbf16, #tpu.memory_space<vmem>>, vector<1x64xbf16>
    %524 = vector.broadcast %523 : vector<1x64xbf16> to vector<16x64xbf16>
    %525 = arith.mulf %522, %524 : vector<16x64xbf16>
    %c368 = arith.constant 368 : index
    %c0_446 = arith.constant 0 : index
    %526 = vector.load %arg30[%c368, %c0_446] : memref<400x256xbf16, #tpu.memory_space<vmem>>, vector<16x64xbf16>
    tpu.vector_store %arg30[%c368, %c0_446], %525 {strides = array<i32>} : memref<400x256xbf16, #tpu.memory_space<vmem>>, vector<16x64xbf16>,
    %c0_447 = arith.constant 0 : index
    %c146_448 = arith.constant 146 : index
    %527 = vector.load %arg29[%c0_447, %c146_448] : memref<32x512xf32, #tpu.memory_space<vmem>>, vector<16x64xf32>
    %528 = arith.truncf %527 : vector<16x64xf32> to vector<16x64xbf16>
    %c24_449 = arith.constant 24 : index
    %c0_450 = arith.constant 0 : index
    %529 = vector.load %arg6[%c24_449, %c0_450] : memref<25x64xbf16, #tpu.memory_space<vmem>>, vector<1x64xbf16>
    %530 = vector.broadcast %529 : vector<1x64xbf16> to vector<16x64xbf16>
    %531 = arith.mulf %528, %530 : vector<16x64xbf16>
    %c384_451 = arith.constant 384 : index
    %c0_452 = arith.constant 0 : index
    %532 = vector.load %arg30[%c384_451, %c0_452] : memref<400x256xbf16, #tpu.memory_space<vmem>>, vector<16x64xbf16>
    tpu.vector_store %arg30[%c384_451, %c0_452], %531 {strides = array<i32>} : memref<400x256xbf16, #tpu.memory_space<vmem>>, vector<16x64xbf16>,
    %c0_453 = arith.constant 0 : index
    %c0_454 = arith.constant 0 : index
    %533 = vector.load %arg16[%c0_453, %c0_454] : memref<32x400xbf16, #tpu.memory_space<vmem>>, vector<32x400xbf16>
    %c0_455 = arith.constant 0 : index
    %c0_456 = arith.constant 0 : index
    %534 = vector.load %arg30[%c0_455, %c0_456] : memref<400x256xbf16, #tpu.memory_space<vmem>>, vector<400x64xbf16>
    %cst_457 = arith.constant dense<0.000000e+00> : vector<32x64xf32>
    %535 = tpu.matmul %533, %534, %cst_457 {dimension_numbers = #tpu.dot_dimension_numbers<[1], [0], [0], [1], [0, 0, 1, 1], [], []>} : vector<32x400xbf16>, vector<400x64xbf16>, vector<32x64xf32> -> vector<32x64xf32>
    %cst_458 = arith.constant 0.000000e+00 : f32
    %536 = vector.broadcast %cst_458 : f32 to vector<32x64xf32>
    %537 = arith.maximumf %535, %536 : vector<32x64xf32>
    %c0_459 = arith.constant 0 : index
    %c0_460 = arith.constant 0 : index
    %538 = vector.load %arg8[%c0_459, %c0_460] : memref<8x4xbf16, #tpu.memory_space<vmem>>, vector<8x4xbf16>
    %539 = vector.extract_strided_slice %537 {offsets = [0, 0], sizes = [32, 8], strides = [1, 1]} : vector<32x64xf32> to vector<32x8xf32>
    %540 = arith.truncf %539 : vector<32x8xf32> to vector<32x8xbf16>
    %cst_461 = arith.constant dense<0.000000e+00> : vector<32x4xf32>
    %541 = tpu.matmul %540, %538, %cst_461 {dimension_numbers = #tpu.dot_dimension_numbers<[1], [0], [0], [1], [0, 0, 1, 1], [], []>} : vector<32x8xbf16>, vector<8x4xbf16>, vector<32x4xf32> -> vector<32x4xf32>
    %542 = vector.extract_strided_slice %537 {offsets = [0, 16], sizes = [32, 8], strides = [1, 1]} : vector<32x64xf32> to vector<32x8xf32>
    %543 = arith.truncf %542 : vector<32x8xf32> to vector<32x8xbf16>
    %cst_462 = arith.constant dense<0.000000e+00> : vector<32x4xf32>
    %544 = tpu.matmul %543, %538, %cst_462 {dimension_numbers = #tpu.dot_dimension_numbers<[1], [0], [0], [1], [0, 0, 1, 1], [], []>} : vector<32x8xbf16>, vector<8x4xbf16>, vector<32x4xf32> -> vector<32x4xf32>
    %545 = vector.extract_strided_slice %537 {offsets = [0, 32], sizes = [32, 8], strides = [1, 1]} : vector<32x64xf32> to vector<32x8xf32>
    %546 = arith.truncf %545 : vector<32x8xf32> to vector<32x8xbf16>
    %cst_463 = arith.constant dense<0.000000e+00> : vector<32x4xf32>
    %547 = tpu.matmul %546, %538, %cst_463 {dimension_numbers = #tpu.dot_dimension_numbers<[1], [0], [0], [1], [0, 0, 1, 1], [], []>} : vector<32x8xbf16>, vector<8x4xbf16>, vector<32x4xf32> -> vector<32x4xf32>
    %548 = vector.extract_strided_slice %537 {offsets = [0, 48], sizes = [32, 8], strides = [1, 1]} : vector<32x64xf32> to vector<32x8xf32>
    %549 = arith.truncf %548 : vector<32x8xf32> to vector<32x8xbf16>
    %cst_464 = arith.constant dense<0.000000e+00> : vector<32x4xf32>
    %550 = tpu.matmul %549, %538, %cst_464 {dimension_numbers = #tpu.dot_dimension_numbers<[1], [0], [0], [1], [0, 0, 1, 1], [], []>} : vector<32x8xbf16>, vector<8x4xbf16>, vector<32x4xf32> -> vector<32x4xf32>
    %cst_465 = arith.constant 0.000000e+00 : f32
    %551 = vector.broadcast %cst_465 : f32 to vector<32x128xf32>
    %c0_466 = arith.constant 0 : index
    %c0_467 = arith.constant 0 : index
    %552 = vector.load %arg29[%c0_466, %c0_467] : memref<32x512xf32, #tpu.memory_space<vmem>>, vector<32x128xf32>
    tpu.vector_store %arg29[%c0_466, %c0_467], %551 {strides = array<i32>} : memref<32x512xf32, #tpu.memory_space<vmem>>, vector<32x128xf32>,
    %c0_468 = arith.constant 0 : index
    %c144_469 = arith.constant 144 : index
    %553 = vector.load %arg29[%c0_468, %c144_469] : memref<32x512xf32, #tpu.memory_space<vmem>>, vector<32x128xf32>
    tpu.vector_store %arg29[%c0_468, %c144_469], %551 {strides = array<i32>} : memref<32x512xf32, #tpu.memory_space<vmem>>, vector<32x128xf32>,
    %c0_470 = arith.constant 0 : index
    %c128_471 = arith.constant 128 : index
    %554 = vector.load %arg29[%c0_470, %c128_471] : memref<32x512xf32, #tpu.memory_space<vmem>>, vector<32x4xf32>
    tpu.vector_store %arg29[%c0_470, %c128_471], %541 {strides = array<i32>} : memref<32x512xf32, #tpu.memory_space<vmem>>, vector<32x4xf32>,
    %c0_472 = arith.constant 0 : index
    %c132 = arith.constant 132 : index
    %555 = vector.load %arg29[%c0_472, %c132] : memref<32x512xf32, #tpu.memory_space<vmem>>, vector<32x4xf32>
    tpu.vector_store %arg29[%c0_472, %c132], %544 {strides = array<i32>} : memref<32x512xf32, #tpu.memory_space<vmem>>, vector<32x4xf32>,
    %c0_473 = arith.constant 0 : index
    %c136_474 = arith.constant 136 : index
    %556 = vector.load %arg29[%c0_473, %c136_474] : memref<32x512xf32, #tpu.memory_space<vmem>>, vector<32x4xf32>
    tpu.vector_store %arg29[%c0_473, %c136_474], %547 {strides = array<i32>} : memref<32x512xf32, #tpu.memory_space<vmem>>, vector<32x4xf32>,
    %c0_475 = arith.constant 0 : index
    %c140 = arith.constant 140 : index
    %557 = vector.load %arg29[%c0_475, %c140] : memref<32x512xf32, #tpu.memory_space<vmem>>, vector<32x4xf32>
    tpu.vector_store %arg29[%c0_475, %c140], %550 {strides = array<i32>} : memref<32x512xf32, #tpu.memory_space<vmem>>, vector<32x4xf32>,
    %c0_476 = arith.constant 0 : index
    %c123 = arith.constant 123 : index
    %558 = vector.load %arg29[%c0_476, %c123] : memref<32x512xf32, #tpu.memory_space<vmem>>, vector<32x16xf32>
    %559 = arith.truncf %558 : vector<32x16xf32> to vector<32x16xbf16>
    %c0_477 = arith.constant 0 : index
    %c0_478 = arith.constant 0 : index
    %560 = vector.load %arg4[%c0_477, %c0_478] : memref<9x16xbf16, #tpu.memory_space<vmem>>, vector<1x16xbf16>
    %561 = vector.broadcast %560 : vector<1x16xbf16> to vector<32x16xbf16>
    %562 = arith.mulf %559, %561 : vector<32x16xbf16>
    %c0_479 = arith.constant 0 : index
    %c0_480 = arith.constant 0 : index
    %563 = vector.load %arg30[%c0_479, %c0_480] : memref<400x256xbf16, #tpu.memory_space<vmem>>, vector<32x16xbf16>
    tpu.vector_store %arg30[%c0_479, %c0_480], %562 {strides = array<i32>} : memref<400x256xbf16, #tpu.memory_space<vmem>>, vector<32x16xbf16>,
    %c0_481 = arith.constant 0 : index
    %c124 = arith.constant 124 : index
    %564 = vector.load %arg29[%c0_481, %c124] : memref<32x512xf32, #tpu.memory_space<vmem>>, vector<32x16xf32>
    %565 = arith.truncf %564 : vector<32x16xf32> to vector<32x16xbf16>
    %c32_482 = arith.constant 32 : index
    %c0_483 = arith.constant 0 : index
    %566 = vector.load %arg30[%c32_482, %c0_483] : memref<400x256xbf16, #tpu.memory_space<vmem>>, vector<32x16xbf16>
    tpu.vector_store %arg30[%c32_482, %c0_483], %565 {strides = array<i32>} : memref<400x256xbf16, #tpu.memory_space<vmem>>, vector<32x16xbf16>,
    %c0_484 = arith.constant 0 : index
    %c125 = arith.constant 125 : index
    %567 = vector.load %arg29[%c0_484, %c125] : memref<32x512xf32, #tpu.memory_space<vmem>>, vector<32x16xf32>
    %568 = arith.truncf %567 : vector<32x16xf32> to vector<32x16xbf16>
    %c2_485 = arith.constant 2 : index
    %c0_486 = arith.constant 0 : index
    %569 = vector.load %arg4[%c2_485, %c0_486] : memref<9x16xbf16, #tpu.memory_space<vmem>>, vector<1x16xbf16>
    %570 = vector.broadcast %569 : vector<1x16xbf16> to vector<32x16xbf16>
    %571 = arith.mulf %568, %570 : vector<32x16xbf16>
    %c64_487 = arith.constant 64 : index
    %c0_488 = arith.constant 0 : index
    %572 = vector.load %arg30[%c64_487, %c0_488] : memref<400x256xbf16, #tpu.memory_space<vmem>>, vector<32x16xbf16>
    tpu.vector_store %arg30[%c64_487, %c0_488], %571 {strides = array<i32>} : memref<400x256xbf16, #tpu.memory_space<vmem>>, vector<32x16xbf16>,
    %c0_489 = arith.constant 0 : index
    %c127_490 = arith.constant 127 : index
    %573 = vector.load %arg29[%c0_489, %c127_490] : memref<32x512xf32, #tpu.memory_space<vmem>>, vector<32x16xf32>
    %574 = arith.truncf %573 : vector<32x16xf32> to vector<32x16xbf16>
    %c3_491 = arith.constant 3 : index
    %c0_492 = arith.constant 0 : index
    %575 = vector.load %arg4[%c3_491, %c0_492] : memref<9x16xbf16, #tpu.memory_space<vmem>>, vector<1x16xbf16>
    %576 = vector.broadcast %575 : vector<1x16xbf16> to vector<32x16xbf16>
    %577 = arith.mulf %574, %576 : vector<32x16xbf16>
    %c96_493 = arith.constant 96 : index
    %c0_494 = arith.constant 0 : index
    %578 = vector.load %arg30[%c96_493, %c0_494] : memref<400x256xbf16, #tpu.memory_space<vmem>>, vector<32x16xbf16>
    tpu.vector_store %arg30[%c96_493, %c0_494], %577 {strides = array<i32>} : memref<400x256xbf16, #tpu.memory_space<vmem>>, vector<32x16xbf16>,
    %c0_495 = arith.constant 0 : index
    %c128_496 = arith.constant 128 : index
    %579 = vector.load %arg29[%c0_495, %c128_496] : memref<32x512xf32, #tpu.memory_space<vmem>>, vector<32x16xf32>
    %580 = arith.truncf %579 : vector<32x16xf32> to vector<32x16xbf16>
    %c128_497 = arith.constant 128 : index
    %c0_498 = arith.constant 0 : index
    %581 = vector.load %arg30[%c128_497, %c0_498] : memref<400x256xbf16, #tpu.memory_space<vmem>>, vector<32x16xbf16>
    tpu.vector_store %arg30[%c128_497, %c0_498], %580 {strides = array<i32>} : memref<400x256xbf16, #tpu.memory_space<vmem>>, vector<32x16xbf16>,
    %c0_499 = arith.constant 0 : index
    %c129_500 = arith.constant 129 : index
    %582 = vector.load %arg29[%c0_499, %c129_500] : memref<32x512xf32, #tpu.memory_space<vmem>>, vector<32x16xf32>
    %583 = arith.truncf %582 : vector<32x16xf32> to vector<32x16xbf16>
    %c5_501 = arith.constant 5 : index
    %c0_502 = arith.constant 0 : index
    %584 = vector.load %arg4[%c5_501, %c0_502] : memref<9x16xbf16, #tpu.memory_space<vmem>>, vector<1x16xbf16>
    %585 = vector.broadcast %584 : vector<1x16xbf16> to vector<32x16xbf16>
    %586 = arith.mulf %583, %585 : vector<32x16xbf16>
    %c160_503 = arith.constant 160 : index
    %c0_504 = arith.constant 0 : index
    %587 = vector.load %arg30[%c160_503, %c0_504] : memref<400x256xbf16, #tpu.memory_space<vmem>>, vector<32x16xbf16>
    tpu.vector_store %arg30[%c160_503, %c0_504], %586 {strides = array<i32>} : memref<400x256xbf16, #tpu.memory_space<vmem>>, vector<32x16xbf16>,
    %c0_505 = arith.constant 0 : index
    %c131 = arith.constant 131 : index
    %588 = vector.load %arg29[%c0_505, %c131] : memref<32x512xf32, #tpu.memory_space<vmem>>, vector<32x16xf32>
    %589 = arith.truncf %588 : vector<32x16xf32> to vector<32x16xbf16>
    %c6_506 = arith.constant 6 : index
    %c0_507 = arith.constant 0 : index
    %590 = vector.load %arg4[%c6_506, %c0_507] : memref<9x16xbf16, #tpu.memory_space<vmem>>, vector<1x16xbf16>
    %591 = vector.broadcast %590 : vector<1x16xbf16> to vector<32x16xbf16>
    %592 = arith.mulf %589, %591 : vector<32x16xbf16>
    %c192_508 = arith.constant 192 : index
    %c0_509 = arith.constant 0 : index
    %593 = vector.load %arg30[%c192_508, %c0_509] : memref<400x256xbf16, #tpu.memory_space<vmem>>, vector<32x16xbf16>
    tpu.vector_store %arg30[%c192_508, %c0_509], %592 {strides = array<i32>} : memref<400x256xbf16, #tpu.memory_space<vmem>>, vector<32x16xbf16>,
    %c0_510 = arith.constant 0 : index
    %c132_511 = arith.constant 132 : index
    %594 = vector.load %arg29[%c0_510, %c132_511] : memref<32x512xf32, #tpu.memory_space<vmem>>, vector<32x16xf32>
    %595 = arith.truncf %594 : vector<32x16xf32> to vector<32x16xbf16>
    %c224_512 = arith.constant 224 : index
    %c0_513 = arith.constant 0 : index
    %596 = vector.load %arg30[%c224_512, %c0_513] : memref<400x256xbf16, #tpu.memory_space<vmem>>, vector<32x16xbf16>
    tpu.vector_store %arg30[%c224_512, %c0_513], %595 {strides = array<i32>} : memref<400x256xbf16, #tpu.memory_space<vmem>>, vector<32x16xbf16>,
    %c0_514 = arith.constant 0 : index
    %c133 = arith.constant 133 : index
    %597 = vector.load %arg29[%c0_514, %c133] : memref<32x512xf32, #tpu.memory_space<vmem>>, vector<32x16xf32>
    %598 = arith.truncf %597 : vector<32x16xf32> to vector<32x16xbf16>
    %c8_515 = arith.constant 8 : index
    %c0_516 = arith.constant 0 : index
    %599 = vector.load %arg4[%c8_515, %c0_516] : memref<9x16xbf16, #tpu.memory_space<vmem>>, vector<1x16xbf16>
    %600 = vector.broadcast %599 : vector<1x16xbf16> to vector<32x16xbf16>
    %601 = arith.mulf %598, %600 : vector<32x16xbf16>
    %c256_517 = arith.constant 256 : index
    %c0_518 = arith.constant 0 : index
    %602 = vector.load %arg30[%c256_517, %c0_518] : memref<400x256xbf16, #tpu.memory_space<vmem>>, vector<32x16xbf16>
    tpu.vector_store %arg30[%c256_517, %c0_518], %601 {strides = array<i32>} : memref<400x256xbf16, #tpu.memory_space<vmem>>, vector<32x16xbf16>,
    %c0_519 = arith.constant 0 : index
    %c0_520 = arith.constant 0 : index
    %603 = vector.load %arg17[%c0_519, %c0_520] : memref<32x288xbf16, #tpu.memory_space<vmem>>, vector<32x288xbf16>
    %c0_521 = arith.constant 0 : index
    %c0_522 = arith.constant 0 : index
    %604 = vector.load %arg30[%c0_521, %c0_522] : memref<400x256xbf16, #tpu.memory_space<vmem>>, vector<288x16xbf16>
    %cst_523 = arith.constant dense<0.000000e+00> : vector<32x16xf32>
    %605 = tpu.matmul %603, %604, %cst_523 {dimension_numbers = #tpu.dot_dimension_numbers<[1], [0], [0], [1], [0, 0, 1, 1], [], []>} : vector<32x288xbf16>, vector<288x16xbf16>, vector<32x16xf32> -> vector<32x16xf32>
    %cst_524 = arith.constant 0.000000e+00 : f32
    %606 = vector.broadcast %cst_524 : f32 to vector<32x16xf32>
    %607 = arith.maximumf %605, %606 : vector<32x16xf32>
    %cst_525 = arith.constant 0.000000e+00 : f32
    %608 = vector.broadcast %cst_525 : f32 to vector<32x128xf32>
    %c0_526 = arith.constant 0 : index
    %c0_527 = arith.constant 0 : index
    %609 = vector.load %arg29[%c0_526, %c0_527] : memref<32x512xf32, #tpu.memory_space<vmem>>, vector<32x128xf32>
    tpu.vector_store %arg29[%c0_526, %c0_527], %608 {strides = array<i32>} : memref<32x512xf32, #tpu.memory_space<vmem>>, vector<32x128xf32>,
    %c0_528 = arith.constant 0 : index
    %c144_529 = arith.constant 144 : index
    %610 = vector.load %arg29[%c0_528, %c144_529] : memref<32x512xf32, #tpu.memory_space<vmem>>, vector<32x128xf32>
    tpu.vector_store %arg29[%c0_528, %c144_529], %608 {strides = array<i32>} : memref<32x512xf32, #tpu.memory_space<vmem>>, vector<32x128xf32>,
    %c0_530 = arith.constant 0 : index
    %c128_531 = arith.constant 128 : index
    %611 = vector.load %arg29[%c0_530, %c128_531] : memref<32x512xf32, #tpu.memory_space<vmem>>, vector<32x16xf32>
    tpu.vector_store %arg29[%c0_530, %c128_531], %607 {strides = array<i32>} : memref<32x512xf32, #tpu.memory_space<vmem>>, vector<32x16xf32>,
    %c0_532 = arith.constant 0 : index
    %c123_533 = arith.constant 123 : index
    %612 = vector.load %arg29[%c0_532, %c123_533] : memref<32x512xf32, #tpu.memory_space<vmem>>, vector<32x16xf32>
    %613 = arith.truncf %612 : vector<32x16xf32> to vector<32x16xbf16>
    %c0_534 = arith.constant 0 : index
    %c0_535 = arith.constant 0 : index
    %614 = vector.load %arg4[%c0_534, %c0_535] : memref<9x16xbf16, #tpu.memory_space<vmem>>, vector<1x16xbf16>
    %615 = vector.broadcast %614 : vector<1x16xbf16> to vector<32x16xbf16>
    %616 = arith.mulf %613, %615 : vector<32x16xbf16>
    %c0_536 = arith.constant 0 : index
    %c0_537 = arith.constant 0 : index
    %617 = vector.load %arg30[%c0_536, %c0_537] : memref<400x256xbf16, #tpu.memory_space<vmem>>, vector<32x16xbf16>
    tpu.vector_store %arg30[%c0_536, %c0_537], %616 {strides = array<i32>} : memref<400x256xbf16, #tpu.memory_space<vmem>>, vector<32x16xbf16>,
    %c0_538 = arith.constant 0 : index
    %c124_539 = arith.constant 124 : index
    %618 = vector.load %arg29[%c0_538, %c124_539] : memref<32x512xf32, #tpu.memory_space<vmem>>, vector<32x16xf32>
    %619 = arith.truncf %618 : vector<32x16xf32> to vector<32x16xbf16>
    %c32_540 = arith.constant 32 : index
    %c0_541 = arith.constant 0 : index
    %620 = vector.load %arg30[%c32_540, %c0_541] : memref<400x256xbf16, #tpu.memory_space<vmem>>, vector<32x16xbf16>
    tpu.vector_store %arg30[%c32_540, %c0_541], %619 {strides = array<i32>} : memref<400x256xbf16, #tpu.memory_space<vmem>>, vector<32x16xbf16>,
    %c0_542 = arith.constant 0 : index
    %c125_543 = arith.constant 125 : index
    %621 = vector.load %arg29[%c0_542, %c125_543] : memref<32x512xf32, #tpu.memory_space<vmem>>, vector<32x16xf32>
    %622 = arith.truncf %621 : vector<32x16xf32> to vector<32x16xbf16>
    %c2_544 = arith.constant 2 : index
    %c0_545 = arith.constant 0 : index
    %623 = vector.load %arg4[%c2_544, %c0_545] : memref<9x16xbf16, #tpu.memory_space<vmem>>, vector<1x16xbf16>
    %624 = vector.broadcast %623 : vector<1x16xbf16> to vector<32x16xbf16>
    %625 = arith.mulf %622, %624 : vector<32x16xbf16>
    %c64_546 = arith.constant 64 : index
    %c0_547 = arith.constant 0 : index
    %626 = vector.load %arg30[%c64_546, %c0_547] : memref<400x256xbf16, #tpu.memory_space<vmem>>, vector<32x16xbf16>
    tpu.vector_store %arg30[%c64_546, %c0_547], %625 {strides = array<i32>} : memref<400x256xbf16, #tpu.memory_space<vmem>>, vector<32x16xbf16>,
    %c0_548 = arith.constant 0 : index
    %c127_549 = arith.constant 127 : index
    %627 = vector.load %arg29[%c0_548, %c127_549] : memref<32x512xf32, #tpu.memory_space<vmem>>, vector<32x16xf32>
    %628 = arith.truncf %627 : vector<32x16xf32> to vector<32x16xbf16>
    %c3_550 = arith.constant 3 : index
    %c0_551 = arith.constant 0 : index
    %629 = vector.load %arg4[%c3_550, %c0_551] : memref<9x16xbf16, #tpu.memory_space<vmem>>, vector<1x16xbf16>
    %630 = vector.broadcast %629 : vector<1x16xbf16> to vector<32x16xbf16>
    %631 = arith.mulf %628, %630 : vector<32x16xbf16>
    %c96_552 = arith.constant 96 : index
    %c0_553 = arith.constant 0 : index
    %632 = vector.load %arg30[%c96_552, %c0_553] : memref<400x256xbf16, #tpu.memory_space<vmem>>, vector<32x16xbf16>
    tpu.vector_store %arg30[%c96_552, %c0_553], %631 {strides = array<i32>} : memref<400x256xbf16, #tpu.memory_space<vmem>>, vector<32x16xbf16>,
    %c0_554 = arith.constant 0 : index
    %c128_555 = arith.constant 128 : index
    %633 = vector.load %arg29[%c0_554, %c128_555] : memref<32x512xf32, #tpu.memory_space<vmem>>, vector<32x16xf32>
    %634 = arith.truncf %633 : vector<32x16xf32> to vector<32x16xbf16>
    %c128_556 = arith.constant 128 : index
    %c0_557 = arith.constant 0 : index
    %635 = vector.load %arg30[%c128_556, %c0_557] : memref<400x256xbf16, #tpu.memory_space<vmem>>, vector<32x16xbf16>
    tpu.vector_store %arg30[%c128_556, %c0_557], %634 {strides = array<i32>} : memref<400x256xbf16, #tpu.memory_space<vmem>>, vector<32x16xbf16>,
    %c0_558 = arith.constant 0 : index
    %c129_559 = arith.constant 129 : index
    %636 = vector.load %arg29[%c0_558, %c129_559] : memref<32x512xf32, #tpu.memory_space<vmem>>, vector<32x16xf32>
    %637 = arith.truncf %636 : vector<32x16xf32> to vector<32x16xbf16>
    %c5_560 = arith.constant 5 : index
    %c0_561 = arith.constant 0 : index
    %638 = vector.load %arg4[%c5_560, %c0_561] : memref<9x16xbf16, #tpu.memory_space<vmem>>, vector<1x16xbf16>
    %639 = vector.broadcast %638 : vector<1x16xbf16> to vector<32x16xbf16>
    %640 = arith.mulf %637, %639 : vector<32x16xbf16>
    %c160_562 = arith.constant 160 : index
    %c0_563 = arith.constant 0 : index
    %641 = vector.load %arg30[%c160_562, %c0_563] : memref<400x256xbf16, #tpu.memory_space<vmem>>, vector<32x16xbf16>
    tpu.vector_store %arg30[%c160_562, %c0_563], %640 {strides = array<i32>} : memref<400x256xbf16, #tpu.memory_space<vmem>>, vector<32x16xbf16>,
    %c0_564 = arith.constant 0 : index
    %c131_565 = arith.constant 131 : index
    %642 = vector.load %arg29[%c0_564, %c131_565] : memref<32x512xf32, #tpu.memory_space<vmem>>, vector<32x16xf32>
    %643 = arith.truncf %642 : vector<32x16xf32> to vector<32x16xbf16>
    %c6_566 = arith.constant 6 : index
    %c0_567 = arith.constant 0 : index
    %644 = vector.load %arg4[%c6_566, %c0_567] : memref<9x16xbf16, #tpu.memory_space<vmem>>, vector<1x16xbf16>
    %645 = vector.broadcast %644 : vector<1x16xbf16> to vector<32x16xbf16>
    %646 = arith.mulf %643, %645 : vector<32x16xbf16>
    %c192_568 = arith.constant 192 : index
    %c0_569 = arith.constant 0 : index
    %647 = vector.load %arg30[%c192_568, %c0_569] : memref<400x256xbf16, #tpu.memory_space<vmem>>, vector<32x16xbf16>
    tpu.vector_store %arg30[%c192_568, %c0_569], %646 {strides = array<i32>} : memref<400x256xbf16, #tpu.memory_space<vmem>>, vector<32x16xbf16>,
    %c0_570 = arith.constant 0 : index
    %c132_571 = arith.constant 132 : index
    %648 = vector.load %arg29[%c0_570, %c132_571] : memref<32x512xf32, #tpu.memory_space<vmem>>, vector<32x16xf32>
    %649 = arith.truncf %648 : vector<32x16xf32> to vector<32x16xbf16>
    %c224_572 = arith.constant 224 : index
    %c0_573 = arith.constant 0 : index
    %650 = vector.load %arg30[%c224_572, %c0_573] : memref<400x256xbf16, #tpu.memory_space<vmem>>, vector<32x16xbf16>
    tpu.vector_store %arg30[%c224_572, %c0_573], %649 {strides = array<i32>} : memref<400x256xbf16, #tpu.memory_space<vmem>>, vector<32x16xbf16>,
    %c0_574 = arith.constant 0 : index
    %c133_575 = arith.constant 133 : index
    %651 = vector.load %arg29[%c0_574, %c133_575] : memref<32x512xf32, #tpu.memory_space<vmem>>, vector<32x16xf32>
    %652 = arith.truncf %651 : vector<32x16xf32> to vector<32x16xbf16>
    %c8_576 = arith.constant 8 : index
    %c0_577 = arith.constant 0 : index
    %653 = vector.load %arg4[%c8_576, %c0_577] : memref<9x16xbf16, #tpu.memory_space<vmem>>, vector<1x16xbf16>
    %654 = vector.broadcast %653 : vector<1x16xbf16> to vector<32x16xbf16>
    %655 = arith.mulf %652, %654 : vector<32x16xbf16>
    %c256_578 = arith.constant 256 : index
    %c0_579 = arith.constant 0 : index
    %656 = vector.load %arg30[%c256_578, %c0_579] : memref<400x256xbf16, #tpu.memory_space<vmem>>, vector<32x16xbf16>
    tpu.vector_store %arg30[%c256_578, %c0_579], %655 {strides = array<i32>} : memref<400x256xbf16, #tpu.memory_space<vmem>>, vector<32x16xbf16>,
    %c0_580 = arith.constant 0 : index
    %c0_581 = arith.constant 0 : index
    %657 = vector.load %arg18[%c0_580, %c0_581] : memref<32x288xbf16, #tpu.memory_space<vmem>>, vector<32x288xbf16>
    %c0_582 = arith.constant 0 : index
    %c0_583 = arith.constant 0 : index
    %658 = vector.load %arg30[%c0_582, %c0_583] : memref<400x256xbf16, #tpu.memory_space<vmem>>, vector<288x16xbf16>
    %cst_584 = arith.constant dense<0.000000e+00> : vector<32x16xf32>
    %659 = tpu.matmul %657, %658, %cst_584 {dimension_numbers = #tpu.dot_dimension_numbers<[1], [0], [0], [1], [0, 0, 1, 1], [], []>} : vector<32x288xbf16>, vector<288x16xbf16>, vector<32x16xf32> -> vector<32x16xf32>
    %cst_585 = arith.constant 0.000000e+00 : f32
    %660 = vector.broadcast %cst_585 : f32 to vector<32x16xf32>
    %661 = arith.maximumf %659, %660 : vector<32x16xf32>
    %c0_586 = arith.constant 0 : index
    %c0_587 = arith.constant 0 : index
    %662 = vector.load %arg23[%c0_586, %c0_587] : memref<32x32xbf16, #tpu.memory_space<vmem>>, vector<32x32xbf16>
    %663 = arith.truncf %661 : vector<32x16xf32> to vector<32x16xbf16>
    %cst_588 = arith.constant dense<0.000000e+00> : vector<32x16xf32>
    %664 = tpu.matmul %662, %663, %cst_588 {dimension_numbers = #tpu.dot_dimension_numbers<[1], [0], [0], [1], [0, 0, 1, 1], [], []>} : vector<32x32xbf16>, vector<32x16xbf16>, vector<32x16xf32> -> vector<32x16xf32>
    %c0_589 = arith.constant 0 : index
    %c0_590 = arith.constant 0 : index
    %c0_591 = arith.constant 0 : index
    %665 = vector.load %arg26[%c0_589, %c0_590, %c0_591] : memref<1x32x16xf32, #tpu.memory_space<vmem>>, vector<1x32x16xf32>
    %666 = vector.shape_cast %665 : vector<1x32x16xf32> to vector<32x16xf32>
    %667 = vector.shape_cast %664 : vector<32x16xf32> to vector<1x32x16xf32>
    tpu.vector_store %arg26[%c0_589, %c0_590, %c0_591], %667 {strides = array<i32>} : memref<1x32x16xf32, #tpu.memory_space<vmem>>, vector<1x32x16xf32>,
    %c0_592 = arith.constant 0 : index
    %c0_593 = arith.constant 0 : index
    %668 = vector.load %arg9[%c0_592, %c0_593] : memref<4x8xbf16, #tpu.memory_space<vmem>>, vector<4x8xbf16>
    %669 = vector.extract_strided_slice %661 {offsets = [0, 0], sizes = [32, 4], strides = [1, 1]} : vector<32x16xf32> to vector<32x4xf32>
    %670 = arith.truncf %669 : vector<32x4xf32> to vector<32x4xbf16>
    %cst_594 = arith.constant dense<0.000000e+00> : vector<32x8xf32>
    %671 = tpu.matmul %670, %668, %cst_594 {dimension_numbers = #tpu.dot_dimension_numbers<[1], [0], [0], [1], [0, 0, 1, 1], [], []>} : vector<32x4xbf16>, vector<4x8xbf16>, vector<32x8xf32> -> vector<32x8xf32>
    %672 = vector.extract_strided_slice %661 {offsets = [0, 4], sizes = [32, 4], strides = [1, 1]} : vector<32x16xf32> to vector<32x4xf32>
    %673 = arith.truncf %672 : vector<32x4xf32> to vector<32x4xbf16>
    %cst_595 = arith.constant dense<0.000000e+00> : vector<32x8xf32>
    %674 = tpu.matmul %673, %668, %cst_595 {dimension_numbers = #tpu.dot_dimension_numbers<[1], [0], [0], [1], [0, 0, 1, 1], [], []>} : vector<32x4xbf16>, vector<4x8xbf16>, vector<32x8xf32> -> vector<32x8xf32>
    %675 = vector.extract_strided_slice %661 {offsets = [0, 8], sizes = [32, 4], strides = [1, 1]} : vector<32x16xf32> to vector<32x4xf32>
    %676 = arith.truncf %675 : vector<32x4xf32> to vector<32x4xbf16>
    %cst_596 = arith.constant dense<0.000000e+00> : vector<32x8xf32>
    %677 = tpu.matmul %676, %668, %cst_596 {dimension_numbers = #tpu.dot_dimension_numbers<[1], [0], [0], [1], [0, 0, 1, 1], [], []>} : vector<32x4xbf16>, vector<4x8xbf16>, vector<32x8xf32> -> vector<32x8xf32>
    %678 = vector.extract_strided_slice %661 {offsets = [0, 12], sizes = [32, 4], strides = [1, 1]} : vector<32x16xf32> to vector<32x4xf32>
    %679 = arith.truncf %678 : vector<32x4xf32> to vector<32x4xbf16>
    %cst_597 = arith.constant dense<0.000000e+00> : vector<32x8xf32>
    %680 = tpu.matmul %679, %668, %cst_597 {dimension_numbers = #tpu.dot_dimension_numbers<[1], [0], [0], [1], [0, 0, 1, 1], [], []>} : vector<32x4xbf16>, vector<4x8xbf16>, vector<32x8xf32> -> vector<32x8xf32>
    %cst_598 = arith.constant 0.000000e+00 : f32
    %681 = vector.broadcast %cst_598 : f32 to vector<32x128xf32>
    %c0_599 = arith.constant 0 : index
    %c0_600 = arith.constant 0 : index
    %682 = vector.load %arg29[%c0_599, %c0_600] : memref<32x512xf32, #tpu.memory_space<vmem>>, vector<32x128xf32>
    tpu.vector_store %arg29[%c0_599, %c0_600], %681 {strides = array<i32>} : memref<32x512xf32, #tpu.memory_space<vmem>>, vector<32x128xf32>,
    %c0_601 = arith.constant 0 : index
    %c192_602 = arith.constant 192 : index
    %683 = vector.load %arg29[%c0_601, %c192_602] : memref<32x512xf32, #tpu.memory_space<vmem>>, vector<32x128xf32>
    tpu.vector_store %arg29[%c0_601, %c192_602], %681 {strides = array<i32>} : memref<32x512xf32, #tpu.memory_space<vmem>>, vector<32x128xf32>,
    %cst_603 = arith.constant 0.000000e+00 : f32
    %684 = vector.broadcast %cst_603 : f32 to vector<32x64xf32>
    %c0_604 = arith.constant 0 : index
    %c128_605 = arith.constant 128 : index
    %685 = vector.load %arg29[%c0_604, %c128_605] : memref<32x512xf32, #tpu.memory_space<vmem>>, vector<32x64xf32>
    tpu.vector_store %arg29[%c0_604, %c128_605], %684 {strides = array<i32>} : memref<32x512xf32, #tpu.memory_space<vmem>>, vector<32x64xf32>,
    %c0_606 = arith.constant 0 : index
    %c128_607 = arith.constant 128 : index
    %686 = vector.load %arg29[%c0_606, %c128_607] : memref<32x512xf32, #tpu.memory_space<vmem>>, vector<32x8xf32>
    tpu.vector_store %arg29[%c0_606, %c128_607], %671 {strides = array<i32>} : memref<32x512xf32, #tpu.memory_space<vmem>>, vector<32x8xf32>,
    %c0_608 = arith.constant 0 : index
    %c144_609 = arith.constant 144 : index
    %687 = vector.load %arg29[%c0_608, %c144_609] : memref<32x512xf32, #tpu.memory_space<vmem>>, vector<32x8xf32>
    tpu.vector_store %arg29[%c0_608, %c144_609], %674 {strides = array<i32>} : memref<32x512xf32, #tpu.memory_space<vmem>>, vector<32x8xf32>,
    %c0_610 = arith.constant 0 : index
    %c160_611 = arith.constant 160 : index
    %688 = vector.load %arg29[%c0_610, %c160_611] : memref<32x512xf32, #tpu.memory_space<vmem>>, vector<32x8xf32>
    tpu.vector_store %arg29[%c0_610, %c160_611], %677 {strides = array<i32>} : memref<32x512xf32, #tpu.memory_space<vmem>>, vector<32x8xf32>,
    %c0_612 = arith.constant 0 : index
    %c176_613 = arith.constant 176 : index
    %689 = vector.load %arg29[%c0_612, %c176_613] : memref<32x512xf32, #tpu.memory_space<vmem>>, vector<32x8xf32>
    tpu.vector_store %arg29[%c0_612, %c176_613], %680 {strides = array<i32>} : memref<32x512xf32, #tpu.memory_space<vmem>>, vector<32x8xf32>,
    %c0_614 = arith.constant 0 : index
    %c119_615 = arith.constant 119 : index
    %690 = vector.load %arg29[%c0_614, %c119_615] : memref<32x512xf32, #tpu.memory_space<vmem>>, vector<32x64xf32>
    %691 = arith.truncf %690 : vector<32x64xf32> to vector<32x64xbf16>
    %c0_616 = arith.constant 0 : index
    %c0_617 = arith.constant 0 : index
    %692 = vector.load %arg3[%c0_616, %c0_617] : memref<9x64xbf16, #tpu.memory_space<vmem>>, vector<1x64xbf16>
    %693 = vector.broadcast %692 : vector<1x64xbf16> to vector<32x64xbf16>
    %694 = arith.mulf %691, %693 : vector<32x64xbf16>
    %c0_618 = arith.constant 0 : index
    %c0_619 = arith.constant 0 : index
    %695 = vector.load %arg30[%c0_618, %c0_619] : memref<400x256xbf16, #tpu.memory_space<vmem>>, vector<32x64xbf16>
    tpu.vector_store %arg30[%c0_618, %c0_619], %694 {strides = array<i32>} : memref<400x256xbf16, #tpu.memory_space<vmem>>, vector<32x64xbf16>,
    %c0_620 = arith.constant 0 : index
    %c120_621 = arith.constant 120 : index
    %696 = vector.load %arg29[%c0_620, %c120_621] : memref<32x512xf32, #tpu.memory_space<vmem>>, vector<32x64xf32>
    %697 = arith.truncf %696 : vector<32x64xf32> to vector<32x64xbf16>
    %c32_622 = arith.constant 32 : index
    %c0_623 = arith.constant 0 : index
    %698 = vector.load %arg30[%c32_622, %c0_623] : memref<400x256xbf16, #tpu.memory_space<vmem>>, vector<32x64xbf16>
    tpu.vector_store %arg30[%c32_622, %c0_623], %697 {strides = array<i32>} : memref<400x256xbf16, #tpu.memory_space<vmem>>, vector<32x64xbf16>,
    %c0_624 = arith.constant 0 : index
    %c121_625 = arith.constant 121 : index
    %699 = vector.load %arg29[%c0_624, %c121_625] : memref<32x512xf32, #tpu.memory_space<vmem>>, vector<32x64xf32>
    %700 = arith.truncf %699 : vector<32x64xf32> to vector<32x64xbf16>
    %c2_626 = arith.constant 2 : index
    %c0_627 = arith.constant 0 : index
    %701 = vector.load %arg3[%c2_626, %c0_627] : memref<9x64xbf16, #tpu.memory_space<vmem>>, vector<1x64xbf16>
    %702 = vector.broadcast %701 : vector<1x64xbf16> to vector<32x64xbf16>
    %703 = arith.mulf %700, %702 : vector<32x64xbf16>
    %c64_628 = arith.constant 64 : index
    %c0_629 = arith.constant 0 : index
    %704 = vector.load %arg30[%c64_628, %c0_629] : memref<400x256xbf16, #tpu.memory_space<vmem>>, vector<32x64xbf16>
    tpu.vector_store %arg30[%c64_628, %c0_629], %703 {strides = array<i32>} : memref<400x256xbf16, #tpu.memory_space<vmem>>, vector<32x64xbf16>,
    %c0_630 = arith.constant 0 : index
    %c127_631 = arith.constant 127 : index
    %705 = vector.load %arg29[%c0_630, %c127_631] : memref<32x512xf32, #tpu.memory_space<vmem>>, vector<32x64xf32>
    %706 = arith.truncf %705 : vector<32x64xf32> to vector<32x64xbf16>
    %c3_632 = arith.constant 3 : index
    %c0_633 = arith.constant 0 : index
    %707 = vector.load %arg3[%c3_632, %c0_633] : memref<9x64xbf16, #tpu.memory_space<vmem>>, vector<1x64xbf16>
    %708 = vector.broadcast %707 : vector<1x64xbf16> to vector<32x64xbf16>
    %709 = arith.mulf %706, %708 : vector<32x64xbf16>
    %c96_634 = arith.constant 96 : index
    %c0_635 = arith.constant 0 : index
    %710 = vector.load %arg30[%c96_634, %c0_635] : memref<400x256xbf16, #tpu.memory_space<vmem>>, vector<32x64xbf16>
    tpu.vector_store %arg30[%c96_634, %c0_635], %709 {strides = array<i32>} : memref<400x256xbf16, #tpu.memory_space<vmem>>, vector<32x64xbf16>,
    %c0_636 = arith.constant 0 : index
    %c128_637 = arith.constant 128 : index
    %711 = vector.load %arg29[%c0_636, %c128_637] : memref<32x512xf32, #tpu.memory_space<vmem>>, vector<32x64xf32>
    %712 = arith.truncf %711 : vector<32x64xf32> to vector<32x64xbf16>
    %c128_638 = arith.constant 128 : index
    %c0_639 = arith.constant 0 : index
    %713 = vector.load %arg30[%c128_638, %c0_639] : memref<400x256xbf16, #tpu.memory_space<vmem>>, vector<32x64xbf16>
    tpu.vector_store %arg30[%c128_638, %c0_639], %712 {strides = array<i32>} : memref<400x256xbf16, #tpu.memory_space<vmem>>, vector<32x64xbf16>,
    %c0_640 = arith.constant 0 : index
    %c129_641 = arith.constant 129 : index
    %714 = vector.load %arg29[%c0_640, %c129_641] : memref<32x512xf32, #tpu.memory_space<vmem>>, vector<32x64xf32>
    %715 = arith.truncf %714 : vector<32x64xf32> to vector<32x64xbf16>
    %c5_642 = arith.constant 5 : index
    %c0_643 = arith.constant 0 : index
    %716 = vector.load %arg3[%c5_642, %c0_643] : memref<9x64xbf16, #tpu.memory_space<vmem>>, vector<1x64xbf16>
    %717 = vector.broadcast %716 : vector<1x64xbf16> to vector<32x64xbf16>
    %718 = arith.mulf %715, %717 : vector<32x64xbf16>
    %c160_644 = arith.constant 160 : index
    %c0_645 = arith.constant 0 : index
    %719 = vector.load %arg30[%c160_644, %c0_645] : memref<400x256xbf16, #tpu.memory_space<vmem>>, vector<32x64xbf16>
    tpu.vector_store %arg30[%c160_644, %c0_645], %718 {strides = array<i32>} : memref<400x256xbf16, #tpu.memory_space<vmem>>, vector<32x64xbf16>,
    %c0_646 = arith.constant 0 : index
    %c135_647 = arith.constant 135 : index
    %720 = vector.load %arg29[%c0_646, %c135_647] : memref<32x512xf32, #tpu.memory_space<vmem>>, vector<32x64xf32>
    %721 = arith.truncf %720 : vector<32x64xf32> to vector<32x64xbf16>
    %c6_648 = arith.constant 6 : index
    %c0_649 = arith.constant 0 : index
    %722 = vector.load %arg3[%c6_648, %c0_649] : memref<9x64xbf16, #tpu.memory_space<vmem>>, vector<1x64xbf16>
    %723 = vector.broadcast %722 : vector<1x64xbf16> to vector<32x64xbf16>
    %724 = arith.mulf %721, %723 : vector<32x64xbf16>
    %c192_650 = arith.constant 192 : index
    %c0_651 = arith.constant 0 : index
    %725 = vector.load %arg30[%c192_650, %c0_651] : memref<400x256xbf16, #tpu.memory_space<vmem>>, vector<32x64xbf16>
    tpu.vector_store %arg30[%c192_650, %c0_651], %724 {strides = array<i32>} : memref<400x256xbf16, #tpu.memory_space<vmem>>, vector<32x64xbf16>,
    %c0_652 = arith.constant 0 : index
    %c136_653 = arith.constant 136 : index
    %726 = vector.load %arg29[%c0_652, %c136_653] : memref<32x512xf32, #tpu.memory_space<vmem>>, vector<32x64xf32>
    %727 = arith.truncf %726 : vector<32x64xf32> to vector<32x64xbf16>
    %c224_654 = arith.constant 224 : index
    %c0_655 = arith.constant 0 : index
    %728 = vector.load %arg30[%c224_654, %c0_655] : memref<400x256xbf16, #tpu.memory_space<vmem>>, vector<32x64xbf16>
    tpu.vector_store %arg30[%c224_654, %c0_655], %727 {strides = array<i32>} : memref<400x256xbf16, #tpu.memory_space<vmem>>, vector<32x64xbf16>,
    %c0_656 = arith.constant 0 : index
    %c137_657 = arith.constant 137 : index
    %729 = vector.load %arg29[%c0_656, %c137_657] : memref<32x512xf32, #tpu.memory_space<vmem>>, vector<32x64xf32>
    %730 = arith.truncf %729 : vector<32x64xf32> to vector<32x64xbf16>
    %c8_658 = arith.constant 8 : index
    %c0_659 = arith.constant 0 : index
    %731 = vector.load %arg3[%c8_658, %c0_659] : memref<9x64xbf16, #tpu.memory_space<vmem>>, vector<1x64xbf16>
    %732 = vector.broadcast %731 : vector<1x64xbf16> to vector<32x64xbf16>
    %733 = arith.mulf %730, %732 : vector<32x64xbf16>
    %c256_660 = arith.constant 256 : index
    %c0_661 = arith.constant 0 : index
    %734 = vector.load %arg30[%c256_660, %c0_661] : memref<400x256xbf16, #tpu.memory_space<vmem>>, vector<32x64xbf16>
    tpu.vector_store %arg30[%c256_660, %c0_661], %733 {strides = array<i32>} : memref<400x256xbf16, #tpu.memory_space<vmem>>, vector<32x64xbf16>,
    %c0_662 = arith.constant 0 : index
    %c0_663 = arith.constant 0 : index
    %735 = vector.load %arg19[%c0_662, %c0_663] : memref<16x288xbf16, #tpu.memory_space<vmem>>, vector<16x288xbf16>
    %c0_664 = arith.constant 0 : index
    %c0_665 = arith.constant 0 : index
    %736 = vector.load %arg30[%c0_664, %c0_665] : memref<400x256xbf16, #tpu.memory_space<vmem>>, vector<288x64xbf16>
    %cst_666 = arith.constant dense<0.000000e+00> : vector<16x64xf32>
    %737 = tpu.matmul %735, %736, %cst_666 {dimension_numbers = #tpu.dot_dimension_numbers<[1], [0], [0], [1], [0, 0, 1, 1], [], []>} : vector<16x288xbf16>, vector<288x64xbf16>, vector<16x64xf32> -> vector<16x64xf32>
    %cst_667 = arith.constant 0.000000e+00 : f32
    %738 = vector.broadcast %cst_667 : f32 to vector<16x64xf32>
    %739 = arith.maximumf %737, %738 : vector<16x64xf32>
    %cst_668 = arith.constant 0.000000e+00 : f32
    %740 = vector.broadcast %cst_668 : f32 to vector<32x128xf32>
    %c0_669 = arith.constant 0 : index
    %c0_670 = arith.constant 0 : index
    %741 = vector.load %arg29[%c0_669, %c0_670] : memref<32x512xf32, #tpu.memory_space<vmem>>, vector<32x128xf32>
    tpu.vector_store %arg29[%c0_669, %c0_670], %740 {strides = array<i32>} : memref<32x512xf32, #tpu.memory_space<vmem>>, vector<32x128xf32>,
    %c0_671 = arith.constant 0 : index
    %c192_672 = arith.constant 192 : index
    %742 = vector.load %arg29[%c0_671, %c192_672] : memref<32x512xf32, #tpu.memory_space<vmem>>, vector<32x128xf32>
    tpu.vector_store %arg29[%c0_671, %c192_672], %740 {strides = array<i32>} : memref<32x512xf32, #tpu.memory_space<vmem>>, vector<32x128xf32>,
    %c0_673 = arith.constant 0 : index
    %c128_674 = arith.constant 128 : index
    %743 = vector.load %arg29[%c0_673, %c128_674] : memref<32x512xf32, #tpu.memory_space<vmem>>, vector<16x64xf32>
    tpu.vector_store %arg29[%c0_673, %c128_674], %739 {strides = array<i32>} : memref<32x512xf32, #tpu.memory_space<vmem>>, vector<16x64xf32>,
    %c16_675 = arith.constant 16 : index
    %c128_676 = arith.constant 128 : index
    %744 = vector.load %arg29[%c16_675, %c128_676] : memref<32x512xf32, #tpu.memory_space<vmem>>, vector<16x64xf32>
    tpu.vector_store %arg29[%c16_675, %c128_676], %393 {strides = array<i32>} : memref<32x512xf32, #tpu.memory_space<vmem>>, vector<16x64xf32>,
    %c0_677 = arith.constant 0 : index
    %c119_678 = arith.constant 119 : index
    %745 = vector.load %arg29[%c0_677, %c119_678] : memref<32x512xf32, #tpu.memory_space<vmem>>, vector<32x64xf32>
    %746 = arith.truncf %745 : vector<32x64xf32> to vector<32x64xbf16>
    %c0_679 = arith.constant 0 : index
    %c0_680 = arith.constant 0 : index
    %747 = vector.load %arg3[%c0_679, %c0_680] : memref<9x64xbf16, #tpu.memory_space<vmem>>, vector<1x64xbf16>
    %748 = vector.broadcast %747 : vector<1x64xbf16> to vector<32x64xbf16>
    %749 = arith.mulf %746, %748 : vector<32x64xbf16>
    %c0_681 = arith.constant 0 : index
    %c0_682 = arith.constant 0 : index
    %750 = vector.load %arg30[%c0_681, %c0_682] : memref<400x256xbf16, #tpu.memory_space<vmem>>, vector<32x64xbf16>
    tpu.vector_store %arg30[%c0_681, %c0_682], %749 {strides = array<i32>} : memref<400x256xbf16, #tpu.memory_space<vmem>>, vector<32x64xbf16>,
    %c0_683 = arith.constant 0 : index
    %c120_684 = arith.constant 120 : index
    %751 = vector.load %arg29[%c0_683, %c120_684] : memref<32x512xf32, #tpu.memory_space<vmem>>, vector<32x64xf32>
    %752 = arith.truncf %751 : vector<32x64xf32> to vector<32x64xbf16>
    %c32_685 = arith.constant 32 : index
    %c0_686 = arith.constant 0 : index
    %753 = vector.load %arg30[%c32_685, %c0_686] : memref<400x256xbf16, #tpu.memory_space<vmem>>, vector<32x64xbf16>
    tpu.vector_store %arg30[%c32_685, %c0_686], %752 {strides = array<i32>} : memref<400x256xbf16, #tpu.memory_space<vmem>>, vector<32x64xbf16>,
    %c0_687 = arith.constant 0 : index
    %c121_688 = arith.constant 121 : index
    %754 = vector.load %arg29[%c0_687, %c121_688] : memref<32x512xf32, #tpu.memory_space<vmem>>, vector<32x64xf32>
    %755 = arith.truncf %754 : vector<32x64xf32> to vector<32x64xbf16>
    %c2_689 = arith.constant 2 : index
    %c0_690 = arith.constant 0 : index
    %756 = vector.load %arg3[%c2_689, %c0_690] : memref<9x64xbf16, #tpu.memory_space<vmem>>, vector<1x64xbf16>
    %757 = vector.broadcast %756 : vector<1x64xbf16> to vector<32x64xbf16>
    %758 = arith.mulf %755, %757 : vector<32x64xbf16>
    %c64_691 = arith.constant 64 : index
    %c0_692 = arith.constant 0 : index
    %759 = vector.load %arg30[%c64_691, %c0_692] : memref<400x256xbf16, #tpu.memory_space<vmem>>, vector<32x64xbf16>
    tpu.vector_store %arg30[%c64_691, %c0_692], %758 {strides = array<i32>} : memref<400x256xbf16, #tpu.memory_space<vmem>>, vector<32x64xbf16>,
    %c0_693 = arith.constant 0 : index
    %c127_694 = arith.constant 127 : index
    %760 = vector.load %arg29[%c0_693, %c127_694] : memref<32x512xf32, #tpu.memory_space<vmem>>, vector<32x64xf32>
    %761 = arith.truncf %760 : vector<32x64xf32> to vector<32x64xbf16>
    %c3_695 = arith.constant 3 : index
    %c0_696 = arith.constant 0 : index
    %762 = vector.load %arg3[%c3_695, %c0_696] : memref<9x64xbf16, #tpu.memory_space<vmem>>, vector<1x64xbf16>
    %763 = vector.broadcast %762 : vector<1x64xbf16> to vector<32x64xbf16>
    %764 = arith.mulf %761, %763 : vector<32x64xbf16>
    %c96_697 = arith.constant 96 : index
    %c0_698 = arith.constant 0 : index
    %765 = vector.load %arg30[%c96_697, %c0_698] : memref<400x256xbf16, #tpu.memory_space<vmem>>, vector<32x64xbf16>
    tpu.vector_store %arg30[%c96_697, %c0_698], %764 {strides = array<i32>} : memref<400x256xbf16, #tpu.memory_space<vmem>>, vector<32x64xbf16>,
    %c0_699 = arith.constant 0 : index
    %c128_700 = arith.constant 128 : index
    %766 = vector.load %arg29[%c0_699, %c128_700] : memref<32x512xf32, #tpu.memory_space<vmem>>, vector<32x64xf32>
    %767 = arith.truncf %766 : vector<32x64xf32> to vector<32x64xbf16>
    %c128_701 = arith.constant 128 : index
    %c0_702 = arith.constant 0 : index
    %768 = vector.load %arg30[%c128_701, %c0_702] : memref<400x256xbf16, #tpu.memory_space<vmem>>, vector<32x64xbf16>
    tpu.vector_store %arg30[%c128_701, %c0_702], %767 {strides = array<i32>} : memref<400x256xbf16, #tpu.memory_space<vmem>>, vector<32x64xbf16>,
    %c0_703 = arith.constant 0 : index
    %c129_704 = arith.constant 129 : index
    %769 = vector.load %arg29[%c0_703, %c129_704] : memref<32x512xf32, #tpu.memory_space<vmem>>, vector<32x64xf32>
    %770 = arith.truncf %769 : vector<32x64xf32> to vector<32x64xbf16>
    %c5_705 = arith.constant 5 : index
    %c0_706 = arith.constant 0 : index
    %771 = vector.load %arg3[%c5_705, %c0_706] : memref<9x64xbf16, #tpu.memory_space<vmem>>, vector<1x64xbf16>
    %772 = vector.broadcast %771 : vector<1x64xbf16> to vector<32x64xbf16>
    %773 = arith.mulf %770, %772 : vector<32x64xbf16>
    %c160_707 = arith.constant 160 : index
    %c0_708 = arith.constant 0 : index
    %774 = vector.load %arg30[%c160_707, %c0_708] : memref<400x256xbf16, #tpu.memory_space<vmem>>, vector<32x64xbf16>
    tpu.vector_store %arg30[%c160_707, %c0_708], %773 {strides = array<i32>} : memref<400x256xbf16, #tpu.memory_space<vmem>>, vector<32x64xbf16>,
    %c0_709 = arith.constant 0 : index
    %c135_710 = arith.constant 135 : index
    %775 = vector.load %arg29[%c0_709, %c135_710] : memref<32x512xf32, #tpu.memory_space<vmem>>, vector<32x64xf32>
    %776 = arith.truncf %775 : vector<32x64xf32> to vector<32x64xbf16>
    %c6_711 = arith.constant 6 : index
    %c0_712 = arith.constant 0 : index
    %777 = vector.load %arg3[%c6_711, %c0_712] : memref<9x64xbf16, #tpu.memory_space<vmem>>, vector<1x64xbf16>
    %778 = vector.broadcast %777 : vector<1x64xbf16> to vector<32x64xbf16>
    %779 = arith.mulf %776, %778 : vector<32x64xbf16>
    %c192_713 = arith.constant 192 : index
    %c0_714 = arith.constant 0 : index
    %780 = vector.load %arg30[%c192_713, %c0_714] : memref<400x256xbf16, #tpu.memory_space<vmem>>, vector<32x64xbf16>
    tpu.vector_store %arg30[%c192_713, %c0_714], %779 {strides = array<i32>} : memref<400x256xbf16, #tpu.memory_space<vmem>>, vector<32x64xbf16>,
    %c0_715 = arith.constant 0 : index
    %c136_716 = arith.constant 136 : index
    %781 = vector.load %arg29[%c0_715, %c136_716] : memref<32x512xf32, #tpu.memory_space<vmem>>, vector<32x64xf32>
    %782 = arith.truncf %781 : vector<32x64xf32> to vector<32x64xbf16>
    %c224_717 = arith.constant 224 : index
    %c0_718 = arith.constant 0 : index
    %783 = vector.load %arg30[%c224_717, %c0_718] : memref<400x256xbf16, #tpu.memory_space<vmem>>, vector<32x64xbf16>
    tpu.vector_store %arg30[%c224_717, %c0_718], %782 {strides = array<i32>} : memref<400x256xbf16, #tpu.memory_space<vmem>>, vector<32x64xbf16>,
    %c0_719 = arith.constant 0 : index
    %c137_720 = arith.constant 137 : index
    %784 = vector.load %arg29[%c0_719, %c137_720] : memref<32x512xf32, #tpu.memory_space<vmem>>, vector<32x64xf32>
    %785 = arith.truncf %784 : vector<32x64xf32> to vector<32x64xbf16>
    %c8_721 = arith.constant 8 : index
    %c0_722 = arith.constant 0 : index
    %786 = vector.load %arg3[%c8_721, %c0_722] : memref<9x64xbf16, #tpu.memory_space<vmem>>, vector<1x64xbf16>
    %787 = vector.broadcast %786 : vector<1x64xbf16> to vector<32x64xbf16>
    %788 = arith.mulf %785, %787 : vector<32x64xbf16>
    %c256_723 = arith.constant 256 : index
    %c0_724 = arith.constant 0 : index
    %789 = vector.load %arg30[%c256_723, %c0_724] : memref<400x256xbf16, #tpu.memory_space<vmem>>, vector<32x64xbf16>
    tpu.vector_store %arg30[%c256_723, %c0_724], %788 {strides = array<i32>} : memref<400x256xbf16, #tpu.memory_space<vmem>>, vector<32x64xbf16>,
    %c0_725 = arith.constant 0 : index
    %c0_726 = arith.constant 0 : index
    %790 = vector.load %arg20[%c0_725, %c0_726] : memref<16x288xbf16, #tpu.memory_space<vmem>>, vector<16x288xbf16>
    %c0_727 = arith.constant 0 : index
    %c0_728 = arith.constant 0 : index
    %791 = vector.load %arg30[%c0_727, %c0_728] : memref<400x256xbf16, #tpu.memory_space<vmem>>, vector<288x64xbf16>
    %cst_729 = arith.constant dense<0.000000e+00> : vector<16x64xf32>
    %792 = tpu.matmul %790, %791, %cst_729 {dimension_numbers = #tpu.dot_dimension_numbers<[1], [0], [0], [1], [0, 0, 1, 1], [], []>} : vector<16x288xbf16>, vector<288x64xbf16>, vector<16x64xf32> -> vector<16x64xf32>
    %cst_730 = arith.constant 0.000000e+00 : f32
    %793 = vector.broadcast %cst_730 : f32 to vector<16x64xf32>
    %794 = arith.maximumf %792, %793 : vector<16x64xf32>
    %c0_731 = arith.constant 0 : index
    %c0_732 = arith.constant 0 : index
    %795 = vector.load %arg24[%c0_731, %c0_732] : memref<16x16xbf16, #tpu.memory_space<vmem>>, vector<16x16xbf16>
    %796 = arith.truncf %794 : vector<16x64xf32> to vector<16x64xbf16>
    %cst_733 = arith.constant dense<0.000000e+00> : vector<16x64xf32>
    %797 = tpu.matmul %795, %796, %cst_733 {dimension_numbers = #tpu.dot_dimension_numbers<[1], [0], [0], [1], [0, 0, 1, 1], [], []>} : vector<16x16xbf16>, vector<16x64xbf16>, vector<16x64xf32> -> vector<16x64xf32>
    %c0_734 = arith.constant 0 : index
    %c0_735 = arith.constant 0 : index
    %c0_736 = arith.constant 0 : index
    %798 = vector.load %arg27[%c0_734, %c0_735, %c0_736] : memref<1x16x64xf32, #tpu.memory_space<vmem>>, vector<1x16x64xf32>
    %799 = vector.shape_cast %798 : vector<1x16x64xf32> to vector<16x64xf32>
    %800 = vector.shape_cast %797 : vector<16x64xf32> to vector<1x16x64xf32>
    tpu.vector_store %arg27[%c0_734, %c0_735, %c0_736], %800 {strides = array<i32>} : memref<1x16x64xf32, #tpu.memory_space<vmem>>, vector<1x16x64xf32>,
    %c0_737 = arith.constant 0 : index
    %c0_738 = arith.constant 0 : index
    %801 = vector.load %arg10[%c0_737, %c0_738] : memref<8x16xbf16, #tpu.memory_space<vmem>>, vector<8x16xbf16>
    %802 = vector.extract_strided_slice %794 {offsets = [0, 0], sizes = [16, 8], strides = [1, 1]} : vector<16x64xf32> to vector<16x8xf32>
    %803 = arith.truncf %802 : vector<16x8xf32> to vector<16x8xbf16>
    %cst_739 = arith.constant dense<0.000000e+00> : vector<16x16xf32>
    %804 = tpu.matmul %803, %801, %cst_739 {dimension_numbers = #tpu.dot_dimension_numbers<[1], [0], [0], [1], [0, 0, 1, 1], [], []>} : vector<16x8xbf16>, vector<8x16xbf16>, vector<16x16xf32> -> vector<16x16xf32>
    %805 = vector.extract_strided_slice %794 {offsets = [0, 8], sizes = [16, 8], strides = [1, 1]} : vector<16x64xf32> to vector<16x8xf32>
    %806 = arith.truncf %805 : vector<16x8xf32> to vector<16x8xbf16>
    %cst_740 = arith.constant dense<0.000000e+00> : vector<16x16xf32>
    %807 = tpu.matmul %806, %801, %cst_740 {dimension_numbers = #tpu.dot_dimension_numbers<[1], [0], [0], [1], [0, 0, 1, 1], [], []>} : vector<16x8xbf16>, vector<8x16xbf16>, vector<16x16xf32> -> vector<16x16xf32>
    %808 = vector.extract_strided_slice %794 {offsets = [0, 16], sizes = [16, 8], strides = [1, 1]} : vector<16x64xf32> to vector<16x8xf32>
    %809 = arith.truncf %808 : vector<16x8xf32> to vector<16x8xbf16>
    %cst_741 = arith.constant dense<0.000000e+00> : vector<16x16xf32>
    %810 = tpu.matmul %809, %801, %cst_741 {dimension_numbers = #tpu.dot_dimension_numbers<[1], [0], [0], [1], [0, 0, 1, 1], [], []>} : vector<16x8xbf16>, vector<8x16xbf16>, vector<16x16xf32> -> vector<16x16xf32>
    %811 = vector.extract_strided_slice %794 {offsets = [0, 24], sizes = [16, 8], strides = [1, 1]} : vector<16x64xf32> to vector<16x8xf32>
    %812 = arith.truncf %811 : vector<16x8xf32> to vector<16x8xbf16>
    %cst_742 = arith.constant dense<0.000000e+00> : vector<16x16xf32>
    %813 = tpu.matmul %812, %801, %cst_742 {dimension_numbers = #tpu.dot_dimension_numbers<[1], [0], [0], [1], [0, 0, 1, 1], [], []>} : vector<16x8xbf16>, vector<8x16xbf16>, vector<16x16xf32> -> vector<16x16xf32>
    %814 = vector.extract_strided_slice %794 {offsets = [0, 32], sizes = [16, 8], strides = [1, 1]} : vector<16x64xf32> to vector<16x8xf32>
    %815 = arith.truncf %814 : vector<16x8xf32> to vector<16x8xbf16>
    %cst_743 = arith.constant dense<0.000000e+00> : vector<16x16xf32>
    %816 = tpu.matmul %815, %801, %cst_743 {dimension_numbers = #tpu.dot_dimension_numbers<[1], [0], [0], [1], [0, 0, 1, 1], [], []>} : vector<16x8xbf16>, vector<8x16xbf16>, vector<16x16xf32> -> vector<16x16xf32>
    %817 = vector.extract_strided_slice %794 {offsets = [0, 40], sizes = [16, 8], strides = [1, 1]} : vector<16x64xf32> to vector<16x8xf32>
    %818 = arith.truncf %817 : vector<16x8xf32> to vector<16x8xbf16>
    %cst_744 = arith.constant dense<0.000000e+00> : vector<16x16xf32>
    %819 = tpu.matmul %818, %801, %cst_744 {dimension_numbers = #tpu.dot_dimension_numbers<[1], [0], [0], [1], [0, 0, 1, 1], [], []>} : vector<16x8xbf16>, vector<8x16xbf16>, vector<16x16xf32> -> vector<16x16xf32>
    %820 = vector.extract_strided_slice %794 {offsets = [0, 48], sizes = [16, 8], strides = [1, 1]} : vector<16x64xf32> to vector<16x8xf32>
    %821 = arith.truncf %820 : vector<16x8xf32> to vector<16x8xbf16>
    %cst_745 = arith.constant dense<0.000000e+00> : vector<16x16xf32>
    %822 = tpu.matmul %821, %801, %cst_745 {dimension_numbers = #tpu.dot_dimension_numbers<[1], [0], [0], [1], [0, 0, 1, 1], [], []>} : vector<16x8xbf16>, vector<8x16xbf16>, vector<16x16xf32> -> vector<16x16xf32>
    %823 = vector.extract_strided_slice %794 {offsets = [0, 56], sizes = [16, 8], strides = [1, 1]} : vector<16x64xf32> to vector<16x8xf32>
    %824 = arith.truncf %823 : vector<16x8xf32> to vector<16x8xbf16>
    %cst_746 = arith.constant dense<0.000000e+00> : vector<16x16xf32>
    %825 = tpu.matmul %824, %801, %cst_746 {dimension_numbers = #tpu.dot_dimension_numbers<[1], [0], [0], [1], [0, 0, 1, 1], [], []>} : vector<16x8xbf16>, vector<8x16xbf16>, vector<16x16xf32> -> vector<16x16xf32>
    %cst_747 = arith.constant 0.000000e+00 : f32
    %826 = vector.broadcast %cst_747 : f32 to vector<16x128xf32>
    %c0_748 = arith.constant 0 : index
    %c0_749 = arith.constant 0 : index
    %827 = vector.load %arg29[%c0_748, %c0_749] : memref<32x512xf32, #tpu.memory_space<vmem>>, vector<16x128xf32>
    tpu.vector_store %arg29[%c0_748, %c0_749], %826 {strides = array<i32>} : memref<32x512xf32, #tpu.memory_space<vmem>>, vector<16x128xf32>,
    %c0_750 = arith.constant 0 : index
    %c384_751 = arith.constant 384 : index
    %828 = vector.load %arg29[%c0_750, %c384_751] : memref<32x512xf32, #tpu.memory_space<vmem>>, vector<16x128xf32>
    tpu.vector_store %arg29[%c0_750, %c384_751], %826 {strides = array<i32>} : memref<32x512xf32, #tpu.memory_space<vmem>>, vector<16x128xf32>,
    %cst_752 = arith.constant 0.000000e+00 : f32
    %829 = vector.broadcast %cst_752 : f32 to vector<16x256xf32>
    %c0_753 = arith.constant 0 : index
    %c128_754 = arith.constant 128 : index
    %830 = vector.load %arg29[%c0_753, %c128_754] : memref<32x512xf32, #tpu.memory_space<vmem>>, vector<16x256xf32>
    tpu.vector_store %arg29[%c0_753, %c128_754], %829 {strides = array<i32>} : memref<32x512xf32, #tpu.memory_space<vmem>>, vector<16x256xf32>,
    %c0_755 = arith.constant 0 : index
    %c128_756 = arith.constant 128 : index
    %831 = vector.load %arg29[%c0_755, %c128_756] : memref<32x512xf32, #tpu.memory_space<vmem>>, vector<16x16xf32>
    tpu.vector_store %arg29[%c0_755, %c128_756], %804 {strides = array<i32>} : memref<32x512xf32, #tpu.memory_space<vmem>>, vector<16x16xf32>,
    %c0_757 = arith.constant 0 : index
    %c160_758 = arith.constant 160 : index
    %832 = vector.load %arg29[%c0_757, %c160_758] : memref<32x512xf32, #tpu.memory_space<vmem>>, vector<16x16xf32>
    tpu.vector_store %arg29[%c0_757, %c160_758], %807 {strides = array<i32>} : memref<32x512xf32, #tpu.memory_space<vmem>>, vector<16x16xf32>,
    %c0_759 = arith.constant 0 : index
    %c192_760 = arith.constant 192 : index
    %833 = vector.load %arg29[%c0_759, %c192_760] : memref<32x512xf32, #tpu.memory_space<vmem>>, vector<16x16xf32>
    tpu.vector_store %arg29[%c0_759, %c192_760], %810 {strides = array<i32>} : memref<32x512xf32, #tpu.memory_space<vmem>>, vector<16x16xf32>,
    %c0_761 = arith.constant 0 : index
    %c224_762 = arith.constant 224 : index
    %834 = vector.load %arg29[%c0_761, %c224_762] : memref<32x512xf32, #tpu.memory_space<vmem>>, vector<16x16xf32>
    tpu.vector_store %arg29[%c0_761, %c224_762], %813 {strides = array<i32>} : memref<32x512xf32, #tpu.memory_space<vmem>>, vector<16x16xf32>,
    %c0_763 = arith.constant 0 : index
    %c256_764 = arith.constant 256 : index
    %835 = vector.load %arg29[%c0_763, %c256_764] : memref<32x512xf32, #tpu.memory_space<vmem>>, vector<16x16xf32>
    tpu.vector_store %arg29[%c0_763, %c256_764], %816 {strides = array<i32>} : memref<32x512xf32, #tpu.memory_space<vmem>>, vector<16x16xf32>,
    %c0_765 = arith.constant 0 : index
    %c288_766 = arith.constant 288 : index
    %836 = vector.load %arg29[%c0_765, %c288_766] : memref<32x512xf32, #tpu.memory_space<vmem>>, vector<16x16xf32>
    tpu.vector_store %arg29[%c0_765, %c288_766], %819 {strides = array<i32>} : memref<32x512xf32, #tpu.memory_space<vmem>>, vector<16x16xf32>,
    %c0_767 = arith.constant 0 : index
    %c320_768 = arith.constant 320 : index
    %837 = vector.load %arg29[%c0_767, %c320_768] : memref<32x512xf32, #tpu.memory_space<vmem>>, vector<16x16xf32>
    tpu.vector_store %arg29[%c0_767, %c320_768], %822 {strides = array<i32>} : memref<32x512xf32, #tpu.memory_space<vmem>>, vector<16x16xf32>,
    %c0_769 = arith.constant 0 : index
    %c352_770 = arith.constant 352 : index
    %838 = vector.load %arg29[%c0_769, %c352_770] : memref<32x512xf32, #tpu.memory_space<vmem>>, vector<16x16xf32>
    tpu.vector_store %arg29[%c0_769, %c352_770], %825 {strides = array<i32>} : memref<32x512xf32, #tpu.memory_space<vmem>>, vector<16x16xf32>,
    %c0_771 = arith.constant 0 : index
    %c111_772 = arith.constant 111 : index
    %839 = vector.load %arg29[%c0_771, %c111_772] : memref<32x512xf32, #tpu.memory_space<vmem>>, vector<16x256xf32>
    %840 = arith.truncf %839 : vector<16x256xf32> to vector<16x256xbf16>
    %c0_773 = arith.constant 0 : index
    %c0_774 = arith.constant 0 : index
    %841 = vector.load %arg2[%c0_773, %c0_774] : memref<9x256xbf16, #tpu.memory_space<vmem>>, vector<1x256xbf16>
    %842 = vector.broadcast %841 : vector<1x256xbf16> to vector<16x256xbf16>
    %843 = arith.mulf %840, %842 : vector<16x256xbf16>
    %c0_775 = arith.constant 0 : index
    %c0_776 = arith.constant 0 : index
    %844 = vector.load %arg30[%c0_775, %c0_776] : memref<400x256xbf16, #tpu.memory_space<vmem>>, vector<16x256xbf16>
    tpu.vector_store %arg30[%c0_775, %c0_776], %843 {strides = array<i32>} : memref<400x256xbf16, #tpu.memory_space<vmem>>, vector<16x256xbf16>,
    %c0_777 = arith.constant 0 : index
    %c112_778 = arith.constant 112 : index
    %845 = vector.load %arg29[%c0_777, %c112_778] : memref<32x512xf32, #tpu.memory_space<vmem>>, vector<16x256xf32>
    %846 = arith.truncf %845 : vector<16x256xf32> to vector<16x256xbf16>
    %c16_779 = arith.constant 16 : index
    %c0_780 = arith.constant 0 : index
    %847 = vector.load %arg30[%c16_779, %c0_780] : memref<400x256xbf16, #tpu.memory_space<vmem>>, vector<16x256xbf16>
    tpu.vector_store %arg30[%c16_779, %c0_780], %846 {strides = array<i32>} : memref<400x256xbf16, #tpu.memory_space<vmem>>, vector<16x256xbf16>,
    %c0_781 = arith.constant 0 : index
    %c113_782 = arith.constant 113 : index
    %848 = vector.load %arg29[%c0_781, %c113_782] : memref<32x512xf32, #tpu.memory_space<vmem>>, vector<16x256xf32>
    %849 = arith.truncf %848 : vector<16x256xf32> to vector<16x256xbf16>
    %c2_783 = arith.constant 2 : index
    %c0_784 = arith.constant 0 : index
    %850 = vector.load %arg2[%c2_783, %c0_784] : memref<9x256xbf16, #tpu.memory_space<vmem>>, vector<1x256xbf16>
    %851 = vector.broadcast %850 : vector<1x256xbf16> to vector<16x256xbf16>
    %852 = arith.mulf %849, %851 : vector<16x256xbf16>
    %c32_785 = arith.constant 32 : index
    %c0_786 = arith.constant 0 : index
    %853 = vector.load %arg30[%c32_785, %c0_786] : memref<400x256xbf16, #tpu.memory_space<vmem>>, vector<16x256xbf16>
    tpu.vector_store %arg30[%c32_785, %c0_786], %852 {strides = array<i32>} : memref<400x256xbf16, #tpu.memory_space<vmem>>, vector<16x256xbf16>,
    %c0_787 = arith.constant 0 : index
    %c127_788 = arith.constant 127 : index
    %854 = vector.load %arg29[%c0_787, %c127_788] : memref<32x512xf32, #tpu.memory_space<vmem>>, vector<16x256xf32>
    %855 = arith.truncf %854 : vector<16x256xf32> to vector<16x256xbf16>
    %c3_789 = arith.constant 3 : index
    %c0_790 = arith.constant 0 : index
    %856 = vector.load %arg2[%c3_789, %c0_790] : memref<9x256xbf16, #tpu.memory_space<vmem>>, vector<1x256xbf16>
    %857 = vector.broadcast %856 : vector<1x256xbf16> to vector<16x256xbf16>
    %858 = arith.mulf %855, %857 : vector<16x256xbf16>
    %c48_791 = arith.constant 48 : index
    %c0_792 = arith.constant 0 : index
    %859 = vector.load %arg30[%c48_791, %c0_792] : memref<400x256xbf16, #tpu.memory_space<vmem>>, vector<16x256xbf16>
    tpu.vector_store %arg30[%c48_791, %c0_792], %858 {strides = array<i32>} : memref<400x256xbf16, #tpu.memory_space<vmem>>, vector<16x256xbf16>,
    %c0_793 = arith.constant 0 : index
    %c128_794 = arith.constant 128 : index
    %860 = vector.load %arg29[%c0_793, %c128_794] : memref<32x512xf32, #tpu.memory_space<vmem>>, vector<16x256xf32>
    %861 = arith.truncf %860 : vector<16x256xf32> to vector<16x256xbf16>
    %c64_795 = arith.constant 64 : index
    %c0_796 = arith.constant 0 : index
    %862 = vector.load %arg30[%c64_795, %c0_796] : memref<400x256xbf16, #tpu.memory_space<vmem>>, vector<16x256xbf16>
    tpu.vector_store %arg30[%c64_795, %c0_796], %861 {strides = array<i32>} : memref<400x256xbf16, #tpu.memory_space<vmem>>, vector<16x256xbf16>,
    %c0_797 = arith.constant 0 : index
    %c129_798 = arith.constant 129 : index
    %863 = vector.load %arg29[%c0_797, %c129_798] : memref<32x512xf32, #tpu.memory_space<vmem>>, vector<16x256xf32>
    %864 = arith.truncf %863 : vector<16x256xf32> to vector<16x256xbf16>
    %c5_799 = arith.constant 5 : index
    %c0_800 = arith.constant 0 : index
    %865 = vector.load %arg2[%c5_799, %c0_800] : memref<9x256xbf16, #tpu.memory_space<vmem>>, vector<1x256xbf16>
    %866 = vector.broadcast %865 : vector<1x256xbf16> to vector<16x256xbf16>
    %867 = arith.mulf %864, %866 : vector<16x256xbf16>
    %c80_801 = arith.constant 80 : index
    %c0_802 = arith.constant 0 : index
    %868 = vector.load %arg30[%c80_801, %c0_802] : memref<400x256xbf16, #tpu.memory_space<vmem>>, vector<16x256xbf16>
    tpu.vector_store %arg30[%c80_801, %c0_802], %867 {strides = array<i32>} : memref<400x256xbf16, #tpu.memory_space<vmem>>, vector<16x256xbf16>,
    %c0_803 = arith.constant 0 : index
    %c143_804 = arith.constant 143 : index
    %869 = vector.load %arg29[%c0_803, %c143_804] : memref<32x512xf32, #tpu.memory_space<vmem>>, vector<16x256xf32>
    %870 = arith.truncf %869 : vector<16x256xf32> to vector<16x256xbf16>
    %c6_805 = arith.constant 6 : index
    %c0_806 = arith.constant 0 : index
    %871 = vector.load %arg2[%c6_805, %c0_806] : memref<9x256xbf16, #tpu.memory_space<vmem>>, vector<1x256xbf16>
    %872 = vector.broadcast %871 : vector<1x256xbf16> to vector<16x256xbf16>
    %873 = arith.mulf %870, %872 : vector<16x256xbf16>
    %c96_807 = arith.constant 96 : index
    %c0_808 = arith.constant 0 : index
    %874 = vector.load %arg30[%c96_807, %c0_808] : memref<400x256xbf16, #tpu.memory_space<vmem>>, vector<16x256xbf16>
    tpu.vector_store %arg30[%c96_807, %c0_808], %873 {strides = array<i32>} : memref<400x256xbf16, #tpu.memory_space<vmem>>, vector<16x256xbf16>,
    %c0_809 = arith.constant 0 : index
    %c144_810 = arith.constant 144 : index
    %875 = vector.load %arg29[%c0_809, %c144_810] : memref<32x512xf32, #tpu.memory_space<vmem>>, vector<16x256xf32>
    %876 = arith.truncf %875 : vector<16x256xf32> to vector<16x256xbf16>
    %c112_811 = arith.constant 112 : index
    %c0_812 = arith.constant 0 : index
    %877 = vector.load %arg30[%c112_811, %c0_812] : memref<400x256xbf16, #tpu.memory_space<vmem>>, vector<16x256xbf16>
    tpu.vector_store %arg30[%c112_811, %c0_812], %876 {strides = array<i32>} : memref<400x256xbf16, #tpu.memory_space<vmem>>, vector<16x256xbf16>,
    %c0_813 = arith.constant 0 : index
    %c145_814 = arith.constant 145 : index
    %878 = vector.load %arg29[%c0_813, %c145_814] : memref<32x512xf32, #tpu.memory_space<vmem>>, vector<16x256xf32>
    %879 = arith.truncf %878 : vector<16x256xf32> to vector<16x256xbf16>
    %c8_815 = arith.constant 8 : index
    %c0_816 = arith.constant 0 : index
    %880 = vector.load %arg2[%c8_815, %c0_816] : memref<9x256xbf16, #tpu.memory_space<vmem>>, vector<1x256xbf16>
    %881 = vector.broadcast %880 : vector<1x256xbf16> to vector<16x256xbf16>
    %882 = arith.mulf %879, %881 : vector<16x256xbf16>
    %c128_817 = arith.constant 128 : index
    %c0_818 = arith.constant 0 : index
    %883 = vector.load %arg30[%c128_817, %c0_818] : memref<400x256xbf16, #tpu.memory_space<vmem>>, vector<16x256xbf16>
    tpu.vector_store %arg30[%c128_817, %c0_818], %882 {strides = array<i32>} : memref<400x256xbf16, #tpu.memory_space<vmem>>, vector<16x256xbf16>,
    %c0_819 = arith.constant 0 : index
    %c0_820 = arith.constant 0 : index
    %884 = vector.load %arg21[%c0_819, %c0_820] : memref<8x144xbf16, #tpu.memory_space<vmem>>, vector<8x144xbf16>
    %c0_821 = arith.constant 0 : index
    %c0_822 = arith.constant 0 : index
    %885 = vector.load %arg30[%c0_821, %c0_822] : memref<400x256xbf16, #tpu.memory_space<vmem>>, vector<144x256xbf16>
    %cst_823 = arith.constant dense<0.000000e+00> : vector<8x256xf32>
    %886 = tpu.matmul %884, %885, %cst_823 {dimension_numbers = #tpu.dot_dimension_numbers<[1], [0], [0], [1], [0, 0, 1, 1], [], []>} : vector<8x144xbf16>, vector<144x256xbf16>, vector<8x256xf32> -> vector<8x256xf32>
    %cst_824 = arith.constant 0.000000e+00 : f32
    %887 = vector.broadcast %cst_824 : f32 to vector<8x256xf32>
    %888 = arith.maximumf %886, %887 : vector<8x256xf32>
    %cst_825 = arith.constant 0.000000e+00 : f32
    %889 = vector.broadcast %cst_825 : f32 to vector<16x128xf32>
    %c0_826 = arith.constant 0 : index
    %c0_827 = arith.constant 0 : index
    %890 = vector.load %arg29[%c0_826, %c0_827] : memref<32x512xf32, #tpu.memory_space<vmem>>, vector<16x128xf32>
    tpu.vector_store %arg29[%c0_826, %c0_827], %889 {strides = array<i32>} : memref<32x512xf32, #tpu.memory_space<vmem>>, vector<16x128xf32>,
    %c0_828 = arith.constant 0 : index
    %c384_829 = arith.constant 384 : index
    %891 = vector.load %arg29[%c0_828, %c384_829] : memref<32x512xf32, #tpu.memory_space<vmem>>, vector<16x128xf32>
    tpu.vector_store %arg29[%c0_828, %c384_829], %889 {strides = array<i32>} : memref<32x512xf32, #tpu.memory_space<vmem>>, vector<16x128xf32>,
    %c0_830 = arith.constant 0 : index
    %c128_831 = arith.constant 128 : index
    %892 = vector.load %arg29[%c0_830, %c128_831] : memref<32x512xf32, #tpu.memory_space<vmem>>, vector<8x256xf32>
    tpu.vector_store %arg29[%c0_830, %c128_831], %888 {strides = array<i32>} : memref<32x512xf32, #tpu.memory_space<vmem>>, vector<8x256xf32>,
    %c8_832 = arith.constant 8 : index
    %c128_833 = arith.constant 128 : index
    %893 = vector.load %arg29[%c8_832, %c128_833] : memref<32x512xf32, #tpu.memory_space<vmem>>, vector<8x256xf32>
    tpu.vector_store %arg29[%c8_832, %c128_833], %109 {strides = array<i32>} : memref<32x512xf32, #tpu.memory_space<vmem>>, vector<8x256xf32>,
    %c0_834 = arith.constant 0 : index
    %c111_835 = arith.constant 111 : index
    %894 = vector.load %arg29[%c0_834, %c111_835] : memref<32x512xf32, #tpu.memory_space<vmem>>, vector<16x256xf32>
    %895 = arith.truncf %894 : vector<16x256xf32> to vector<16x256xbf16>
    %c0_836 = arith.constant 0 : index
    %c0_837 = arith.constant 0 : index
    %896 = vector.load %arg2[%c0_836, %c0_837] : memref<9x256xbf16, #tpu.memory_space<vmem>>, vector<1x256xbf16>
    %897 = vector.broadcast %896 : vector<1x256xbf16> to vector<16x256xbf16>
    %898 = arith.mulf %895, %897 : vector<16x256xbf16>
    %c0_838 = arith.constant 0 : index
    %c0_839 = arith.constant 0 : index
    %899 = vector.load %arg30[%c0_838, %c0_839] : memref<400x256xbf16, #tpu.memory_space<vmem>>, vector<16x256xbf16>
    tpu.vector_store %arg30[%c0_838, %c0_839], %898 {strides = array<i32>} : memref<400x256xbf16, #tpu.memory_space<vmem>>, vector<16x256xbf16>,
    %c0_840 = arith.constant 0 : index
    %c112_841 = arith.constant 112 : index
    %900 = vector.load %arg29[%c0_840, %c112_841] : memref<32x512xf32, #tpu.memory_space<vmem>>, vector<16x256xf32>
    %901 = arith.truncf %900 : vector<16x256xf32> to vector<16x256xbf16>
    %c16_842 = arith.constant 16 : index
    %c0_843 = arith.constant 0 : index
    %902 = vector.load %arg30[%c16_842, %c0_843] : memref<400x256xbf16, #tpu.memory_space<vmem>>, vector<16x256xbf16>
    tpu.vector_store %arg30[%c16_842, %c0_843], %901 {strides = array<i32>} : memref<400x256xbf16, #tpu.memory_space<vmem>>, vector<16x256xbf16>,
    %c0_844 = arith.constant 0 : index
    %c113_845 = arith.constant 113 : index
    %903 = vector.load %arg29[%c0_844, %c113_845] : memref<32x512xf32, #tpu.memory_space<vmem>>, vector<16x256xf32>
    %904 = arith.truncf %903 : vector<16x256xf32> to vector<16x256xbf16>
    %c2_846 = arith.constant 2 : index
    %c0_847 = arith.constant 0 : index
    %905 = vector.load %arg2[%c2_846, %c0_847] : memref<9x256xbf16, #tpu.memory_space<vmem>>, vector<1x256xbf16>
    %906 = vector.broadcast %905 : vector<1x256xbf16> to vector<16x256xbf16>
    %907 = arith.mulf %904, %906 : vector<16x256xbf16>
    %c32_848 = arith.constant 32 : index
    %c0_849 = arith.constant 0 : index
    %908 = vector.load %arg30[%c32_848, %c0_849] : memref<400x256xbf16, #tpu.memory_space<vmem>>, vector<16x256xbf16>
    tpu.vector_store %arg30[%c32_848, %c0_849], %907 {strides = array<i32>} : memref<400x256xbf16, #tpu.memory_space<vmem>>, vector<16x256xbf16>,
    %c0_850 = arith.constant 0 : index
    %c127_851 = arith.constant 127 : index
    %909 = vector.load %arg29[%c0_850, %c127_851] : memref<32x512xf32, #tpu.memory_space<vmem>>, vector<16x256xf32>
    %910 = arith.truncf %909 : vector<16x256xf32> to vector<16x256xbf16>
    %c3_852 = arith.constant 3 : index
    %c0_853 = arith.constant 0 : index
    %911 = vector.load %arg2[%c3_852, %c0_853] : memref<9x256xbf16, #tpu.memory_space<vmem>>, vector<1x256xbf16>
    %912 = vector.broadcast %911 : vector<1x256xbf16> to vector<16x256xbf16>
    %913 = arith.mulf %910, %912 : vector<16x256xbf16>
    %c48_854 = arith.constant 48 : index
    %c0_855 = arith.constant 0 : index
    %914 = vector.load %arg30[%c48_854, %c0_855] : memref<400x256xbf16, #tpu.memory_space<vmem>>, vector<16x256xbf16>
    tpu.vector_store %arg30[%c48_854, %c0_855], %913 {strides = array<i32>} : memref<400x256xbf16, #tpu.memory_space<vmem>>, vector<16x256xbf16>,
    %c0_856 = arith.constant 0 : index
    %c128_857 = arith.constant 128 : index
    %915 = vector.load %arg29[%c0_856, %c128_857] : memref<32x512xf32, #tpu.memory_space<vmem>>, vector<16x256xf32>
    %916 = arith.truncf %915 : vector<16x256xf32> to vector<16x256xbf16>
    %c64_858 = arith.constant 64 : index
    %c0_859 = arith.constant 0 : index
    %917 = vector.load %arg30[%c64_858, %c0_859] : memref<400x256xbf16, #tpu.memory_space<vmem>>, vector<16x256xbf16>
    tpu.vector_store %arg30[%c64_858, %c0_859], %916 {strides = array<i32>} : memref<400x256xbf16, #tpu.memory_space<vmem>>, vector<16x256xbf16>,
    %c0_860 = arith.constant 0 : index
    %c129_861 = arith.constant 129 : index
    %918 = vector.load %arg29[%c0_860, %c129_861] : memref<32x512xf32, #tpu.memory_space<vmem>>, vector<16x256xf32>
    %919 = arith.truncf %918 : vector<16x256xf32> to vector<16x256xbf16>
    %c5_862 = arith.constant 5 : index
    %c0_863 = arith.constant 0 : index
    %920 = vector.load %arg2[%c5_862, %c0_863] : memref<9x256xbf16, #tpu.memory_space<vmem>>, vector<1x256xbf16>
    %921 = vector.broadcast %920 : vector<1x256xbf16> to vector<16x256xbf16>
    %922 = arith.mulf %919, %921 : vector<16x256xbf16>
    %c80_864 = arith.constant 80 : index
    %c0_865 = arith.constant 0 : index
    %923 = vector.load %arg30[%c80_864, %c0_865] : memref<400x256xbf16, #tpu.memory_space<vmem>>, vector<16x256xbf16>
    tpu.vector_store %arg30[%c80_864, %c0_865], %922 {strides = array<i32>} : memref<400x256xbf16, #tpu.memory_space<vmem>>, vector<16x256xbf16>,
    %c0_866 = arith.constant 0 : index
    %c143_867 = arith.constant 143 : index
    %924 = vector.load %arg29[%c0_866, %c143_867] : memref<32x512xf32, #tpu.memory_space<vmem>>, vector<16x256xf32>
    %925 = arith.truncf %924 : vector<16x256xf32> to vector<16x256xbf16>
    %c6_868 = arith.constant 6 : index
    %c0_869 = arith.constant 0 : index
    %926 = vector.load %arg2[%c6_868, %c0_869] : memref<9x256xbf16, #tpu.memory_space<vmem>>, vector<1x256xbf16>
    %927 = vector.broadcast %926 : vector<1x256xbf16> to vector<16x256xbf16>
    %928 = arith.mulf %925, %927 : vector<16x256xbf16>
    %c96_870 = arith.constant 96 : index
    %c0_871 = arith.constant 0 : index
    %929 = vector.load %arg30[%c96_870, %c0_871] : memref<400x256xbf16, #tpu.memory_space<vmem>>, vector<16x256xbf16>
    tpu.vector_store %arg30[%c96_870, %c0_871], %928 {strides = array<i32>} : memref<400x256xbf16, #tpu.memory_space<vmem>>, vector<16x256xbf16>,
    %c0_872 = arith.constant 0 : index
    %c144_873 = arith.constant 144 : index
    %930 = vector.load %arg29[%c0_872, %c144_873] : memref<32x512xf32, #tpu.memory_space<vmem>>, vector<16x256xf32>
    %931 = arith.truncf %930 : vector<16x256xf32> to vector<16x256xbf16>
    %c112_874 = arith.constant 112 : index
    %c0_875 = arith.constant 0 : index
    %932 = vector.load %arg30[%c112_874, %c0_875] : memref<400x256xbf16, #tpu.memory_space<vmem>>, vector<16x256xbf16>
    tpu.vector_store %arg30[%c112_874, %c0_875], %931 {strides = array<i32>} : memref<400x256xbf16, #tpu.memory_space<vmem>>, vector<16x256xbf16>,
    %c0_876 = arith.constant 0 : index
    %c145_877 = arith.constant 145 : index
    %933 = vector.load %arg29[%c0_876, %c145_877] : memref<32x512xf32, #tpu.memory_space<vmem>>, vector<16x256xf32>
    %934 = arith.truncf %933 : vector<16x256xf32> to vector<16x256xbf16>
    %c8_878 = arith.constant 8 : index
    %c0_879 = arith.constant 0 : index
    %935 = vector.load %arg2[%c8_878, %c0_879] : memref<9x256xbf16, #tpu.memory_space<vmem>>, vector<1x256xbf16>
    %936 = vector.broadcast %935 : vector<1x256xbf16> to vector<16x256xbf16>
    %937 = arith.mulf %934, %936 : vector<16x256xbf16>
    %c128_880 = arith.constant 128 : index
    %c0_881 = arith.constant 0 : index
    %938 = vector.load %arg30[%c128_880, %c0_881] : memref<400x256xbf16, #tpu.memory_space<vmem>>, vector<16x256xbf16>
    tpu.vector_store %arg30[%c128_880, %c0_881], %937 {strides = array<i32>} : memref<400x256xbf16, #tpu.memory_space<vmem>>, vector<16x256xbf16>,
    %c0_882 = arith.constant 0 : index
    %c0_883 = arith.constant 0 : index
    %939 = vector.load %arg22[%c0_882, %c0_883] : memref<8x144xbf16, #tpu.memory_space<vmem>>, vector<8x144xbf16>
    %c0_884 = arith.constant 0 : index
    %c0_885 = arith.constant 0 : index
    %940 = vector.load %arg30[%c0_884, %c0_885] : memref<400x256xbf16, #tpu.memory_space<vmem>>, vector<144x256xbf16>
    %cst_886 = arith.constant dense<0.000000e+00> : vector<8x256xf32>
    %941 = tpu.matmul %939, %940, %cst_886 {dimension_numbers = #tpu.dot_dimension_numbers<[1], [0], [0], [1], [0, 0, 1, 1], [], []>} : vector<8x144xbf16>, vector<144x256xbf16>, vector<8x256xf32> -> vector<8x256xf32>
    %cst_887 = arith.constant 0.000000e+00 : f32
    %942 = vector.broadcast %cst_887 : f32 to vector<8x256xf32>
    %943 = arith.maximumf %941, %942 : vector<8x256xf32>
    %c0_888 = arith.constant 0 : index
    %c0_889 = arith.constant 0 : index
    %944 = vector.load %arg25[%c0_888, %c0_889] : memref<8x8xbf16, #tpu.memory_space<vmem>>, vector<8x8xbf16>
    %945 = arith.truncf %943 : vector<8x256xf32> to vector<8x256xbf16>
    %cst_890 = arith.constant dense<0.000000e+00> : vector<8x256xf32>
    %946 = tpu.matmul %944, %945, %cst_890 {dimension_numbers = #tpu.dot_dimension_numbers<[1], [0], [0], [1], [0, 0, 1, 1], [], []>} : vector<8x8xbf16>, vector<8x256xbf16>, vector<8x256xf32> -> vector<8x256xf32>
    %c0_891 = arith.constant 0 : index
    %c0_892 = arith.constant 0 : index
    %c0_893 = arith.constant 0 : index
    %947 = vector.load %arg28[%c0_891, %c0_892, %c0_893] : memref<1x8x256xf32, #tpu.memory_space<vmem>>, vector<1x8x256xf32>
    %948 = vector.shape_cast %947 : vector<1x8x256xf32> to vector<8x256xf32>
    %949 = vector.shape_cast %946 : vector<8x256xf32> to vector<1x8x256xf32>
    tpu.vector_store %arg28[%c0_891, %c0_892, %c0_893], %949 {strides = array<i32>} : memref<1x8x256xf32, #tpu.memory_space<vmem>>, vector<1x8x256xf32>,
    return
  }
  func.func @transform_0(%arg0: i32) -> (i32, i32, i32) {
    %c0_i32 = arith.constant 0 : i32
    %c0_i32_0 = arith.constant 0 : i32
    %c0_i32_1 = arith.constant 0 : i32
    return %arg0, %c0_i32, %c0_i32_0 : i32, i32, i32
  }
  func.func @transform_1(%arg0: i32) -> (i32, i32) {
    %c0_i32 = arith.constant 0 : i32
    %c0_i32_0 = arith.constant 0 : i32
    %c0_i32_1 = arith.constant 0 : i32
    return %c0_i32, %c0_i32_0 : i32, i32
  }
  func.func @transform_2(%arg0: i32) -> (i32, i32) {
    %c0_i32 = arith.constant 0 : i32
    %c0_i32_0 = arith.constant 0 : i32
    %c0_i32_1 = arith.constant 0 : i32
    return %c0_i32, %c0_i32_0 : i32, i32
  }
  func.func @transform_3(%arg0: i32) -> (i32, i32) {
    %c0_i32 = arith.constant 0 : i32
    %c0_i32_0 = arith.constant 0 : i32
    %c0_i32_1 = arith.constant 0 : i32
    return %c0_i32, %c0_i32_0 : i32, i32
  }
  func.func @transform_4(%arg0: i32) -> (i32, i32) {
    %c0_i32 = arith.constant 0 : i32
    %c0_i32_0 = arith.constant 0 : i32
    %c0_i32_1 = arith.constant 0 : i32
    return %c0_i32, %c0_i32_0 : i32, i32
  }
  func.func @transform_5(%arg0: i32) -> (i32, i32) {
    %c0_i32 = arith.constant 0 : i32
    %c0_i32_0 = arith.constant 0 : i32
    %c0_i32_1 = arith.constant 0 : i32
    return %c0_i32, %c0_i32_0 : i32, i32
  }
  func.func @transform_6(%arg0: i32) -> (i32, i32) {
    %c0_i32 = arith.constant 0 : i32
    %c0_i32_0 = arith.constant 0 : i32
    %c0_i32_1 = arith.constant 0 : i32
    return %c0_i32, %c0_i32_0 : i32, i32
  }
  func.func @transform_7(%arg0: i32) -> (i32, i32) {
    %c0_i32 = arith.constant 0 : i32
    %c0_i32_0 = arith.constant 0 : i32
    %c0_i32_1 = arith.constant 0 : i32
    return %c0_i32, %c0_i32_0 : i32, i32
  }
  func.func @transform_8(%arg0: i32) -> (i32, i32) {
    %c0_i32 = arith.constant 0 : i32
    %c0_i32_0 = arith.constant 0 : i32
    %c0_i32_1 = arith.constant 0 : i32
    return %c0_i32, %c0_i32_0 : i32, i32
  }
  func.func @transform_9(%arg0: i32) -> (i32, i32) {
    %c0_i32 = arith.constant 0 : i32
    %c0_i32_0 = arith.constant 0 : i32
    %c0_i32_1 = arith.constant 0 : i32
    return %c0_i32, %c0_i32_0 : i32, i32
  }
  func.func @transform_10(%arg0: i32) -> (i32, i32) {
    %c0_i32 = arith.constant 0 : i32
    %c0_i32_0 = arith.constant 0 : i32
    %c0_i32_1 = arith.constant 0 : i32
    return %c0_i32, %c0_i32_0 : i32, i32
  }
  func.func @transform_11(%arg0: i32) -> (i32, i32) {
    %c0_i32 = arith.constant 0 : i32
    %c0_i32_0 = arith.constant 0 : i32
    %c0_i32_1 = arith.constant 0 : i32
    return %c0_i32, %c0_i32_0 : i32, i32
  }
  func.func @transform_12(%arg0: i32) -> (i32, i32) {
    %c0_i32 = arith.constant 0 : i32
    %c0_i32_0 = arith.constant 0 : i32
    %c0_i32_1 = arith.constant 0 : i32
    return %c0_i32, %c0_i32_0 : i32, i32
  }
  func.func @transform_13(%arg0: i32) -> (i32, i32) {
    %c0_i32 = arith.constant 0 : i32
    %c0_i32_0 = arith.constant 0 : i32
    %c0_i32_1 = arith.constant 0 : i32
    return %c0_i32, %c0_i32_0 : i32, i32
  }
  func.func @transform_14(%arg0: i32) -> (i32, i32) {
    %c0_i32 = arith.constant 0 : i32
    %c0_i32_0 = arith.constant 0 : i32
    %c0_i32_1 = arith.constant 0 : i32
    return %c0_i32, %c0_i32_0 : i32, i32
  }
  func.func @transform_15(%arg0: i32) -> (i32, i32) {
    %c0_i32 = arith.constant 0 : i32
    %c0_i32_0 = arith.constant 0 : i32
    %c0_i32_1 = arith.constant 0 : i32
    return %c0_i32, %c0_i32_0 : i32, i32
  }
  func.func @transform_16(%arg0: i32) -> (i32, i32) {
    %c0_i32 = arith.constant 0 : i32
    %c0_i32_0 = arith.constant 0 : i32
    %c0_i32_1 = arith.constant 0 : i32
    return %c0_i32, %c0_i32_0 : i32, i32
  }
  func.func @transform_17(%arg0: i32) -> (i32, i32) {
    %c0_i32 = arith.constant 0 : i32
    %c0_i32_0 = arith.constant 0 : i32
    %c0_i32_1 = arith.constant 0 : i32
    return %c0_i32, %c0_i32_0 : i32, i32
  }
  func.func @transform_18(%arg0: i32) -> (i32, i32) {
    %c0_i32 = arith.constant 0 : i32
    %c0_i32_0 = arith.constant 0 : i32
    %c0_i32_1 = arith.constant 0 : i32
    return %c0_i32, %c0_i32_0 : i32, i32
  }
  func.func @transform_19(%arg0: i32) -> (i32, i32) {
    %c0_i32 = arith.constant 0 : i32
    %c0_i32_0 = arith.constant 0 : i32
    %c0_i32_1 = arith.constant 0 : i32
    return %c0_i32, %c0_i32_0 : i32, i32
  }
  func.func @transform_20(%arg0: i32) -> (i32, i32) {
    %c0_i32 = arith.constant 0 : i32
    %c0_i32_0 = arith.constant 0 : i32
    %c0_i32_1 = arith.constant 0 : i32
    return %c0_i32, %c0_i32_0 : i32, i32
  }
  func.func @transform_21(%arg0: i32) -> (i32, i32) {
    %c0_i32 = arith.constant 0 : i32
    %c0_i32_0 = arith.constant 0 : i32
    %c0_i32_1 = arith.constant 0 : i32
    return %c0_i32, %c0_i32_0 : i32, i32
  }
  func.func @transform_22(%arg0: i32) -> (i32, i32) {
    %c0_i32 = arith.constant 0 : i32
    %c0_i32_0 = arith.constant 0 : i32
    %c0_i32_1 = arith.constant 0 : i32
    return %c0_i32, %c0_i32_0 : i32, i32
  }
  func.func @transform_23(%arg0: i32) -> (i32, i32) {
    %c0_i32 = arith.constant 0 : i32
    %c0_i32_0 = arith.constant 0 : i32
    %c0_i32_1 = arith.constant 0 : i32
    return %c0_i32, %c0_i32_0 : i32, i32
  }
  func.func @transform_24(%arg0: i32) -> (i32, i32) {
    %c0_i32 = arith.constant 0 : i32
    %c0_i32_0 = arith.constant 0 : i32
    %c0_i32_1 = arith.constant 0 : i32
    return %c0_i32, %c0_i32_0 : i32, i32
  }
  func.func @transform_25(%arg0: i32) -> (i32, i32, i32) {
    %c0_i32 = arith.constant 0 : i32
    %c0_i32_0 = arith.constant 0 : i32
    %c0_i32_1 = arith.constant 0 : i32
    return %arg0, %c0_i32, %c0_i32_0 : i32, i32, i32
  }
  func.func @transform_26(%arg0: i32) -> (i32, i32, i32) {
    %c0_i32 = arith.constant 0 : i32
    %c0_i32_0 = arith.constant 0 : i32
    %c0_i32_1 = arith.constant 0 : i32
    return %arg0, %c0_i32, %c0_i32_0 : i32, i32, i32
  }
  func.func @transform_27(%arg0: i32) -> (i32, i32, i32) {
    %c0_i32 = arith.constant 0 : i32
    %c0_i32_0 = arith.constant 0 : i32
    %c0_i32_1 = arith.constant 0 : i32
    return %arg0, %c0_i32, %c0_i32_0 : i32, i32, i32
  }
}

</mosaic_0001>

<bundles_post_ra>
// kernel: featurenet_forward.1
= control target key start
LH: loop header
LB: loop body
LE: loop exit
PB: predicated region body
PF: predicated region fallthrough
CT: control target
= control target key end

     0   :  { %s12264_s0 = inlined_call_operand.vmem [shape: f32[2,8,256], index: 0, kind: input, shape index: {}]   ;;  %s12265_s1 = inlined_call_operand.vmem [shape: bf16[9,256], index: 1, kind: input, shape index: {}]   ;;  %s12266_s2 = inlined_call_operand.vmem [shape: bf16[9,64], index: 2, kind: input, shape index: {}]   ;;  %s12267_s3 = inlined_call_operand.vmem [shape: bf16[9,16], index: 3, kind: input, shape index: {}]   ;;  %s12268_s4 = inlined_call_operand.vmem [shape: bf16[25,256], index: 4, kind: input, shape index: {}]   ;;  %s12269_s5 = inlined_call_operand.vmem [shape: bf16[25,64], index: 5, kind: input, shape index: {}]   ;;  %s12270_s6 = inlined_call_operand.vmem [shape: bf16[16,8], index: 6, kind: input, shape index: {}]   ;;  %s12271_s7 = inlined_call_operand.vmem [shape: bf16[8,4], index: 7, kind: input, shape index: {}]   ;;  %s12272_s8 = inlined_call_operand.vmem [shape: bf16[4,8], index: 8, kind: input, shape index: {}]   ;;  %s12273_s9 = inlined_call_operand.vmem [shape: bf16[8,16], index: 9, kind: input, shape index: {}]   ;;  %s12274_s10 = inlined_call_operand.vmem [shape: bf16[8,72], index: 10, kind: input, shape index: {}]   ;;  %s12275_s11 = inlined_call_operand.vmem [shape: bf16[8,72], index: 11, kind: input, shape index: {}]   ;;  %s12276_s12 = inlined_call_operand.vmem [shape: bf16[16,200], index: 12, kind: input, shape index: {}]   ;;  %s12277_s13 = inlined_call_operand.vmem [shape: bf16[16,144], index: 13, kind: input, shape index: {}]   ;;  %s12278_s14 = inlined_call_operand.vmem [shape: bf16[16,144], index: 14, kind: input, shape index: {}]   ;;  %s12279_s15 = inlined_call_operand.vmem [shape: bf16[32,400], index: 15, kind: input, shape index: {}]   ;;  %s12280_s16 = inlined_call_operand.vmem [shape: bf16[32,288], index: 16, kind: input, shape index: {}]   ;;  %s12281_s17 = inlined_call_operand.vmem [shape: bf16[32,288], index: 17, kind: input, shape index: {}]   ;;  %s12282_s18 = inlined_call_operand.vmem [shape: bf16[16,288], index: 18, kind: input, shape index: {}]   ;;  %s12283_s19 = inlined_call_operand.vmem [shape: bf16[16,288], index: 19, kind: input, shape index: {}]   ;;  %s12284_s20 = inlined_call_operand.vmem [shape: bf16[8,144], index: 20, kind: input, shape index: {}]   ;;  %s12285_s21 = inlined_call_operand.vmem [shape: bf16[8,144], index: 21, kind: input, shape index: {}]   ;;  %s12286_s22 = inlined_call_operand.vmem [shape: bf16[32,32], index: 22, kind: input, shape index: {}]   ;;  %s12287_s23 = inlined_call_operand.vmem [shape: bf16[16,16], index: 23, kind: input, shape index: {}]   ;;  %s12288_s24 = inlined_call_operand.vmem [shape: bf16[8,8], index: 24, kind: input, shape index: {}]   ;;  %s12289_s25 = inlined_call_operand.vmem [shape: f32[2,32,16], index: 25, kind: output, shape index: {0}]   ;;  %s12290_s26 = inlined_call_operand.vmem [shape: f32[2,16,64], index: 26, kind: output, shape index: {1}]   ;;  %s12291_s27 = inlined_call_operand.vmem [shape: f32[2,8,256], index: 27, kind: output, shape index: {2}]  }
   0x1   :  { %12388 = sst [smem:[#allocation6_spill]] %s12264_s0 }
   0x2   :  { %12389 = sst [smem:[#allocation7_spill]] %s12265_s1 }
   0x3   :  { %12390 = sst [smem:[#allocation8_spill]] %s12266_s2 }
   0x4   :  { %12391 = sst [smem:[#allocation9_spill]] %s12267_s3 }
   0x5   :  { %12392 = sst [smem:[#allocation10_spill]] %s12268_s4 }
   0x6   :  { %12393 = sst [smem:[#allocation11_spill]] %s12269_s5 }
   0x7   :  { %12394 = sst [smem:[#allocation12_spill]] %s12270_s6 }
   0x8   :  { %12395 = sst [smem:[#allocation13_spill]] %s12271_s7  ;;  %s9805_s7 = smov 0  }
   0x9   :  { %12396 = sst [smem:[#allocation14_spill]] %s12272_s8 }
   0xa   :  { %12397 = sst [smem:[#allocation15_spill]] %s12273_s9 }
   0xb   :  { %12398 = sst [smem:[#allocation16_spill]] %s12274_s10 }
   0xc   :  { %12399 = sst [smem:[#allocation17_spill]] %s12275_s11 }
   0xd   :  { %12400 = sst [smem:[#allocation18_spill]] %s12276_s12 }
   0xe   :  { %12401 = sst [smem:[#allocation19_spill]] %s12277_s13 }
   0xf   :  { %12402 = sst [smem:[#allocation20_spill]] %s12278_s14 }
  0x10   :  { %12403 = sst [smem:[#allocation21_spill]] %s12279_s15 }
  0x11   :  { %12404 = sst [smem:[#allocation22_spill]] %s12283_s19 }
  0x12   :  { %12405 = sst [smem:[#allocation23_spill]] %s12284_s20 }
  0x13   :  { %12406 = sst [smem:[#allocation24_spill]] %s12285_s21 }
  0x14   :  { %12407 = sst [smem:[#allocation25_spill]] %s12287_s23 }
  0x15   :  { %12408 = sst [smem:[#allocation26_spill]] %s12288_s24 }
  0x16   :  { %12409 = sst [smem:[#allocation27_spill]] %s12290_s26 }
  0x17   :  { %12410 = sst [smem:[#allocation28_spill]] %s12291_s27 }
  0x18 LB: > { %12411 = sst [smem:[#allocation4_spill]] %s9608_s7  ;;  %s8826_s4 = sadd.s32 4294967295, %s9608_s7   ;;  %s9608_s7 = sphi %s9805_s7, %s38_s7  }
  0x19   : > { %p8830_p0 = scmp.ge.s32.totalorder %s9608_s7, 1  ;;  %p742_p1 = scmp.lt.s32.totalorder %s9608_s7, 3 }
  0x1b   : > { %p743_p2 = pnand %p8830_p0, %p742_p1 }
  0x1d   : > { %746 = sbr.rel (%p743_p2) target bundleno = 7341 (0x1cad), region = 120 }
  0x24   : > { %v866_v0 = vlaneseq  ;;  %s12412_s9 = sld [smem:[#allocation7_spill]]  ;;  %p824_p3 = scmp.lt.s32.totalorder %s8826_s4, 1  ;;  %v9610_v12 = vmov 0.0   ;;  %v9614_v36 = vmov 0.0|0.0   ;;  %vm12338_vm0 = vcmask 1039360  }
  0x25   : > { %6773 = vst [vmem:[#allocation2 + $0x40] sm:$0xff] %v9610_v12  ;;  %s12311_s1 = smov 111   ;;  %s12324_s6 = smov 127   ;;  %v9855_v37 = vrot.slane %v9614_v36, 4  ;;  %vm1073_vm1 = vcmask 7168   ;;  %vm12340_vm2 = vcmask 908288  }
  0x26   : > { %v867_v8 = vshrl.u32 %v866_v0, 7  ;;  %s12514_s4 = smov (!%p824_p3, %s8826_s4), 1  ;;  %s12414_s3 = sld [smem:[#allocation6_spill]]  ;;  %vm906_vm3 = vcmask 1043456   ;;  %vm12339_vm4 = vcmask 924672   ;;  %vm1011_vm5 = vcmask 932864  }
  0x27   : > { %s9830_s29 = sshll.u32 %s12514_s4, 4  ;;  %s12321_s30 = smov 113   ;;  %vm12373_vm6 = vcmask 121856   ;;  %vm12372_vm7 = vcmask 138240   ;;  %vm1247_vm8 = vcmask 588800   ;;  %vm1808_vm9 = vcmask 777216  }
  0x28   : > { %v9824_v13 = vsub.s32 1, %v867_v8  ;;  %v9826_v14 = vsub.s32 0, %v867_v8  ;;  %12413 = sst [smem:[#allocation5_spill]] %s9830_s29  ;;  %v9843_v30 = vsub.s32 2, %v867_v8  ;;  %s12309_s0 = smov 1   ;;  %v9867_v46 = vsub.s32 3, %v867_v8 }
  0x29   : > { %s12319_s10 = smov 15   ;;  %s12303_s11 = smov 114   ;;  %vm1996_vm10 = vcmask 900096   ;;  %vm1889_vm11 = vcmask 793600   ;;  %vm2742_vm12 = vcmask 252928   ;;  %vm12323_vm13 = vcmask 113664  }
  0x2a   : > { %v938_v1 = vld [vmem:[%s12412_s9] sm:$0x22]  ;;  %v857_v2 = vld [vmem:[%s12412_s9] sm:$0x11]  ;;  %v1045_v7 = vld [vmem:[%s12412_s9] sm:$0x44] }
  0x2b   : > { %v8841_v3 = vcombine.low %v938_v1, %v938_v1  ;;  %v8842_v4 = vcombine.high %v938_v1, %v938_v1  ;;  %v8839_v5 = vcombine.low %v857_v2, %v857_v2  ;;  %v8840_v6 = vcombine.high %v857_v2, %v857_v2  ;;  %v1111_v35 = vld [vmem:[%s12412_s9] sm:$0x88]  ;;  %v1188_v59 = vld [vmem:[%s12412_s9 + $0x8] sm:$0x11]  ;;  %s12415_s2 = sld [smem:[#allocation16_spill]]  ;;  %s9621_s28 = smov 97  }
  0x2c   : > { %v8843_v16 = vcombine.low %v1045_v7, %v1045_v7  ;;  %s828_s8 = scalar_lea.vmem %s12414_s3, %s9830_s29  ;;  %v8844_v32 = vcombine.high %v1045_v7, %v1045_v7  ;;  %v8845_v43 = vcombine.low %v1111_v35, %v1111_v35  ;;  %v8846_v51 = vcombine.high %v1111_v35, %v1111_v35  ;;  %s12416_s3 = sld [smem:[#allocation10_spill]] }
  0x2d   : > { %v972_v9 = vshrl.u32 %v8841_v3, 16  ;;  %v979_v10 = vshrl.u32 %v8842_v4, 16  ;;  %v864_v11 = vpack.i.b16 %v8839_v5, %v8839_v5  ;;  %v871_v15 = vpack.i.b16 %v8840_v6, %v8840_v6  ;;  %v846_v26 = vld [vmem:[%s828_s8 + $0x8] sm:$0xff]  ;;  %v845_v28 = vld [vmem:[%s828_s8] sm:$0xff]  ;;  %s12297_s8 = smov 17   ;;  %s12301_s5 = smov 18  }
  0x2e   : > { %v945_v22 = vpack.i.b16 %v8841_v3, %v8841_v3  ;;  %v1052_v23 = vshrl.u32 %v8843_v16, 16  ;;  %v952_v25 = vpack.i.b16 %v8842_v4, %v8842_v4  ;;  %v9849_v34 = vpack.c.bf16 %v846_v26, %v846_v26  ;;  %s12422_s12 = sld [smem:[#allocation18_spill]]  ;;  %s12344_s27 = smov 48  }
  0x2f   : > { %v973_v17 = vpack.i.b16 %v972_v9, %v972_v9  ;;  %v980_v18 = vpack.i.b16 %v979_v10, %v979_v10  ;;  %v869_v19 = vrot.slane %v864_v11, %v9826_v14  ;;  %v876_v21 = vrot.slane %v871_v15, %v9826_v14  ;;  %s12427_s7 = smov 8   ;;  %s12428_s13 = sld [smem:[#allocation19_spill]] }
  0x30   : > { %v950_v27 = vrot.slane %v945_v22, %v9824_v13  ;;  %v1053_v29 = vpack.i.b16 %v1052_v23, %v1052_v23  ;;  %v957_v31 = vrot.slane %v952_v25, %v9824_v13  ;;  %v9857_v38 = vpack.c.bf16 %v845_v28, %v845_v28  ;;  %s12429_s20 = smov 119   ;;  %s12430_s21 = smov 121  }
  0x31   : > { %v978_v20 = vrot.slane %v973_v17, %v9824_v13  ;;  %879 = vrot.lane.b32.xlu1 %v869_v19, %s12311_s1  ;;  %v985_v24 = vrot.slane %v980_v18, %v9824_v13  ;;  %v1060_v39 = vshrl.u32 %v8844_v32, 16  ;;  %v896_v40 = vrot.slane %v9849_v34, 4  ;;  %s12431_s24 = smov 7   ;;  %s12434_s14 = sld [smem:[#allocation20_spill]] }
  0x32   : > { %v1058_v33 = vrot.slane %v1053_v29, %v9843_v30  ;;  %v895_v41 = vrot.slane %v9857_v38, 4  ;;  %v1118_v45 = vpack.i.b16 %v8845_v43, %v8845_v43  ;;  %v1125_v58 = vpack.i.b16 %v8846_v51, %v8846_v51  ;;  %s12436_s19 = smov 110   ;;  %s12437_s23 = smov 113  }
  0x33   : > { %988 = vrot.lane.b32.xlu0 %v978_v20, %s12324_s6  ;;  %v1061_v42 = vpack.i.b16 %v1060_v39, %v1060_v39  ;;  %v8848_v63 = vcombine.high %v1188_v59, %v1188_v59  ;;  %v8847_v2 = vcombine.low %v1188_v59, %v1188_v59  ;;  %vm2637_vm14 = vcmask 146432   ;;  %s12361_s29 = smov 10   ;;  %s12438_s26 = smov 114  }
  0x34   : > { %v1123_v47 = vrot.slane %v1118_v45, %v9867_v46  ;;  %v1130_v1 = vrot.slane %v1125_v58, %v9867_v46  ;;  %vm2822_vm15 = vcmask 269312   ;;  %s12448_s15 = sld [smem:[#allocation21_spill]] }
  0x35   : > { %881 = vrot.lane.b32.xlu1 %v876_v21, %s12311_s1  ;;  %v1066_v44 = vrot.slane %v1061_v42, %v9843_v30  ;;  %v1202_v4 = vpack.i.b16 %v8848_v63, %v8848_v63  ;;  %v1195_v5 = vpack.i.b16 %v8847_v2, %v8847_v2 }
  0x37   : > { %990 = vrot.lane.b32.xlu0 %v985_v24, %s12324_s6  ;;  %v1207_v8 = vrot.slane %v1202_v4, %v9826_v14  ;;  %v1200_v9 = vrot.slane %v1195_v5, %v9826_v14  ;;  %v9619_v5 = vmov 0  }
  0x38   : > { %1289 = vmatprep.mubr.bf16.mxu0 %v9619_v5  ;;  %1733 = vmatprep.mubr.bf16.mxu1 %v9619_v5 }
  0x39   : > { %960 = vrot.lane.b32.xlu1 %v950_v27, %s12321_s30 }
  0x3b   : > { %962 = vrot.lane.b32.xlu0 %v957_v31, %s12321_s30 }
  0x3d   : > { %1069 = vrot.lane.b32.xlu1 %v1058_v33, %s12309_s0 }
  0x3f   : > { %897 = vrot.lane.b32.xlu0 %v9855_v37, %s12324_s6 }
  0x41   : > { %901 = vrot.lane.b32.xlu1 %v896_v40, %s12324_s6 }
  0x43   : > { %899 = vrot.lane.b32.xlu0 %v895_v41, %s12324_s6 }
  0x47   : > { %1071 = vrot.lane.b32.xlu0 %v1066_v44, %s12309_s0 }
  0x4b   : > { %1133 = vrot.lane.b32.xlu0 %v1123_v47, %s12319_s10 }
  0xa3   : > { %v9872_v48 = vpop.permute.xlu1 %879 }
  0xa4   : > { %v888_v26 = vmul.bf16 0.0|0.0, %v9872_v48 }
  0xa5   : > { %v989_v49 = vpop.permute.xlu0 %988 }
  0xa6   : > { %v996_v50 = vmul.bf16 0.0|0.0, %v989_v49 }
  0xa7   : > { %v882_v53 = vpop.permute.xlu1 %881 }
  0xa8   : > { %v1002_v52 = vrot.slane %v996_v50, 4  ;;  %v890_v16 = vmul.bf16 %v882_v53, %v9849_v34  ;;  %v884_v20 = vsel %vm12340_vm2, %v9872_v48, %v882_v53 }
  0xa9   : > { %v991_v54 = vpop.permute.xlu0 %990  ;;  %v889_v24 = vmul.bf16 %v884_v20, %v9857_v38 }
  0xaa   : > { %v992_v55 = vsel %vm12338_vm0, %v989_v49, %v991_v54  ;;  %v998_v56 = vmul.bf16 %v991_v54, %v9849_v34  ;;  %1005 = vrot.lane.b32.xlu1 %v1002_v52, %s12303_s11 }
  0xab   : > { %v997_v57 = vmul.bf16 %v992_v55, %v9857_v38  ;;  %v9882_v0 = vpop.permute.xlu1 %960 }
  0xac   : > { %v1004_v60 = vrot.slane %v998_v56, 4  ;;  %v969_v47 = vmul.bf16 0.0|0.0, %v9882_v0 }
  0xad   : > { %v1003_v61 = vrot.slane %v997_v57, 4  ;;  %v963_v62 = vpop.permute.xlu0 %962 }
  0xae   : > { %1009 = vrot.lane.b32.xlu0 %v1004_v60, %s12303_s11  ;;  %v965_v33 = vsel %vm12339_vm4, %v9882_v0, %v963_v62  ;;  %v971_v35 = vmul.bf16 %v963_v62, %v9849_v34 }
  0xaf   : > { %1007 = vrot.lane.b32.xlu1 %v1003_v61, %s12303_s11  ;;  %v1070_v6 = vpop.permute.xlu1 %1069  ;;  %v970_v39 = vmul.bf16 %v965_v33, %v9857_v38 }
  0xb0   : > { %v1078_v10 = vmul.bf16 %v1070_v6, %v9857_v38 }
  0xb1   : > { %v898_v3 = vpop.permute.xlu0 %897 }
  0xb2   : > { %1152 = vrot.lane.b32.xlu0 %v896_v40, %s12324_s6  ;;  %v1084_v17 = vrot.slane %v1078_v10, 4 }
  0xb3   : > { %1135 = vrot.lane.b32.xlu1 %v1130_v1, %s12319_s10  ;;  %v902_v21 = vpop.permute.xlu1 %901 }
  0xb4   : > { %v915_v23 = vsel %vm906_vm3, %v890_v16, %v902_v21 }
  0xb5   : > { %v900_v7 = vpop.permute.xlu0 %899 }
  0xb6   : > { %1150 = vrot.lane.b32.xlu0 %v895_v41, %s12324_s6  ;;  %v905_v25 = vsel %vm12338_vm0, %v900_v7, %v902_v21  ;;  %v904_v28 = vsel %vm12338_vm0, %v898_v3, %v900_v7  ;;  %v1310_v7 = vld [vmem:[%s12412_s9] sm:$0x11] }
  0xb7   : > { %1154 = vrot.lane.b32.xlu1 %v9855_v37, %s12324_s6  ;;  %v912_v27 = vsel %vm906_vm3, %v889_v24, %v905_v25  ;;  %v909_v29 = vsel %vm906_vm3, %v888_v26, %v904_v28  ;;  %v8851_v10 = vcombine.low %v1310_v7, %v1310_v7  ;;  %v1491_v24 = vld [vmem:[%s12412_s9] sm:$0x44] }
  0xb9   : > { %v1072_v11 = vpop.permute.xlu0 %1071  ;;  %v1317_v20 = vpack.i.b16 %v8851_v10, %v8851_v10 }
  0xba   : > { %1212 = vrot.lane.b32.xlu0 %v1207_v8, %s12297_s8  ;;  %v1074_v12 = vsel %vm1073_vm1, %v1070_v6, %v1072_v11  ;;  %v1080_v15 = vmul.bf16 0.0|0.0, %v1072_v11  ;;  %v1387_v6 = vld [vmem:[%s12412_s9] sm:$0x22] }
  0xbb   : > { %1210 = vrot.lane.b32.xlu1 %v1200_v9, %s12297_s8  ;;  %v1079_v18 = vmul.bf16 %v1074_v12, %v9849_v34  ;;  %v8853_v9 = vcombine.low %v1387_v6, %v1387_v6  ;;  %v8854_v11 = vcombine.high %v1387_v6, %v1387_v6  ;;  %v8852_v12 = vcombine.high %v1310_v7, %v1310_v7 }
  0xbc   : > { %v1086_v19 = vrot.slane %v1080_v15, 4 }
  0xbd   : > { %v1085_v22 = vrot.slane %v1079_v18, 4  ;;  %v1134_v31 = vpop.permute.xlu0 %1133  ;;  %v1420_v16 = vshrl.u32 %v8853_v9, 16 }
  0xbe   : > { %1091 = vrot.lane.b32.xlu0 %v1086_v19, %s12324_s6  ;;  %v1141_v60 = vmul.bf16 %v1134_v31, %v9857_v38 }
  0xbf   : > { %1087 = vrot.lane.b32.xlu1 %v1084_v17, %s12324_s6  ;;  %v1427_v17 = vshrl.u32 %v8854_v11, 16  ;;  %v1421_v19 = vpack.i.b16 %v1420_v16, %v1420_v16 }
  0xc1   : > { %v1426_v25 = vrot.slane %v1421_v19, %v9824_v13 }
  0xc2   : > { %923 = vrot.lane.b32.xlu0 %v915_v23, %s12297_s8  ;;  %v1324_v23 = vpack.i.b16 %v8852_v12, %v8852_v12 }
  0xc3   : > { %1089 = vrot.lane.b32.xlu1 %v1085_v22, %s12324_s6  ;;  %v1428_v22 = vpack.i.b16 %v1427_v17, %v1427_v17 }
  0xc4   : > { %v1329_v33 = vrot.slane %v1324_v23, %v9826_v14 }
  0xc5   : > { %v1433_v26 = vrot.slane %v1428_v22, %v9824_v13 }
  0xc7   : > { %921 = vrot.lane.b32.xlu1 %v912_v27, %s12297_s8  ;;  %v8855_v27 = vcombine.low %v1491_v24, %v1491_v24 }
  0xcb   : > { %919 = vrot.lane.b32.xlu1 %v909_v29, %s12297_s8  ;;  %v1322_v29 = vrot.slane %v1317_v20, %v9826_v14 }
 0x11c   : > { %v1006_v32 = vpop.permute.xlu1 %1005 }
 0x120   : > { %v1010_v36 = vpop.permute.xlu0 %1009 }
 0x121   : > { %v1008_v40 = vpop.permute.xlu1 %1007  ;;  %v1022_v41 = vsel %vm906_vm3, %v971_v35, %v1010_v36  ;;  %v1394_v35 = vpack.i.b16 %v8853_v9, %v8853_v9  ;;  %v1236_v9 = vld [vmem:[%s12415_s2] sm:$0xf]  ;;  %s9620_s2 = smov 95  }
 0x122   : > { %v1013_v42 = vsel %vm1011_vm5, %v1008_v40, %v1010_v36  ;;  %1030 = vrot.lane.b32.xlu1 %v1022_v41, %s12319_s10  ;;  %v1012_v44 = vsel %vm1011_vm5, %v1006_v32, %v1008_v40  ;;  %v1498_v36 = vshrl.u32 %v8855_v27, 16 }
 0x123   : > { %v1019_v43 = vsel %vm906_vm3, %v970_v39, %v1013_v42  ;;  %v1016_v50 = vsel %vm906_vm3, %v969_v47, %v1012_v44  ;;  %v1401_v39 = vpack.i.b16 %v8854_v11, %v8854_v11  ;;  %v1399_v41 = vrot.slane %v1394_v35, %v9824_v13  ;;  %v9973_v42 = vld [vmem:[%s12412_s9] sm:$0x88] }
 0x124   : > { %1028 = vrot.lane.b32.xlu0 %v1019_v43, %s12319_s10  ;;  %v1153_v45 = vpop.permute.xlu0 %1152  ;;  %v1499_v43 = vpack.i.b16 %v1498_v36, %v1498_v36  ;;  %v8857_v47 = vcombine.low %v9973_v42, %v9973_v42 }
 0x125   : > { %v1136_v48 = vpop.permute.xlu1 %1135  ;;  %v1406_v44 = vrot.slane %v1401_v39, %v9824_v13  ;;  %v1633_v39 = vld [vmem:[%s12412_s9 + $0x8] sm:$0x11]  ;;  %s12439_s9 = smov 14  }
 0x126   : > { %v1137_v49 = vsel %vm12373_vm6, %v1134_v31, %v1136_v48  ;;  %v1143_v51 = vmul.bf16 0.0|0.0, %v1136_v48  ;;  %v8856_v31 = vcombine.high %v1491_v24, %v1491_v24  ;;  %v1504_v48 = vrot.slane %v1499_v43, %v9843_v30 }
 0x127   : > { %v1142_v53 = vmul.bf16 %v1137_v49, %v9849_v34  ;;  %v8859_v43 = vcombine.low %v1633_v39, %v1633_v39 }
 0x128   : > { %1026 = vrot.lane.b32.xlu0 %v1016_v50, %s12319_s10  ;;  %v1151_v52 = vpop.permute.xlu0 %1150  ;;  %v1506_v40 = vshrl.u32 %v8856_v31, 16  ;;  %v1563_v50 = vpack.i.b16 %v8857_v47, %v8857_v47 }
 0x129   : > { %v1155_v54 = vpop.permute.xlu1 %1154  ;;  %v1156_v58 = vsel %vm12338_vm0, %v1151_v52, %v1153_v45 }
 0x12a   : > { %v1157_v55 = vsel %vm12338_vm0, %v1153_v45, %v1155_v54  ;;  %v1166_v56 = vsel %vm906_vm3, %v1143_v51, %v1155_v54  ;;  %v1160_v0 = vsel %vm906_vm3, %v1141_v60, %v1156_v58  ;;  %v1507_v45 = vpack.i.b16 %v1506_v40, %v1506_v40 }
 0x12b   : > { %1174 = vrot.lane.b32.xlu1 %v1166_v56, %s12321_s30  ;;  %v1163_v57 = vsel %vm906_vm3, %v1142_v53, %v1157_v55  ;;  %v1568_v51 = vrot.slane %v1563_v50, %v9867_v46 }
 0x12c   : > { %1172 = vrot.lane.b32.xlu0 %v1163_v57, %s12321_s30  ;;  %v1213_v59 = vpop.permute.xlu0 %1212  ;;  %v1512_v49 = vrot.slane %v1507_v45, %v9843_v30 }
 0x12d   : > { %v1211_v61 = vpop.permute.xlu1 %1210  ;;  %v1220_v1 = vmul.bf16 0.0|0.0, %v1213_v59 }
 0x12e   : > { %v1218_v62 = vmul.bf16 %v1211_v61, %v9857_v38  ;;  %v1214_v63 = vsel %vm12372_vm7, %v1211_v61, %v1213_v59 }
 0x12f   : > { %v1219_v4 = vmul.bf16 %v1214_v63, %v9849_v34 }
 0x130   : > { %1170 = vrot.lane.b32.xlu0 %v1160_v0, %s12321_s30  ;;  %1224 = vrot.lane.b32.xlu1 %v1218_v62, %s12311_s1  ;;  %v9943_v3 = vpop.permute.xlu0 %1091 }
 0x131   : > { %v9941_v2 = vpop.permute.xlu1 %1087 }
 0x134   : > { %1226 = vrot.lane.b32.xlu0 %v1219_v4, %s12311_s1  ;;  %1228 = vrot.lane.b32.xlu1 %v1220_v1, %s12311_s1  ;;  %v924_v15 = vpop.permute.xlu0 %923 }
 0x135   : > { %v1090_v8 = vpop.permute.xlu1 %1089 }
 0x136   : > { %v1094_v55 = vsel %vm12338_vm0, %v1090_v8, %v9943_v3  ;;  %v1093_v58 = vsel %vm12338_vm0, %v9941_v2, %v1090_v8 }
 0x137   : > { %v1101_v59 = vsel %vm906_vm3, %v9849_v34, %v1094_v55  ;;  %v1097_v62 = vsel %vm906_vm3, %v9857_v38, %v1093_v58 }
 0x138   : > { %1436 = vrot.lane.b32.xlu0 %v1426_v25, %s12324_s6  ;;  %1438 = vrot.lane.b32.xlu1 %v1433_v26, %s12324_s6  ;;  %v8858_v25 = vcombine.high %v9973_v42, %v9973_v42  ;;  %v8860_v42 = vcombine.high %v1633_v39, %v1633_v39 }
 0x139   : > { %v922_v18 = vpop.permute.xlu1 %921 }
 0x13a   : > { %v927_v21 = vsel %vm12372_vm7, %v922_v18, %v924_v15  ;;  %v1570_v35 = vpack.i.b16 %v8858_v25, %v8858_v25  ;;  %v1647_v47 = vpack.i.b16 %v8860_v42, %v8860_v42 }
 0x13b   : > { %1257 = vmatprep.subr.bf16.mxu0 %v927_v21 }
 0x13c   : > { %1332 = vrot.lane.b32.xlu0 %v1322_v29, %s12311_s1  ;;  %1334 = vrot.lane.b32.xlu1 %v1329_v33, %s12311_s1 }
 0x13d   : > { %v920_v28 = vpop.permute.xlu1 %919 }
 0x13e   : > { %v926_v32 = vsel %vm12372_vm7, %v920_v28, %v922_v18 }
 0x13f   : > { %1258 = vmatpush1.bf16.msra.mxu0 %v926_v32 }
 0x140   : > { %1349 = vrot.lane.b32.xlu0 %v9855_v37, %s12324_s6  ;;  %1409 = vrot.lane.b32.xlu1 %v1399_v41, %s12321_s30  ;;  %v1575_v41 = vrot.slane %v1570_v35, %v9867_v46 }
 0x144   : > { %1411 = vrot.lane.b32.xlu0 %v1406_v44, %s12321_s30  ;;  %1515 = vrot.lane.b32.xlu1 %v1504_v48, %s12309_s0  ;;  %v1640_v48 = vpack.i.b16 %v8859_v43, %v8859_v43  ;;  %v1942_v43 = vld [vmem:[%s12416_s3] sm:$0x44] }
 0x148   : > { %1517 = vrot.lane.b32.xlu0 %v1512_v49, %s12309_s0 }
 0x14c   : > { %1578 = vrot.lane.b32.xlu0 %v1568_v51, %s12319_s10 }
 0x194   : > { %v1031_v52 = vpop.permute.xlu1 %1030 }
 0x196   : > { %v1029_v53 = vpop.permute.xlu0 %1028 }
 0x197   : > { %v1034_v54 = vsel %vm12373_vm6, %v1029_v53, %v1031_v52  ;;  %v1652_v52 = vrot.slane %v1647_v47, %v9826_v14 }
 0x198   : > { %1259 = vmatprep.subr.bf16.mxu0 %v1034_v54 }
 0x19a   : > { %v1027_v56 = vpop.permute.xlu0 %1026 }
 0x19b   : > { %v1033_v57 = vsel %vm12373_vm6, %v1027_v56, %v1029_v53  ;;  %v1645_v53 = vrot.slane %v1640_v48, %v9826_v14 }
 0x19c   : > { %1260 = vmatpush1.bf16.msra.mxu0 %v1033_v57 }
 0x19d   : > { %v1175_v60 = vpop.permute.xlu1 %1174  ;;  %1261 = vmatprep.subr.bf16.mxu0 %v1101_v59 }
 0x19e   : > { %v1173_v61 = vpop.permute.xlu0 %1172 }
 0x19f   : > { %v1177_v63 = vsel %vm12339_vm4, %v1173_v61, %v1175_v60 }
 0x1a0   : > { %1262 = vmatpush1.bf16.msra.mxu0 %v1097_v62 }
 0x1a1   : > { %1263 = vmatprep.subr.bf16.mxu0 %v1177_v63 }
 0x1a2   : > { %v1171_v0 = vpop.permute.xlu0 %1170  ;;  %v1225_v1 = vpop.permute.xlu1 %1224 }
 0x1a3   : > { %v1176_v3 = vsel %vm12339_vm4, %v1171_v0, %v1173_v61 }
 0x1a4   : > { %1264 = vmatpush1.bf16.msra.mxu0 %v1176_v3 }
 0x1a6   : > { %v1227_v2 = vpop.permute.xlu0 %1226  ;;  %v1229_v4 = vpop.permute.xlu1 %1228 }
 0x1a7   : > { %v1230_v34 = vsel %vm12340_vm2, %v1225_v1, %v1227_v2  ;;  %v1231_v6 = vsel %vm12340_vm2, %v1227_v2, %v1229_v4 }
 0x1a8   : > { %1234 = vst [vmem:[#allocation3 + $0x40] sm:$0xf] %v1230_v34  ;;  %1235 = vst [vmem:[#allocation3 + $0x48] sm:$0xf] %v1231_v6 }
 0x1aa   : > { %v1437_v10 = vpop.permute.xlu0 %1436  ;;  %v1439_v18 = vpop.permute.xlu1 %1438 }
 0x1ab   : > { %v1444_v11 = vmul.bf16 0.0|0.0, %v1437_v10  ;;  %v1440_v26 = vsel %vm12338_vm0, %v1437_v10, %v1439_v18 }
 0x1ad   : > { %v1450_v12 = vrot.slane %v1444_v11, 4 }
 0x1ae   : > { %v10009_v15 = vpop.permute.xlu0 %1332  ;;  %v1335_v31 = vpop.permute.xlu1 %1334 }
 0x1af   : > { %v1246_v7 = vld [vmem:[#allocation3 + $0x48] sm:$0xf]  ;;  %v1245_v8 = vld [vmem:[#allocation3 + $0x40] sm:$0xf]  ;;  %1453 = vrot.lane.b32.xlu1 %v1450_v12, %s12303_s11  ;;  %v1340_v62 = vmul.bf16 0.0|0.0, %v10009_v15  ;;  %v1336_v1 = vsel %vm12340_vm2, %v10009_v15, %v1335_v31 }
 0x1b0   : > { %8849 = vmatprep.subr.msk.bf16.mxu0 %vm906_vm3, %v1246_v7  ;;  %v1252_v38 = vsel %vm906_vm3, %v1245_v8, 0 }
 0x1b1   : > { %1266 = vmatpush1.bf16.msra.mxu0 %v1252_v38 }
 0x1b2   : > { %v1350_v29 = vpop.permute.xlu0 %1349  ;;  %v1410_v45 = vpop.permute.xlu1 %1409 }
 0x1b3   : > { %v1417_v7 = vmul.bf16 0.0|0.0, %v1410_v45 }
 0x1b4   : > { %8850 = vmatmul.mubr.msk.bf16.vlgmr.msra.gmra.mrb[0].mxu0 %vm1247_vm8, %v1236_v9 }
 0x1b6   : > { %v1412_v44 = vpop.permute.xlu0 %1411  ;;  %v1516_v50 = vpop.permute.xlu1 %1515 }
 0x1b7   : > { %v1413_v9 = vsel %vm12339_vm4, %v1410_v45, %v1412_v44 }
 0x1ba   : > { %v1518_v49 = vpop.permute.xlu0 %1517 }
 0x1bb   : > { %v1525_v51 = vmul.bf16 0.0|0.0, %v1518_v49  ;;  %v1519_v55 = vsel %vm1073_vm1, %v1516_v50, %v1518_v49 }
 0x1bd   : > { %v1531_v56 = vrot.slane %v1525_v51, 4 }
 0x1be   : > { %v1579_v60 = vpop.permute.xlu0 %1578 }
 0x221   : > { %v1454_v59 = vpop.permute.xlu1 %1453 }
 0x287   : > { %v1291_v16 = vpop.f32.mrb[0].mxu0 }
 0x288   : > { %v1298_v17 = vmax.f32 %v1291_v16, 0.0  ;;  %v1293_v19 = vpop.f32.mrb[1].mxu0  ;;  %v1754_v16 = vld [vmem:[%s12416_s3] sm:$0x11] }
 0x289   : > { %v1299_v20 = vmax.f32 %v1293_v19, 0.0  ;;  %v1295_v21 = vpop.f32.mrb[2].mxu0 }
 0x28a   : > { %v1296_v22 = vpop.f32.mrb[3].mxu0  ;;  %v10011_v23 = vpack.c.bf16 %v1298_v17, %v1298_v17 }
 0x28b   : > { %v10013_v24 = vpack.c.bf16 %v1299_v20, %v1299_v20 }
 0x28c   : > { %v1347_v27 = vrot.slane %v10011_v23, 4  ;;  %v1445_v33 = vmul.bf16 %v1440_v26, %v10011_v23  ;;  %v1523_v54 = vmul.bf16 %v1516_v50, %v10011_v23  ;;  %v1341_v6 = vmul.bf16 %v1336_v1, %v10011_v23 }
 0x28d   : > { %v1348_v28 = vrot.slane %v10013_v24, 4  ;;  %v1446_v32 = vmul.bf16 %v1439_v18, %v10013_v24  ;;  %v1524_v58 = vmul.bf16 %v1519_v55, %v10013_v24  ;;  %v1342_v61 = vmul.bf16 %v10013_v24, %v1335_v31 }
 0x28e   : > { %1351 = vrot.lane.b32.xlu0 %v1347_v27, %s12324_s6  ;;  %v1451_v40 = vrot.slane %v1445_v33, 4  ;;  %v1529_v57 = vrot.slane %v1523_v54, 4  ;;  %v1419_v17 = vmul.bf16 %v1412_v44, %v10013_v24  ;;  %v1418_v18 = vmul.bf16 %v1413_v9, %v10011_v23 }
 0x28f   : > { %1353 = vrot.lane.b32.xlu1 %v1348_v28, %s12324_s6  ;;  %v1452_v36 = vrot.slane %v1446_v32, 4  ;;  %v10071_v26 = vcombine.low %v1754_v16, %v1754_v16  ;;  %v1586_v47 = vmul.bf16 %v1579_v60, %v10011_v23  ;;  %v10096_v55 = vcombine.low %v1942_v43, %v1942_v43 }
 0x292   : > { %1457 = vrot.lane.b32.xlu0 %v1452_v36, %s12303_s11 }
 0x293   : > { %1455 = vrot.lane.b32.xlu1 %v1451_v40, %s12303_s11 }
 0x296   : > { %1597 = vrot.lane.b32.xlu0 %v1348_v28, %s12324_s6 }
 0x297   : > { %1580 = vrot.lane.b32.xlu1 %v1575_v41, %s12319_s10  ;;  %v1788_v41 = vshrl.u32 %v10071_v26, 16 }
 0x299   : > { %v1789_v54 = vpack.i.b16 %v1788_v41, %v1788_v41  ;;  %v2689_v41 = vld [vmem:[%s12416_s3 + $0x10] sm:$0x44] }
 0x29a   : > { %1595 = vrot.lane.b32.xlu0 %v1347_v27, %s12324_s6  ;;  %v1861_v27 = vld [vmem:[%s12416_s3] sm:$0x22] }
 0x29b   : > { %1599 = vrot.lane.b32.xlu1 %v9855_v37, %s12324_s6  ;;  %v1530_v37 = vrot.slane %v1524_v58, 4  ;;  %v8865_v39 = vcombine.low %v1861_v27, %v1861_v27  ;;  %v8866_v45 = vcombine.high %v1861_v27, %v1861_v27  ;;  %v2584_v27 = vld [vmem:[%s12416_s3 + $0x10] sm:$0x22] }
 0x29d   : > { %v1868_v51 = vshrl.u32 %v8865_v39, 16  ;;  %v1876_v58 = vshrl.u32 %v8866_v45, 16  ;;  %v10156_v45 = vcombine.high %v2689_v41, %v2689_v41 }
 0x29e   : > { %1657 = vrot.lane.b32.xlu0 %v1652_v52, %s12297_s8 }
 0x29f   : > { %1655 = vrot.lane.b32.xlu1 %v1645_v53, %s12297_s8 }
 0x2a2   : > { %1536 = vrot.lane.b32.xlu0 %v1531_v56, %s12324_s6 }
 0x2a3   : > { %1532 = vrot.lane.b32.xlu1 %v1529_v57, %s12324_s6 }
 0x2a7   : > { %1534 = vrot.lane.b32.xlu1 %v1530_v37, %s12324_s6  ;;  %v2127_v37 = vld [vmem:[%s12416_s3 + $0x8] sm:$0x11] }
 0x300   : > { %v1352_v63 = vpop.permute.xlu0 %1351 }
 0x301   : > { %v1354_v0 = vpop.permute.xlu1 %1353  ;;  %v1355_v3 = vsel %vm12338_vm0, %v1350_v29, %v1352_v63  ;;  %v10078_v29 = vcombine.high %v1754_v16, %v1754_v16 }
 0x302   : > { %v1365_v2 = vsel %vm906_vm3, %v1342_v61, %v1354_v0  ;;  %v1359_v4 = vsel %vm906_vm3, %v1340_v62, %v1355_v3  ;;  %v1356_v34 = vsel %vm12338_vm0, %v1352_v63, %v1354_v0  ;;  %v1794_v61 = vrot.slane %v1789_v54, %v9826_v14 }
 0x303   : > { %1373 = vrot.lane.b32.xlu0 %v1365_v2, %s12297_s8  ;;  %1369 = vrot.lane.b32.xlu1 %v1359_v4, %s12297_s8  ;;  %v1362_v11 = vsel %vm906_vm3, %v1341_v6, %v1356_v34  ;;  %v1795_v44 = vshrl.u32 %v10078_v29, 16  ;;  %v1869_v62 = vpack.i.b16 %v1868_v51, %v1868_v51  ;;  %v1976_v63 = vshrl.u32 %v10096_v55, 16  ;;  %v2231_v34 = vld [vmem:[%s12416_s3 + $0x8] sm:$0x22]  ;;  %v2794_v51 = vld [vmem:[%s12416_s3 + $0x10] sm:$0x88] }
 0x304   : > { %v1458_v8 = vpop.permute.xlu0 %1457  ;;  %v10108_v0 = vcombine.low %v2127_v37, %v2127_v37  ;;  %v1877_v3 = vpack.i.b16 %v1876_v58, %v1876_v58  ;;  %v10114_v4 = vcombine.high %v2127_v37, %v2127_v37  ;;  %v2729_v54 = vshrl.u32 %v10156_v45, 16 }
 0x305   : > { %v1456_v38 = vpop.permute.xlu1 %1455  ;;  %v1469_v22 = vsel %vm906_vm3, %v1419_v17, %v1458_v8  ;;  %v1796_v57 = vpack.i.b16 %v1795_v44, %v1795_v44  ;;  %v1874_v6 = vrot.slane %v1869_v62, %v9824_v13 }
 0x306   : > { %v1459_v10 = vsel %vm1011_vm5, %v1454_v59, %v1456_v38  ;;  %v1460_v15 = vsel %vm1011_vm5, %v1456_v38, %v1458_v8  ;;  %v10103_v59 = vcombine.high %v1942_v43, %v1942_v43  ;;  %v2160_v8 = vshrl.u32 %v10108_v0, 16 }
 0x307   : > { %v1463_v12 = vsel %vm906_vm3, %v1417_v7, %v1459_v10  ;;  %1371 = vrot.lane.b32.xlu1 %v1362_v11, %s12297_s8  ;;  %v1466_v25 = vsel %vm906_vm3, %v1418_v18, %v1460_v15  ;;  %v1801_v1 = vrot.slane %v1796_v57, %v9826_v14  ;;  %v1977_v7 = vpack.i.b16 %v1976_v63, %v1976_v63  ;;  %v2402_v15 = vld [vmem:[%s12416_s3 + $0x8] sm:$0x88]  ;;  %s12305_s8 = smov 110  }
 0x308   : > { %1473 = vrot.lane.b32.xlu0 %v1463_v12, %s12319_s10  ;;  %v1598_v19 = vpop.permute.xlu0 %1597  ;;  %v1983_v2 = vshrl.u32 %v10103_v59, 16  ;;  %v10121_v38 = vcombine.low %v2231_v34, %v2231_v34  ;;  %v1882_v9 = vrot.slane %v1877_v3, %v9824_v13  ;;  %v2167_v11 = vshrl.u32 %v10114_v4, 16 }
 0x309   : > { %v1581_v20 = vpop.permute.xlu1 %1580  ;;  %v10125_v12 = vcombine.high %v2231_v34, %v2231_v34  ;;  %v1982_v16 = vrot.slane %v1977_v7, %v9843_v30  ;;  %v2161_v17 = vpack.i.b16 %v2160_v8, %v2160_v8 }
 0x30a   : > { %v1582_v21 = vsel %vm12373_vm6, %v1579_v60, %v1581_v20  ;;  %v1588_v28 = vmul.bf16 0.0|0.0, %v1581_v20  ;;  %v1984_v10 = vpack.i.b16 %v1983_v2, %v1983_v2  ;;  %v2265_v18 = vshrl.u32 %v10121_v38, 16 }
 0x30b   : > { %1477 = vrot.lane.b32.xlu1 %v1469_v22, %s12319_s10  ;;  %v1587_v31 = vmul.bf16 %v1582_v21, %v10013_v24  ;;  %v2168_v21 = vpack.i.b16 %v2167_v11, %v2167_v11  ;;  %v2272_v22 = vshrl.u32 %v10125_v12, 16 }
 0x30c   : > { %1475 = vrot.lane.b32.xlu0 %v1466_v25, %s12319_s10  ;;  %v1596_v32 = vpop.permute.xlu0 %1595  ;;  %v1989_v20 = vrot.slane %v1984_v10, %v9843_v30  ;;  %v10136_v25 = vcombine.low %v2402_v15, %v2402_v15 }
 0x30d   : > { %v1600_v33 = vpop.permute.xlu1 %1599  ;;  %v1601_v42 = vsel %vm12338_vm0, %v1596_v32, %v1598_v19 }
 0x30e   : > { %v1602_v35 = vsel %vm12338_vm0, %v1598_v19, %v1600_v33  ;;  %v1611_v36 = vsel %vm906_vm3, %v1588_v28, %v1600_v33  ;;  %v1605_v53 = vsel %vm906_vm3, %v1586_v47, %v1601_v42  ;;  %v10132_v19 = vcombine.high %v2402_v15, %v2402_v15 }
 0x30f   : > { %v1608_v40 = vsel %vm906_vm3, %v1587_v31, %v1602_v35  ;;  %1619 = vrot.lane.b32.xlu1 %v1611_v36, %s12321_s30  ;;  %v2166_v28 = vrot.slane %v2161_v17, %v9826_v14  ;;  %v2266_v31 = vpack.i.b16 %v2265_v18, %v2265_v18  ;;  %v10143_v33 = vcombine.high %v2584_v27, %v2584_v27 }
 0x310   : > { %1617 = vrot.lane.b32.xlu0 %v1608_v40, %s12321_s30  ;;  %v1658_v48 = vpop.permute.xlu0 %1657  ;;  %v2442_v32 = vshrl.u32 %v10132_v19, 16  ;;  %v2173_v35 = vrot.slane %v2168_v21, %v9826_v14  ;;  %v2273_v36 = vpack.i.b16 %v2272_v22, %v2272_v22  ;;  %v2435_v39 = vshrl.u32 %v10136_v25, 16 }
 0x311   : > { %v1656_v49 = vpop.permute.xlu1 %1655  ;;  %v1665_v56 = vmul.bf16 0.0|0.0, %v1658_v48  ;;  %v10149_v40 = vcombine.low %v2584_v27, %v2584_v27  ;;  %v2271_v42 = vrot.slane %v2266_v31, %v9824_v13  ;;  %v2624_v44 = vshrl.u32 %v10143_v33, 16 }
 0x312   : > { %v1663_v50 = vmul.bf16 %v1656_v49, %v10011_v23  ;;  %v1659_v52 = vsel %vm12372_vm7, %v1656_v49, %v1658_v48  ;;  %v2443_v43 = vpack.i.b16 %v2442_v32, %v2442_v32  ;;  %v2278_v47 = vrot.slane %v2273_v36, %v9824_v13 }
 0x313   : > { %v1664_v60 = vmul.bf16 %v1659_v52, %v10013_v24  ;;  %v2436_v48 = vpack.i.b16 %v2435_v39, %v2435_v39  ;;  %v2617_v49 = vshrl.u32 %v10149_v40, 16  ;;  %v1761_v15 = vpack.i.b16 %v10071_v26, %v10071_v26 }
 0x314   : > { %1615 = vrot.lane.b32.xlu0 %v1605_v53, %s12321_s30  ;;  %1669 = vrot.lane.b32.xlu1 %v1663_v50, %s12311_s1  ;;  %v10162_v50 = vcombine.low %v2689_v41, %v2689_v41  ;;  %v2448_v52 = vrot.slane %v2443_v43, %v9867_v46  ;;  %v2625_v53 = vpack.i.b16 %v2624_v44, %v2624_v44  ;;  %v1537_v18 = vpop.permute.xlu0 %1536 }
 0x315   : > { %v2441_v57 = vrot.slane %v2436_v48, %v9867_v46  ;;  %v2618_v58 = vpack.i.b16 %v2617_v49, %v2617_v49  ;;  %v1766_v17 = vrot.slane %v1761_v15, %v9826_v14 }
 0x316   : > { %v2722_v37 = vshrl.u32 %v10162_v50, 16  ;;  %v2630_v63 = vrot.slane %v2625_v53, %v9824_v13 }
 0x318   : > { %1673 = vrot.lane.b32.xlu1 %v1665_v56, %s12311_s1  ;;  %1671 = vrot.lane.b32.xlu0 %v1664_v60, %s12311_s1  ;;  %v8886_v56 = vcombine.high %v2794_v51, %v2794_v51  ;;  %v8885_v60 = vcombine.low %v2794_v51, %v2794_v51  ;;  %v2723_v3 = vpack.i.b16 %v2722_v37, %v2722_v37 }
 0x31a   : > { %v2809_v62 = vshrl.u32 %v8886_v56, 16  ;;  %v2801_v2 = vshrl.u32 %v8885_v60, 16  ;;  %v2728_v7 = vrot.slane %v2723_v3, %v9843_v30  ;;  %v1956_v3 = vpack.i.b16 %v10103_v59, %v10103_v59 }
 0x31c   : > { %1804 = vrot.lane.b32.xlu0 %v1794_v61, %s9620_s2  ;;  %1806 = vrot.lane.b32.xlu1 %v1801_v1, %s9620_s2  ;;  %v2730_v61 = vpack.i.b16 %v2729_v54, %v2729_v54  ;;  %s12299_s2 = smov 14   ;;  %v2623_v1 = vrot.slane %v2618_v58, %v9824_v13  ;;  %v2810_v34 = vpack.i.b16 %v2809_v62, %v2809_v62  ;;  %v9597_v58 = vld [vmem:[#allocation2 + $0x40] sm:$0xff] }
 0x31d   : > { %v2802_v8 = vpack.i.b16 %v2801_v2, %v2801_v2  ;;  %v10205_v37 = vpack.c.bf16 %v9597_v58, %v9597_v58  ;;  %v2050_v62 = vld [vmem:[%s12416_s3] sm:$0x88] }
 0x31e   : > { %v2815_v10 = vrot.slane %v2810_v34, %v9867_v46 }
 0x31f   : > { %v2807_v11 = vrot.slane %v2802_v8, %v9867_v46  ;;  %v8869_v8 = vcombine.low %v2050_v62, %v2050_v62 }
 0x320   : > { %1885 = vrot.lane.b32.xlu0 %v1874_v6, %s9621_s28  ;;  %1887 = vrot.lane.b32.xlu1 %v1882_v9, %s9621_s28  ;;  %v2735_v6 = vrot.slane %v2730_v61, %v9843_v30  ;;  %v1768_v9 = vpack.i.b16 %v10078_v29, %v10078_v29  ;;  %s9625_s28 = smov 31   ;;  %v1533_v29 = vpop.permute.xlu1 %1532  ;;  %v1949_v61 = vpack.i.b16 %v10096_v55, %v10096_v55 }
 0x322   : > { %v1954_v55 = vrot.slane %v1949_v61, %v9843_v30 }
 0x324   : > { %1992 = vrot.lane.b32.xlu0 %v1982_v16, %s12305_s8  ;;  %1994 = vrot.lane.b32.xlu1 %v1989_v20, %s12305_s8  ;;  %v1773_v16 = vrot.slane %v1768_v9, %v9826_v14  ;;  %v1535_v20 = vpop.permute.xlu1 %1534  ;;  %v8870_v9 = vcombine.high %v2050_v62, %v2050_v62  ;;  %s9628_s8 = smov 98  }
 0x325   : > { %v1539_v32 = vsel %vm12338_vm0, %v1535_v20, %v1537_v18 }
 0x326   : > { %v1546_v43 = vsel %vm906_vm3, %v10013_v24, %v1539_v32  ;;  %v2064_v18 = vpack.i.b16 %v8870_v9, %v8870_v9  ;;  %v2141_v32 = vpack.i.b16 %v10114_v4, %v10114_v4 }
 0x328   : > { %2176 = vrot.lane.b32.xlu0 %v2166_v28, %s12303_s11  ;;  %2178 = vrot.lane.b32.xlu1 %v2173_v35, %s12303_s11  ;;  %s12417_s11 = sld [smem:[#allocation17_spill]] }
 0x32c   : > { %2281 = vrot.lane.b32.xlu0 %v2271_v42, %s12324_s6  ;;  %2283 = vrot.lane.b32.xlu1 %v2278_v47, %s12324_s6  ;;  %v1538_v42 = vsel %vm12338_vm0, %v1533_v29, %v1535_v20  ;;  %v2057_v29 = vpack.i.b16 %v8869_v8, %v8869_v8 }
 0x32d   : > { %v1542_v48 = vsel %vm906_vm3, %v10011_v23, %v1538_v42 }
 0x32e   : > { %v1681_v59 = vld [vmem:[%s12417_s11] sm:$0xf]  ;;  %s12315_s11 = smov 116  }
 0x330   : > { %2453 = vrot.lane.b32.xlu1 %v2448_v52, %s12299_s2  ;;  %2451 = vrot.lane.b32.xlu0 %v2441_v57, %s12299_s2  ;;  %s9626_s2 = smov 33  }
 0x334   : > { %2635 = vrot.lane.b32.xlu1 %v2630_v63, %s12301_s5  ;;  %2633 = vrot.lane.b32.xlu0 %v2623_v1, %s12301_s5  ;;  %s12307_s5 = smov 94  }
 0x338   : > { %2740 = vrot.lane.b32.xlu1 %v2735_v6, %s9625_s28  ;;  %2738 = vrot.lane.b32.xlu0 %v2728_v7, %s9625_s28  ;;  %s12418_s28 = smov 17  }
 0x33c   : > { %2820 = vrot.lane.b32.xlu1 %v2815_v10, %s9626_s2  ;;  %2818 = vrot.lane.b32.xlu0 %v2807_v11, %s9626_s2  ;;  %s12317_s2 = smov 2  }
 0x340   : > { %1778 = vrot.lane.b32.xlu1 %v1773_v16, %s12307_s5  ;;  %1776 = vrot.lane.b32.xlu0 %v1766_v17, %s12307_s5  ;;  %v1961_v16 = vrot.slane %v1956_v3, %v9843_v30  ;;  %s12313_s5 = smov 126  }
 0x375   : > { %v1374_v21 = vpop.permute.xlu0 %1373  ;;  %v1370_v22 = vpop.permute.xlu1 %1369 }
 0x379   : > { %v1372_v27 = vpop.permute.xlu1 %1371 }
 0x37a   : > { %v1474_v28 = vpop.permute.xlu0 %1473  ;;  %v1375_v26 = vsel %vm12372_vm7, %v1370_v22, %v1372_v27  ;;  %v1376_v31 = vsel %vm12372_vm7, %v1372_v27, %v1374_v21  ;;  %v2062_v22 = vrot.slane %v2057_v29, %v9867_v46  ;;  %v2069_v27 = vrot.slane %v2064_v18, %v9867_v46 }
 0x37b   : > { %1701 = vmatprep.subr.bf16.mxu1 %v1376_v31 }
 0x37c   : > { %1702 = vmatpush1.bf16.msra.mxu1 %v1375_v26  ;;  %v2337_v26 = vld [vmem:[%s12416_s3 + $0x8] sm:$0x44] }
 0x37d   : > { %v1478_v35 = vpop.permute.xlu1 %1477  ;;  %v8876_v42 = vcombine.high %v2337_v26, %v2337_v26 }
 0x37e   : > { %v1476_v36 = vpop.permute.xlu0 %1475 }
 0x37f   : > { %v1479_v39 = vsel %vm12373_vm6, %v1474_v28, %v1476_v36  ;;  %v1480_v41 = vsel %vm12373_vm6, %v1476_v36, %v1478_v35  ;;  %v2134_v28 = vpack.i.b16 %v10108_v0, %v10108_v0  ;;  %v8875_v36 = vcombine.low %v2337_v26, %v2337_v26 }
 0x380   : > { %1703 = vmatprep.subr.bf16.mxu1 %v1480_v41 }
 0x381   : > { %1704 = vmatpush1.bf16.msra.mxu1 %v1479_v39  ;;  %v1620_v44 = vpop.permute.xlu1 %1619  ;;  %v2086_v39 = vrot.slane %v10205_v37, 4  ;;  %v2139_v41 = vrot.slane %v2134_v28, %v9826_v14 }
 0x382   : > { %v1618_v47 = vpop.permute.xlu0 %1617  ;;  %1705 = vmatprep.subr.bf16.mxu1 %v1546_v43  ;;  %v2146_v43 = vrot.slane %v2141_v32, %v9826_v14 }
 0x383   : > { %v1622_v49 = vsel %vm12339_vm4, %v1618_v47, %v1620_v44  ;;  %v2344_v44 = vshrl.u32 %v8875_v36, 16 }
 0x385   : > { %1706 = vmatpush1.bf16.msra.mxu1 %v1542_v48  ;;  %v2245_v48 = vpack.i.b16 %v10125_v12, %v10125_v12 }
 0x386   : > { %v1616_v51 = vpop.permute.xlu0 %1615  ;;  %v1670_v52 = vpop.permute.xlu1 %1669  ;;  %1707 = vmatprep.subr.bf16.mxu1 %v1622_v49  ;;  %v2352_v49 = vshrl.u32 %v8876_v42, 16 }
 0x387   : > { %v1621_v53 = vsel %vm12339_vm4, %v1616_v51, %v1618_v47  ;;  %v2238_v47 = vpack.i.b16 %v10121_v38, %v10121_v38  ;;  %v2507_v38 = vld [vmem:[%s12416_s3 + $0x10] sm:$0x11] }
 0x388   : > { %v8880_v62 = vcombine.high %v2507_v38, %v2507_v38  ;;  %v8879_v8 = vcombine.low %v2507_v38, %v2507_v38 }
 0x389   : > { %1708 = vmatpush1.bf16.msra.mxu1 %v1621_v53  ;;  %v2243_v53 = vrot.slane %v2238_v47, %v9824_v13 }
 0x38a   : > { %v1672_v54 = vpop.permute.xlu0 %1671  ;;  %v1674_v56 = vpop.permute.xlu1 %1673 }
 0x38b   : > { %v1675_v24 = vsel %vm12340_vm2, %v1670_v52, %v1672_v54  ;;  %v1676_v57 = vsel %vm12340_vm2, %v1672_v54, %v1674_v56  ;;  %v2345_v52 = vpack.i.b16 %v2344_v44, %v2344_v44  ;;  %v2250_v54 = vrot.slane %v2245_v48, %v9824_v13 }
 0x38c   : > { %1679 = vst [vmem:[#allocation3 + $0x40] sm:$0xf] %v1675_v24  ;;  %1680 = vst [vmem:[#allocation3 + $0x48] sm:$0xf] %v1676_v57  ;;  %v2353_v56 = vpack.i.b16 %v2352_v49, %v2352_v49 }
 0x38d   : > { %v2350_v12 = vrot.slane %v2345_v52, %v9843_v30 }
 0x38e   : > { %v10207_v23 = vpop.permute.xlu0 %1804  ;;  %v10220_v2 = vpop.permute.xlu1 %1806  ;;  %v2358_v61 = vrot.slane %v2353_v56, %v9843_v30 }
 0x38f   : > { %v1813_v60 = vmul.bf16 %v10207_v23, %v10205_v37  ;;  %v1809_v49 = vsel %vm1808_vm9, %v10207_v23, %v10220_v2  ;;  %vm1780_vm9 = vcmask 769024  }
 0x391   : > { %v1819_v63 = vrot.slane %v1813_v60, 4 }
 0x392   : > { %v10216_v1 = vpop.permute.xlu0 %1885  ;;  %v10239_v20 = vpop.permute.xlu1 %1887 }
 0x393   : > { %v1691_v34 = vld [vmem:[#allocation3 + $0x48] sm:$0xf]  ;;  %v1690_v6 = vld [vmem:[#allocation3 + $0x40] sm:$0xf]  ;;  %v1894_v7 = vmul.bf16 %v10216_v1, %v10205_v37  ;;  %1822 = vrot.lane.b32.xlu0 %v1819_v63, %s12324_s6  ;;  %v2416_v63 = vpack.i.b16 %v10132_v19, %v10132_v19 }
 0x394   : > { %8861 = vmatprep.subr.msk.bf16.mxu1 %vm906_vm3, %v1691_v34  ;;  %v1696_v10 = vsel %vm906_vm3, %v1690_v6, 0  ;;  %v2521_v34 = vpack.i.b16 %v8880_v62, %v8880_v62 }
 0x395   : > { %1710 = vmatpush1.bf16.msra.mxu1 %v1696_v10  ;;  %v1900_v11 = vrot.slane %v1894_v7, 4  ;;  %v2421_v7 = vrot.slane %v2416_v63, %v9867_v46  ;;  %v2514_v10 = vpack.i.b16 %v8879_v8, %v8879_v8 }
 0x396   : > { %v10231_v15 = vpop.permute.xlu0 %1992  ;;  %9214 = vmatprep.subr.bf16.mxu1 %v9597_v58  ;;  %v10254_v35 = vpop.permute.xlu1 %1994  ;;  %v2409_v58 = vpack.i.b16 %v10136_v25, %v10136_v25  ;;  %v2526_v19 = vrot.slane %v2521_v34, %v9826_v14 }
 0x397   : > { %1903 = vrot.lane.b32.xlu1 %v1900_v11, %s12324_s6  ;;  %v2001_v17 = vmul.bf16 %v10231_v15, %v10205_v37  ;;  %1964 = vrot.lane.b32.xlu0 %v1954_v55, %s9628_s8  ;;  %v2519_v11 = vrot.slane %v2514_v10, %v9826_v14  ;;  %v1997_v38 = vsel %vm1996_vm10, %v10231_v15, %v10254_v35  ;;  %vm1968_vm10 = vcmask 801792  }
 0x398   : > { %8862 = vmatmul.mubr.msk.bf16.vlgmr.msra.gmra.mrb[0].mxu1 %vm1247_vm8, %v1681_v59  ;;  %v2414_v25 = vrot.slane %v2409_v58, %v9867_v46  ;;  %v2591_v59 = vpack.i.b16 %v10149_v40, %v10149_v40  ;;  %v1890_v58 = vsel %vm1889_vm11, %v10216_v1, %v10239_v20  ;;  %vm2257_vm11 = vcmask 1031168  }
 0x399   : > { %v2007_v21 = vrot.slane %v2001_v17, 4  ;;  %v2598_v17 = vpack.i.b16 %v10143_v33, %v10143_v33 }
 0x39a   : > { %v10250_v31 = vpop.permute.xlu0 %2176  ;;  %v10269_v51 = vpop.permute.xlu1 %2178 }
 0x39b   : > { %1966 = vrot.lane.b32.xlu1 %v1961_v16, %s9628_s8  ;;  %2010 = vrot.lane.b32.xlu0 %v2007_v21, %s12315_s11  ;;  %v2184_v0 = vmul.bf16 %v10250_v31, %v10205_v37  ;;  %v2596_v16 = vrot.slane %v2591_v59, %v9824_v13  ;;  %v2603_v18 = vrot.slane %v2598_v17, %v9824_v13 }
 0x39c   : > { %v2696_v59 = vpack.i.b16 %v10162_v50, %v10162_v50 }
 0x39d   : > { %v2190_v4 = vrot.slane %v2184_v0, 4 }
 0x39e   : > { %v10275_v24 = vpop.permute.xlu0 %2281  ;;  %v10281_v57 = vpop.permute.xlu1 %2283 }
 0x39f   : > { %2072 = vrot.lane.b32.xlu1 %v2062_v22, %s12311_s1  ;;  %2074 = vrot.lane.b32.xlu0 %v2069_v27, %s12311_s1  ;;  %v2289_v60 = vmul.bf16 %v10275_v24, %v10205_v37  ;;  %v2285_v1 = vsel %vm12338_vm0, %v10275_v24, %v10281_v57  ;;  %s9633_s1 = smov 34  }
 0x3a1   : > { %v2295_v3 = vrot.slane %v2289_v60, 4  ;;  %v2180_v60 = vsel %vm1011_vm5, %v10250_v31, %v10269_v51  ;;  %vm2016_vm5 = vcmask 949248  }
 0x3a2   : > { %v10295_v6 = vpop.permute.xlu1 %2453  ;;  %v10322_v22 = vpop.permute.xlu0 %2451 }
 0x3a3   : > { %2089 = vrot.lane.b32.xlu1 %v2086_v39, %s12324_s6  ;;  %2149 = vrot.lane.b32.xlu0 %v2139_v41, %s12321_s30  ;;  %v2462_v55 = vmul.bf16 %v10295_v6, %v10205_v37 }
 0x3a5   : > { %v2468_v9 = vrot.slane %v2462_v55, 4 }
 0x3a6   : > { %v10313_v29 = vpop.permute.xlu1 %2635  ;;  %v10324_v27 = vpop.permute.xlu0 %2633 }
 0x3a7   : > { %2151 = vrot.lane.b32.xlu1 %v2146_v43, %s12321_s30  ;;  %2193 = vrot.lane.b32.xlu0 %v2190_v4, %s12324_s6  ;;  %v2644_v40 = vmul.bf16 %v10313_v29, %v10205_v37 }
 0x3a9   : > { %v2650_v21 = vrot.slane %v2644_v40, 4  ;;  %v2701_v40 = vrot.slane %v2696_v59, %v9843_v30 }
 0x3aa   : > { %v10326_v33 = vpop.permute.xlu0 %2738  ;;  %v10328_v28 = vpop.permute.xlu1 %2740 }
 0x3ab   : > { %2253 = vrot.lane.b32.xlu1 %v2243_v53, %s12313_s5  ;;  %2255 = vrot.lane.b32.xlu0 %v2250_v54, %s12313_s5  ;;  %s12335_s5 = smov 32  }
 0x3ae   : > { %v10330_v26 = vpop.permute.xlu0 %2818  ;;  %v10332_v32 = vpop.permute.xlu1 %2820 }
 0x3af   : > { %2361 = vrot.lane.b32.xlu1 %v2350_v12, %s12309_s0  ;;  %2363 = vrot.lane.b32.xlu0 %v2358_v61, %s12309_s0  ;;  %s9632_s0 = smov 30  }
 0x3b2   : > { %v10354_v53 = vpop.permute.xlu1 %1778 }
 0x3b3   : > { %2298 = vrot.lane.b32.xlu1 %v2295_v3, %s12324_s6  ;;  %2424 = vrot.lane.b32.xlu0 %v2414_v25, %s12317_s2 }
 0x3b7   : > { %2426 = vrot.lane.b32.xlu1 %v2421_v7, %s12317_s2  ;;  %2531 = vrot.lane.b32.xlu0 %v2526_v19, %s12319_s10 }
 0x3bb   : > { %2473 = vrot.lane.b32.xlu1 %v2468_v9, %s12315_s11  ;;  %2550 = vrot.lane.b32.xlu0 %v2086_v39, %s12324_s6  ;;  %v10334_v39 = vpop.permute.xlu0 %1776 }
 0x3bf   : > { %2529 = vrot.lane.b32.xlu1 %v2519_v11, %s12319_s10  ;;  %2606 = vrot.lane.b32.xlu0 %v2596_v16, %s12418_s28  ;;  %v2703_v11 = vpack.i.b16 %v10156_v45, %v10156_v45 }
 0x3c3   : > { %2608 = vrot.lane.b32.xlu1 %v2603_v18, %s12418_s28 }
 0x3c7   : > { %2655 = vrot.lane.b32.xlu1 %v2650_v21, %s12324_s6  ;;  %v2708_v21 = vrot.slane %v2703_v11, %v9843_v30 }
 0x405   : > { %v10356_v54 = vpop.permute.xlu0 %1822 }
 0x409   : > { %v10371_v61 = vpop.permute.xlu1 %1903  ;;  %v10373_v62 = vpop.permute.xlu0 %1964 }
 0x40d   : > { %v10385_v55 = vpop.permute.xlu1 %1966  ;;  %v10387_v19 = vpop.permute.xlu0 %2010 }
 0x411   : > { %v10401_v16 = vpop.permute.xlu1 %2072  ;;  %v10403_v17 = vpop.permute.xlu0 %2074 }
 0x46b   : > { %v1735_v36 = vpop.f32.mrb[0].mxu1 }
 0x46c   : > { %v10336_v0 = vmax.f32 %v1735_v36, 0.0  ;;  %v1737_v41 = vpop.f32.mrb[1].mxu1  ;;  %v10413_v36 = vpop.permute.xlu1 %2089 }
 0x46d   : > { %v10338_v42 = vmax.f32 %v1737_v41, 0.0  ;;  %v1739_v43 = vpop.f32.mrb[2].mxu1  ;;  %v10415_v41 = vpop.permute.xlu0 %2149 }
 0x46e   : > { %1746 = vst [vmem:[#allocation2 + $0x8] sm:$0xff] %v10336_v0  ;;  %v1740_v44 = vpop.f32.mrb[3].mxu1  ;;  %v10343_v4 = vpack.c.bf16 %v10336_v0, %v10336_v0  ;;  %v2749_v43 = vmul.bf16 %v10328_v28, %v10205_v37 }
 0x46f   : > { %1747 = vst [vmem:[#allocation2 + $0x10] sm:$0xff] %v10338_v42  ;;  %v10348_v47 = vpack.c.bf16 %v10338_v42, %v10338_v42 }
 0x470   : > { %v2087_v48 = vrot.slane %v10343_v4, 4  ;;  %v1814_v56 = vmul.bf16 %v10343_v4, %v1809_v49  ;;  %v2002_v23 = vmul.bf16 %v10343_v4, %v1997_v38  ;;  %v1895_v15 = vmul.bf16 %v10343_v4, %v1890_v58 }
 0x471   : > { %v2088_v52 = vrot.slane %v10348_v47, 4  ;;  %v2185_v3 = vmul.bf16 %v10343_v4, %v2180_v60  ;;  %v2290_v31 = vmul.bf16 %v10343_v4, %v2285_v1  ;;  %v2460_v7 = vmul.bf16 %v10343_v4, %v10322_v22  ;;  %v10430_v38 = vpop.permute.xlu0 %2193 }
 0x472   : > { %2091 = vrot.lane.b32.xlu1 %v2087_v48, %s12324_s6  ;;  %v1820_v12 = vrot.slane %v1814_v56, 4  ;;  %v2008_v63 = vrot.slane %v2002_v23, 4  ;;  %v1901_v25 = vrot.slane %v1895_v15, 4  ;;  %v1815_v24 = vmul.bf16 %v10348_v47, %v10220_v2  ;;  %v10428_v56 = vpop.permute.xlu1 %2151 }
 0x473   : > { %2093 = vrot.lane.b32.xlu0 %v2088_v52, %s12324_s6  ;;  %v2191_v34 = vrot.slane %v2185_v3, 4  ;;  %v2296_v8 = vrot.slane %v2290_v31, 4  ;;  %v2642_v9 = vmul.bf16 %v10324_v27, %v10343_v4  ;;  %v2466_v10 = vrot.slane %v2460_v7, 4 }
 0x474   : > { %v1821_v18 = vrot.slane %v1815_v24, 4  ;;  %v2003_v50 = vmul.bf16 %v10348_v47, %v10254_v35  ;;  %v1896_v45 = vmul.bf16 %v10348_v47, %v10239_v20  ;;  %v2875_v20 = vld [vmem:[%s12416_s3 + $0x18] sm:$0x11]  ;;  %v2755_v49 = vrot.slane %v2749_v43, 4  ;;  %s12350_s3 = smov 120  }
 0x475   : > { %v2648_v2 = vrot.slane %v2642_v9, 4  ;;  %v2186_v23 = vmul.bf16 %v10348_v47, %v10269_v51  ;;  %v2827_v58 = vmul.bf16 %v10330_v26, %v10343_v4  ;;  %v2829_v60 = vmul.bf16 %v10332_v32, %v10205_v37 }
 0x476   : > { %2546 = vrot.lane.b32.xlu1 %v2087_v48, %s12324_s6  ;;  %v2009_v44 = vrot.slane %v2003_v50, 4  ;;  %v2747_v48 = vmul.bf16 %v10326_v33, %v10343_v4  ;;  %v1902_v35 = vrot.slane %v1896_v45, 4  ;;  %v8887_v15 = vcombine.low %v2875_v20, %v2875_v20  ;;  %v10440_v31 = vpop.permute.xlu1 %2253 }
 0x477   : > { %1824 = vrot.lane.b32.xlu0 %v1820_v12, %s12324_s6  ;;  %v2192_v3 = vrot.slane %v2186_v23, 4  ;;  %v2833_v1 = vrot.slane %v2827_v58, 4  ;;  %v2291_v24 = vmul.bf16 %v10348_v47, %v10281_v57  ;;  %v2823_v50 = vsel %vm2822_vm15, %v10330_v26, %v10332_v32 }
 0x478   : > { %v2753_v12 = vrot.slane %v2747_v48, 4  ;;  %v2882_v51 = vpack.i.b16 %v8887_v15, %v8887_v15  ;;  %v2080_v58 = vmul.bf16 %v10401_v16, %v10205_v37  ;;  %v2082_v15 = vmul.bf16 %v10348_v47, %v10403_v17 }
 0x479   : > { %vm2037_vm15 = vcmask 244736  }
 0x47a   : > { %2548 = vrot.lane.b32.xlu1 %v2088_v52, %s12324_s6  ;;  %v8888_v52 = vcombine.high %v2875_v20, %v2875_v20  ;;  %v2887_v9 = vrot.slane %v2882_v51, %v9826_v14  ;;  %v10457_v59 = vpop.permute.xlu1 %2361 }
 0x47b   : > { %2012 = vrot.lane.b32.xlu0 %v2008_v63, %s12315_s11 }
 0x47c   : > { %v2889_v63 = vpack.i.b16 %v8888_v52, %v8888_v52 }
 0x47e   : > { %1905 = vrot.lane.b32.xlu1 %v1901_v25, %s12324_s6  ;;  %v2835_v25 = vrot.slane %v2829_v60, 4  ;;  %v2894_v7 = vrot.slane %v2889_v63, %v9826_v14  ;;  %v2076_v63 = vsel %vm12340_vm2, %v10401_v16, %v10403_v17  ;;  %v1785_v16 = vmul.bf16 %v10334_v39, %v10205_v37 }
 0x47f   : > { %2195 = vrot.lane.b32.xlu0 %v2191_v34, %s12324_s6  ;;  %v10442_v34 = vpop.permute.xlu0 %2255 }
 0x482   : > { %2300 = vrot.lane.b32.xlu1 %v2296_v8, %s12324_s6  ;;  %v2743_v8 = vsel %vm2742_vm12, %v10326_v33, %v10328_v28  ;;  %v2297_v28 = vrot.slane %v2291_v24, 4  ;;  %v2081_v24 = vmul.bf16 %v10343_v4, %v2076_v63  ;;  %vm2324_vm12 = vcmask 15360  }
 0x483   : > { %2469 = vrot.lane.b32.xlu0 %v2466_v10, %s12315_s11  ;;  %v2456_v10 = vsel %vm12323_vm13, %v10322_v22, %v10295_v6  ;;  %v10459_v11 = vpop.permute.xlu0 %2363  ;;  %v2748_v33 = vmul.bf16 %v2743_v8, %v10348_v47  ;;  %vm1929_vm13 = vcmask 261120  }
 0x484   : > { %v2365_v57 = vsel %vm1073_vm1, %v10457_v59, %v10459_v11 }
 0x485   : > { %v2754_v6 = vrot.slane %v2748_v33, 4  ;;  %v2370_v22 = vmul.bf16 %v10348_v47, %v2365_v57 }
 0x486   : > { %1826 = vrot.lane.b32.xlu1 %v1821_v18, %s12324_s6  ;;  %v2461_v18 = vmul.bf16 %v10348_v47, %v2456_v10 }
 0x487   : > { %2651 = vrot.lane.b32.xlu0 %v2648_v2, %s12324_s6  ;;  %v2638_v2 = vsel %vm2637_vm14, %v10324_v27, %v10313_v29  ;;  %v2376_v45 = vrot.slane %v2370_v22, 4  ;;  %v2828_v27 = vmul.bf16 %v2823_v50, %v10348_v47  ;;  %v10487_v32 = vpop.permute.xlu0 %2424 }
 0x489   : > { %v2834_v43 = vrot.slane %v2828_v27, 4 }
 0x48a   : > { %2711 = vrot.lane.b32.xlu1 %v2701_v40, %s9632_s0  ;;  %v2467_v40 = vrot.slane %v2461_v18, 4 }
 0x48b   : > { %2713 = vrot.lane.b32.xlu0 %v2708_v21, %s9632_s0  ;;  %v2643_v21 = vmul.bf16 %v2638_v2, %v10348_v47 }
 0x48d   : > { %v2649_v29 = vrot.slane %v2643_v21, 4 }
 0x48e   : > { %2014 = vrot.lane.b32.xlu1 %v2009_v44, %s12315_s11  ;;  %v10481_v44 = vpop.permute.xlu1 %2298 }
 0x48f   : > { %1907 = vrot.lane.b32.xlu0 %v1902_v35, %s12324_s6  ;;  %v10491_v35 = vpop.permute.xlu0 %2531 }
 0x492   : > { %2756 = vrot.lane.b32.xlu1 %v2753_v12, %s12324_s6  ;;  %v10483_v48 = vpop.permute.xlu1 %2426 }
 0x493   : > { %2760 = vrot.lane.b32.xlu0 %v2755_v49, %s12324_s6  ;;  %v10495_v52 = vpop.permute.xlu0 %2550 }
 0x496   : > { %2197 = vrot.lane.b32.xlu1 %v2192_v3, %s12324_s6  ;;  %v10485_v26 = vpop.permute.xlu1 %2473 }
 0x497   : > { %2836 = vrot.lane.b32.xlu0 %v2833_v1, %s12324_s6  ;;  %v10499_v23 = vpop.permute.xlu0 %2606 }
 0x49a   : > { %2840 = vrot.lane.b32.xlu1 %v2835_v25, %s12324_s6  ;;  %v10489_v20 = vpop.permute.xlu1 %2529 }
 0x49b   : > { %2899 = vrot.lane.b32.xlu0 %v2894_v7, %s9633_s1 }
 0x49e   : > { %2897 = vrot.lane.b32.xlu1 %v2887_v9, %s9633_s1  ;;  %v10493_v49 = vpop.permute.xlu1 %2608 }
 0x49f   : > { %2302 = vrot.lane.b32.xlu0 %v2297_v28, %s12324_s6 }
 0x4a2   : > { %2758 = vrot.lane.b32.xlu1 %v2754_v6, %s12324_s6  ;;  %v10497_v12 = vpop.permute.xlu1 %2655 }
 0x4a3   : > { %2471 = vrot.lane.b32.xlu0 %v2467_v40, %s12315_s11  ;;  %s12328_s11 = smov 96  }
 0x4a6   : > { %2380 = vrot.lane.b32.xlu1 %v2376_v45, %s12324_s6 }
 0x4a7   : > { %2653 = vrot.lane.b32.xlu0 %v2649_v29, %s12324_s6 }
 0x4ab   : > { %2838 = vrot.lane.b32.xlu0 %v2834_v43, %s12324_s6  ;;  %v1975_v43 = vmul.bf16 %v10348_v47, %v10385_v55 }
 0x4e4   : > { %v2092_v60 = vpop.permute.xlu1 %2091 }
 0x4e5   : > { %v2095_v3 = vsel %vm12338_vm0, %v10413_v36, %v2092_v60  ;;  %v2094_v1 = vpop.permute.xlu0 %2093 }
 0x4e6   : > { %v2105_v25 = vsel %vm906_vm3, %v2082_v15, %v2094_v1  ;;  %v2099_v51 = vsel %vm906_vm3, %v2080_v58, %v2095_v3  ;;  %v2096_v7 = vsel %vm12338_vm0, %v2092_v60, %v2094_v1  ;;  %v1973_v3 = vmul.bf16 %v10373_v62, %v10205_v37 }
 0x4e7   : > { %2113 = vrot.lane.b32.xlu1 %v2105_v25, %s12418_s28  ;;  %2109 = vrot.lane.b32.xlu0 %v2099_v51, %s12418_s28  ;;  %v2102_v9 = vsel %vm906_vm3, %v2081_v24, %v2096_v7  ;;  %v2157_v24 = vmul.bf16 %v10415_v41, %v10205_v37 }
 0x4e8   : > { %v10515_v8 = vpop.permute.xlu1 %2546 }
 0x4e9   : > { %v1825_v17 = vpop.permute.xlu0 %1824 }
 0x4ea   : > { %v1828_v36 = vsel %vm12338_vm0, %v10356_v54, %v1825_v17  ;;  %v1787_v54 = vmul.bf16 %v10348_v47, %v10354_v53 }
 0x4eb   : > { %2111 = vrot.lane.b32.xlu0 %v2102_v9, %s12418_s28  ;;  %v1832_v10 = vsel %vm906_vm3, %v1785_v16, %v1828_v36 }
 0x4ec   : > { %1842 = vrot.lane.b32.xlu1 %v1832_v10, %s9633_s1  ;;  %v10526_v33 = vpop.permute.xlu1 %2548 }
 0x4ed   : > { %v10528_v57 = vpop.permute.xlu0 %2012 }
 0x4ee   : > { %v2017_v63 = vsel %vm2016_vm5, %v10387_v19, %v10528_v57  ;;  %v2159_v19 = vmul.bf16 %v10348_v47, %v10428_v56 }
 0x4ef   : > { %v2021_v51 = vsel %vm906_vm3, %v1973_v3, %v2017_v63 }
 0x4f0   : > { %v1906_v28 = vpop.permute.xlu1 %1905 }
 0x4f1   : > { %v10530_v18 = vpop.permute.xlu0 %2195  ;;  %v1909_v50 = vsel %vm12338_vm0, %v10371_v61, %v1906_v28 }
 0x4f2   : > { %v1913_v27 = vsel %vm906_vm3, %v10205_v37, %v1909_v50  ;;  %v2199_v7 = vsel %vm12338_vm0, %v10430_v38, %v10530_v18 }
 0x4f3   : > { %v2203_v38 = vsel %vm906_vm3, %v2157_v24, %v2199_v7  ;;  %v2258_v24 = vsel %vm2257_vm11, %v10440_v31, %v10442_v34 }
 0x4f4   : > { %v10532_v2 = vpop.permute.xlu1 %2300 }
 0x4f5   : > { %v10534_v6 = vpop.permute.xlu0 %2469  ;;  %v2304_v10 = vsel %vm12338_vm0, %v10481_v44, %v10532_v2  ;;  %v2371_v44 = vmul.bf16 %v10459_v11, %v10205_v37 }
 0x4f7   : > { %v2377_v11 = vrot.slane %v2371_v44, 4 }
 0x4f8   : > { %v1827_v22 = vpop.permute.xlu1 %1826 }
 0x4f9   : > { %v10538_v40 = vpop.permute.xlu0 %2651  ;;  %v1838_v21 = vsel %vm906_vm3, %v1787_v54, %v1827_v22  ;;  %v2262_v54 = vmul.bf16 %v10440_v31, %v10205_v37  ;;  %v2263_v31 = vmul.bf16 %v10343_v4, %v2258_v24 }
 0x4fa   : > { %1846 = vrot.lane.b32.xlu0 %v1838_v21, %s9633_s1 }
 0x4fb   : > { %v2308_v50 = vsel %vm906_vm3, %v2262_v54, %v2304_v10 }
 0x4fc   : > { %v10544_v45 = vpop.permute.xlu1 %2711 }
 0x4fd   : > { %v10546_v29 = vpop.permute.xlu0 %2713 }
 0x4fe   : > { %1923 = vrot.lane.b32.xlu0 %v1913_v27, %s12335_s5 }
 0x500   : > { %v2015_v58 = vpop.permute.xlu1 %2014 }
 0x501   : > { %v1908_v60 = vpop.permute.xlu0 %1907  ;;  %v2027_v61 = vsel %vm906_vm3, %v1975_v43, %v2015_v58  ;;  %v2264_v43 = vmul.bf16 %v10348_v47, %v10442_v34  ;;  %v2428_v34 = vsel %vm2324_vm12, %v10487_v32, %v10483_v48 }
 0x502   : > { %2035 = vrot.lane.b32.xlu0 %v2027_v61, %s9632_s0  ;;  %v1919_v15 = vsel %vm906_vm3, %v10348_v47, %v1908_v60  ;;  %v1910_v27 = vsel %vm12338_vm0, %v1906_v28, %v1908_v60  ;;  %v1781_v61 = vsel %vm1780_vm9, %v10334_v39, %v10354_v53  ;;  %v1829_v60 = vsel %vm12338_vm0, %v1825_v17, %v1827_v22 }
 0x503   : > { %1927 = vrot.lane.b32.xlu1 %v1919_v15, %s12335_s5  ;;  %v1916_v63 = vsel %vm906_vm3, %v10343_v4, %v1910_v27  ;;  %v1786_v3 = vmul.bf16 %v10343_v4, %v1781_v61  ;;  %v2369_v39 = vmul.bf16 %v10343_v4, %v10457_v59  ;;  %v1969_v17 = vsel %vm1968_vm10, %v10373_v62, %v10385_v55 }
 0x504   : > { %v10563_v1 = vpop.permute.xlu1 %2756  ;;  %v2721_v59 = vmul.bf16 %v10546_v29, %v10205_v37  ;;  %v1974_v62 = vmul.bf16 %v10343_v4, %v1969_v17  ;;  %v2432_v61 = vmul.bf16 %v10343_v4, %v10487_v32  ;;  %v2552_v32 = vsel %vm12338_vm0, %v10515_v8, %v10526_v33 }
 0x505   : > { %v10565_v25 = vpop.permute.xlu0 %2760  ;;  %v1835_v53 = vsel %vm906_vm3, %v1786_v3, %v1829_v60  ;;  %v2375_v7 = vrot.slane %v2369_v39, 4  ;;  %v2614_v8 = vmul.bf16 %v10499_v23, %v10343_v4 }
 0x506   : > { %v2772_v55 = vsel %vm906_vm3, %v2721_v59, %v10565_v25 }
 0x507   : > { %2031 = vrot.lane.b32.xlu1 %v2021_v51, %s9632_s0  ;;  %v2539_v51 = vmul.bf16 %v10491_v35, %v10205_v37 }
 0x508   : > { %v2198_v16 = vpop.permute.xlu1 %2197 }
 0x509   : > { %v10576_v36 = vpop.permute.xlu0 %2836  ;;  %v2209_v9 = vsel %vm906_vm3, %v2159_v19, %v2198_v16  ;;  %v2562_v22 = vsel %vm906_vm3, %v2539_v51, %v10495_v52  ;;  %v2018_v19 = vsel %vm2016_vm5, %v10528_v57, %v2015_v58  ;;  %v2200_v27 = vsel %vm12338_vm0, %v10530_v18, %v2198_v16 }
 0x50a   : > { %2217 = vrot.lane.b32.xlu0 %v2209_v9, %s12319_s10  ;;  %v2434_v9 = vmul.bf16 %v10483_v48, %v10205_v37  ;;  %v2024_v57 = vsel %vm906_vm3, %v1974_v62, %v2018_v19  ;;  %v2433_v48 = vmul.bf16 %v10348_v47, %v2428_v34  ;;  %v2553_v18 = vsel %vm12338_vm0, %v10526_v33, %v10495_v52 }
 0x50b   : > { %2213 = vrot.lane.b32.xlu1 %v2203_v38, %s12319_s10  ;;  %v2153_v38 = vsel %vm12339_vm4, %v10415_v41, %v10428_v56  ;;  %v2533_v41 = vsel %vm12373_vm6, %v10489_v20, %v10491_v35  ;;  %v2616_v51 = vmul.bf16 %v10493_v49, %v10205_v37 }
 0x50c   : > { %v2158_v44 = vmul.bf16 %v10343_v4, %v2153_v38  ;;  %v2538_v35 = vmul.bf16 %v2533_v41, %v10348_v47 }
 0x50d   : > { %v10587_v21 = vpop.permute.xlu0 %2899 }
 0x50e   : > { %2318 = vrot.lane.b32.xlu0 %v2308_v50, %s12317_s2  ;;  %v2485_v50 = vsel %vm906_vm3, %v2434_v9, %v10485_v26  ;;  %v2559_v52 = vsel %vm906_vm3, %v2538_v35, %v2553_v18 }
 0x511   : > { %v2303_v15 = vpop.permute.xlu0 %2302 }
 0x512   : > { %1925 = vrot.lane.b32.xlu0 %v1916_v63, %s12335_s5  ;;  %v2314_v28 = vsel %vm906_vm3, %v2264_v43, %v2303_v15  ;;  %v2305_v10 = vsel %vm12338_vm0, %v10532_v2, %v2303_v15  ;;  %v2841_v15 = vpop.permute.xlu1 %2840 }
 0x513   : > { %2322 = vrot.lane.b32.xlu1 %v2314_v28, %s12317_s2  ;;  %v2311_v54 = vsel %vm906_vm3, %v2263_v31, %v2305_v10 }
 0x515   : > { %v2472_v58 = vpop.permute.xlu0 %2471 }
 0x516   : > { %2382 = vrot.lane.b32.xlu0 %v2377_v11, %s12324_s6  ;;  %v2476_v2 = vsel %vm2016_vm5, %v2472_v58, %v10485_v26  ;;  %v2475_v43 = vsel %vm2016_vm5, %v10534_v6, %v2472_v58  ;;  %v2206_v26 = vsel %vm906_vm3, %v2158_v44, %v2200_v27  ;;  %v2610_v6 = vsel %vm12372_vm7, %v10499_v23, %v10493_v49  ;;  %v2898_v39 = vpop.permute.xlu1 %2897 }
 0x517   : > { %1844 = vrot.lane.b32.xlu1 %v1835_v53, %s9633_s1  ;;  %v2482_v56 = vsel %vm906_vm3, %v2433_v48, %v2476_v2  ;;  %v2479_v63 = vsel %vm906_vm3, %v2432_v61, %v2475_v43  ;;  %v2615_v60 = vmul.bf16 %v2610_v6, %v10348_v47  ;;  %v2537_v11 = vmul.bf16 %v10489_v20, %v10343_v4  ;;  %s12420_s1 = smov 111  }
 0x518   : > { %v2667_v49 = vsel %vm906_vm3, %v2616_v51, %v10497_v12  ;;  %v2715_v23 = vsel %vm2037_vm15, %v10544_v45, %v10546_v29  ;;  %vm1848_vm5 = vcmask 277504   ;;  %v2907_v58 = vmul.bf16 %v10587_v21, %v10205_v37 }
 0x519   : > { %v2654_v16 = vpop.permute.xlu0 %2653  ;;  %v2556_v17 = vsel %vm906_vm3, %v2537_v11, %v2552_v32  ;;  %v2720_v29 = vmul.bf16 %v2715_v23, %v10348_v47  ;;  %v2901_v24 = vsel %vm1848_vm5, %v2898_v39, %v10587_v21 }
 0x51a   : > { %2570 = vrot.lane.b32.xlu0 %v2562_v22, %s12321_s30  ;;  %v2658_v28 = vsel %vm12338_vm0, %v2654_v16, %v10497_v12  ;;  %v2657_v53 = vsel %vm12338_vm0, %v10538_v40, %v2654_v16  ;;  %v2759_v40 = vpop.permute.xlu1 %2758  ;;  %v2852_v12 = vsel %vm906_vm3, %v10205_v37, %v2841_v15  ;;  %v2906_v9 = vmul.bf16 %v2901_v24, %v10348_v47 }
 0x51b   : > { %2378 = vrot.lane.b32.xlu1 %v2375_v7, %s12324_s6  ;;  %v2664_v3 = vsel %vm906_vm3, %v2615_v60, %v2658_v28  ;;  %v2661_v20 = vsel %vm906_vm3, %v2614_v8, %v2657_v53  ;;  %v2763_v19 = vsel %vm12338_vm0, %v2759_v40, %v10565_v25  ;;  %v2719_v25 = vmul.bf16 %v10544_v45, %v10343_v4  ;;  %s12423_s6 = sld [smem:[#allocation12_spill]] }
 0x51d   : > { %v2839_v33 = vpop.permute.xlu0 %2838 }
 0x51e   : > { %2780 = vrot.lane.b32.xlu0 %v2772_v55, %s9628_s8  ;;  %v2843_v22 = vsel %vm12338_vm0, %v2839_v33, %v2841_v15  ;;  %v2842_v59 = vsel %vm12338_vm0, %v10576_v36, %v2839_v33  ;;  %v2769_v36 = vsel %vm906_vm3, %v2720_v29, %v2763_v19  ;;  %v2762_v55 = vsel %vm12338_vm0, %v10563_v1, %v2759_v40  ;;  %v9520_v1 = vld [vmem:[%s12422_s12 + $0x4] ss:$8 sps:$4 sm:$0xff]   ;;  %v2381_v38 = vpop.permute.xlu1 %2380 }
 0x51f   : > { %2033 = vrot.lane.b32.xlu1 %v2024_v57, %s9632_s0  ;;  %s12419_s0 = smov 126   ;;  %v2849_v7 = vsel %vm906_vm3, %v10348_v47, %v2843_v22  ;;  %v2846_v62 = vsel %vm906_vm3, %v10343_v4, %v2842_v59  ;;  %v2766_v10 = vsel %vm906_vm3, %v2719_v25, %v2762_v55  ;;  %v2905_v57 = vmul.bf16 %v2898_v39, %v10343_v4 }
 0x520   : > { %8892 = vmatprep.mubr.msk.bf16.mxu0 %vm1247_vm8, %v9520_v1  ;;  %vm2862_vm8 = vcmask 785408  }
 0x522   : > { %2320 = vrot.lane.b32.xlu0 %v2311_v54, %s12317_s2  ;;  %s12421_s2 = smov 94  }
 0x523   : > { %2493 = vrot.lane.b32.xlu1 %v2485_v50, %s12419_s0 }
 0x526   : > { %2491 = vrot.lane.b32.xlu0 %v2482_v56, %s12419_s0 }
 0x527   : > { %2215 = vrot.lane.b32.xlu1 %v2206_v26, %s12319_s10  ;;  %s12330_s10 = smov 16  }
 0x52a   : > { %2489 = vrot.lane.b32.xlu0 %v2479_v63, %s12419_s0 }
 0x52b   : > { %2568 = vrot.lane.b32.xlu1 %v2559_v52, %s12321_s30 }
 0x52e   : > { %2673 = vrot.lane.b32.xlu0 %v2664_v3, %s12420_s1 }
 0x52f   : > { %2566 = vrot.lane.b32.xlu1 %v2556_v17, %s12321_s30  ;;  %s12332_s30 = smov 8  }
 0x532   : > { %2671 = vrot.lane.b32.xlu0 %v2661_v20, %s12420_s1 }
 0x533   : > { %2675 = vrot.lane.b32.xlu1 %v2667_v49, %s12420_s1 }
 0x536   : > { %2858 = vrot.lane.b32.xlu0 %v2849_v7, %s12328_s11 }
 0x537   : > { %2860 = vrot.lane.b32.xlu1 %v2852_v12, %s12328_s11 }
 0x53a   : > { %2856 = vrot.lane.b32.xlu0 %v2846_v62, %s12328_s11 }
 0x53b   : > { %2778 = vrot.lane.b32.xlu1 %v2769_v36, %s9628_s8 }
 0x53e   : > { %2913 = vrot.lane.b32.xlu0 %v2906_v9, %s12421_s2 }
 0x53f   : > { %2776 = vrot.lane.b32.xlu1 %v2766_v10, %s9628_s8  ;;  %s9640_s8 = smov 24  }
 0x543   : > { %2911 = vrot.lane.b32.xlu1 %v2905_v57, %s12421_s2 }
 0x547   : > { %2915 = vrot.lane.b32.xlu1 %v2907_v58, %s12421_s2  ;;  %s9641_s2 = smov 40  }
 0x559   : > { %v2110_v45 = vpop.permute.xlu0 %2109  ;;  %v2114_v54 = vpop.permute.xlu1 %2113 }
 0x55d   : > { %v2112_v31 = vpop.permute.xlu0 %2111 }
 0x55e   : > { %v2115_v34 = vsel %vm12372_vm7, %v2110_v45, %v2112_v31  ;;  %v1843_v50 = vpop.permute.xlu1 %1842  ;;  %v2116_v39 = vsel %vm12372_vm7, %v2112_v31, %v2114_v54 }
 0x55f   : > { %2119 = vst [vmem:[#allocation3 + $0x30] sm:$0xff] %v2115_v34 }
 0x56c   : > { %v1847_v2 = vpop.permute.xlu0 %1846 }
 0x570   : > { %v1924_v27 = vpop.permute.xlu0 %1923 }
 0x574   : > { %v2036_v44 = vpop.permute.xlu0 %2035 }
 0x575   : > { %v1928_v48 = vpop.permute.xlu1 %1927 }
 0x579   : > { %v2032_v41 = vpop.permute.xlu1 %2031 }
 0x57c   : > { %v2218_v56 = vpop.permute.xlu0 %2217 }
 0x57d   : > { %v2214_v37 = vpop.permute.xlu1 %2213 }
 0x580   : > { %v2319_v43 = vpop.permute.xlu0 %2318 }
 0x584   : > { %v1926_v21 = vpop.permute.xlu0 %1925 }
 0x585   : > { %v1930_v26 = vsel %vm1929_vm13, %v1924_v27, %v1926_v21  ;;  %v2323_v18 = vpop.permute.xlu1 %2322  ;;  %v1931_v15 = vsel %vm1929_vm13, %v1926_v21, %v1928_v48  ;;  %v10772_v21 = vld [vmem:[#allocation2 + $0x40] sm:$0xff] }
 0x586   : > { %1934 = vst [vmem:[#allocation3 + $0x10] sm:$0xff] %v1930_v26 }
 0x588   : > { %v2383_v16 = vpop.permute.xlu0 %2382 }
 0x589   : > { %v1845_v61 = vpop.permute.xlu1 %1844  ;;  %v2385_v23 = vsel %vm12338_vm0, %v2381_v38, %v2383_v16 }
 0x58a   : > { %v1849_v35 = vsel %vm1848_vm5, %v1843_v50, %v1845_v61  ;;  %v1850_v6 = vsel %vm1848_vm5, %v1845_v61, %v1847_v2  ;;  %v2392_v12 = vsel %vm906_vm3, %v10348_v47, %v2385_v23  ;;  %vm3397_vm5 = vcmask 523264  }
 0x58b   : > { %1853 = vst [vmem:[#allocation3] sm:$0xff] %v1849_v35  ;;  %2969 = vmatprep.subr.bf16.mxu0 %v1850_v6  ;;  %3398 = vst.msk [vmem:[#allocation2 + $0x10] sm:$0xff] %vm3397_vm5, %v10772_v21 }
 0x58c   : > { %v2571_v63 = vpop.permute.xlu0 %2570  ;;  %2970 = vmatpush1.bf16.msra.mxu0 %v1849_v35  ;;  %3400 = vst.msk [vmem:[#allocation2 + $0x30] sm:$0xff] %vm3397_vm5, %v10772_v21  ;;  %3732 = vst.msk [vmem:[#allocation2 + $0x10] sm:$0xff] %vm3397_vm5, %v10772_v21 }
 0x58d   : > { %v2379_v28 = vpop.permute.xlu1 %2378  ;;  %2971 = vmatprep.subr.bf16.mxu0 %v1931_v15  ;;  %3734 = vst.msk [vmem:[#allocation2 + $0x30] sm:$0xff] %vm3397_vm5, %v10772_v21  ;;  %3985 = vst.msk [vmem:[#allocation2 + $0x10] sm:$0xff] %vm3397_vm5, %v10772_v21 }
 0x58e   : > { %v2384_v52 = vsel %vm12338_vm0, %v2379_v28, %v2381_v38  ;;  %3987 = vst.msk [vmem:[#allocation2 + $0x30] sm:$0xff] %vm3397_vm5, %v10772_v21  ;;  %vm12343_vm0 = vcmask 195712  }
 0x58f   : > { %v2388_v60 = vsel %vm906_vm3, %v10343_v4, %v2384_v52 }
 0x590   : > { %2394 = vst [vmem:[#allocation3 + $0x60] sm:$0xff] %v2388_v60  ;;  %v2781_v32 = vpop.permute.xlu0 %2780  ;;  %2972 = vmatpush1.bf16.msra.mxu0 %v1930_v26  ;;  %v9523_v26 = vld [vmem:[%s12423_s6] sm:$0xff]   ;;  %s12326_s6 = smov 64  }
 0x591   : > { %v2034_v11 = vpop.permute.xlu1 %2033  ;;  %9215 = vmatpush3.bf16.msra.mxu1 %v9523_v26 }
 0x592   : > { %v2038_v3 = vsel %vm2037_vm15, %v2032_v41, %v2034_v11  ;;  %v2039_v51 = vsel %vm2037_vm15, %v2034_v11, %v2036_v44  ;;  %9220 = vmatprep.subr.bf16.mxu1 %v10772_v21  ;;  %vm3401_vm15 = vcmask 64512  }
 0x593   : > { %2042 = vst [vmem:[#allocation3 + $0x20] sm:$0xff] %v2038_v3  ;;  %2973 = vmatprep.subr.bf16.mxu0 %v2039_v51 }
 0x594   : > { %v2321_v53 = vpop.permute.xlu0 %2320  ;;  %2974 = vmatpush1.bf16.msra.mxu0 %v2038_v3 }
 0x595   : > { %v2325_v17 = vsel %vm2324_vm12, %v2319_v43, %v2321_v53  ;;  %v2494_v8 = vpop.permute.xlu1 %2493  ;;  %2975 = vmatprep.subr.bf16.mxu0 %v2116_v39  ;;  %v2326_v49 = vsel %vm2324_vm12, %v2321_v53, %v2323_v18 }
 0x596   : > { %2329 = vst [vmem:[#allocation3 + $0x50] sm:$0xff] %v2325_v17 }
 0x598   : > { %v2492_v4 = vpop.permute.xlu0 %2491  ;;  %2976 = vmatpush1.bf16.msra.mxu0 %v2115_v34 }
 0x599   : > { %v2216_v33 = vpop.permute.xlu1 %2215  ;;  %v2496_v62 = vsel %vm2257_vm11, %v2492_v4, %v2494_v8 }
 0x59a   : > { %v2219_v20 = vsel %vm12373_vm6, %v2214_v37, %v2216_v33  ;;  %v2220_v22 = vsel %vm12373_vm6, %v2216_v33, %v2218_v56  ;;  %v9522_v37 = vld [vmem:[%s12422_s12] ss:$8 sps:$4 sm:$0xff]   ;;  %s12346_s12 = smov 9  }
 0x59b   : > { %2223 = vst [vmem:[#allocation3 + $0x40] sm:$0xff] %v2219_v20  ;;  %2977 = vmatprep.subr.bf16.mxu0 %v2220_v22 }
 0x59c   : > { %v2490_v40 = vpop.permute.xlu0 %2489  ;;  %2978 = vmatpush1.bf16.msra.mxu0 %v2219_v20 }
 0x59d   : > { %v2495_v7 = vsel %vm2257_vm11, %v2490_v40, %v2492_v4  ;;  %v2569_v59 = vpop.permute.xlu1 %2568  ;;  %2979 = vmatprep.subr.bf16.mxu0 %v2326_v49  ;;  %vm3395_vm11 = vcmask 1048064  }
 0x59e   : > { %2499 = vst [vmem:[#allocation3 + $0x70] sm:$0xff] %v2495_v7  ;;  %v2573_v47 = vsel %vm12339_vm4, %v2569_v59, %v2571_v63  ;;  %3396 = vst.msk [vmem:[#allocation2 + $0x8] sm:$0xff] %vm3395_vm11, %v10772_v21 }
 0x59f   : > { %3399 = vst.msk [vmem:[#allocation2 + $0x28] sm:$0xff] %vm3395_vm11, %v10772_v21 }
 0x5a0   : > { %v2674_v19 = vpop.permute.xlu0 %2673  ;;  %2980 = vmatpush1.bf16.msra.mxu0 %v2325_v17 }
 0x5a1   : > { %v2567_v29 = vpop.permute.xlu1 %2566  ;;  %2981 = vmatprep.subr.bf16.mxu0 %v2392_v12 }
 0x5a2   : > { %v2572_v24 = vsel %vm12339_vm4, %v2567_v29, %v2569_v59  ;;  %vm3434_vm4 = vcmask 261312  }
 0x5a3   : > { %2576 = vst [vmem:[#allocation3 + $0x80] sm:$0xff] %v2572_v24 }
 0x5a4   : > { %v2672_v36 = vpop.permute.xlu0 %2671  ;;  %2982 = vmatpush1.bf16.msra.mxu0 %v2388_v60 }
 0x5a5   : > { %v2677_v55 = vsel %vm12340_vm2, %v2672_v36, %v2674_v19  ;;  %v2676_v25 = vpop.permute.xlu1 %2675  ;;  %2983 = vmatprep.subr.bf16.mxu0 %v2496_v62 }
 0x5a6   : > { %2681 = vst [vmem:[#allocation3 + $0x90] sm:$0xff] %v2677_v55  ;;  %v2678_v9 = vsel %vm12340_vm2, %v2674_v19, %v2676_v25  ;;  %vm3445_vm2 = vcmask 326912  }
 0x5a8   : > { %v2859_v10 = vpop.permute.xlu0 %2858  ;;  %2984 = vmatpush1.bf16.msra.mxu0 %v2495_v7 }
 0x5a9   : > { %v2861_v57 = vpop.permute.xlu1 %2860  ;;  %2985 = vmatprep.subr.bf16.mxu0 %v2573_v47 }
 0x5aa   : > { %v2864_v1 = vsel %vm2862_vm8, %v2859_v10, %v2861_v57 }
 0x5ac   : > { %v2857_v58 = vpop.permute.xlu0 %2856  ;;  %2986 = vmatpush1.bf16.msra.mxu0 %v2572_v24 }
 0x5ad   : > { %v2863_v45 = vsel %vm2862_vm8, %v2857_v58, %v2859_v10  ;;  %v2779_v31 = vpop.permute.xlu1 %2778  ;;  %2987 = vmatprep.subr.bf16.mxu0 %v2678_v9  ;;  %vm3412_vm8 = vcmask 130112  }
 0x5ae   : > { %2867 = vst [vmem:[#allocation3 + $0xb0] sm:$0xff] %v2863_v45  ;;  %v2783_v34 = vsel %vm1968_vm10, %v2779_v31, %v2781_v32 }
 0x5b0   : > { %2988 = vmatpush1.bf16.msra.mxu0 %v2677_v55  ;;  %v2914_v2 = vpop.permute.xlu0 %2913 }
 0x5b1   : > { %v2777_v38 = vpop.permute.xlu1 %2776  ;;  %2989 = vmatprep.subr.bf16.mxu0 %v2783_v34 }
 0x5b2   : > { %v2782_v54 = vsel %vm1968_vm10, %v2777_v38, %v2779_v31  ;;  %vm3025_vm10 = vcmask 130048  }
 0x5b3   : > { %2786 = vst [vmem:[#allocation3 + $0xa0] sm:$0xff] %v2782_v54  ;;  %4978 = vst.msk [vmem:[#allocation2 + $0x10] sm:$0xff] %vm3025_vm10, %v10772_v21 }
 0x5b4   : > { %2990 = vmatpush1.bf16.msra.mxu0 %v2782_v54  ;;  %4980 = vst.msk [vmem:[#allocation2 + $0x30] sm:$0xff] %vm3025_vm10, %v10772_v21  ;;  %5510 = vst.msk [vmem:[#allocation2 + $0x10] sm:$0xff] %vm3025_vm10, %v10772_v21 }
 0x5b5   : > { %v2912_v50 = vpop.permute.xlu1 %2911  ;;  %2991 = vmatprep.subr.bf16.mxu0 %v2864_v1  ;;  %5512 = vst.msk [vmem:[#allocation2 + $0x30] sm:$0xff] %vm3025_vm10, %v10772_v21 }
 0x5b6   : > { %v2917_v27 = vsel %vm1780_vm9, %v2912_v50, %v2914_v2  ;;  %6288 = vst.msk [vmem:[#allocation2 + $0x10] sm:$0xff] %vm3397_vm5, %v10772_v21  ;;  %6290 = vst.msk [vmem:[#allocation2 + $0x30] sm:$0xff] %vm3397_vm5, %v10772_v21 }
 0x5b7   : > { %2921 = vst [vmem:[#allocation3 + $0xc0] sm:$0xf] %v2917_v27  ;;  %6776 = vst.msk [vmem:[#allocation2 + $0x10] sm:$0xff] %vm3397_vm5, %v10772_v21 }
 0x5b8   : > { %2992 = vmatpush1.bf16.msra.mxu0 %v2863_v45  ;;  %6778 = vst.msk [vmem:[#allocation2 + $0x30] sm:$0xff] %vm3397_vm5, %v10772_v21  ;;  %7625 = vst [vmem:[#allocation2 + $0x10] sm:$0xff] %v10772_v21 }
 0x5b9   : > { %v2916_v48 = vpop.permute.xlu1 %2915  ;;  %7627 = vst [vmem:[#allocation2 + $0x30] sm:$0xff] %v10772_v21 }
 0x5ba   : > { %v2918_v44 = vsel %vm1780_vm9, %v2914_v2, %v2916_v48  ;;  %vm12341_vm9 = vmmov 0  }
 0x5bb   : > { %2922 = vst [vmem:[#allocation3 + $0xc8] sm:$0xf] %v2918_v44  ;;  %9216 = vmatprep.mubr.msk.bf16.mxu1 %vm12341_vm9, %v10772_v21 }
 0x5be   : > { %v2949_v41 = vld [vmem:[#allocation3 + $0xc0] sm:$0xf] }
 0x5bf   : > { %v2964_v43 = vsel %vm906_vm3, %v2949_v41, 0 }
 0x5c2   : > { %v2950_v56 = vld [vmem:[#allocation3 + $0xc8] sm:$0xf] }
 0x5c3   : > { %8891 = vmatprep.subr.msk.bf16.mxu0 %vm906_vm3, %v2950_v56 }
 0x5c4   : > { %2994 = vmatpush1.bf16.msra.mxu0 %v2964_v43 }
 0x5c5   : > { %9256 = vmatprep.subr.bf16.mxu0 %v10772_v21 }
 0x5c7   : > { %3002 = vmatmul.mubr.bf16.vlgmr.msra.gmra.mrb[4].mxu0 %v9522_v37 }
 0x5c8   : > { %9258 = vmatprep.mubr.msk.bf16.mxu0 %vm12341_vm9, %v10772_v21  ;;  %9257 = vmatpush3.bf16.msra.mxu0 %v9523_v26 }
 0x5c9   : > { %3939 = vmatprep.subr.bf16.mxu0 %v9619_v5 }
 0x69a   : > { %v3003_v18 = vpop.f32.mrb[4].mxu0 }
 0x69b   : > { %v3005_v16 = vpop.f32.mrb[5].mxu0  ;;  %v3012_v35 = vmax.f32 %v3003_v18, 0.0 }
 0x69c   : > { %v3007_v61 = vpop.f32.mrb[6].mxu0  ;;  %v3013_v63 = vmax.f32 %v3005_v16, 0.0 }
 0x69d   : > { %v3014_v6 = vmax.f32 %v3007_v61, 0.0  ;;  %v3009_v15 = vpop.f32.mrb[7].mxu0 }
 0x69e   : > { %v3015_v28 = vmax.f32 %v3009_v15, 0.0 }
 0x69f   : > { %v3018_v52 = vpack.c.bf16 %v3014_v6, %v3012_v35 }
 0x6a0   : > { %v3209_v60 = vpack.c.bf16 %v3015_v28, %v3013_v63 }
 0x6a1   : > { %3117 = vrot.lane.b32.xlu1 %v3018_v52, %s12326_s6  ;;  %3071 = vrot.lane.b32.xlu0 %v3018_v52, %s12328_s11 }
 0x6a2   : > { %9217 = vmatmul.mubr.msk.bf16.vlgmr.msra.gmra.mrb[4].mxu1 %vm3025_vm10, %v3018_v52 }
 0x6a3   : > { %9221 = vmatpush3.bf16.msra.mxu1 %v9523_v26  ;;  %9222 = vmatprep.mubr.msk.bf16.mxu1 %vm12341_vm9, %v10772_v21 }
 0x6a4   : > { %9226 = vmatprep.subr.bf16.mxu1 %v10772_v21 }
 0x6a5   : > { %3163 = vrot.lane.b32.xlu0 %v3018_v52, %s12335_s5  ;;  %3255 = vrot.lane.b32.xlu1 %v3209_v60, %s12328_s11  ;;  %s9643_s11 = smov 56  }
 0x6a9   : > { %3301 = vrot.lane.b32.xlu0 %v3209_v60, %s12326_s6  ;;  %3347 = vrot.lane.b32.xlu1 %v3209_v60, %s12335_s5  ;;  %s12354_s6 = smov 119  }
 0x713   : > { %v3118_v32 = vpop.permute.xlu1 %3117  ;;  %v3072_v11 = vpop.permute.xlu0 %3071 }
 0x714   : > { %9223 = vmatmul.mubr.msk.bf16.vlgmr.msra.gmra.mrb[8].mxu1 %vm3025_vm10, %v3072_v11 }
 0x715   : > { %9227 = vmatpush3.bf16.msra.mxu1 %v9523_v26  ;;  %9228 = vmatprep.mubr.msk.bf16.mxu1 %vm12341_vm9, %v10772_v21 }
 0x716   : > { %9232 = vmatprep.subr.bf16.mxu1 %v10772_v21 }
 0x717   : > { %v3256_v3 = vpop.permute.xlu1 %3255  ;;  %v3164_v39 = vpop.permute.xlu0 %3163 }
 0x71b   : > { %v3348_v51 = vpop.permute.xlu1 %3347  ;;  %v3302_v53 = vpop.permute.xlu0 %3301 }
 0x71c   : > { %9229 = vmatmul.mubr.msk.bf16.vlgmr.msra.gmra.mrb[12].mxu1 %vm3025_vm10, %v3118_v32  ;;  %9259 = vmatmul.mubr.msk.bf16.vlgmr.msra.gmra.mrb[8].mxu0 %vm3025_vm10, %v3348_v51 }
 0x71d   : > { %9233 = vmatpush3.bf16.msra.mxu1 %v9523_v26  ;;  %9234 = vmatprep.mubr.msk.bf16.mxu1 %vm12341_vm9, %v10772_v21 }
 0x71e   : > { %9238 = vmatprep.subr.bf16.mxu1 %v10772_v21 }
 0x724   : > { %9235 = vmatmul.mubr.msk.bf16.vlgmr.msra.gmra.mrb[16].mxu1 %vm3025_vm10, %v3164_v39 }
 0x725   : > { %9239 = vmatpush3.bf16.msra.mxu1 %v9523_v26  ;;  %9240 = vmatprep.mubr.msk.bf16.mxu1 %vm12341_vm9, %v10772_v21 }
 0x726   : > { %9244 = vmatprep.subr.bf16.mxu1 %v10772_v21 }
 0x72c   : > { %9241 = vmatmul.mubr.msk.bf16.vlgmr.msra.gmra.mrb[20].mxu1 %vm3025_vm10, %v3209_v60 }
 0x72d   : > { %9245 = vmatpush3.bf16.msra.mxu1 %v9523_v26  ;;  %9246 = vmatprep.mubr.msk.bf16.mxu1 %vm12341_vm9, %v10772_v21 }
 0x72e   : > { %9250 = vmatprep.subr.bf16.mxu1 %v10772_v21 }
 0x734   : > { %9247 = vmatmul.mubr.msk.bf16.vlgmr.msra.gmra.mrb[24].mxu1 %vm3025_vm10, %v3256_v3 }
 0x735   : > { %9251 = vmatpush3.bf16.msra.mxu1 %v9523_v26  ;;  %9252 = vmatprep.mubr.msk.bf16.mxu1 %vm12341_vm9, %v10772_v21  ;;  %vm3467_vm9 = vcmask 458112  }
 0x736   : > { %3686 = vmatprep.subr.bf16.mxu1 %v9619_v5 }
 0x73c   : > { %9253 = vmatmul.mubr.msk.bf16.vlgmr.msra.gmra.mrb[28].mxu1 %vm3025_vm10, %v3302_v53 }
 0x775   : > { %v3063_v17 = vpop.f32.mrb[4].mxu1 }
 0x776   : > { %3402 = vst.msk [vmem:[#allocation2 + $0x8] sm:$0xff] %vm3401_vm15, %v3063_v17  ;;  %v9218_v8 = vpop.f32.mrb[5].mxu1 }
 0x777   : > { %v3066_v4 = vpop.f32.mrb[6].mxu1 }
 0x778   : > { %3403 = vst.msk [vmem:[#allocation2 + $0x28] sm:$0xff] %vm3401_vm15, %v3066_v4  ;;  %v9219_v33 = vpop.f32.mrb[7].mxu1 }
 0x7e7   : > { %v3110_v20 = vpop.f32.mrb[8].mxu1 }
 0x7e8   : > { %v9224_v22 = vpop.f32.mrb[9].mxu1  ;;  %3406 = vrot.lane.b32.xlu0 %v3110_v20, %s12332_s30 }
 0x7e9   : > { %v3113_v49 = vpop.f32.mrb[10].mxu1 }
 0x7ea   : > { %v9225_v40 = vpop.f32.mrb[11].mxu1  ;;  %3408 = vrot.lane.b32.xlu1 %v3113_v49, %s12332_s30  ;;  %s12352_s30 = smov 121  }
 0x7ef   : > { %v3156_v23 = vpop.f32.mrb[12].mxu1  ;;  %v3386_v7 = vpop.f32.mrb[8].mxu0 }
 0x7f0   : > { %v9230_v59 = vpop.f32.mrb[13].mxu1  ;;  %3417 = vrot.lane.b32.xlu0 %v3156_v23, %s12330_s10  ;;  %v9260_v12 = vpop.f32.mrb[9].mxu0 }
 0x7f1   : > { %v3159_v19 = vpop.f32.mrb[14].mxu1  ;;  %v3389_v29 = vpop.f32.mrb[10].mxu0 }
 0x7f2   : > { %v9231_v24 = vpop.f32.mrb[15].mxu1  ;;  %3419 = vrot.lane.b32.xlu1 %v3159_v19, %s12330_s10  ;;  %v9261_v62 = vpop.f32.mrb[11].mxu0  ;;  %s12424_s10 = sld [smem:[#allocation8_spill]] }
 0x7f7   : > { %v3202_v36 = vpop.f32.mrb[16].mxu1 }
 0x7f8   : > { %v9236_v55 = vpop.f32.mrb[17].mxu1  ;;  %3428 = vrot.lane.b32.xlu0 %v3202_v36, %s9640_s8  ;;  %v3487_v38 = vld [vmem:[%s12424_s10] sm:$0x1]  ;;  %v3563_v54 = vld [vmem:[%s12424_s10] sm:$0x2] }
 0x7f9   : > { %v3205_v25 = vpop.f32.mrb[18].mxu1  ;;  %v3533_v50 = vld [vmem:[%s12424_s10] sm:$0x2]  ;;  %v3594_v27 = vld [vmem:[%s12424_s10] sm:$0x4]  ;;  %v3489_v44 = vpack.i.b16 %v3487_v38, %v3487_v38  ;;  %v3565_v41 = vshrl.u32 %v3563_v54, 16 }
 0x7fa   : > { %v9237_v9 = vpop.f32.mrb[19].mxu1  ;;  %3430 = vrot.lane.b32.xlu1 %v3205_v25, %s9640_s8  ;;  %v3535_v37 = vpack.i.b16 %v3533_v50, %v3533_v50  ;;  %v3596_v26 = vshrl.u32 %v3594_v27, 16  ;;  %v3616_v61 = vld [vmem:[%s12424_s10] sm:$0x8]  ;;  %v3645_v15 = vld [vmem:[%s12424_s10 + $0x4] sm:$0x1] }
 0x7fb   : > { %v3494_v18 = vrot.slane %v3489_v44, %v9826_v14  ;;  %v3566_v16 = vpack.i.b16 %v3565_v41, %v3565_v41  ;;  %v3618_v28 = vpack.i.b16 %v3616_v61, %v3616_v61  ;;  %v3647_v60 = vpack.i.b16 %v3645_v15, %v3645_v15  ;;  %s12426_s8 = smov 1   ;;  %v9524_v54 = vld [vmem:[%s12428_s13 + $0x4] ss:$8 sps:$4 sm:$0xff]   ;;  %v3787_v50 = vld [vmem:[%s12424_s10] sm:$0x2] }
 0x7fc   : > { %v3540_v35 = vrot.slane %v3535_v37, %v9824_v13  ;;  %v3597_v6 = vpack.i.b16 %v3596_v26, %v3596_v26  ;;  %8904 = vmatprep.mubr.msk.bf16.mxu1 %vm3025_vm10, %v9524_v54  ;;  %v3816_v27 = vld [vmem:[%s12424_s10] sm:$0x2]  ;;  %v3789_v44 = vpack.i.b16 %v3787_v50, %v3787_v50  ;;  %v3869_v37 = vld [vmem:[%s12424_s10] sm:$0x8]  ;;  %v3898_v26 = vld [vmem:[%s12424_s10 + $0x4] sm:$0x1] }
 0x7fd   : > { %v3571_v63 = vrot.slane %v3566_v16, %v9824_v13  ;;  %v3623_v32 = vrot.slane %v3618_v28, %v9867_v46  ;;  %v3652_v11 = vrot.slane %v3647_v60, %v9826_v14  ;;  %v3818_v41 = vshrl.u32 %v3816_v27, 16 }
 0x7fe   : > { %v3602_v52 = vrot.slane %v3597_v6, %v9843_v30  ;;  %v3794_v16 = vrot.slane %v3789_v44, %v9824_v13  ;;  %v3871_v15 = vpack.i.b16 %v3869_v37, %v3869_v37 }
 0x7ff   : > { %v3247_v47 = vpop.f32.mrb[20].mxu1  ;;  %v3819_v61 = vpack.i.b16 %v3818_v41, %v3818_v41 }
 0x800   : > { %3439 = vrot.lane.b32.xlu0 %v3247_v47, %s12335_s5  ;;  %v9242_v10 = vpop.f32.mrb[21].mxu1 }
 0x801   : > { %v3250_v57 = vpop.f32.mrb[22].mxu1  ;;  %v3824_v6 = vrot.slane %v3819_v61, %v9824_v13 }
 0x802   : > { %3441 = vrot.lane.b32.xlu1 %v3250_v57, %s12335_s5  ;;  %v9243_v1 = vpop.f32.mrb[23].mxu1  ;;  %s12364_s5 = smov 6  }
 0x807   : > { %v3294_v58 = vpop.f32.mrb[24].mxu1 }
 0x808   : > { %3450 = vrot.lane.b32.xlu0 %v3294_v58, %s9641_s2  ;;  %v9248_v45 = vpop.f32.mrb[25].mxu1 }
 0x809   : > { %v3297_v31 = vpop.f32.mrb[26].mxu1 }
 0x80a   : > { %3452 = vrot.lane.b32.xlu1 %v3297_v31, %s9641_s2  ;;  %v9249_v34 = vpop.f32.mrb[27].mxu1  ;;  %s12425_s2 = smov 127  }
 0x80f   : > { %v3340_v2 = vpop.f32.mrb[28].mxu1 }
 0x810   : > { %3461 = vrot.lane.b32.xlu0 %v3340_v2, %s12344_s27  ;;  %v9254_v48 = vpop.f32.mrb[29].mxu1  ;;  %v3743_v2 = vld [vmem:[%s12424_s10] sm:$0x1] }
 0x811   : > { %v3343_v56 = vpop.f32.mrb[30].mxu1  ;;  %v3745_v48 = vpack.i.b16 %v3743_v2, %v3743_v2 }
 0x812   : > { %3463 = vrot.lane.b32.xlu1 %v3343_v56, %s12344_s27  ;;  %v9255_v43 = vpop.f32.mrb[31].mxu1  ;;  %v3847_v56 = vld [vmem:[%s12424_s10] sm:$0x4]  ;;  %s12433_s27 = smov 120  }
 0x813   : > { %v3849_v43 = vshrl.u32 %v3847_v56, 16 }
 0x814   : > { %3472 = vrot.lane.b32.xlu0 %v3386_v7, %s9643_s11  ;;  %v10898_v7 = vpack.c.bf16 %v10772_v21, %v10772_v21 }
 0x816   : > { %3474 = vrot.lane.b32.xlu1 %v3389_v29, %s9643_s11  ;;  %s12348_s11 = smov 7  }
 0x818   : > { %3496 = vrot.lane.b32.xlu0 %v3494_v18, %s12354_s6  ;;  %v3750_v18 = vrot.slane %v3745_v48, %v9826_v14 }
 0x81a   : > { %3542 = vrot.lane.b32.xlu1 %v3540_v35, %s12352_s30  ;;  %v3850_v35 = vpack.i.b16 %v3849_v43, %v3849_v43 }
 0x81c   : > { %3573 = vrot.lane.b32.xlu0 %v3571_v63, %s12425_s2  ;;  %v3900_v63 = vpack.i.b16 %v3898_v26, %v3898_v26  ;;  %v3855_v28 = vrot.slane %v3850_v35, %v9843_v30 }
 0x81e   : > { %3604 = vrot.lane.b32.xlu1 %v3602_v52, %s12426_s8  ;;  %v3876_v52 = vrot.slane %v3871_v15, %v9867_v46  ;;  %v3905_v60 = vrot.slane %v3900_v63, %v9826_v14 }
 0x820   : > { %3625 = vrot.lane.b32.xlu0 %v3623_v32, %s12348_s11 }
 0x822   : > { %3654 = vrot.lane.b32.xlu1 %v3652_v11, %s12346_s12 }
 0x85a   : > { %v3407_v3 = vpop.permute.xlu0 %3406 }
 0x85b   : > { %3413 = vst.msk [vmem:[#allocation2 + $0x8] sm:$0xff] %vm3412_vm8, %v3407_v3 }
 0x85c   : > { %v3409_v51 = vpop.permute.xlu1 %3408 }
 0x85d   : > { %3414 = vst.msk [vmem:[#allocation2 + $0x28] sm:$0xff] %vm3412_vm8, %v3409_v51  ;;  %vm3456_vm8 = vcmask 392512  }
 0x862   : > { %v3418_v39 = vpop.permute.xlu0 %3417 }
 0x863   : > { %3424 = vst.msk [vmem:[#allocation2 + $0x8] sm:$0xff] %vm12343_vm0, %v3418_v39 }
 0x864   : > { %v3420_v53 = vpop.permute.xlu1 %3419 }
 0x865   : > { %3425 = vst.msk [vmem:[#allocation2 + $0x28] sm:$0xff] %vm12343_vm0, %v3420_v53  ;;  %vm3478_vm0 = vcmask 523712  }
 0x86a   : > { %v3429_v17 = vpop.permute.xlu0 %3428 }
 0x86b   : > { %3435 = vst.msk [vmem:[#allocation2 + $0x8] sm:$0xff] %vm3434_vm4, %v3429_v17 }
 0x86c   : > { %v3431_v8 = vpop.permute.xlu1 %3430 }
 0x86d   : > { %3436 = vst.msk [vmem:[#allocation2 + $0x28] sm:$0xff] %vm3434_vm4, %v3431_v8  ;;  %vm3553_vm4 = vcmask 56320  }
 0x872   : > { %v3440_v4 = vpop.permute.xlu0 %3439 }
 0x873   : > { %3446 = vst.msk [vmem:[#allocation2 + $0x8] sm:$0xff] %vm3445_vm2, %v3440_v4 }
 0x874   : > { %v3442_v33 = vpop.permute.xlu1 %3441 }
 0x875   : > { %3447 = vst.msk [vmem:[#allocation2 + $0x28] sm:$0xff] %vm3445_vm2, %v3442_v33 }
 0x87a   : > { %v3451_v20 = vpop.permute.xlu0 %3450 }
 0x87b   : > { %3457 = vst.msk [vmem:[#allocation2 + $0x8] sm:$0xff] %vm3456_vm8, %v3451_v20 }
 0x87c   : > { %v3453_v22 = vpop.permute.xlu1 %3452 }
 0x87d   : > { %3458 = vst.msk [vmem:[#allocation2 + $0x28] sm:$0xff] %vm3456_vm8, %v3453_v22  ;;  %vm4255_vm8 = vcmask 48128  }
 0x882   : > { %v3462_v49 = vpop.permute.xlu0 %3461 }
 0x883   : > { %3468 = vst.msk [vmem:[#allocation2 + $0x8] sm:$0xff] %vm3467_vm9, %v3462_v49 }
 0x884   : > { %v3464_v40 = vpop.permute.xlu1 %3463 }
 0x885   : > { %3469 = vst.msk [vmem:[#allocation2 + $0x28] sm:$0xff] %vm3467_vm9, %v3464_v40 }
 0x886   : > { %v3473_v23 = vpop.permute.xlu0 %3472 }
 0x887   : > { %3479 = vst.msk [vmem:[#allocation2 + $0x8] sm:$0xff] %vm3478_vm0, %v3473_v23 }
 0x888   : > { %v3475_v59 = vpop.permute.xlu1 %3474 }
 0x889   : > { %3480 = vst.msk [vmem:[#allocation2 + $0x28] sm:$0xff] %vm3478_vm0, %v3475_v59  ;;  %vm3507_vm0 = vcmask 72704  }
 0x88a   : > { %v3497_v12 = vpop.permute.xlu0 %3496 }
 0x88b   : > { %v3499_v19 = vmul.bf16 %v3497_v12, %v10898_v7 }
 0x88c   : > { %v3543_v62 = vpop.permute.xlu1 %3542 }
 0x88d   : > { %3503 = vrot.lane.b32.xlu0 %v3499_v19, %s12346_s12  ;;  %v3545_v55 = vmul.bf16 %v3543_v62, %v10898_v7 }
 0x88e   : > { %v3587_v29 = vld [vmem:[#allocation2 + $0x8] sm:$0xff]  ;;  %v3574_v9 = vpop.permute.xlu0 %3573 }
 0x88f   : > { %3731 = vst.msk [vmem:[#allocation2 + $0x8] sm:$0xff] %vm3395_vm11, %v10772_v21  ;;  %v3576_v47 = vmul.bf16 %v3574_v9, %v10898_v7 }
 0x890   : > { %v3588_v24 = vld [vmem:[#allocation2 + $0x28] sm:$0xff]  ;;  %v3605_v10 = vpop.permute.xlu1 %3604 }
 0x891   : > { %v3589_v36 = vpack.c.bf16 %v3588_v24, %v3587_v29  ;;  %3519 = vrot.lane.b32.xlu0 %v10898_v7, %s12427_s7  ;;  %3733 = vst.msk [vmem:[#allocation2 + $0x28] sm:$0xff] %vm3395_vm11, %v10772_v21 }
 0x892   : > { %v3626_v45 = vpop.permute.xlu0 %3625 }
 0x893   : > { %v3500_v25 = vmul.bf16 %v3589_v36, %v3497_v12  ;;  %3590 = vst.msk [vmem:[#allocation3 + $0x40] sm:$0xff] %vm3397_vm5, %v3589_v36  ;;  %v3546_v57 = vmul.bf16 %v3589_v36, %v3543_v62  ;;  %v3607_v1 = vmul.bf16 %v3605_v10, %v3589_v36  ;;  %v3577_v58 = vmul.bf16 %v3589_v36, %v3574_v9 }
 0x894   : > { %v3628_v31 = vmul.bf16 %v3626_v45, %v3589_v36  ;;  %v3655_v34 = vpop.permute.xlu1 %3654 }
 0x895   : > { %3505 = vrot.lane.b32.xlu1 %v3500_v25, %s12346_s12  ;;  %3549 = vrot.lane.b32.xlu0 %v3545_v55, %s12348_s11  ;;  %v3657_v38 = vmul.bf16 %v3655_v34, %v3589_v36  ;;  %s12442_s12 = smov 18  }
 0x899   : > { %3521 = vrot.lane.b32.xlu1 %v3589_v36, %s12427_s7  ;;  %3580 = vrot.lane.b32.xlu0 %v3576_v47, %s12426_s8 }
 0x89a   : > { %v3669_v62 = vld [vmem:[#allocation3 + $0x40] sm:$0xff] }
 0x89d   : > { %3551 = vrot.lane.b32.xlu1 %v3546_v57, %s12348_s11  ;;  %3609 = vrot.lane.b32.xlu0 %v3607_v1, %s12425_s2  ;;  %v9526_v57 = vld [vmem:[%s12428_s13] ss:$8 sps:$4 sm:$0xff]   ;;  %s12360_s13 = smov 122   ;;  %s12363_s11 = smov 118  }
 0x8a1   : > { %3582 = vrot.lane.b32.xlu1 %v3577_v58, %s12426_s8  ;;  %3638 = vrot.lane.b32.xlu0 %v3589_v36, %s12350_s3  ;;  %s12435_s3 = sld [smem:[#allocation11_spill]] }
 0x8a5   : > { %3630 = vrot.lane.b32.xlu1 %v3628_v31, %s12352_s30  ;;  %3752 = vrot.lane.b32.xlu0 %v3750_v18, %s12429_s20  ;;  %s12441_s30 = smov 2  }
 0x8a7   : > { %v4205_v15 = vld [vmem:[%s12435_s3 + $0x4] sm:$0x1]  ;;  %v3996_v63 = vld [vmem:[%s12435_s3] sm:$0x1] }
 0x8a9   : > { %3659 = vrot.lane.b32.xlu1 %v3657_v38, %s12354_s6  ;;  %3826 = vrot.lane.b32.xlu0 %v3824_v6, %s12425_s2  ;;  %s12432_s6 = smov 9   ;;  %v9527_v6 = vld [vmem:[%s12434_s14 + $0x4] ss:$8 sps:$4 sm:$0xff]  }
 0x8aa   : > { %8907 = vmatprep.mubr.msk.bf16.mxu0 %vm3025_vm10, %v9527_v6  ;;  %v4347_v6 = vld [vmem:[%s12435_s3 + $0x4] sm:$0x8] }
 0x8ad   : > { %3796 = vrot.lane.b32.xlu1 %v3794_v16, %s12430_s21  ;;  %3878 = vrot.lane.b32.xlu0 %v3876_v52, %s12431_s24  ;;  %v4207_v52 = vpack.i.b16 %v4205_v15, %v4205_v15 }
 0x8b1   : > { %3857 = vrot.lane.b32.xlu1 %v3855_v28, %s12426_s8  ;;  %v4390_v28 = vld [vmem:[%s12435_s3 + $0x8] sm:$0x1] }
 0x8b5   : > { %3907 = vrot.lane.b32.xlu1 %v3905_v60, %s12432_s6  ;;  %v3998_v60 = vpack.i.b16 %v3996_v63, %v3996_v63  ;;  %v4513_v63 = vld [vmem:[%s12435_s3 + $0x8] sm:$0x8] }
 0x8ff   : > { %v3504_v32 = vpop.permute.xlu0 %3503 }
 0x903   : > { %v3520_v11 = vpop.permute.xlu0 %3519 }
 0x907   : > { %v3550_v3 = vpop.permute.xlu0 %3549  ;;  %v3506_v51 = vpop.permute.xlu1 %3505 }
 0x908   : > { %v3508_v39 = vsel %vm3507_vm0, %v3504_v32, %v3506_v51  ;;  %v4392_v32 = vpack.i.b16 %v4390_v28, %v4390_v28  ;;  %v4349_v28 = vpack.i.b16 %v4347_v6, %v4347_v6 }
 0x909   : > { %3510 = vst.msk [vmem:[#allocation3] sm:$0xff] %vm3397_vm5, %v3508_v39 }
 0x90b   : > { %v3581_v53 = vpop.permute.xlu0 %3580  ;;  %v3522_v17 = vpop.permute.xlu1 %3521 }
 0x90c   : > { %v3524_v8 = vsel %vm3401_vm15, %v3520_v11, %v3522_v17  ;;  %v4234_v11 = vld [vmem:[%s12435_s3 + $0x4] sm:$0x1]  ;;  %v4212_v17 = vrot.slane %v4207_v52, %v9826_v14 }
 0x90d   : > { %3526 = vst.msk [vmem:[#allocation3 + $0x10] sm:$0xff] %vm3397_vm5, %v3524_v8  ;;  %v4236_v51 = vshrl.u32 %v4234_v11, 16  ;;  %v4003_v8 = vrot.slane %v3998_v60, %v9826_v14  ;;  %v4515_v11 = vshrl.u32 %v4513_v63, 16 }
 0x90f   : > { %v3610_v4 = vpop.permute.xlu0 %3609  ;;  %v3552_v33 = vpop.permute.xlu1 %3551 }
 0x910   : > { %3612 = vst.msk [vmem:[#allocation3 + $0x50] sm:$0xff] %vm3397_vm5, %v3610_v4  ;;  %v3554_v20 = vsel %vm3553_vm4, %v3550_v3, %v3552_v33  ;;  %v3665_v22 = vld [vmem:[#allocation3] sm:$0xff]  ;;  %v4237_v33 = vpack.i.b16 %v4236_v51, %v4236_v51 }
 0x911   : > { %3556 = vst.msk [vmem:[#allocation3 + $0x20] sm:$0xff] %vm3397_vm5, %v3554_v20  ;;  %3687 = vmatpush1.bf16.msra.mxu1 %v3665_v22  ;;  %v4025_v3 = vld [vmem:[%s12435_s3] sm:$0x1]  ;;  %v4294_v4 = vld [vmem:[%s12435_s3 + $0x4] sm:$0x2]  ;;  %v4397_v22 = vrot.slane %v4392_v32, %v9826_v14 }
 0x912   : > { %3688 = vmatprep.subr.bf16.mxu1 %v9619_v5  ;;  %v4027_v39 = vshrl.u32 %v4025_v3, 16  ;;  %v4535_v3 = vld [vmem:[%s12435_s3 + $0xc] sm:$0x1] }
 0x913   : > { %v3639_v49 = vpop.permute.xlu0 %3638  ;;  %v3583_v40 = vpop.permute.xlu1 %3582  ;;  %v4537_v51 = vpack.i.b16 %v4535_v3, %v4535_v3 }
 0x914   : > { %3641 = vst.msk [vmem:[#allocation3 + $0x70] sm:$0xff] %vm3397_vm5, %v3639_v49  ;;  %v3584_v23 = vsel %vm1073_vm1, %v3581_v53, %v3583_v40  ;;  %v3666_v59 = vld [vmem:[#allocation3 + $0x10] sm:$0xff]  ;;  %v4265_v53 = vld [vmem:[%s12435_s3 + $0x4] sm:$0x2]  ;;  %v4028_v49 = vpack.i.b16 %v4027_v39, %v4027_v39  ;;  %v4419_v40 = vld [vmem:[%s12435_s3 + $0x8] sm:$0x2]  ;;  %v4354_v39 = vrot.slane %v4349_v28, %v9867_v46 }
 0x915   : > { %3586 = vst.msk [vmem:[#allocation3 + $0x30] sm:$0xff] %vm3397_vm5, %v3584_v23  ;;  %3689 = vmatpush1.bf16.msra.mxu1 %v3666_v59  ;;  %v4267_v20 = vpack.i.b16 %v4265_v53, %v4265_v53  ;;  %v4296_v23 = vshrl.u32 %v4294_v4, 16  ;;  %v4242_v59 = vrot.slane %v4237_v33, %v9826_v14  ;;  %v4542_v4 = vrot.slane %v4537_v51, %v9826_v14 }
 0x916   : > { %3690 = vmatprep.subr.bf16.mxu1 %v9619_v5 }
 0x917   : > { %v3631_v12 = vpop.permute.xlu1 %3630  ;;  %v3670_v36 = vld [vmem:[#allocation3 + $0x50] sm:$0xff]  ;;  %v3753_v25 = vpop.permute.xlu0 %3752 }
 0x918   : > { %3633 = vst.msk [vmem:[#allocation3 + $0x60] sm:$0xff] %vm3397_vm5, %v3631_v12  ;;  %v3667_v19 = vld [vmem:[#allocation3 + $0x20] sm:$0xff]  ;;  %v3755_v47 = vmul.bf16 %v3753_v25, %v10898_v7 }
 0x919   : > { %3691 = vmatpush1.bf16.msra.mxu1 %v3667_v19  ;;  %v4071_v12 = vld [vmem:[%s12435_s3] sm:$0x2]  ;;  %v4440_v19 = vld [vmem:[%s12435_s3 + $0x8] sm:$0x2] }
 0x91a   : > { %3692 = vmatprep.subr.bf16.mxu1 %v9619_v5  ;;  %3759 = vrot.lane.b32.xlu0 %v3755_v47, %s12432_s6 }
 0x91b   : > { %v3660_v29 = vpop.permute.xlu1 %3659  ;;  %v3672_v9 = vld [vmem:[#allocation3 + $0x70] sm:$0xff]  ;;  %v3827_v58 = vpop.permute.xlu0 %3826 }
 0x91c   : > { %3662 = vst.msk [vmem:[#allocation3 + $0x80] sm:$0xff] %vm3397_vm5, %v3660_v29  ;;  %v3668_v24 = vld [vmem:[#allocation3 + $0x30] sm:$0xff]  ;;  %v3829_v31 = vmul.bf16 %v3827_v58, %v10898_v7  ;;  %v4272_v29 = vrot.slane %v4267_v20, %v9824_v13 }
 0x91d   : > { %3693 = vmatpush1.bf16.msra.mxu1 %v3668_v24  ;;  %v4421_v24 = vpack.i.b16 %v4419_v40, %v4419_v40 }
 0x91e   : > { %3694 = vmatprep.subr.bf16.mxu1 %v9619_v5  ;;  %3774 = vrot.lane.b32.xlu0 %v10898_v7, %s12427_s7 }
 0x91f   : > { %v3671_v55 = vld [vmem:[#allocation3 + $0x60] sm:$0xff]  ;;  %v3797_v1 = vpop.permute.xlu1 %3796  ;;  %v3879_v16 = vpop.permute.xlu0 %3878 }
 0x920   : > { %v3799_v45 = vmul.bf16 %v3797_v1, %v10898_v7 }
 0x921   : > { %3695 = vmatpush1.bf16.msra.mxu1 %v3669_v62  ;;  %v4033_v62 = vrot.slane %v4028_v49, %v9826_v14 }
 0x922   : > { %3696 = vmatprep.subr.bf16.mxu1 %v9619_v5  ;;  %3803 = vrot.lane.b32.xlu0 %v3799_v45, %s12431_s24  ;;  %v4130_v45 = vld [vmem:[%s12435_s3] sm:$0x4] }
 0x923   : > { %v3673_v10 = vld [vmem:[#allocation3 + $0x80] sm:$0xff]  ;;  %v3858_v56 = vpop.permute.xlu1 %3857 }
 0x925   : > { %3697 = vmatpush1.bf16.msra.mxu1 %v3670_v36  ;;  %v4297_v36 = vpack.i.b16 %v4296_v23, %v4296_v23 }
 0x926   : > { %3698 = vmatprep.subr.bf16.mxu1 %v9619_v5  ;;  %3833 = vrot.lane.b32.xlu0 %v3829_v31, %s12426_s8  ;;  %v4325_v31 = vld [vmem:[%s12435_s3 + $0x4] sm:$0x4] }
 0x927   : > { %v3908_v61 = vpop.permute.xlu1 %3907  ;;  %v4302_v47 = vrot.slane %v4297_v36, %v9824_v13 }
 0x929   : > { %3699 = vmatpush1.bf16.msra.mxu1 %v3671_v55  ;;  %v4073_v55 = vshrl.u32 %v4071_v12, 16 }
 0x92a   : > { %3700 = vmatprep.subr.bf16.mxu1 %v9619_v5 }
 0x92d   : > { %3701 = vmatpush1.bf16.msra.mxu1 %v3672_v9  ;;  %v4426_v9 = vrot.slane %v4421_v24, %v9824_v13 }
 0x92e   : > { %3702 = vmatprep.subr.bf16.mxu1 %v9619_v5 }
 0x931   : > { %3703 = vmatpush1.bf16.msra.mxu1 %v3673_v10  ;;  %v4074_v10 = vpack.i.b16 %v4073_v55, %v4073_v55 }
 0x934   : > { %3719 = vmatmul.mubr.bf16.vlgmr.msra.gmra.mrb[32].mxu1 %v9526_v57 }
 0x98c   : > { %v3760_v33 = vpop.permute.xlu0 %3759 }
 0x990   : > { %v3775_v20 = vpop.permute.xlu0 %3774 }
 0xa07   : > { %v3720_v34 = vpop.f32.mrb[32].mxu1 }
 0xa08   : > { %v3727_v38 = vmax.f32 %v3720_v34, 0.0  ;;  %v3722_v54 = vpop.f32.mrb[33].mxu1 }
 0xa09   : > { %v3723_v2 = vpop.f32.mrb[34].mxu1  ;;  %v4079_v54 = vrot.slane %v4074_v10, %v9824_v13 }
 0xa0a   : > { %3735 = vst.msk [vmem:[#allocation2 + $0x8] sm:$0xff] %vm3397_vm5, %v3727_v38  ;;  %v3728_v50 = vmax.f32 %v3723_v2, 0.0  ;;  %v3725_v27 = vpop.f32.mrb[35].mxu1 }
 0xa0b   : > { %v4327_v27 = vshrl.u32 %v4325_v31, 16 }
 0xa0c   : > { %3736 = vst.msk [vmem:[#allocation2 + $0x28] sm:$0xff] %vm3397_vm5, %v3728_v50  ;;  %v4132_v50 = vshrl.u32 %v4130_v45, 16 }
 0xa11   : > { %v3840_v48 = vld [vmem:[#allocation2 + $0x8] sm:$0xff] }
 0xa12   : > { %3984 = vst.msk [vmem:[#allocation2 + $0x8] sm:$0xff] %vm3395_vm11, %v10772_v21 }
 0xa13   : > { %v3841_v44 = vld [vmem:[#allocation2 + $0x28] sm:$0xff] }
 0xa14   : > { %v3842_v41 = vpack.c.bf16 %v3841_v44, %v3840_v48  ;;  %3986 = vst.msk [vmem:[#allocation2 + $0x28] sm:$0xff] %vm3395_vm11, %v10772_v21  ;;  %v4483_v48 = vld [vmem:[%s12435_s3 + $0x8] sm:$0x4] }
 0xa16   : > { %3843 = vst.msk [vmem:[#allocation3 + $0x40] sm:$0xff] %vm3397_vm5, %v3842_v41  ;;  %v3860_v43 = vmul.bf16 %v3858_v56, %v3842_v41  ;;  %v3756_v37 = vmul.bf16 %v3842_v41, %v3753_v25  ;;  %v3800_v26 = vmul.bf16 %v3842_v41, %v3797_v1  ;;  %v3830_v18 = vmul.bf16 %v3842_v41, %v3827_v58  ;;  %v4101_v1 = vld [vmem:[%s12435_s3] sm:$0x4]  ;;  %v4462_v58 = vld [vmem:[%s12435_s3 + $0x8] sm:$0x4] }
 0xa17   : > { %v3881_v21 = vmul.bf16 %v3879_v16, %v3842_v41  ;;  %v3910_v35 = vmul.bf16 %v3908_v61, %v3842_v41  ;;  %v4442_v25 = vshrl.u32 %v4440_v19, 16  ;;  %v4103_v34 = vpack.i.b16 %v4101_v1, %v4101_v1 }
 0xa18   : > { %3862 = vrot.lane.b32.xlu0 %v3860_v43, %s12425_s2  ;;  %3761 = vrot.lane.b32.xlu1 %v3756_v37, %s12432_s6  ;;  %v4464_v38 = vpack.i.b16 %v4462_v58, %v4462_v58  ;;  %v4133_v43 = vpack.i.b16 %v4132_v50, %v4132_v50  ;;  %v4328_v37 = vpack.i.b16 %v4327_v27, %v4327_v27 }
 0xa19   : > { %v4443_v57 = vpack.i.b16 %v4442_v25, %v4442_v25  ;;  %v4108_v44 = vrot.slane %v4103_v34, %v9843_v30 }
 0xa1a   : > { %v4469_v56 = vrot.slane %v4464_v38, %v9843_v30  ;;  %v4333_v61 = vrot.slane %v4328_v37, %v9843_v30 }
 0xa1b   : > { %v4448_v2 = vrot.slane %v4443_v57, %v9824_v13 }
 0xa1c   : > { %3891 = vrot.lane.b32.xlu0 %v3842_v41, %s12433_s27  ;;  %3776 = vrot.lane.b32.xlu1 %v3842_v41, %s12427_s7  ;;  %v4485_v41 = vshrl.u32 %v4483_v48, 16 }
 0xa1d   : > { %v3922_v58 = vld [vmem:[#allocation3 + $0x40] sm:$0xff] }
 0xa1e   : > { %v4486_v16 = vpack.i.b16 %v4485_v41, %v4485_v41  ;;  %v9529_v41 = vld [vmem:[%s12434_s14] ss:$8 sps:$4 sm:$0xff]   ;;  %s12461_s14 = smov 116  }
 0xa20   : > { %3805 = vrot.lane.b32.xlu1 %v3800_v26, %s12431_s24  ;;  %4214 = vrot.lane.b32.xlu0 %v4212_v17, %s12430_s21  ;;  %v4161_v26 = vld [vmem:[%s12435_s3] sm:$0x8]  ;;  %v4491_v52 = vrot.slane %v4486_v16, %v9843_v30  ;;  %v4516_v17 = vpack.i.b16 %v4515_v11, %v4515_v11 }
 0xa24   : > { %3835 = vrot.lane.b32.xlu1 %v3830_v18, %s12426_s8  ;;  %4399 = vrot.lane.b32.xlu0 %v4397_v22, %s12431_s24  ;;  %v4368_v18 = vld [vmem:[%s12435_s3 + $0x4] sm:$0x8]  ;;  %v3804_v22 = vpop.permute.xlu0 %3803  ;;  %s12445_s3 = smov 6  }
 0xa25   : > { %v4370_v15 = vshrl.u32 %v4368_v18, 16 }
 0xa27   : > { %v4371_v32 = vpack.i.b16 %v4370_v15, %v4370_v15 }
 0xa28   : > { %3883 = vrot.lane.b32.xlu1 %v3881_v21, %s12430_s21  ;;  %4035 = vrot.lane.b32.xlu0 %v4033_v62, %s12420_s1  ;;  %v4138_v21 = vrot.slane %v4133_v43, %v9843_v30  ;;  %v3834_v49 = vpop.permute.xlu0 %3833 }
 0xa29   : > { %v4376_v53 = vrot.slane %v4371_v32, %v9867_v46 }
 0xa2c   : > { %3912 = vrot.lane.b32.xlu1 %v3910_v35, %s12429_s20  ;;  %4428 = vrot.lane.b32.xlu0 %v4426_v9, %s12432_s6  ;;  %v4163_v35 = vpack.i.b16 %v4161_v26, %v4161_v26 }
 0xa2e   : > { %v4168_v60 = vrot.slane %v4163_v35, %v9867_v46 }
 0xa30   : > { %4005 = vrot.lane.b32.xlu1 %v4003_v8, %s12436_s19  ;;  %4081 = vrot.lane.b32.xlu0 %v4079_v54, %s12437_s23  ;;  %v4521_v8 = vrot.slane %v4516_v17, %v9867_v46 }
 0xa34   : > { %4244 = vrot.lane.b32.xlu1 %v4242_v59, %s12360_s13  ;;  %4110 = vrot.lane.b32.xlu0 %v4108_v44, %s12438_s26  ;;  %s12444_s13 = smov 10  }
 0xa38   : > { %4274 = vrot.lane.b32.xlu1 %v4272_v29, %s12419_s0  ;;  %4140 = vrot.lane.b32.xlu0 %v4138_v21, %s12363_s11  ;;  %s12443_s11 = smov 16  }
 0xa3c   : > { %4304 = vrot.lane.b32.xlu1 %v4302_v47, %s12425_s2 }
 0xa40   : > { %4450 = vrot.lane.b32.xlu1 %v4448_v2, %s12361_s29  ;;  %s12440_s29 = smov 15  }
 0xa41   : > { %4493 = vrot.lane.b32.xlu0 %v4491_v52, %s12440_s29 }
 0xa44   : > { %4471 = vrot.lane.b32.xlu1 %v4469_v56, %s12439_s9 }
 0xa45   : > { %4356 = vrot.lane.b32.xlu0 %v4354_v39, %s12441_s30 }
 0xa48   : > { %4335 = vrot.lane.b32.xlu1 %v4333_v61, %s12426_s8 }
 0xa49   : > { %4523 = vrot.lane.b32.xlu0 %v4521_v8, %s12418_s28 }
 0xa4c   : > { %4170 = vrot.lane.b32.xlu1 %v4168_v60, %s12429_s20 }
 0xa50   : > { %4378 = vrot.lane.b32.xlu1 %v4376_v53, %s12364_s5 }
 0xa54   : > { %4544 = vrot.lane.b32.xlu1 %v4542_v4, %s12442_s12 }
 0xa8a   : > { %v3863_v40 = vpop.permute.xlu0 %3862  ;;  %v3762_v23 = vpop.permute.xlu1 %3761 }
 0xa8b   : > { %3865 = vst.msk [vmem:[#allocation3 + $0x50] sm:$0xff] %vm3397_vm5, %v3863_v40  ;;  %v3763_v59 = vsel %vm3507_vm0, %v3760_v33, %v3762_v23 }
 0xa8c   : > { %3765 = vst.msk [vmem:[#allocation3] sm:$0xff] %vm3397_vm5, %v3763_v59 }
 0xa8e   : > { %v3892_v12 = vpop.permute.xlu0 %3891  ;;  %v3777_v19 = vpop.permute.xlu1 %3776 }
 0xa8f   : > { %3894 = vst.msk [vmem:[#allocation3 + $0x70] sm:$0xff] %vm3397_vm5, %v3892_v12  ;;  %v3778_v29 = vsel %vm3401_vm15, %v3775_v20, %v3777_v19 }
 0xa90   : > { %3780 = vst.msk [vmem:[#allocation3 + $0x10] sm:$0xff] %vm3397_vm5, %v3778_v29  ;;  %v11185_v29 = vld [vmem:[#allocation2 + $0x40] sm:$0xff] }
 0xa92   : > { %v3806_v24 = vpop.permute.xlu1 %3805  ;;  %v3923_v45 = vld [vmem:[#allocation3 + $0x50] sm:$0xff]  ;;  %v11124_v34 = vpop.permute.xlu0 %4214 }
 0xa93   : > { %v3807_v62 = vsel %vm3553_vm4, %v3804_v22, %v3806_v24  ;;  %v3918_v36 = vld [vmem:[#allocation3] sm:$0xff]  ;;  %v4217_v2 = vmul.bf16 %v11124_v34, %v10898_v7  ;;  %v11189_v24 = vpack.c.bf16 %v11185_v29, %v11185_v29 }
 0xa94   : > { %3809 = vst.msk [vmem:[#allocation3 + $0x20] sm:$0xff] %vm3397_vm5, %v3807_v62  ;;  %3940 = vmatpush1.bf16.msra.mxu0 %v3918_v36 }
 0xa95   : > { %3941 = vmatprep.subr.bf16.mxu0 %v9619_v5  ;;  %4221 = vrot.lane.b32.xlu0 %v4217_v2, %s12431_s24 }
 0xa96   : > { %v3836_v55 = vpop.permute.xlu1 %3835  ;;  %v3925_v54 = vld [vmem:[#allocation3 + $0x70] sm:$0xff]  ;;  %v4400_v27 = vpop.permute.xlu0 %4399 }
 0xa97   : > { %v3837_v25 = vsel %vm1073_vm1, %v3834_v49, %v3836_v55  ;;  %v3919_v9 = vld [vmem:[#allocation3 + $0x10] sm:$0xff] }
 0xa98   : > { %3839 = vst.msk [vmem:[#allocation3 + $0x30] sm:$0xff] %vm3397_vm5, %v3837_v25  ;;  %3942 = vmatpush1.bf16.msra.mxu0 %v3919_v9 }
 0xa99   : > { %3943 = vmatprep.subr.bf16.mxu0 %v9619_v5 }
 0xa9a   : > { %v3884_v47 = vpop.permute.xlu1 %3883  ;;  %v4036_v43 = vpop.permute.xlu0 %4035 }
 0xa9b   : > { %3886 = vst.msk [vmem:[#allocation3 + $0x60] sm:$0xff] %vm3397_vm5, %v3884_v47  ;;  %v3920_v10 = vld [vmem:[#allocation3 + $0x20] sm:$0xff]  ;;  %v4038_v26 = vmul.bf16 %v4036_v43, %v10898_v7 }
 0xa9c   : > { %3944 = vmatpush1.bf16.msra.mxu0 %v3920_v10 }
 0xa9d   : > { %3945 = vmatprep.subr.bf16.mxu0 %v9619_v5 }
 0xa9e   : > { %v3913_v57 = vpop.permute.xlu1 %3912  ;;  %v4429_v16 = vpop.permute.xlu0 %4428 }
 0xa9f   : > { %3915 = vst.msk [vmem:[#allocation3 + $0x80] sm:$0xff] %vm3397_vm5, %v3913_v57  ;;  %v3921_v1 = vld [vmem:[#allocation3 + $0x30] sm:$0xff] }
 0xaa0   : > { %3946 = vmatpush1.bf16.msra.mxu0 %v3921_v1 }
 0xaa1   : > { %3947 = vmatprep.subr.bf16.mxu0 %v9619_v5 }
 0xaa2   : > { %v3924_v31 = vld [vmem:[#allocation3 + $0x60] sm:$0xff]  ;;  %v11126_v38 = vpop.permute.xlu1 %4005  ;;  %v4082_v35 = vpop.permute.xlu0 %4081 }
 0xaa3   : > { %v4008_v50 = vmul.bf16 %v11126_v38, %v10898_v7  ;;  %v4084_v6 = vmul.bf16 %v4082_v35, %v10898_v7 }
 0xaa4   : > { %3948 = vmatpush1.bf16.msra.mxu0 %v3922_v58 }
 0xaa5   : > { %3949 = vmatprep.subr.bf16.mxu0 %v9619_v5  ;;  %4012 = vrot.lane.b32.xlu0 %v4008_v50, %s12442_s12 }
 0xaa6   : > { %v4245_v48 = vpop.permute.xlu1 %4244  ;;  %v3926_v44 = vld [vmem:[#allocation3 + $0x80] sm:$0xff]  ;;  %v4111_v15 = vpop.permute.xlu0 %4110 }
 0xaa7   : > { %v4247_v56 = vmul.bf16 %v4245_v48, %v10898_v7  ;;  %v4113_v63 = vmul.bf16 %v4111_v15, %v10898_v7 }
 0xaa8   : > { %3950 = vmatpush1.bf16.msra.mxu0 %v3923_v45 }
 0xaa9   : > { %3951 = vmatprep.subr.bf16.mxu0 %v9619_v5  ;;  %4251 = vrot.lane.b32.xlu1 %v4247_v56, %s12364_s5  ;;  %s12366_s5 = smov 112  }
 0xaaa   : > { %v4275_v37 = vpop.permute.xlu1 %4274  ;;  %v4141_v60 = vpop.permute.xlu0 %4140 }
 0xaab   : > { %v4277_v18 = vmul.bf16 %v4275_v37, %v10898_v7  ;;  %v4143_v32 = vmul.bf16 %v4141_v60, %v10898_v7 }
 0xaac   : > { %3952 = vmatpush1.bf16.msra.mxu0 %v3924_v31 }
 0xaad   : > { %3953 = vmatprep.subr.bf16.mxu0 %v9619_v5  ;;  %4042 = vrot.lane.b32.xlu1 %v4038_v26, %s12418_s28 }
 0xaae   : > { %4281 = vrot.lane.b32.xlu0 %v4277_v18, %s12441_s30  ;;  %v4305_v21 = vpop.permute.xlu1 %4304 }
 0xaaf   : > { %v4307_v61 = vmul.bf16 %v4305_v21, %v10898_v7 }
 0xab0   : > { %3954 = vmatpush1.bf16.msra.mxu0 %v3925_v54 }
 0xab1   : > { %3955 = vmatprep.subr.bf16.mxu0 %v9619_v5  ;;  %4311 = vrot.lane.b32.xlu1 %v4307_v61, %s12426_s8 }
 0xab2   : > { %4057 = vrot.lane.b32.xlu0 %v10898_v7, %s12443_s11  ;;  %v4451_v28 = vpop.permute.xlu1 %4450 }
 0xab3   : > { %v4494_v47 = vpop.permute.xlu0 %4493 }
 0xab4   : > { %3956 = vmatpush1.bf16.msra.mxu0 %v3926_v44 }
 0xab5   : > { %4679 = vmatprep.subr.bf16.mxu0 %v9619_v5  ;;  %4088 = vrot.lane.b32.xlu1 %v4084_v6, %s12440_s29 }
 0xab6   : > { %4117 = vrot.lane.b32.xlu0 %v4113_v63, %s12439_s9  ;;  %v4472_v52 = vpop.permute.xlu1 %4471 }
 0xab7   : > { %3972 = vmatmul.mubr.bf16.vlgmr.msra.gmra.mrb[12].mxu0 %v9529_v41  ;;  %v4357_v1 = vpop.permute.xlu0 %4356  ;;  %v9533_v41 = vld [vmem:[%s12448_s15 + $0xc] ss:$16 sps:$4 sm:$0xff]  }
 0xab8   : > { %8916 = vmatprep.mubr.msk.bf16.mxu0 %vm3025_vm10, %v9533_v41 }
 0xab9   : > { %4147 = vrot.lane.b32.xlu1 %v4143_v32, %s12444_s13 }
 0xaba   : > { %v4336_v11 = vpop.permute.xlu1 %4335 }
 0xabb   : > { %v4524_v50 = vpop.permute.xlu0 %4523 }
 0xabe   : > { %v11155_v3 = vpop.permute.xlu1 %4170 }
 0xabf   : > { %v4173_v51 = vmul.bf16 %v11155_v3, %v10898_v7 }
 0xac1   : > { %4177 = vrot.lane.b32.xlu1 %v4173_v51, %s12432_s6 }
 0xac2   : > { %v4379_v58 = vpop.permute.xlu1 %4378 }
 0xac6   : > { %v4545_v54 = vpop.permute.xlu1 %4544 }
 0xb1b   : > { %v4252_v56 = vpop.permute.xlu1 %4251 }
 0xb8a   : > { %v11160_v39 = vpop.f32.mrb[12].mxu0 }
 0xb8b   : > { %v3980_v53 = vmax.f32 %v11160_v39, 0.0  ;;  %v3975_v17 = vpop.f32.mrb[13].mxu0 }
 0xb8c   : > { %v11163_v8 = vpop.f32.mrb[14].mxu0 }
 0xb8d   : > { %3988 = vst.msk [vmem:[#allocation2 + $0x8] sm:$0xff] %vm3397_vm5, %v3980_v53  ;;  %v3981_v4 = vmax.f32 %v11163_v8, 0.0  ;;  %v3978_v33 = vpop.f32.mrb[15].mxu0 }
 0xb8f   : > { %3989 = vst.msk [vmem:[#allocation2 + $0x28] sm:$0xff] %vm3397_vm5, %v3981_v4 }
 0xb94   : > { %v4318_v7 = vld [vmem:[#allocation2 + $0x8] sm:$0xff] }
 0xb96   : > { %v4319_v20 = vld [vmem:[#allocation2 + $0x28] sm:$0xff] }
 0xb97   : > { %v4320_v22 = vpack.c.bf16 %v4319_v20, %v4318_v7 }
 0xb99   : > { %4321 = vst.msk [vmem:[#allocation3 + $0xc0] sm:$0xff] %vm3397_vm5, %v4320_v22  ;;  %4506 = vrot.lane.b32.xlu0 %v4320_v22, %s12366_s5  ;;  %4412 = vrot.lane.b32.xlu1 %v4320_v22, %s12433_s27  ;;  %v4402_v49 = vmul.bf16 %v4400_v27, %v4320_v22  ;;  %v4248_v40 = vmul.bf16 %v4320_v22, %v4245_v48  ;;  %v9532_v48 = vld [vmem:[%s12448_s15 + $0x4] ss:$16 sps:$4 sm:$0xff]   ;;  %s12450_s5 = sld [smem:[#allocation13_spill]] }
 0xb9a   : > { %v4218_v23 = vmul.bf16 %v4320_v22, %v11124_v34  ;;  %v4039_v59 = vmul.bf16 %v4320_v22, %v4036_v43  ;;  %v4009_v12 = vmul.bf16 %v4320_v22, %v11126_v38  ;;  %v4278_v19 = vmul.bf16 %v4320_v22, %v4275_v37  ;;  %4662 = vmatprep.mubr.bf16.mxu1 %v9532_v48  ;;  %v4043_v43 = vpop.permute.xlu1 %4042  ;;  %v4222_v37 = vpop.permute.xlu0 %4221 }
 0xb9b   : > { %v4431_v62 = vmul.bf16 %v4429_v16, %v4320_v22  ;;  %v4308_v36 = vmul.bf16 %v4320_v22, %v4305_v21  ;;  %v4453_v55 = vmul.bf16 %v4451_v28, %v4320_v22  ;;  %v4085_v25 = vmul.bf16 %v4320_v22, %v4082_v35 }
 0xb9c   : > { %v4114_v9 = vmul.bf16 %v4320_v22, %v4111_v15  ;;  %v4474_v10 = vmul.bf16 %v4472_v52, %v4320_v22  ;;  %v4338_v57 = vmul.bf16 %v4336_v11, %v4320_v22  ;;  %v4144_v45 = vmul.bf16 %v4320_v22, %v4141_v60 }
 0xb9d   : > { %4404 = vrot.lane.b32.xlu0 %v4402_v49, %s12430_s21  ;;  %4059 = vrot.lane.b32.xlu1 %v4320_v22, %s12443_s11  ;;  %v4359_v31 = vmul.bf16 %v4357_v1, %v4320_v22  ;;  %v4496_v34 = vmul.bf16 %v4494_v47, %v4320_v22  ;;  %v4381_v38 = vmul.bf16 %v4379_v58, %v4320_v22 }
 0xb9e   : > { %v4174_v2 = vmul.bf16 %v4320_v22, %v11155_v3  ;;  %v4547_v27 = vmul.bf16 %v4545_v54, %v4320_v22  ;;  %v4526_v44 = vmul.bf16 %v4524_v50, %v4320_v22  ;;  %v4312_v26 = vpop.permute.xlu1 %4311  ;;  %v4013_v18 = vpop.permute.xlu0 %4012 }
 0xba1   : > { %4253 = vrot.lane.b32.xlu0 %v4248_v40, %s12445_s3  ;;  %4223 = vrot.lane.b32.xlu1 %v4218_v23, %s12431_s24  ;;  %s12446_s3 = smov 118  }
 0xba2   : > { %v4089_v16 = vpop.permute.xlu1 %4088  ;;  %v4282_v21 = vpop.permute.xlu0 %4281 }
 0xba5   : > { %4044 = vrot.lane.b32.xlu0 %v4039_v59, %s12418_s28  ;;  %4014 = vrot.lane.b32.xlu1 %v4009_v12, %s12442_s12  ;;  %s12368_s12 = smov 80   ;;  %s12383_s28 = smov 123  }
 0xba6   : > { %v4058_v61 = vpop.permute.xlu0 %4057  ;;  %v11215_v35 = vpop.permute.xlu1 %4147 }
 0xba9   : > { %4194 = vrot.lane.b32.xlu0 %v4320_v22, %s12427_s7  ;;  %4283 = vrot.lane.b32.xlu1 %v4278_v19, %s12441_s30  ;;  %s12454_s30 = smov 4  }
 0xbaa   : > { %v4118_v6 = vpop.permute.xlu0 %4117  ;;  %v11217_v15 = vpop.permute.xlu1 %4177 }
 0xbad   : > { %4433 = vrot.lane.b32.xlu0 %v4431_v62, %s12429_s20  ;;  %4192 = vrot.lane.b32.xlu1 %v11189_v24, %s12427_s7 }
 0xbb1   : > { %4313 = vrot.lane.b32.xlu0 %v4308_v36, %s12426_s8  ;;  %4455 = vrot.lane.b32.xlu1 %v4453_v55, %s12446_s3  ;;  %s12476_s3 = sld [smem:[#allocation7_spill]] }
 0xbb5   : > { %4090 = vrot.lane.b32.xlu0 %v4085_v25, %s12440_s29  ;;  %4119 = vrot.lane.b32.xlu1 %v4114_v9, %s12439_s9  ;;  %s12447_s9 = smov 122   ;;  %s12455_s29 = smov 123  }
 0xbb9   : > { %4476 = vrot.lane.b32.xlu0 %v4474_v10, %s12438_s26  ;;  %4340 = vrot.lane.b32.xlu1 %v4338_v57, %s12425_s2  ;;  %s12374_s26 = smov 5  }
 0xbbd   : > { %4149 = vrot.lane.b32.xlu0 %v4144_v45, %s12444_s13  ;;  %4361 = vrot.lane.b32.xlu1 %v4359_v31, %s12419_s0  ;;  %s12452_s0 = smov 96   ;;  %s12378_s13 = smov 124  }
 0xbc1   : > { %4498 = vrot.lane.b32.xlu0 %v4496_v34, %s12437_s23  ;;  %4383 = vrot.lane.b32.xlu1 %v4381_v38, %s12447_s9  ;;  %s12453_s9 = sld [smem:[#allocation9_spill]]  ;;  %s12456_s23 = smov 125  }
 0xbc5   : > { %4179 = vrot.lane.b32.xlu0 %v4174_v2, %s12432_s6  ;;  %4549 = vrot.lane.b32.xlu1 %v4547_v27, %s12436_s19  ;;  %s12369_s19 = smov 4  }
 0xbc9   : > { %4528 = vrot.lane.b32.xlu0 %v4526_v44, %s12420_s1  ;;  %s12459_s1 = smov 124  }
 0xc0b   : > { %v4507_v63 = vpop.permute.xlu0 %4506  ;;  %v4413_v28 = vpop.permute.xlu1 %4412 }
 0xc0c   : > { %4509 = vst.msk [vmem:[#allocation3 + $0x160] sm:$0xff] %vm3397_vm5, %v4507_v63  ;;  %4415 = vst.msk [vmem:[#allocation3 + $0x110] sm:$0xff] %vm3397_vm5, %v4413_v28 }
 0xc0f   : > { %v4405_v52 = vpop.permute.xlu0 %4404  ;;  %v4060_v60 = vpop.permute.xlu1 %4059 }
 0xc10   : > { %4407 = vst.msk [vmem:[#allocation3 + $0x100] sm:$0xff] %vm3397_vm5, %v4405_v52  ;;  %v4062_v32 = vsel %vm3025_vm10, %v4058_v61, %v4060_v60 }
 0xc11   : > { %4064 = vst.msk [vmem:[#allocation3 + $0x20] sm:$0xff] %vm3397_vm5, %v4062_v32 }
 0xc13   : > { %v4254_v11 = vpop.permute.xlu0 %4253  ;;  %v4224_v51 = vpop.permute.xlu1 %4223  ;;  %v4578_v23 = vld [vmem:[#allocation3 + $0x110] sm:$0xff] }
 0xc14   : > { %v4256_v3 = vsel %vm4255_vm8, %v4252_v56, %v4254_v11  ;;  %v4225_v17 = vsel %vm3553_vm4, %v4222_v37, %v4224_v51  ;;  %vm4976_vm8 = vcmask 1047680  }
 0xc15   : > { %4258 = vst.msk [vmem:[#allocation3 + $0x90] sm:$0xff] %vm3397_vm5, %v4256_v3  ;;  %4227 = vst.msk [vmem:[#allocation3 + $0x80] sm:$0xff] %vm3397_vm5, %v4225_v17  ;;  %v4583_v3 = vld [vmem:[#allocation3 + $0x160] sm:$0xff] }
 0xc16   : > { %4981 = vst.msk [vmem:[#allocation2 + $0x48] sm:$0xff] %vm4976_vm8, %v11185_v29  ;;  %4977 = vst.msk [vmem:[#allocation2 + $0x8] sm:$0xff] %vm4976_vm8, %v11185_v29 }
 0xc17   : > { %v4045_v33 = vpop.permute.xlu0 %4044  ;;  %v4577_v7 = vld [vmem:[#allocation3 + $0x100] sm:$0xff]  ;;  %v4015_v22 = vpop.permute.xlu1 %4014  ;;  %4979 = vst.msk [vmem:[#allocation2 + $0x28] sm:$0xff] %vm4976_vm8, %v11185_v29  ;;  %4983 = vst.msk [vmem:[#allocation2 + $0x68] sm:$0xff] %vm4976_vm8, %v11185_v29 }
 0xc18   : > { %v4046_v20 = vsel %vm12372_vm7, %v4043_v43, %v4045_v33  ;;  %4680 = vmatpush1.bf16.msra.mxu0 %v4577_v7  ;;  %v4016_v49 = vsel %vm2637_vm14, %v4013_v18, %v4015_v22  ;;  %vm12449_vm14 = vcmask 113664   ;;  %v4563_v2 = vld [vmem:[#allocation3 + $0x20] sm:$0xff]  ;;  %vm5027_vm7 = vcmask 97344  }
 0xc19   : > { %4048 = vst.msk [vmem:[#allocation3 + $0x10] sm:$0xff] %vm3397_vm5, %v4046_v20  ;;  %4681 = vmatprep.subr.bf16.mxu0 %v9619_v5  ;;  %4018 = vst.msk [vmem:[#allocation3] sm:$0xff] %vm3397_vm5, %v4016_v49  ;;  %v9530_v7 = vld [vmem:[%s12448_s15] ss:$16 sps:$4 sm:$0xff]   ;;  %v9536_v20 = vld [vmem:[%s12448_s15 + $0x24] ss:$16 sps:$4 sm:$0xff]  }
 0xc1a   : > { %v9535_v49 = vld [vmem:[%s12448_s15 + $0x8] ss:$16 sps:$4 sm:$0xff]  }
 0xc1b   : > { %v4195_v40 = vpop.permute.xlu0 %4194  ;;  %v4284_v59 = vpop.permute.xlu1 %4283 }
 0xc1c   : > { %4682 = vmatpush1.bf16.msra.mxu0 %v4578_v23  ;;  %v4285_v12 = vsel %vm2324_vm12, %v4282_v21, %v4284_v59  ;;  %v4569_v19 = vld [vmem:[#allocation3 + $0x80] sm:$0xff]  ;;  %v4570_v9 = vld [vmem:[#allocation3 + $0x90] sm:$0xff]  ;;  %vm4151_vm12 = vcmask 80896   ;;  %v9541_v59 = vld [vmem:[%s12448_s15 + $0x28] ss:$16 sps:$4 sm:$0xff]  }
 0xc1d   : > { %4683 = vmatprep.subr.bf16.mxu0 %v9619_v5  ;;  %4287 = vst.msk [vmem:[#allocation3 + $0xa0] sm:$0xff] %vm3397_vm5, %v4285_v12  ;;  %9026 = vmatprep.subr.bf16.mxu1 %v4569_v19  ;;  %v9538_v23 = vld [vmem:[%s12448_s15 + $0x20] ss:$16 sps:$4 sm:$0xff]  }
 0xc1e   : > { %v4732_v12 = vld [vmem:[%s12450_s5] sm:$0xf]  ;;  %s12451_s5 = smov 112  }
 0xc1f   : > { %v4434_v62 = vpop.permute.xlu0 %4433  ;;  %v4193_v36 = vpop.permute.xlu1 %4192  ;;  %v4742_v19 = vsel %vm906_vm3, %v4732_v12, 0 }
 0xc20   : > { %4436 = vst.msk [vmem:[#allocation3 + $0x120] sm:$0xff] %vm3397_vm5, %v4434_v62  ;;  %v4196_v55 = vsel %vm3401_vm15, %v4193_v36, %v4195_v40  ;;  %v4561_v25 = vld [vmem:[#allocation3] sm:$0xff]  ;;  %v4562_v1 = vld [vmem:[#allocation3 + $0x10] sm:$0xff]  ;;  %v9539_v40 = vld [vmem:[%s12448_s15 + $0x2c] ss:$16 sps:$4 sm:$0xff]  }
 0xc21   : > { %4198 = vst.msk [vmem:[#allocation3 + $0x70] sm:$0xff] %vm3397_vm5, %v4196_v55  ;;  %9027 = vmatpush3.bf16.msra.mxu1 %v4561_v25 }
 0xc22   : > { %9028 = vmatprep.subr.bf16.mxu1 %v4570_v9 }
 0xc23   : > { %v4314_v47 = vpop.permute.xlu0 %4313  ;;  %v4456_v57 = vpop.permute.xlu1 %4455 }
 0xc24   : > { %v4315_v10 = vsel %vm1073_vm1, %v4312_v26, %v4314_v47  ;;  %4458 = vst.msk [vmem:[#allocation3 + $0x130] sm:$0xff] %vm3397_vm5, %v4456_v57  ;;  %v4571_v58 = vld [vmem:[#allocation3 + $0xa0] sm:$0xff] }
 0xc25   : > { %4317 = vst.msk [vmem:[#allocation3 + $0xb0] sm:$0xff] %vm3397_vm5, %v4315_v10  ;;  %9029 = vmatpush3.bf16.msra.mxu1 %v4562_v1  ;;  %v4573_v26 = vld [vmem:[#allocation3 + $0xc0] sm:$0xff] }
 0xc26   : > { %9030 = vmatprep.subr.bf16.mxu1 %v4571_v58 }
 0xc27   : > { %v4091_v45 = vpop.permute.xlu0 %4090  ;;  %v4579_v31 = vld [vmem:[#allocation3 + $0x120] sm:$0xff]  ;;  %v4120_v38 = vpop.permute.xlu1 %4119 }
 0xc28   : > { %v4092_v34 = vsel %vm12373_vm6, %v4089_v16, %v4091_v45  ;;  %4684 = vmatpush1.bf16.msra.mxu0 %v4579_v31  ;;  %v4121_v54 = vsel %vm12449_vm14, %v4118_v6, %v4120_v38  ;;  %v4568_v33 = vld [vmem:[#allocation3 + $0x70] sm:$0xff]  ;;  %vm4985_vm14 = vcmask 31744   ;;  %vm5048_vm6 = vcmask 130144  }
 0xc29   : > { %4094 = vst.msk [vmem:[#allocation3 + $0x30] sm:$0xff] %vm3397_vm5, %v4092_v34  ;;  %4685 = vmatprep.subr.bf16.mxu0 %v9619_v5  ;;  %4123 = vst.msk [vmem:[#allocation3 + $0x40] sm:$0xff] %vm3397_vm5, %v4121_v54  ;;  %9031 = vmatpush3.bf16.msra.mxu1 %v4563_v2 }
 0xc2b   : > { %v4477_v50 = vpop.permute.xlu0 %4476  ;;  %v4341_v27 = vpop.permute.xlu1 %4340  ;;  %v4580_v48 = vld [vmem:[#allocation3 + $0x130] sm:$0xff] }
 0xc2c   : > { %4479 = vst.msk [vmem:[#allocation3 + $0x140] sm:$0xff] %vm3397_vm5, %v4477_v50  ;;  %v4572_v44 = vld [vmem:[#allocation3 + $0xb0] sm:$0xff]  ;;  %4343 = vst.msk [vmem:[#allocation3 + $0xd0] sm:$0xff] %vm3397_vm5, %v4341_v27  ;;  %4686 = vmatpush1.bf16.msra.mxu0 %v4580_v48 }
 0xc2d   : > { %9032 = vmatprep.subr.bf16.mxu1 %v4572_v44  ;;  %4687 = vmatprep.subr.bf16.mxu0 %v9619_v5 }
 0xc2f   : > { %v4150_v41 = vpop.permute.xlu0 %4149  ;;  %v4362_v43 = vpop.permute.xlu1 %4361 }
 0xc30   : > { %v4152_v56 = vsel %vm4151_vm12, %v11215_v35, %v4150_v41  ;;  %v4564_v37 = vld [vmem:[#allocation3 + $0x30] sm:$0xff]  ;;  %4364 = vst.msk [vmem:[#allocation3 + $0xe0] sm:$0xff] %vm3397_vm5, %v4362_v43  ;;  %v4565_v61 = vld [vmem:[#allocation3 + $0x40] sm:$0xff]  ;;  %vm5006_vm12 = vcmask 64544  }
 0xc31   : > { %4154 = vst.msk [vmem:[#allocation3 + $0x50] sm:$0xff] %vm3397_vm5, %v4152_v56  ;;  %9033 = vmatpush3.bf16.msra.mxu1 %v4564_v37 }
 0xc32   : > { %9034 = vmatprep.subr.bf16.mxu1 %v4573_v26 }
 0xc33   : > { %v4499_v18 = vpop.permute.xlu0 %4498  ;;  %v4581_v16 = vld [vmem:[#allocation3 + $0x140] sm:$0xff]  ;;  %v4384_v21 = vpop.permute.xlu1 %4383  ;;  %v4574_v35 = vld [vmem:[#allocation3 + $0xd0] sm:$0xff] }
 0xc34   : > { %4501 = vst.msk [vmem:[#allocation3 + $0x150] sm:$0xff] %vm3397_vm5, %v4499_v18  ;;  %4688 = vmatpush1.bf16.msra.mxu0 %v4581_v16  ;;  %4386 = vst.msk [vmem:[#allocation3 + $0xf0] sm:$0xff] %vm3397_vm5, %v4384_v21 }
 0xc35   : > { %9035 = vmatpush3.bf16.msra.mxu1 %v4565_v61  ;;  %4689 = vmatprep.subr.bf16.mxu0 %v9619_v5 }
 0xc36   : > { %9036 = vmatprep.subr.bf16.mxu1 %v4574_v35 }
 0xc37   : > { %v4180_v6 = vpop.permute.xlu0 %4179  ;;  %v4550_v28 = vpop.permute.xlu1 %4549  ;;  %v4575_v60 = vld [vmem:[#allocation3 + $0xe0] sm:$0xff] }
 0xc38   : > { %v4181_v63 = vsel %vm3507_vm0, %v11217_v15, %v4180_v6  ;;  %v4566_v52 = vld [vmem:[#allocation3 + $0x50] sm:$0xff]  ;;  %4552 = vst.msk [vmem:[#allocation3 + $0x180] sm:$0xff] %vm3397_vm5, %v4550_v28 }
 0xc39   : > { %4183 = vst.msk [vmem:[#allocation3 + $0x60] sm:$0xff] %vm3397_vm5, %v4181_v63  ;;  %9037 = vmatpush3.bf16.msra.mxu1 %v4566_v52 }
 0xc3a   : > { %9038 = vmatprep.subr.bf16.mxu1 %v4575_v60 }
 0xc3b   : > { %v4529_v32 = vpop.permute.xlu0 %4528  ;;  %v4582_v11 = vld [vmem:[#allocation3 + $0x150] sm:$0xff] }
 0xc3c   : > { %4531 = vst.msk [vmem:[#allocation3 + $0x170] sm:$0xff] %vm3397_vm5, %v4529_v32  ;;  %4690 = vmatpush1.bf16.msra.mxu0 %v4582_v11  ;;  %v4576_v15 = vld [vmem:[#allocation3 + $0xf0] sm:$0xff] }
 0xc3d   : > { %4691 = vmatprep.subr.bf16.mxu0 %v9619_v5 }
 0xc3f   : > { %v4585_v22 = vld [vmem:[#allocation3 + $0x180] sm:$0xff] }
 0xc40   : > { %4692 = vmatpush1.bf16.msra.mxu0 %v4583_v3  ;;  %v4567_v51 = vld [vmem:[#allocation3 + $0x60] sm:$0xff] }
 0xc41   : > { %9039 = vmatpush3.bf16.msra.mxu1 %v4567_v51  ;;  %4693 = vmatprep.subr.bf16.mxu0 %v9619_v5 }
 0xc42   : > { %9040 = vmatprep.subr.bf16.mxu1 %v4576_v15 }
 0xc43   : > { %v4584_v17 = vld [vmem:[#allocation3 + $0x170] sm:$0xff] }
 0xc44   : > { %4694 = vmatpush1.bf16.msra.mxu0 %v4584_v17 }
 0xc45   : > { %9041 = vmatpush3.bf16.msra.mxu1 %v4568_v33  ;;  %4695 = vmatprep.subr.bf16.mxu0 %v9619_v5 }
 0xc46   : > { %9404 = vmatprep.subr.msk.bf16.mxu1 %vm906_vm3, %v4732_v12 }
 0xc48   : > { %4663 = vmatmul.mubr.bf16.vlgmr.msra.gmra.mrb[36].mxu1 %v9530_v7  ;;  %4696 = vmatpush1.bf16.msra.mxu0 %v4585_v22 }
 0xc49   : > { %4670 = vmatprep.mubr.bf16.mxu1 %v9536_v20  ;;  %9405 = vmatprep.subr.msk.bf16.mxu0 %vm906_vm3, %v4732_v12 }
 0xc4a   : > { %9263 = vmatpush3.bf16.msra.mxu1 %v4742_v19 }
 0xc4b   : > { %4712 = vmatmul.mubr.bf16.vlgmr.msra.gmra.mrb[16].mxu0 %v9535_v49  ;;  %9406 = vmatprep.subr.msk.bf16.mxu1 %vm906_vm3, %v4732_v12 }
 0xc4c   : > { %8917 = vmatprep.mubr.msk.bf16.mxu0 %vm3025_vm10, %v9539_v40  ;;  %9269 = vmatpush3.bf16.msra.mxu0 %v4742_v19 }
 0xc4d   : > { %9407 = vmatprep.subr.msk.bf16.mxu0 %vm906_vm3, %v4732_v12 }
 0xc50   : > { %4671 = vmatmul.mubr.bf16.gmra.mrb[40].mxu1 %v9538_v23 }
 0xc53   : > { %4720 = vmatmul.mubr.bf16.gmra.mrb[20].mxu0 %v9541_v59 }
 0xd1b   : > { %v9042_v62 = vpop.f32.mrb[36].mxu1 }
 0xd1c   : > { %v9043_v36 = vpop.f32.mrb[37].mxu1 }
 0xd1d   : > { %v9044_v55 = vadd.f32 %v9043_v36, %v9042_v62  ;;  %v9045_v25 = vpop.f32.mrb[38].mxu1  ;;  %v5239_v36 = vld [vmem:[%s12453_s9] sm:$0x4] }
 0xd1e   : > { %v9046_v9 = vpop.f32.mrb[39].mxu1  ;;  %v4713_v47 = vpop.f32.mrb[16].mxu0 }
 0xd1f   : > { %v9047_v10 = vadd.f32 %v9046_v9, %v9045_v25  ;;  %v4714_v57 = vadd.f32 %v9044_v55, %v4713_v47  ;;  %v4715_v1 = vpop.f32.mrb[17].mxu0  ;;  %v5065_v55 = vld [vmem:[%s12453_s9] sm:$0x1]  ;;  %v5241_v25 = vshrl.u32 %v5239_v36, 16  ;;  %v5143_v47 = vld [vmem:[%s12453_s9] sm:$0x2] }
 0xd20   : > { %v4716_v58 = vpop.f32.mrb[18].mxu0  ;;  %v5067_v9 = vpack.i.b16 %v5065_v55, %v5065_v55  ;;  %v5270_v1 = vld [vmem:[%s12453_s9] sm:$0x8] }
 0xd21   : > { %v4717_v45 = vadd.f32 %v9047_v10, %v4716_v58  ;;  %v4718_v31 = vpop.f32.mrb[19].mxu0  ;;  %v4728_v34 = vmax.f32 %v4714_v57, 0.0  ;;  %v5190_v10 = vld [vmem:[%s12453_s9] sm:$0x2]  ;;  %v5242_v57 = vpack.i.b16 %v5241_v25, %v5241_v25 }
 0xd22   : > { %v5072_v58 = vrot.slane %v5067_v9, %v9826_v14  ;;  %v5192_v31 = vshrl.u32 %v5190_v10, 16 }
 0xd23   : > { %v4729_v38 = vmax.f32 %v4717_v45, 0.0  ;;  %v9048_v54 = vpop.f32.mrb[40].mxu1  ;;  %v5145_v45 = vpack.i.b16 %v5143_v47, %v5143_v47  ;;  %v9544_v47 = vld [vmem:[%s12280_s16 + $0x4] ss:$12 sps:$4 sm:$0xff]  }
 0xd24   : > { %v9049_v2 = vpop.f32.mrb[41].mxu1 }
 0xd25   : > { %v4733_v50 = vpack.c.bf16 %v4729_v38, %v4728_v34  ;;  %v9050_v27 = vadd.f32 %v9049_v2, %v9048_v54  ;;  %v9051_v48 = vpop.f32.mrb[42].mxu1  ;;  %v5247_v34 = vrot.slane %v5242_v57, %v9843_v30  ;;  %v5272_v38 = vpack.i.b16 %v5270_v1, %v5270_v1  ;;  %v5316_v54 = vld [vmem:[%s12453_s9 + $0x4] sm:$0x1] }
 0xd26   : > { %v9052_v44 = vpop.f32.mrb[43].mxu1  ;;  %v4721_v41 = vpop.f32.mrb[20].mxu0  ;;  %v5150_v2 = vrot.slane %v5145_v45, %v9824_v13  ;;  %v5533_v45 = vld [vmem:[%s12453_s9] sm:$0x1] }
 0xd27   : > { %v9053_v56 = vadd.f32 %v9052_v44, %v9051_v48  ;;  %v4722_v43 = vadd.f32 %v9050_v27, %v4721_v41  ;;  %v4723_v37 = vpop.f32.mrb[21].mxu0  ;;  %4795 = vrot.lane.b32.xlu0 %v4733_v50, %s12451_s5  ;;  %9264 = vmatprep.mubr.msk.bf16.mxu1 %vm3401_vm15, %v4733_v50  ;;  %v5277_v27 = vrot.slane %v5272_v38, %v9867_v46 }
 0xd28   : > { %v4724_v26 = vpop.f32.mrb[22].mxu0  ;;  %v5318_v48 = vpack.i.b16 %v5316_v54, %v5316_v54  ;;  %v5735_v54 = vld [vmem:[%s12453_s9] sm:$0x8] }
 0xd29   : > { %v4725_v18 = vadd.f32 %v9053_v56, %v4724_v26  ;;  %v4726_v16 = vpop.f32.mrb[23].mxu0  ;;  %v4730_v21 = vmax.f32 %v4722_v43, 0.0 }
 0xd2a   : > { %v5323_v41 = vrot.slane %v5318_v48, %v9826_v14 }
 0xd2b   : > { %v4731_v61 = vmax.f32 %v4725_v18, 0.0  ;;  %4854 = vrot.lane.b32.xlu0 %v4733_v50, %s12452_s0 }
 0xd2d   : > { %v4734_v35 = vpack.c.bf16 %v4731_v61, %v4730_v21 }
 0xd2f   : > { %4797 = vrot.lane.b32.xlu1 %v4734_v35, %s12451_s5  ;;  %4913 = vrot.lane.b32.xlu0 %v4733_v50, %s12368_s12  ;;  %v5193_v50 = vpack.i.b16 %v5192_v31, %v5192_v31  ;;  %v5704_v31 = vld [vmem:[%s12453_s9] sm:$0x4] }
 0xd30   : > { %9265 = vmatmul.mubr.msk.bf16.vlgmr.msra.gmra.mrb[44].mxu1 %vm3401_vm15, %v4734_v35  ;;  %v5706_v38 = vshrl.u32 %v5704_v31, 16 }
 0xd31   : > { %9275 = vmatpush3.bf16.msra.mxu1 %v4742_v19  ;;  %v5198_v44 = vrot.slane %v5193_v50, %v9824_v13 }
 0xd33   : > { %4856 = vrot.lane.b32.xlu1 %v4734_v35, %s12452_s0 }
 0xd37   : > { %4915 = vrot.lane.b32.xlu1 %v4734_v35, %s12368_s12  ;;  %s9656_s12 = smov 12  }
 0xd99   : > { %v4796_v6 = vpop.permute.xlu0 %4795 }
 0xd9a   : > { %9270 = vmatprep.mubr.msk.bf16.mxu0 %vm3401_vm15, %v4796_v6 }
 0xd9d   : > { %v4855_v63 = vpop.permute.xlu0 %4854 }
 0xd9e   : > { %9276 = vmatprep.mubr.msk.bf16.mxu1 %vm3401_vm15, %v4855_v63 }
 0xda1   : > { %v4798_v28 = vpop.permute.xlu1 %4797  ;;  %v4914_v52 = vpop.permute.xlu0 %4913 }
 0xda2   : > { %9271 = vmatmul.mubr.msk.bf16.vlgmr.msra.gmra.mrb[24].mxu0 %vm3401_vm15, %v4798_v28 }
 0xda3   : > { %9282 = vmatprep.mubr.msk.bf16.mxu0 %vm3401_vm15, %v4914_v52  ;;  %9281 = vmatpush3.bf16.msra.mxu0 %v4742_v19 }
 0xda5   : > { %v4857_v60 = vpop.permute.xlu1 %4856 }
 0xda6   : > { %9277 = vmatmul.mubr.msk.bf16.vlgmr.msra.gmra.mrb[48].mxu1 %vm3401_vm15, %v4857_v60 }
 0xda7   : > { %5435 = vmatprep.mubr.bf16.mxu1 %v9544_v47 }
 0xda9   : > { %v4916_v32 = vpop.permute.xlu1 %4915 }
 0xdaa   : > { %9283 = vmatmul.mubr.msk.bf16.vlgmr.msra.gmra.mrb[28].mxu0 %vm3401_vm15, %v4916_v32 }
 0xe03   : > { %v9266_v11 = vpop.f32.mrb[44].mxu1 }
 0xe04   : > { %4988 = vst.msk [vmem:[#allocation2 + $0x48] sm:$0xff] %vm4985_vm14, %v9266_v11  ;;  %v4778_v3 = vpop.f32.mrb[45].mxu1 }
 0xe05   : > { %4986 = vst.msk [vmem:[#allocation2 + $0x8] sm:$0xff] %vm4985_vm14, %v4778_v3  ;;  %v9267_v51 = vpop.f32.mrb[46].mxu1 }
 0xe06   : > { %4989 = vst.msk [vmem:[#allocation2 + $0x68] sm:$0xff] %vm4985_vm14, %v9267_v51  ;;  %v4781_v15 = vpop.f32.mrb[47].mxu1 }
 0xe07   : > { %4987 = vst.msk [vmem:[#allocation2 + $0x28] sm:$0xff] %vm4985_vm14, %v4781_v15 }
 0xe75   : > { %v9272_v17 = vpop.f32.mrb[24].mxu0 }
 0xe76   : > { %4998 = vrot.lane.b32.xlu0 %v9272_v17, %s12369_s19  ;;  %v4839_v33 = vpop.f32.mrb[25].mxu0 }
 0xe77   : > { %v9273_v7 = vpop.f32.mrb[26].mxu0 }
 0xe78   : > { %5000 = vrot.lane.b32.xlu1 %v9273_v7, %s12369_s19  ;;  %v4842_v20 = vpop.f32.mrb[27].mxu0 }
 0xe79   : > { %v9278_v22 = vpop.f32.mrb[48].mxu1 }
 0xe7a   : > { %5019 = vrot.lane.b32.xlu0 %v9278_v22, %s12427_s7  ;;  %v4898_v49 = vpop.f32.mrb[49].mxu1 }
 0xe7b   : > { %v9279_v40 = vpop.f32.mrb[50].mxu1 }
 0xe7c   : > { %5021 = vrot.lane.b32.xlu1 %v9279_v40, %s12427_s7  ;;  %v4901_v23 = vpop.f32.mrb[51].mxu1 }
 0xe7d   : > { %v9284_v59 = vpop.f32.mrb[28].mxu0 }
 0xe7e   : > { %v4957_v12 = vpop.f32.mrb[29].mxu0  ;;  %4994 = vrot.lane.b32.xlu0 %v4839_v33, %s12369_s19 }
 0xe7f   : > { %v9285_v19 = vpop.f32.mrb[30].mxu0 }
 0xe80   : > { %v4960_v62 = vpop.f32.mrb[31].mxu0  ;;  %4996 = vrot.lane.b32.xlu1 %v4842_v20, %s12369_s19  ;;  %s12380_s19 = smov 125  }
 0xe82   : > { %5015 = vrot.lane.b32.xlu0 %v4898_v49, %s12427_s7 }
 0xe84   : > { %5017 = vrot.lane.b32.xlu1 %v4901_v23, %s12427_s7 }
 0xe86   : > { %5036 = vrot.lane.b32.xlu0 %v4957_v12, %s9656_s12 }
 0xe88   : > { %5038 = vrot.lane.b32.xlu1 %v4960_v62, %s9656_s12 }
 0xe8a   : > { %5040 = vrot.lane.b32.xlu0 %v9284_v59, %s9656_s12 }
 0xe8c   : > { %5042 = vrot.lane.b32.xlu1 %v9285_v19, %s9656_s12  ;;  %s12376_s12 = smov 3  }
 0xe8e   : > { %5074 = vrot.lane.b32.xlu0 %v5072_v58, %s12383_s28  ;;  %v9547_v58 = vld [vmem:[%s12280_s16 + $0x8] ss:$12 sps:$4 sm:$0xff]  }
 0xe8f   : > { %9290 = vmatprep.mubr.msk.bf16.mxu0 %vm1929_vm13, %v9547_v58 }
 0xe90   : > { %5249 = vrot.lane.b32.xlu1 %v5247_v34, %s12426_s8  ;;  %v5535_v34 = vpack.i.b16 %v5533_v45, %v5533_v45 }
 0xe92   : > { %5152 = vrot.lane.b32.xlu0 %v5150_v2, %s12380_s19  ;;  %v5609_v2 = vld [vmem:[%s12453_s9] sm:$0x2]  ;;  %v5540_v48 = vrot.slane %v5535_v34, %v9826_v14 }
 0xe93   : > { %v5611_v50 = vpack.i.b16 %v5609_v2, %v5609_v2 }
 0xe94   : > { %5279 = vrot.lane.b32.xlu1 %v5277_v27, %s12376_s12  ;;  %v5655_v27 = vld [vmem:[%s12453_s9] sm:$0x2] }
 0xe96   : > { %5200 = vrot.lane.b32.xlu0 %v5198_v44, %s12425_s2  ;;  %v5707_v44 = vpack.i.b16 %v5706_v38, %v5706_v38 }
 0xe98   : > { %5325 = vrot.lane.b32.xlu1 %v5323_v41, %s12374_s26  ;;  %v5737_v41 = vpack.i.b16 %v5735_v54, %v5735_v54 }
 0xe9c   : > { %5120 = vrot.lane.b32.xlu1 %v11189_v24, %s12454_s30 }
 0xee8   : > { %v4999_v56 = vpop.permute.xlu0 %4998 }
 0xee9   : > { %5009 = vst.msk [vmem:[#allocation2 + $0x48] sm:$0xff] %vm5006_vm12, %v4999_v56  ;;  %v5657_v56 = vshrl.u32 %v5655_v27, 16 }
 0xeea   : > { %v5001_v43 = vpop.permute.xlu1 %5000 }
 0xeeb   : > { %5010 = vst.msk [vmem:[#allocation2 + $0x68] sm:$0xff] %vm5006_vm12, %v5001_v43  ;;  %v5781_v43 = vld [vmem:[%s12453_s9 + $0x4] sm:$0x1]  ;;  %s9663_s9 = smov 88  }
 0xeec   : > { %v5020_v37 = vpop.permute.xlu0 %5019 }
 0xeed   : > { %5030 = vst.msk [vmem:[#allocation2 + $0x48] sm:$0xff] %vm5027_vm7, %v5020_v37  ;;  %v5712_v37 = vrot.slane %v5707_v44, %v9843_v30 }
 0xeee   : > { %v5022_v26 = vpop.permute.xlu1 %5021 }
 0xeef   : > { %5031 = vst.msk [vmem:[#allocation2 + $0x68] sm:$0xff] %vm5027_vm7, %v5022_v26  ;;  %v5616_v26 = vrot.slane %v5611_v50, %v9824_v13 }
 0xef0   : > { %v4995_v18 = vpop.permute.xlu0 %4994 }
 0xef1   : > { %5007 = vst.msk [vmem:[#allocation2 + $0x8] sm:$0xff] %vm5006_vm12, %v4995_v18  ;;  %v5658_v18 = vpack.i.b16 %v5657_v56, %v5657_v56 }
 0xef2   : > { %v4997_v16 = vpop.permute.xlu1 %4996 }
 0xef3   : > { %5008 = vst.msk [vmem:[#allocation2 + $0x28] sm:$0xff] %vm5006_vm12, %v4997_v16  ;;  %v5742_v16 = vrot.slane %v5737_v41, %v9867_v46  ;;  %vm12462_vm12 = vmmov 0  }
 0xef4   : > { %v5016_v21 = vpop.permute.xlu0 %5015 }
 0xef5   : > { %5028 = vst.msk [vmem:[#allocation2 + $0x8] sm:$0xff] %vm5027_vm7, %v5016_v21  ;;  %v5783_v21 = vpack.i.b16 %v5781_v43, %v5781_v43 }
 0xef6   : > { %v5018_v61 = vpop.permute.xlu1 %5017 }
 0xef7   : > { %5029 = vst.msk [vmem:[#allocation2 + $0x28] sm:$0xff] %vm5027_vm7, %v5018_v61  ;;  %v5663_v61 = vrot.slane %v5658_v18, %v9824_v13  ;;  %vm5171_vm7 = vcmask 23552   ;;  %v9545_v18 = vld [vmem:[%s12280_s16 + $0x1c] ss:$12 sps:$4 sm:$0xff]  }
 0xef8   : > { %v5037_v35 = vpop.permute.xlu0 %5036 }
 0xef9   : > { %5049 = vst.msk [vmem:[#allocation2 + $0x8] sm:$0xff] %vm5048_vm6, %v5037_v35  ;;  %v5788_v35 = vrot.slane %v5783_v21, %v9826_v14 }
 0xefa   : > { %v5039_v6 = vpop.permute.xlu1 %5038 }
 0xefb   : > { %5050 = vst.msk [vmem:[#allocation2 + $0x28] sm:$0xff] %vm5048_vm6, %v5039_v6 }
 0xefc   : > { %v5041_v63 = vpop.permute.xlu0 %5040 }
 0xefd   : > { %5051 = vst.msk [vmem:[#allocation2 + $0x48] sm:$0xff] %vm5048_vm6, %v5041_v63 }
 0xefe   : > { %v5043_v28 = vpop.permute.xlu1 %5042 }
 0xeff   : > { %5052 = vst.msk [vmem:[#allocation2 + $0x68] sm:$0xff] %vm5048_vm6, %v5043_v28  ;;  %vm5093_vm6 = vcmask 39936  }
 0xf00   : > { %v5225_v52 = vld [vmem:[#allocation2 + $0x8] sm:$0xff]  ;;  %v5075_v60 = vpop.permute.xlu0 %5074 }
 0xf01   : > { %v5077_v32 = vmul.bf16 %v5075_v60, %v11189_v24  ;;  %5509 = vst.msk [vmem:[#allocation2 + $0x8] sm:$0xff] %vm4976_vm8, %v11185_v29 }
 0xf02   : > { %v5226_v11 = vld [vmem:[#allocation2 + $0x28] sm:$0xff]  ;;  %v5250_v40 = vpop.permute.xlu1 %5249 }
 0xf03   : > { %v5229_v3 = vpack.c.bf16 %v5226_v11, %v5225_v52  ;;  %5085 = vrot.lane.b32.xlu0 %v5077_v32, %s12374_s26  ;;  %5511 = vst.msk [vmem:[#allocation2 + $0x28] sm:$0xff] %vm4976_vm8, %v11185_v29 }
 0xf04   : > { %v5227_v51 = vld [vmem:[#allocation2 + $0x48] sm:$0xff]  ;;  %v5153_v22 = vpop.permute.xlu0 %5152 }
 0xf05   : > { %5231 = vst.msk [vmem:[#allocation3 + $0x80] sm:$0xff] %vm3025_vm10, %v5229_v3  ;;  %5118 = vrot.lane.b32.xlu1 %v5229_v3, %s12454_s30  ;;  %v5078_v20 = vmul.bf16 %v5229_v3, %v5075_v60  ;;  %v5155_v49 = vmul.bf16 %v5153_v22, %v11189_v24  ;;  %v5252_v23 = vmul.bf16 %v5250_v40, %v5229_v3 }
 0xf06   : > { %5513 = vst.msk [vmem:[#allocation2 + $0x48] sm:$0xff] %vm4976_vm8, %v11185_v29  ;;  %v5228_v15 = vld [vmem:[#allocation2 + $0x68] sm:$0xff]  ;;  %v5280_v59 = vpop.permute.xlu1 %5279  ;;  %v5156_v36 = vmul.bf16 %v5229_v3, %v5153_v22 }
 0xf07   : > { %v5230_v17 = vpack.c.bf16 %v5228_v15, %v5227_v51  ;;  %5089 = vrot.lane.b32.xlu0 %v5077_v32, %s12374_s26  ;;  %5515 = vst.msk [vmem:[#allocation2 + $0x68] sm:$0xff] %vm4976_vm8, %v11185_v29  ;;  %v5282_v62 = vmul.bf16 %v5280_v59, %v5229_v3  ;;  %vm6051_vm8 = vcmask 1041408  }
 0xf08   : > { %v5201_v55 = vpop.permute.xlu0 %5200 }
 0xf09   : > { %5232 = vst.msk [vmem:[#allocation3 + $0x90] sm:$0xff] %vm3025_vm10, %v5230_v17  ;;  %v5080_v33 = vmul.bf16 %v5230_v17, %v5075_v60  ;;  %v5253_v29 = vmul.bf16 %v5250_v40, %v5230_v17  ;;  %v5283_v12 = vmul.bf16 %v5280_v59, %v5230_v17  ;;  %v5158_v19 = vmul.bf16 %v5230_v17, %v5153_v22 }
 0xf0a   : > { %v5205_v25 = vmul.bf16 %v5201_v55, %v11189_v24  ;;  %v5204_v9 = vmul.bf16 %v5229_v3, %v5201_v55  ;;  %v5206_v10 = vmul.bf16 %v5230_v17, %v5201_v55  ;;  %v5326_v57 = vpop.permute.xlu1 %5325 }
 0xf0b   : > { %5116 = vrot.lane.b32.xlu0 %v11189_v24, %s12454_s30  ;;  %5091 = vrot.lane.b32.xlu1 %v5080_v33, %s12374_s26  ;;  %v5328_v24 = vmul.bf16 %v5326_v57, %v5229_v3  ;;  %v5329_v1 = vmul.bf16 %v5326_v57, %v5230_v17 }
 0xf0c   : > { %v5356_v7 = vld [vmem:[#allocation3 + $0x80] sm:$0xff] }
 0xf0d   : > { %9066 = vmatprep.subr.bf16.mxu1 %v5356_v7 }
 0xf0e   : > { %v5121_v6 = vpop.permute.xlu1 %5120 }
 0xf0f   : > { %5122 = vrot.lane.b32.xlu0 %v5230_v17, %s12454_s30  ;;  %5087 = vrot.lane.b32.xlu1 %v5078_v20, %s12374_s26 }
 0xf13   : > { %5163 = vrot.lane.b32.xlu0 %v5155_v49, %s12376_s12  ;;  %5258 = vrot.lane.b32.xlu1 %v5253_v29, %s12425_s2  ;;  %v5357_v29 = vld [vmem:[#allocation3 + $0x90] sm:$0xff] }
 0xf17   : > { %5167 = vrot.lane.b32.xlu1 %v5155_v49, %s12376_s12  ;;  %5256 = vrot.lane.b32.xlu0 %v5252_v23, %s12425_s2 }
 0xf1b   : > { %5169 = vrot.lane.b32.xlu0 %v5158_v19, %s12376_s12  ;;  %5288 = vrot.lane.b32.xlu1 %v5283_v12, %s12380_s19 }
 0xf1f   : > { %5165 = vrot.lane.b32.xlu1 %v5156_v36, %s12376_s12  ;;  %5286 = vrot.lane.b32.xlu0 %v5282_v62, %s12380_s19  ;;  %s12458_s19 = smov 5  }
 0xf23   : > { %5215 = vrot.lane.b32.xlu1 %v5205_v25, %s12426_s8  ;;  %5211 = vrot.lane.b32.xlu0 %v5205_v25, %s12426_s8 }
 0xf27   : > { %5213 = vrot.lane.b32.xlu1 %v5204_v9, %s12426_s8  ;;  %5302 = vrot.lane.b32.xlu0 %v5229_v3, %s12378_s13 }
 0xf2b   : > { %5304 = vrot.lane.b32.xlu1 %v5230_v17, %s12378_s13  ;;  %5217 = vrot.lane.b32.xlu0 %v5206_v10, %s12426_s8  ;;  %s9662_s13 = smov 104  }
 0xf2f   : > { %5334 = vrot.lane.b32.xlu1 %v5329_v1, %s12383_s28  ;;  %5332 = vrot.lane.b32.xlu0 %v5328_v24, %s12383_s28  ;;  %s12457_s28 = smov 3  }
 0xf33   : > { %5542 = vrot.lane.b32.xlu0 %v5540_v48, %s12455_s29  ;;  %5714 = vrot.lane.b32.xlu1 %v5712_v37, %s12426_s8 }
 0xf37   : > { %5618 = vrot.lane.b32.xlu0 %v5616_v26, %s12456_s23  ;;  %5744 = vrot.lane.b32.xlu1 %v5742_v16, %s12457_s28  ;;  %v9542_v26 = vld [vmem:[%s12280_s16] ss:$12 sps:$4 sm:$0xff]  }
 0xf3b   : > { %5665 = vrot.lane.b32.xlu0 %v5663_v61, %s12425_s2  ;;  %5790 = vrot.lane.b32.xlu1 %v5788_v35, %s12458_s19  ;;  %v9548_v61 = vld [vmem:[%s12280_s16 + $0x18] ss:$12 sps:$4 sm:$0xff]   ;;  %v9549_v35 = vld [vmem:[%s12280_s16 + $0x20] ss:$12 sps:$4 sm:$0xff]  }
 0xf75   : > { %v5086_v63 = vpop.permute.xlu0 %5085 }
 0xf77   : > { %v5119_v28 = vpop.permute.xlu1 %5118 }
 0xf79   : > { %v5090_v52 = vpop.permute.xlu0 %5089 }
 0xf7d   : > { %v5117_v60 = vpop.permute.xlu0 %5116  ;;  %v5092_v32 = vpop.permute.xlu1 %5091 }
 0xf7e   : > { %v5125_v11 = vsel %vm4985_vm14, %v5117_v60, %v5119_v28  ;;  %v5095_v3 = vsel %vm5093_vm6, %v5090_v52, %v5092_v32 }
 0xf7f   : > { %5129 = vst.msk [vmem:[#allocation3 + $0x20] sm:$0xff] %vm3025_vm10, %v5125_v11  ;;  %5099 = vst.msk [vmem:[#allocation3 + $0x10] sm:$0xff] %vm3025_vm10, %v5095_v3 }
 0xf81   : > { %v5123_v51 = vpop.permute.xlu0 %5122  ;;  %v5088_v15 = vpop.permute.xlu1 %5087 }
 0xf82   : > { %v5126_v17 = vsel %vm4985_vm14, %v5121_v6, %v5123_v51  ;;  %v5094_v33 = vsel %vm5093_vm6, %v5086_v63, %v5088_v15  ;;  %v11469_v63 = vld [vmem:[#allocation2 + $0x40] sm:$0xff] }
 0xf83   : > { %5130 = vst.msk [vmem:[#allocation3 + $0x30] sm:$0xff] %vm3025_vm10, %v5126_v17  ;;  %5098 = vst.msk [vmem:[#allocation3] sm:$0xff] %vm3025_vm10, %v5094_v33  ;;  %v11473_v28 = vpack.c.bf16 %v11469_v63, %v11469_v63 }
 0xf85   : > { %v5164_v7 = vpop.permute.xlu0 %5163  ;;  %v5259_v20 = vpop.permute.xlu1 %5258  ;;  %5587 = vrot.lane.b32.xlu1 %v11473_v28, %s12454_s30 }
 0xf86   : > { %5263 = vst.msk [vmem:[#allocation3 + $0xb0] sm:$0xff] %vm3025_vm10, %v5259_v20  ;;  %v5349_v19 = vld [vmem:[#allocation3 + $0x10] sm:$0xff]  ;;  %v5350_v9 = vld [vmem:[#allocation3 + $0x20] sm:$0xff] }
 0xf89   : > { %v5257_v22 = vpop.permute.xlu0 %5256  ;;  %v5168_v49 = vpop.permute.xlu1 %5167 }
 0xf8a   : > { %5262 = vst.msk [vmem:[#allocation3 + $0xa0] sm:$0xff] %vm3025_vm10, %v5257_v22  ;;  %v5348_v40 = vld [vmem:[#allocation3] sm:$0xff]  ;;  %v5351_v24 = vld [vmem:[#allocation3 + $0x30] sm:$0xff] }
 0xf8b   : > { %9067 = vmatpush3.bf16.msra.mxu1 %v5348_v40 }
 0xf8c   : > { %9068 = vmatprep.subr.bf16.mxu1 %v5357_v29 }
 0xf8d   : > { %v5170_v23 = vpop.permute.xlu0 %5169  ;;  %v5289_v59 = vpop.permute.xlu1 %5288  ;;  %v5359_v47 = vld [vmem:[#allocation3 + $0xb0] sm:$0xff] }
 0xf8e   : > { %v5173_v12 = vsel %vm5171_vm7, %v5168_v49, %v5170_v23  ;;  %5293 = vst.msk [vmem:[#allocation3 + $0xd0] sm:$0xff] %vm3025_vm10, %v5289_v59 }
 0xf8f   : > { %5177 = vst.msk [vmem:[#allocation3 + $0x50] sm:$0xff] %vm3025_vm10, %v5173_v12  ;;  %9069 = vmatpush3.bf16.msra.mxu1 %v5349_v19 }
 0xf91   : > { %v5287_v62 = vpop.permute.xlu0 %5286  ;;  %v5166_v36 = vpop.permute.xlu1 %5165  ;;  %v5358_v55 = vld [vmem:[#allocation3 + $0xa0] sm:$0xff] }
 0xf92   : > { %5292 = vst.msk [vmem:[#allocation3 + $0xc0] sm:$0xff] %vm3025_vm10, %v5287_v62  ;;  %v5172_v25 = vsel %vm5171_vm7, %v5164_v7, %v5166_v36  ;;  %9070 = vmatprep.subr.bf16.mxu1 %v5358_v55 }
 0xf93   : > { %5176 = vst.msk [vmem:[#allocation3 + $0x40] sm:$0xff] %vm3025_vm10, %v5172_v25  ;;  %9071 = vmatpush3.bf16.msra.mxu1 %v5350_v9 }
 0xf94   : > { %9072 = vmatprep.subr.bf16.mxu1 %v5359_v47 }
 0xf95   : > { %v5212_v10 = vpop.permute.xlu0 %5211  ;;  %v5216_v57 = vpop.permute.xlu1 %5215  ;;  %v5361_v38 = vld [vmem:[#allocation3 + $0xd0] sm:$0xff] }
 0xf96   : > { %v5353_v27 = vld [vmem:[#allocation3 + $0x50] sm:$0xff] }
 0xf97   : > { %9073 = vmatpush3.bf16.msra.mxu1 %v5351_v24 }
 0xf99   : > { %v5303_v1 = vpop.permute.xlu0 %5302  ;;  %v5214_v58 = vpop.permute.xlu1 %5213  ;;  %v5360_v45 = vld [vmem:[#allocation3 + $0xc0] sm:$0xff] }
 0xf9a   : > { %5308 = vst.msk [vmem:[#allocation3 + $0xe0] sm:$0xff] %vm3025_vm10, %v5303_v1  ;;  %v5219_v31 = vsel %vm1073_vm1, %v5212_v10, %v5214_v58  ;;  %9074 = vmatprep.subr.bf16.mxu1 %v5360_v45  ;;  %v5352_v34 = vld [vmem:[#allocation3 + $0x40] sm:$0xff] }
 0xf9b   : > { %5223 = vst.msk [vmem:[#allocation3 + $0x60] sm:$0xff] %vm3025_vm10, %v5219_v31  ;;  %9075 = vmatpush3.bf16.msra.mxu1 %v5352_v34 }
 0xf9c   : > { %9076 = vmatprep.subr.bf16.mxu1 %v5361_v38 }
 0xf9d   : > { %v5218_v54 = vpop.permute.xlu0 %5217  ;;  %v5305_v2 = vpop.permute.xlu1 %5304 }
 0xf9e   : > { %v5220_v50 = vsel %vm1073_vm1, %v5216_v57, %v5218_v54  ;;  %5309 = vst.msk [vmem:[#allocation3 + $0xf0] sm:$0xff] %vm3025_vm10, %v5305_v2 }
 0xf9f   : > { %5224 = vst.msk [vmem:[#allocation3 + $0x70] sm:$0xff] %vm3025_vm10, %v5220_v50  ;;  %9077 = vmatpush3.bf16.msra.mxu1 %v5353_v27 }
 0xfa1   : > { %v5333_v48 = vpop.permute.xlu0 %5332  ;;  %v5335_v44 = vpop.permute.xlu1 %5334  ;;  %v5362_v41 = vld [vmem:[#allocation3 + $0xe0] sm:$0xff] }
 0xfa2   : > { %5338 = vst.msk [vmem:[#allocation3 + $0x100] sm:$0xff] %vm3025_vm10, %v5333_v48  ;;  %5339 = vst.msk [vmem:[#allocation3 + $0x110] sm:$0xff] %vm3025_vm10, %v5335_v44  ;;  %9078 = vmatprep.subr.bf16.mxu1 %v5362_v41  ;;  %v5354_v56 = vld [vmem:[#allocation3 + $0x60] sm:$0xff] }
 0xfa3   : > { %9079 = vmatpush3.bf16.msra.mxu1 %v5354_v56 }
 0xfa5   : > { %v5363_v43 = vld [vmem:[#allocation3 + $0xf0] sm:$0xff]  ;;  %v11467_v6 = vpop.permute.xlu0 %5542  ;;  %v5715_v45 = vpop.permute.xlu1 %5714 }
 0xfa6   : > { %9080 = vmatprep.subr.bf16.mxu1 %v5363_v43  ;;  %v5355_v37 = vld [vmem:[#allocation3 + $0x70] sm:$0xff]  ;;  %v5545_v52 = vmul.bf16 %v11467_v6, %v11473_v28 }
 0xfa7   : > { %9081 = vmatpush3.bf16.msra.mxu1 %v5355_v37 }
 0xfa8   : > { %5553 = vrot.lane.b32.xlu0 %v5545_v52, %s12458_s19 }
 0xfa9   : > { %v5364_v16 = vld [vmem:[#allocation3 + $0x100] sm:$0xff]  ;;  %v5365_v21 = vld [vmem:[#allocation3 + $0x110] sm:$0xff]  ;;  %v11481_v60 = vpop.permute.xlu0 %5618  ;;  %v5745_v50 = vpop.permute.xlu1 %5744 }
 0xfaa   : > { %5436 = vmatmul.mubr.bf16.vlgmr.msra.gmra.mrb[52].mxu1 %v9542_v26  ;;  %9286 = vmatprep.subr.bf16.mxu0 %v5364_v16  ;;  %v11487_v32 = vmul.bf16 %v11481_v60, %v11473_v28 }
 0xfab   : > { %9287 = vmatpush3.bf16.msra.mxu0 %v5364_v16  ;;  %5443 = vmatprep.mubr.bf16.mxu1 %v9545_v18 }
 0xfac   : > { %9288 = vmatprep.subr.bf16.mxu0 %v5365_v21  ;;  %5557 = vrot.lane.b32.xlu0 %v5545_v52, %s12458_s19  ;;  %v9553_v52 = vld [vmem:[%s12281_s17 + $0x8] ss:$12 sps:$4 sm:$0xff]  }
 0xfad   : > { %v5666_v41 = vpop.permute.xlu0 %5665 }
 0xfae   : > { %v5668_v43 = vmul.bf16 %v5666_v41, %v11473_v28 }
 0xfaf   : > { %9289 = vmatpush3.bf16.msra.mxu0 %v5365_v21  ;;  %v5791_v21 = vpop.permute.xlu1 %5790 }
 0xfb0   : > { %5583 = vrot.lane.b32.xlu0 %v11473_v28, %s12454_s30 }
 0xfb2   : > { %5444 = vmatmul.mubr.bf16.gmra.mrb[56].mxu1 %v9548_v61  ;;  %9291 = vmatmul.mubr.msk.bf16.vlgmr.msra.gmra.mrb[32].mxu0 %vm1929_vm13, %v9549_v35 }
 0xfb3   : > { %9298 = vmatprep.mubr.msk.bf16.mxu1 %vm1929_vm13, %v9553_v52  ;;  %v9555_v52 = vld [vmem:[%s12281_s17 + $0x1c] ss:$12 sps:$4 sm:$0xff]  }
 0xfb4   : > { %5629 = vrot.lane.b32.xlu0 %v11487_v32, %s12457_s28 }
0x107d   : > { %v9082_v11 = vpop.f32.mrb[52].mxu1 }
0x107e   : > { %v9083_v3 = vpop.f32.mrb[53].mxu1 }
0x107f   : > { %v9084_v51 = vadd.f32 %v9083_v3, %v9082_v11  ;;  %v9085_v15 = vpop.f32.mrb[54].mxu1 }
0x1080   : > { %v9086_v17 = vpop.f32.mrb[55].mxu1 }
0x1081   : > { %v9087_v33 = vadd.f32 %v9086_v17, %v9085_v15 }
0x1085   : > { %v9088_v7 = vpop.f32.mrb[56].mxu1  ;;  %v9292_v20 = vpop.f32.mrb[32].mxu0 }
0x1086   : > { %v9089_v22 = vpop.f32.mrb[57].mxu1  ;;  %v5486_v49 = vpop.f32.mrb[33].mxu0 }
0x1087   : > { %v9090_v40 = vadd.f32 %v9089_v22, %v9088_v7  ;;  %v5487_v29 = vadd.f32 %v9084_v51, %v5486_v49  ;;  %v9091_v23 = vpop.f32.mrb[58].mxu1  ;;  %v9293_v59 = vpop.f32.mrb[34].mxu0 }
0x1088   : > { %v9092_v12 = vpop.f32.mrb[59].mxu1  ;;  %v5489_v19 = vpop.f32.mrb[35].mxu0 }
0x1089   : > { %v5495_v62 = vadd.f32 %v9292_v20, %v9090_v40  ;;  %v5501_v36 = vmax.f32 %v5487_v29, 0.0  ;;  %v9093_v55 = vadd.f32 %v9092_v12, %v9091_v23  ;;  %v5490_v25 = vadd.f32 %v9087_v33, %v5489_v19  ;;  %v5588_v51 = vpop.permute.xlu1 %5587 }
0x108b   : > { %v5503_v9 = vmax.f32 %v5495_v62, 0.0  ;;  %5517 = vst.msk [vmem:[#allocation2 + $0x8] sm:$0xff] %vm3025_vm10, %v5501_v36  ;;  %v5498_v47 = vadd.f32 %v9293_v59, %v9093_v55  ;;  %v5502_v10 = vmax.f32 %v5490_v25, 0.0 }
0x108d   : > { %5519 = vst.msk [vmem:[#allocation2 + $0x48] sm:$0xff] %vm3025_vm10, %v5503_v9  ;;  %v5504_v57 = vmax.f32 %v5498_v47, 0.0  ;;  %5518 = vst.msk [vmem:[#allocation2 + $0x28] sm:$0xff] %vm3025_vm10, %v5502_v10 }
0x108f   : > { %5520 = vst.msk [vmem:[#allocation2 + $0x68] sm:$0xff] %vm3025_vm10, %v5504_v57 }
0x1092   : > { %v5690_v24 = vld [vmem:[#allocation2 + $0x8] sm:$0xff] }
0x1093   : > { %6287 = vst.msk [vmem:[#allocation2 + $0x8] sm:$0xff] %vm3395_vm11, %v11469_v63 }
0x1094   : > { %v5692_v1 = vld [vmem:[#allocation2 + $0x48] sm:$0xff]  ;;  %6295 = vst.msk [vmem:[#allocation2 + $0x8] sm:$0xff] %vm3397_vm5, %v11469_v63 }
0x1095   : > { %v5691_v58 = vld [vmem:[#allocation2 + $0x28] sm:$0xff]  ;;  %6291 = vst.msk [vmem:[#allocation2 + $0x48] sm:$0xff] %vm3395_vm11, %v11469_v63 }
0x1096   : > { %v5694_v31 = vpack.c.bf16 %v5691_v58, %v5690_v24  ;;  %6289 = vst.msk [vmem:[#allocation2 + $0x28] sm:$0xff] %vm3395_vm11, %v11469_v63  ;;  %v5693_v34 = vld [vmem:[#allocation2 + $0x68] sm:$0xff] }
0x1097   : > { %6296 = vst.msk [vmem:[#allocation2 + $0x28] sm:$0xff] %vm3397_vm5, %v11469_v63  ;;  %6297 = vst.msk [vmem:[#allocation2 + $0x48] sm:$0xff] %vm3397_vm5, %v11469_v63  ;;  %v5695_v38 = vpack.c.bf16 %v5693_v34, %v5692_v1 }
0x1098   : > { %5696 = vst.msk [vmem:[#allocation3 + $0x80] sm:$0xff] %vm3025_vm10, %v5694_v31  ;;  %v5717_v54 = vmul.bf16 %v5715_v45, %v5694_v31  ;;  %5585 = vrot.lane.b32.xlu1 %v5694_v31, %s12454_s30  ;;  %v5546_v2 = vmul.bf16 %v5694_v31, %v11467_v6  ;;  %v5747_v27 = vmul.bf16 %v5745_v50, %v5694_v31 }
0x1099   : > { %6293 = vst.msk [vmem:[#allocation2 + $0x68] sm:$0xff] %vm3395_vm11, %v11469_v63  ;;  %v5622_v48 = vmul.bf16 %v5694_v31, %v11481_v60  ;;  %v5548_v56 = vmul.bf16 %v5695_v38, %v11467_v6  ;;  %v5624_v37 = vmul.bf16 %v5695_v38, %v11481_v60  ;;  %v5718_v26 = vmul.bf16 %v5715_v45, %v5695_v38  ;;  %v9552_v6 = vld [vmem:[%s12281_s17 + $0x4] ss:$12 sps:$4 sm:$0xff]  }
0x109a   : > { %6298 = vst.msk [vmem:[#allocation2 + $0x68] sm:$0xff] %vm3397_vm5, %v11469_v63  ;;  %5721 = vrot.lane.b32.xlu0 %v5717_v54, %s12425_s2  ;;  %v5669_v18 = vmul.bf16 %v5694_v31, %v5666_v41  ;;  %v5671_v16 = vmul.bf16 %v5695_v38, %v5666_v41  ;;  %v5748_v61 = vmul.bf16 %v5745_v50, %v5695_v38 }
0x109b   : > { %5697 = vst.msk [vmem:[#allocation3 + $0x90] sm:$0xff] %vm3025_vm10, %v5695_v38  ;;  %v5793_v35 = vmul.bf16 %v5791_v21, %v5694_v31  ;;  %5899 = vmatprep.mubr.bf16.mxu0 %v9552_v6  ;;  %v5794_v60 = vmul.bf16 %v5791_v21, %v5695_v38  ;;  %v9550_v6 = vld [vmem:[%s12281_s17] ss:$12 sps:$4 sm:$0xff]  }
0x109c   : > { %5555 = vrot.lane.b32.xlu1 %v5546_v2, %s12458_s19 }
0x109e   : > { %5751 = vrot.lane.b32.xlu0 %v5747_v27, %s12456_s23 }
0x109f   : > { %v5821_v44 = vld [vmem:[#allocation3 + $0x80] sm:$0xff] }
0x10a0   : > { %9098 = vmatprep.subr.bf16.mxu0 %v5821_v44  ;;  %5631 = vrot.lane.b32.xlu1 %v5622_v48, %s12457_s28 }
0x10a2   : > { %5589 = vrot.lane.b32.xlu0 %v5695_v38, %s12454_s30  ;;  %v5822_v55 = vld [vmem:[#allocation3 + $0x90] sm:$0xff]  ;;  %s9664_s30 = smov 72  }
0x10a4   : > { %5559 = vrot.lane.b32.xlu1 %v5548_v56, %s12458_s19  ;;  %s12464_s19 = smov 48  }
0x10a6   : > { %5676 = vrot.lane.b32.xlu0 %v5668_v43, %s12426_s8 }
0x10a8   : > { %5633 = vrot.lane.b32.xlu1 %v11487_v32, %s12457_s28  ;;  %v5554_v32 = vpop.permute.xlu0 %5553 }
0x10aa   : > { %5635 = vrot.lane.b32.xlu0 %v5624_v37, %s12457_s28  ;;  %s12460_s28 = sld [smem:[#allocation14_spill]] }
0x10ac   : > { %5723 = vrot.lane.b32.xlu1 %v5718_v26, %s12425_s2  ;;  %v5558_v11 = vpop.permute.xlu0 %5557 }
0x10ae   : > { %5767 = vrot.lane.b32.xlu0 %v5694_v31, %s12459_s1 }
0x10b0   : > { %5678 = vrot.lane.b32.xlu1 %v5669_v18, %s12426_s8  ;;  %v5584_v3 = vpop.permute.xlu0 %5583 }
0x10b2   : > { %5682 = vrot.lane.b32.xlu0 %v5671_v16, %s12426_s8 }
0x10b4   : > { %5753 = vrot.lane.b32.xlu1 %v5748_v61, %s12456_s23  ;;  %v5630_v15 = vpop.permute.xlu0 %5629 }
0x10b6   : > { %5797 = vrot.lane.b32.xlu0 %v5793_v35, %s12455_s29 }
0x10b8   : > { %5680 = vrot.lane.b32.xlu1 %v5668_v43, %s12426_s8 }
0x10bc   : > { %5769 = vrot.lane.b32.xlu1 %v5695_v38, %s12459_s1 }
0x10c0   : > { %5799 = vrot.lane.b32.xlu1 %v5794_v60, %s12455_s29  ;;  %s12469_s29 = sld [smem:[#allocation22_spill]] }
0x110a   : > { %v5586_v17 = vpop.permute.xlu1 %5585 }
0x110b   : > { %v5591_v33 = vsel %vm4985_vm14, %v5584_v3, %v5586_v17  ;;  %v6044_v3 = vld [vmem:[%s12460_s28] sm:$0x3]  ;;  %s12473_s28 = sld [smem:[#allocation5_spill]] }
0x110c   : > { %5595 = vst.msk [vmem:[#allocation3 + $0x20] sm:$0xff] %vm3025_vm10, %v5591_v33  ;;  %v5722_v7 = vpop.permute.xlu0 %5721 }
0x110d   : > { %5727 = vst.msk [vmem:[#allocation3 + $0xa0] sm:$0xff] %vm3025_vm10, %v5722_v7 }
0x110e   : > { %v5556_v20 = vpop.permute.xlu1 %5555 }
0x110f   : > { %v5561_v22 = vsel %vm5093_vm6, %v5554_v32, %v5556_v20  ;;  %v9554_v32 = vld [vmem:[%s12281_s17 + $0x20] ss:$12 sps:$4 sm:$0xff]  }
0x1110   : > { %5565 = vst.msk [vmem:[#allocation3] sm:$0xff] %vm3025_vm10, %v5561_v22  ;;  %v5752_v49 = vpop.permute.xlu0 %5751 }
0x1111   : > { %5757 = vst.msk [vmem:[#allocation3 + $0xc0] sm:$0xff] %vm3025_vm10, %v5752_v49 }
0x1112   : > { %v5632_v40 = vpop.permute.xlu1 %5631 }
0x1113   : > { %v5637_v29 = vsel %vm5171_vm7, %v5630_v15, %v5632_v40  ;;  %v5815_v31 = vld [vmem:[#allocation3 + $0x20] sm:$0xff] }
0x1114   : > { %5641 = vst.msk [vmem:[#allocation3 + $0x40] sm:$0xff] %vm3025_vm10, %v5637_v29  ;;  %v5590_v23 = vpop.permute.xlu0 %5589  ;;  %v5823_v1 = vld [vmem:[#allocation3 + $0xa0] sm:$0xff] }
0x1115   : > { %v5592_v59 = vsel %vm4985_vm14, %v5588_v51, %v5590_v23  ;;  %v6053_v51 = vsel %vm6051_vm8, %v6044_v3, 0  ;;  %v9558_v15 = vld [vmem:[%s12286_s22] sm:$0xff]  }
0x1116   : > { %5596 = vst.msk [vmem:[#allocation3 + $0x30] sm:$0xff] %vm3025_vm10, %v5592_v59  ;;  %v5560_v12 = vpop.permute.xlu1 %5559 }
0x1117   : > { %v5562_v19 = vsel %vm5093_vm6, %v5558_v11, %v5560_v12  ;;  %v5813_v62 = vld [vmem:[#allocation3] sm:$0xff] }
0x1118   : > { %5566 = vst.msk [vmem:[#allocation3 + $0x10] sm:$0xff] %vm3025_vm10, %v5562_v19  ;;  %v5677_v36 = vpop.permute.xlu0 %5676  ;;  %9099 = vmatpush3.bf16.msra.mxu0 %v5813_v62  ;;  %v5825_v27 = vld [vmem:[#allocation3 + $0xc0] sm:$0xff] }
0x1119   : > { %9100 = vmatprep.subr.bf16.mxu0 %v5822_v55  ;;  %v9557_v11 = vld [vmem:[%s12281_s17 + $0x18] ss:$12 sps:$4 sm:$0xff]  }
0x111a   : > { %v5634_v25 = vpop.permute.xlu1 %5633 }
0x111b   : > { %v5817_v41 = vld [vmem:[#allocation3 + $0x40] sm:$0xff] }
0x111c   : > { %v5636_v9 = vpop.permute.xlu0 %5635 }
0x111d   : > { %v5638_v47 = vsel %vm5171_vm7, %v5634_v25, %v5636_v9  ;;  %v5816_v2 = vld [vmem:[#allocation3 + $0x30] sm:$0xff] }
0x111e   : > { %5642 = vst.msk [vmem:[#allocation3 + $0x50] sm:$0xff] %vm3025_vm10, %v5638_v47  ;;  %v5724_v10 = vpop.permute.xlu1 %5723 }
0x111f   : > { %5728 = vst.msk [vmem:[#allocation3 + $0xb0] sm:$0xff] %vm3025_vm10, %v5724_v10  ;;  %v5814_v57 = vld [vmem:[#allocation3 + $0x10] sm:$0xff] }
0x1120   : > { %v5768_v24 = vpop.permute.xlu0 %5767  ;;  %9101 = vmatpush3.bf16.msra.mxu0 %v5814_v57 }
0x1121   : > { %5773 = vst.msk [vmem:[#allocation3 + $0xe0] sm:$0xff] %vm3025_vm10, %v5768_v24  ;;  %9102 = vmatprep.subr.bf16.mxu0 %v5823_v1 }
0x1122   : > { %v5679_v58 = vpop.permute.xlu1 %5678 }
0x1123   : > { %v5684_v45 = vsel %vm1073_vm1, %v5677_v36, %v5679_v58 }
0x1124   : > { %5688 = vst.msk [vmem:[#allocation3 + $0x60] sm:$0xff] %vm3025_vm10, %v5684_v45  ;;  %v5683_v34 = vpop.permute.xlu0 %5682  ;;  %9103 = vmatpush3.bf16.msra.mxu0 %v5815_v31 }
0x1125   : > { %v5818_v37 = vld [vmem:[#allocation3 + $0x50] sm:$0xff] }
0x1126   : > { %v5754_v38 = vpop.permute.xlu1 %5753  ;;  %v5824_v54 = vld [vmem:[#allocation3 + $0xb0] sm:$0xff] }
0x1127   : > { %5758 = vst.msk [vmem:[#allocation3 + $0xd0] sm:$0xff] %vm3025_vm10, %v5754_v38  ;;  %9104 = vmatprep.subr.bf16.mxu0 %v5824_v54  ;;  %v9559_v38 = vld [vmem:[%s12286_s22 + $0x8] sm:$0xff]  }
0x1128   : > { %v5798_v50 = vpop.permute.xlu0 %5797  ;;  %9105 = vmatpush3.bf16.msra.mxu0 %v5816_v2  ;;  %v5827_v26 = vld [vmem:[#allocation3 + $0xe0] sm:$0xff] }
0x1129   : > { %5803 = vst.msk [vmem:[#allocation3 + $0x100] sm:$0xff] %vm3025_vm10, %v5798_v50  ;;  %9106 = vmatprep.subr.bf16.mxu0 %v5825_v27 }
0x112a   : > { %v5681_v48 = vpop.permute.xlu1 %5680 }
0x112b   : > { %v5685_v44 = vsel %vm1073_vm1, %v5681_v48, %v5683_v34  ;;  %v5819_v21 = vld [vmem:[#allocation3 + $0x60] sm:$0xff] }
0x112c   : > { %5689 = vst.msk [vmem:[#allocation3 + $0x70] sm:$0xff] %vm3025_vm10, %v5685_v44  ;;  %9107 = vmatpush3.bf16.msra.mxu0 %v5817_v41 }
0x112e   : > { %v5770_v56 = vpop.permute.xlu1 %5769  ;;  %v5826_v43 = vld [vmem:[#allocation3 + $0xd0] sm:$0xff] }
0x112f   : > { %5774 = vst.msk [vmem:[#allocation3 + $0xf0] sm:$0xff] %vm3025_vm10, %v5770_v56  ;;  %9108 = vmatprep.subr.bf16.mxu0 %v5826_v43 }
0x1130   : > { %9109 = vmatpush3.bf16.msra.mxu0 %v5818_v37  ;;  %v5829_v18 = vld [vmem:[#allocation3 + $0x100] sm:$0xff] }
0x1131   : > { %9110 = vmatprep.subr.bf16.mxu0 %v5827_v26  ;;  %9294 = vmatprep.subr.bf16.mxu1 %v5829_v18 }
0x1132   : > { %9295 = vmatpush3.bf16.msra.mxu1 %v5829_v18  ;;  %v5800_v16 = vpop.permute.xlu1 %5799 }
0x1133   : > { %5804 = vst.msk [vmem:[#allocation3 + $0x110] sm:$0xff] %vm3025_vm10, %v5800_v16  ;;  %v5820_v35 = vld [vmem:[#allocation3 + $0x70] sm:$0xff] }
0x1134   : > { %9111 = vmatpush3.bf16.msra.mxu0 %v5819_v21 }
0x1136   : > { %v5828_v61 = vld [vmem:[#allocation3 + $0xf0] sm:$0xff] }
0x1137   : > { %9112 = vmatprep.subr.bf16.mxu0 %v5828_v61 }
0x1138   : > { %9113 = vmatpush3.bf16.msra.mxu0 %v5820_v35 }
0x1139   : > { %9408 = vmatprep.subr.msk.bf16.mxu0 %vm6051_vm8, %v6044_v3 }
0x113a   : > { %v5830_v60 = vld [vmem:[#allocation3 + $0x110] sm:$0xff] }
0x113b   : > { %5900 = vmatmul.mubr.bf16.vlgmr.msra.gmra.mrb[36].mxu0 %v9550_v6  ;;  %9296 = vmatprep.subr.bf16.mxu1 %v5830_v60 }
0x113c   : > { %9297 = vmatpush3.bf16.msra.mxu1 %v5830_v60  ;;  %5907 = vmatprep.mubr.bf16.mxu0 %v9555_v52 }
0x113d   : > { %9311 = vmatpush3.bf16.msra.mxu0 %v6053_v51 }
0x113e   : > { %9410 = vmatprep.subr.msk.bf16.mxu0 %vm6051_vm8, %v6044_v3 }
0x113f   : > { %9299 = vmatmul.mubr.msk.bf16.vlgmr.msra.gmra.mrb[60].mxu1 %vm1929_vm13, %v9554_v32 }
0x1140   : > { %9306 = vmatprep.mubr.msk.bf16.mxu1 %vm1929_vm13, %v9558_v15 }
0x1143   : > { %5908 = vmatmul.mubr.bf16.gmra.mrb[40].mxu0 %v9557_v11 }
0x120e   : > { %v9114_v17 = vpop.f32.mrb[36].mxu0 }
0x120f   : > { %v9115_v33 = vpop.f32.mrb[37].mxu0 }
0x1210   : > { %v9116_v7 = vadd.f32 %v9115_v33, %v9114_v17  ;;  %v9117_v20 = vpop.f32.mrb[38].mxu0 }
0x1211   : > { %v9118_v22 = vpop.f32.mrb[39].mxu0 }
0x1212   : > { %v9119_v49 = vadd.f32 %v9118_v22, %v9117_v20  ;;  %v9300_v40 = vpop.f32.mrb[60].mxu1  ;;  %v6375_v20 = vld [vmem:[%s12424_s10] sm:$0x1] }
0x1213   : > { %v5950_v29 = vpop.f32.mrb[61].mxu1 }
0x1214   : > { %v5951_v23 = vadd.f32 %v9116_v7, %v5950_v29  ;;  %v9301_v59 = vpop.f32.mrb[62].mxu1  ;;  %v6546_v7 = vld [vmem:[%s12424_s10] sm:$0x4]  ;;  %v6497_v29 = vld [vmem:[%s12424_s10] sm:$0x2] }
0x1215   : > { %v5953_v12 = vpop.f32.mrb[63].mxu1  ;;  %v6548_v22 = vshrl.u32 %v6546_v7, 16 }
0x1216   : > { %v5954_v19 = vadd.f32 %v9119_v49, %v5953_v12  ;;  %v9120_v62 = vpop.f32.mrb[40].mxu0  ;;  %v5965_v55 = vmax.f32 %v5951_v23, 0.0  ;;  %v6377_v49 = vpack.i.b16 %v6375_v20, %v6375_v20 }
0x1217   : > { %v9121_v36 = vpop.f32.mrb[41].mxu0  ;;  %v6549_v23 = vpack.i.b16 %v6548_v22, %v6548_v22 }
0x1218   : > { %v5966_v25 = vmax.f32 %v5954_v19, 0.0  ;;  %v9122_v9 = vadd.f32 %v9121_v36, %v9120_v62  ;;  %v9123_v47 = vpop.f32.mrb[42].mxu0  ;;  %v6382_v12 = vrot.slane %v6377_v49, %v9826_v14  ;;  %v6499_v62 = vshrl.u32 %v6497_v29, 16  ;;  %v6970_v49 = vld [vmem:[%s12424_s10] sm:$0x4] }
0x1219   : > { %v9124_v10 = vpop.f32.mrb[43].mxu0  ;;  %v6554_v36 = vrot.slane %v6549_v23, %v9843_v30  ;;  %v6972_v29 = vshrl.u32 %v6970_v49, 16  ;;  %v6799_v23 = vld [vmem:[%s12424_s10] sm:$0x1] }
0x121a   : > { %v5973_v57 = vpack.c.bf16 %v5966_v25, %v5965_v55  ;;  %v5959_v24 = vadd.f32 %v9300_v40, %v9122_v9  ;;  %v9125_v1 = vadd.f32 %v9124_v10, %v9123_v47  ;;  %v6451_v40 = vld [vmem:[%s12424_s10] sm:$0x2]  ;;  %v6623_v25 = vld [vmem:[%s12424_s10 + $0x4] sm:$0x1]  ;;  %v6500_v47 = vpack.i.b16 %v6499_v62, %v6499_v62 }
0x121b   : > { %v6453_v19 = vpack.i.b16 %v6451_v40, %v6451_v40  ;;  %v6801_v62 = vpack.i.b16 %v6799_v23, %v6799_v23 }
0x121c   : > { %v5962_v58 = vadd.f32 %v9301_v59, %v9125_v1  ;;  %6106 = vrot.lane.b32.xlu0 %v5973_v57, %s12459_s1  ;;  %9302 = vmatprep.subr.bf16.mxu1 %v5973_v57  ;;  %v5967_v45 = vmax.f32 %v5959_v24, 0.0  ;;  %v6577_v59 = vld [vmem:[%s12424_s10] sm:$0x8]  ;;  %v6505_v24 = vrot.slane %v6500_v47, %v9824_v13 }
0x121d   : > { %9312 = vmatprep.mubr.msk.bf16.mxu0 %vm4985_vm14, %v5973_v57  ;;  %9303 = vmatpush3.bf16.msra.mxu1 %v5973_v57  ;;  %v6579_v55 = vpack.i.b16 %v6577_v59, %v6577_v59  ;;  %v6458_v9 = vrot.slane %v6453_v19, %v9824_v13  ;;  %v6973_v19 = vpack.i.b16 %v6972_v29, %v6972_v29 }
0x121e   : > { %v5968_v31 = vmax.f32 %v5962_v58, 0.0 }
0x121f   : > { %v6584_v10 = vrot.slane %v6579_v55, %v9867_v46  ;;  %v6875_v55 = vld [vmem:[%s12424_s10] sm:$0x2] }
0x1220   : > { %v5974_v34 = vpack.c.bf16 %v5968_v31, %v5967_v45  ;;  %6165 = vrot.lane.b32.xlu0 %v5973_v57, %s12433_s27 }
0x1222   : > { %6108 = vrot.lane.b32.xlu1 %v5974_v34, %s12459_s1  ;;  %9304 = vmatprep.subr.bf16.mxu1 %v5974_v34  ;;  %s9007_s1 = sshll.u32 %s12514_s4, 5  ;;  %s12463_s4 = smov 32  }
0x1223   : > { %9313 = vmatmul.mubr.msk.bf16.vlgmr.msra.gmra.mrb[44].mxu0 %vm4985_vm14, %v5974_v34  ;;  %9305 = vmatpush3.bf16.msra.mxu1 %v5974_v34  ;;  %s833_s12 = scalar_lea.vmem %s12289_s25, %s9007_s1  ;;  %s12470_s1 = sld [smem:[#allocation15_spill]] }
0x1224   : > { %6224 = vrot.lane.b32.xlu0 %v5973_v57, %s12461_s14  ;;  %9409 = vmatprep.subr.msk.bf16.mxu1 %vm6051_vm8, %v6044_v3  ;;  %v6625_v57 = vpack.i.b16 %v6623_v25, %v6623_v25  ;;  %v6921_v25 = vld [vmem:[%s12424_s10] sm:$0x2] }
0x1225   : > { %9323 = vmatpush3.bf16.msra.mxu0 %v6053_v51 }
0x1226   : > { %6167 = vrot.lane.b32.xlu1 %v5974_v34, %s12433_s27  ;;  %9307 = vmatmul.mubr.msk.bf16.vlgmr.msra.gmra.mrb[64].mxu1 %vm1929_vm13, %v9559_v38  ;;  %v6630_v1 = vrot.slane %v6625_v57, %v9826_v14 }
0x1227   : > { %9317 = vmatpush3.bf16.msra.mxu1 %v6053_v51 }
0x1228   : > { %9411 = vmatprep.subr.msk.bf16.mxu1 %vm6051_vm8, %v6044_v3 }
0x122a   : > { %6226 = vrot.lane.b32.xlu1 %v5974_v34, %s12461_s14 }
0x128e   : > { %v6107_v54 = vpop.permute.xlu0 %6106 }
0x128f   : > { %9318 = vmatprep.mubr.msk.bf16.mxu1 %vm4985_vm14, %v6107_v54 }
0x1292   : > { %v6166_v2 = vpop.permute.xlu0 %6165 }
0x1293   : > { %9324 = vmatprep.mubr.msk.bf16.mxu0 %vm4985_vm14, %v6166_v2 }
0x1294   : > { %v6109_v50 = vpop.permute.xlu1 %6108 }
0x1295   : > { %9319 = vmatmul.mubr.msk.bf16.vlgmr.msra.gmra.mrb[68].mxu1 %vm4985_vm14, %v6109_v50 }
0x1296   : > { %v6225_v27 = vpop.permute.xlu0 %6224  ;;  %9329 = vmatpush3.bf16.msra.mxu1 %v6053_v51 }
0x1297   : > { %9330 = vmatprep.mubr.msk.bf16.mxu1 %vm4985_vm14, %v6225_v27  ;;  %9334 = vmatprep.subr.bf16.mxu1 %v11469_v63 }
0x1298   : > { %v6168_v48 = vpop.permute.xlu1 %6167 }
0x1299   : > { %9325 = vmatmul.mubr.msk.bf16.vlgmr.msra.gmra.mrb[48].mxu0 %vm4985_vm14, %v6168_v48 }
0x129c   : > { %v6227_v44 = vpop.permute.xlu1 %6226 }
0x129d   : > { %9331 = vmatmul.mubr.msk.bf16.vlgmr.msra.gmra.mrb[72].mxu1 %vm4985_vm14, %v6227_v44  ;;  %vm12465_vm14 = vcmask 195712  }
0x129e   : > { %9338 = vmatprep.mubr.msk.bf16.mxu1 %vm12462_vm12, %v11469_v63  ;;  %vm12466_vm6 = vmmov %vm12465_vm14 }
0x129f   : > { %vm12467_vm7 = vmmov %vm12466_vm6 }
0x12a0   : > { %vm12468_vm8 = vmmov %vm12466_vm6 }
0x12f6   : > { %v9314_v41 = vpop.f32.mrb[44].mxu0 }
0x12f7   : > { %6301 = vst.msk [vmem:[#allocation2 + $0x48] sm:$0xff] %vm3401_vm15, %v9314_v41  ;;  %v6089_v56 = vpop.f32.mrb[45].mxu0 }
0x12f8   : > { %6299 = vst.msk [vmem:[#allocation2 + $0x8] sm:$0xff] %vm3401_vm15, %v6089_v56  ;;  %v9315_v43 = vpop.f32.mrb[46].mxu0 }
0x12f9   : > { %6302 = vst.msk [vmem:[#allocation2 + $0x68] sm:$0xff] %vm3401_vm15, %v9315_v43  ;;  %v6092_v37 = vpop.f32.mrb[47].mxu0  ;;  %v9308_v26 = vpop.f32.mrb[64].mxu1 }
0x12fa   : > { %6300 = vst.msk [vmem:[#allocation2 + $0x28] sm:$0xff] %vm3401_vm15, %v6092_v37  ;;  %v6025_v18 = vpop.f32.mrb[65].mxu1 }
0x12fb   : > { %6042 = vst.msk [vmem:[%s833_s12 + $0x10] sm:$0xff] %vm3025_vm10, %v9308_v26  ;;  %6040 = vst.msk [vmem:[%s833_s12] sm:$0xff] %vm3025_vm10, %v6025_v18  ;;  %v9309_v16 = vpop.f32.mrb[66].mxu1 }
0x12fc   : > { %6043 = vst.msk [vmem:[%s833_s12 + $0x18] sm:$0xff] %vm3025_vm10, %v9309_v16  ;;  %v6028_v21 = vpop.f32.mrb[67].mxu1 }
0x12fd   : > { %6041 = vst.msk [vmem:[%s833_s12 + $0x8] sm:$0xff] %vm3025_vm10, %v6028_v21  ;;  %s12471_s12 = sld [smem:[#allocation25_spill]] }
0x1368   : > { %v9320_v61 = vpop.f32.mrb[68].mxu1 }
0x1369   : > { %6311 = vrot.lane.b32.xlu0 %v9320_v61, %s12443_s11  ;;  %v6150_v35 = vpop.f32.mrb[69].mxu1 }
0x136a   : > { %v9321_v6 = vpop.f32.mrb[70].mxu1 }
0x136b   : > { %6313 = vrot.lane.b32.xlu1 %v9321_v6, %s12443_s11  ;;  %v6153_v52 = vpop.f32.mrb[71].mxu1 }
0x136c   : > { %v9326_v60 = vpop.f32.mrb[48].mxu0 }
0x136d   : > { %v6209_v32 = vpop.f32.mrb[49].mxu0  ;;  %6331 = vrot.lane.b32.xlu0 %v9326_v60, %s12463_s4 }
0x136e   : > { %v9327_v11 = vpop.f32.mrb[50].mxu0 }
0x136f   : > { %v6212_v3 = vpop.f32.mrb[51].mxu0  ;;  %6333 = vrot.lane.b32.xlu1 %v9327_v11, %s12463_s4 }
0x1370   : > { %v9332_v51 = vpop.f32.mrb[72].mxu1 }
0x1371   : > { %6307 = vrot.lane.b32.xlu0 %v6150_v35, %s12443_s11  ;;  %v6268_v15 = vpop.f32.mrb[73].mxu1 }
0x1372   : > { %v9333_v17 = vpop.f32.mrb[74].mxu1 }
0x1373   : > { %6309 = vrot.lane.b32.xlu1 %v6153_v52, %s12443_s11  ;;  %v6271_v33 = vpop.f32.mrb[75].mxu1 }
0x1375   : > { %6327 = vrot.lane.b32.xlu0 %v6209_v32, %s12463_s4 }
0x1377   : > { %6329 = vrot.lane.b32.xlu1 %v6212_v3, %s12463_s4 }
0x1379   : > { %6347 = vrot.lane.b32.xlu0 %v6268_v15, %s12464_s19 }
0x137b   : > { %6349 = vrot.lane.b32.xlu1 %v6271_v33, %s12464_s19 }
0x137d   : > { %6351 = vrot.lane.b32.xlu0 %v9332_v51, %s12464_s19 }
0x137f   : > { %6353 = vrot.lane.b32.xlu1 %v9333_v17, %s12464_s19 }
0x1381   : > { %6384 = vrot.lane.b32.xlu0 %v6382_v12, %s12429_s20 }
0x1383   : > { %6556 = vrot.lane.b32.xlu1 %v6554_v36, %s12426_s8  ;;  %v7001_v36 = vld [vmem:[%s12424_s10] sm:$0x8] }
0x1384   : > { %v7003_v57 = vpack.i.b16 %v7001_v36, %v7001_v36 }
0x1385   : > { %6460 = vrot.lane.b32.xlu0 %v6458_v9, %s12430_s21  ;;  %v9562_v9 = vld [vmem:[%s12282_s18 + $0x4] ss:$12 sps:$4 sm:$0xff]  }
0x1386   : > { %6719 = vmatprep.mubr.bf16.mxu0 %v9562_v9 }
0x1387   : > { %6586 = vrot.lane.b32.xlu1 %v6584_v10, %s12431_s24 }
0x1389   : > { %6507 = vrot.lane.b32.xlu0 %v6505_v24, %s12425_s2  ;;  %v6978_v24 = vrot.slane %v6973_v19, %v9843_v30 }
0x138b   : > { %6632 = vrot.lane.b32.xlu1 %v6630_v1, %s12432_s6  ;;  %v6806_v1 = vrot.slane %v6801_v62, %v9826_v14 }
0x138f   : > { %6429 = vrot.lane.b32.xlu1 %v11473_v28, %s12427_s7 }
0x13db   : > { %v6312_v58 = vpop.permute.xlu0 %6311 }
0x13dc   : > { %6321 = vst.msk [vmem:[#allocation2 + $0x48] sm:$0xff] %vm12465_vm14, %v6312_v58  ;;  %v6877_v58 = vpack.i.b16 %v6875_v55, %v6875_v55 }
0x13dd   : > { %v6314_v45 = vpop.permute.xlu1 %6313 }
0x13de   : > { %6322 = vst.msk [vmem:[#allocation2 + $0x68] sm:$0xff] %vm12466_vm6, %v6314_v45  ;;  %v6923_v45 = vshrl.u32 %v6921_v25, 16 }
0x13df   : > { %v6332_v31 = vpop.permute.xlu0 %6331 }
0x13e0   : > { %6341 = vst.msk [vmem:[#allocation2 + $0x48] sm:$0xff] %vm3445_vm2, %v6332_v31  ;;  %v7047_v31 = vld [vmem:[%s12424_s10 + $0x4] sm:$0x1] }
0x13e1   : > { %v6334_v34 = vpop.permute.xlu1 %6333 }
0x13e2   : > { %6342 = vst.msk [vmem:[#allocation2 + $0x68] sm:$0xff] %vm3445_vm2, %v6334_v34  ;;  %v7008_v34 = vrot.slane %v7003_v57, %v9867_v46 }
0x13e3   : > { %v6308_v38 = vpop.permute.xlu0 %6307 }
0x13e4   : > { %6319 = vst.msk [vmem:[#allocation2 + $0x8] sm:$0xff] %vm12467_vm7, %v6308_v38  ;;  %v6882_v38 = vrot.slane %v6877_v58, %v9824_v13 }
0x13e5   : > { %v6310_v54 = vpop.permute.xlu1 %6309 }
0x13e6   : > { %6320 = vst.msk [vmem:[#allocation2 + $0x28] sm:$0xff] %vm12468_vm8, %v6310_v54  ;;  %v7049_v54 = vpack.i.b16 %v7047_v31, %v7047_v31 }
0x13e7   : > { %v6328_v2 = vpop.permute.xlu0 %6327 }
0x13e8   : > { %6339 = vst.msk [vmem:[#allocation2 + $0x8] sm:$0xff] %vm3445_vm2, %v6328_v2  ;;  %v6924_v2 = vpack.i.b16 %v6923_v45, %v6923_v45 }
0x13e9   : > { %v6330_v50 = vpop.permute.xlu1 %6329 }
0x13ea   : > { %6340 = vst.msk [vmem:[#allocation2 + $0x28] sm:$0xff] %vm3445_vm2, %v6330_v50  ;;  %v7054_v50 = vrot.slane %v7049_v54, %v9826_v14  ;;  %v11814_v54 = vld [vmem:[#allocation2 + $0x40] sm:$0xff]  ;;  %vm7638_vm2 = vcmask 392448  }
0x13eb   : > { %v6348_v27 = vpop.permute.xlu0 %6347 }
0x13ec   : > { %6359 = vst.msk [vmem:[#allocation2 + $0x8] sm:$0xff] %vm3467_vm9, %v6348_v27  ;;  %v6929_v27 = vrot.slane %v6924_v2, %v9824_v13 }
0x13ed   : > { %v6350_v48 = vpop.permute.xlu1 %6349 }
0x13ee   : > { %6360 = vst.msk [vmem:[#allocation2 + $0x28] sm:$0xff] %vm3467_vm9, %v6350_v48 }
0x13ef   : > { %v6352_v44 = vpop.permute.xlu0 %6351 }
0x13f0   : > { %6361 = vst.msk [vmem:[#allocation2 + $0x48] sm:$0xff] %vm3467_vm9, %v6352_v44 }
0x13f1   : > { %v6354_v41 = vpop.permute.xlu1 %6353 }
0x13f2   : > { %6362 = vst.msk [vmem:[#allocation2 + $0x68] sm:$0xff] %vm3467_vm9, %v6354_v41  ;;  %vm7660_vm9 = vcmask 917248  }
0x13f3   : > { %v6532_v56 = vld [vmem:[#allocation2 + $0x8] sm:$0xff]  ;;  %v6385_v43 = vpop.permute.xlu0 %6384 }
0x13f4   : > { %v6387_v37 = vmul.bf16 %v6385_v43, %v11473_v28  ;;  %6775 = vst.msk [vmem:[#allocation2 + $0x8] sm:$0xff] %vm3395_vm11, %v11469_v63 }
0x13f5   : > { %v6533_v26 = vld [vmem:[#allocation2 + $0x28] sm:$0xff]  ;;  %v6557_v52 = vpop.permute.xlu1 %6556 }
0x13f6   : > { %v11686_v18 = vpack.c.bf16 %v6533_v26, %v6532_v56  ;;  %6395 = vrot.lane.b32.xlu0 %v6387_v37, %s12432_s6  ;;  %6777 = vst.msk [vmem:[#allocation2 + $0x28] sm:$0xff] %vm3395_vm11, %v11469_v63 }
0x13f7   : > { %v6542_v16 = vld [vmem:[#allocation2 + $0x48] sm:$0xff]  ;;  %v6461_v6 = vpop.permute.xlu0 %6460 }
0x13f8   : > { %6538 = vst.msk [vmem:[#allocation3 + $0x80] sm:$0xff] %vm3397_vm5, %v11686_v18  ;;  %6427 = vrot.lane.b32.xlu1 %v11686_v18, %s12427_s7  ;;  %v6463_v8 = vmul.bf16 %v6461_v6, %v11473_v28  ;;  %v6559_v15 = vmul.bf16 %v6557_v52, %v11686_v18  ;;  %v6464_v20 = vmul.bf16 %v11686_v18, %v6461_v6 }
0x13f9   : > { %6779 = vst.msk [vmem:[#allocation2 + $0x48] sm:$0xff] %vm3395_vm11, %v11469_v63  ;;  %v6543_v21 = vld [vmem:[#allocation2 + $0x68] sm:$0xff]  ;;  %v6587_v51 = vpop.permute.xlu1 %6586 }
0x13fa   : > { %6785 = vst.msk [vmem:[#allocation2 + $0x48] sm:$0xff] %vm3397_vm5, %v3980_v53  ;;  %v6545_v61 = vpack.c.bf16 %v6543_v21, %v6542_v16  ;;  %6399 = vrot.lane.b32.xlu0 %v6387_v37, %s12432_s6  ;;  %v6388_v53 = vmul.bf16 %v11686_v18, %v6385_v43  ;;  %v6589_v22 = vmul.bf16 %v6587_v51, %v11686_v18 }
0x13fb   : > { %6781 = vst.msk [vmem:[#allocation2 + $0x68] sm:$0xff] %vm3395_vm11, %v11469_v63  ;;  %v6508_v33 = vpop.permute.xlu0 %6507  ;;  %vm12481_vm11 = vcmask 908288  }
0x13fc   : > { %6786 = vst.msk [vmem:[#allocation2 + $0x68] sm:$0xff] %vm3397_vm5, %v3981_v4  ;;  %v6390_v35 = vmul.bf16 %v6545_v61, %v6385_v43  ;;  %6539 = vst.msk [vmem:[#allocation3 + $0x90] sm:$0xff] %vm3397_vm5, %v6545_v61  ;;  %v6560_v11 = vmul.bf16 %v6557_v52, %v6545_v61  ;;  %v6466_v3 = vmul.bf16 %v6545_v61, %v6461_v6 }
0x13fd   : > { %v6590_v17 = vmul.bf16 %v6587_v51, %v6545_v61  ;;  %v6510_v7 = vmul.bf16 %v6508_v33, %v11473_v28  ;;  %v6511_v40 = vmul.bf16 %v11686_v18, %v6508_v33  ;;  %v6513_v59 = vmul.bf16 %v6545_v61, %v6508_v33  ;;  %v6633_v12 = vpop.permute.xlu1 %6632 }
0x13fe   : > { %6425 = vrot.lane.b32.xlu0 %v11473_v28, %s12427_s7  ;;  %6401 = vrot.lane.b32.xlu1 %v6390_v35, %s12432_s6  ;;  %v6635_v47 = vmul.bf16 %v6633_v12, %v11686_v18  ;;  %v6636_v10 = vmul.bf16 %v6633_v12, %v6545_v61 }
0x13ff   : > { %v6659_v39 = vld [vmem:[#allocation3 + $0x80] sm:$0xff] }
0x1400   : > { %9146 = vmatprep.subr.bf16.mxu0 %v6659_v39 }
0x1401   : > { %v6958_v4 = vld [vmem:[#allocation2 + $0x48] sm:$0xff]  ;;  %v6430_v48 = vpop.permute.xlu1 %6429 }
0x1402   : > { %6431 = vrot.lane.b32.xlu0 %v6545_v61, %s12427_s7  ;;  %6397 = vrot.lane.b32.xlu1 %v6388_v53, %s12432_s6 }
0x1403   : > { %v6959_v63 = vld [vmem:[#allocation2 + $0x68] sm:$0xff]  ;;  %v11714_v60 = vld [vmem:[#allocation3 + $0x90] sm:$0xff] }
0x1404   : > { %v11716_v32 = vpack.c.bf16 %v6959_v63, %v6958_v4 }
0x1406   : > { %6963 = vst.msk [vmem:[#allocation3 + $0x90] sm:$0xff] %vm3397_vm5, %v11716_v32  ;;  %6471 = vrot.lane.b32.xlu0 %v6463_v8, %s12431_s24  ;;  %6565 = vrot.lane.b32.xlu1 %v6560_v11, %s12425_s2 }
0x140a   : > { %6477 = vrot.lane.b32.xlu0 %v6466_v3, %s12431_s24  ;;  %6475 = vrot.lane.b32.xlu1 %v6463_v8, %s12431_s24 }
0x140e   : > { %6563 = vrot.lane.b32.xlu0 %v6559_v15, %s12425_s2  ;;  %6595 = vrot.lane.b32.xlu1 %v6590_v17, %s12430_s21 }
0x1412   : > { %6518 = vrot.lane.b32.xlu0 %v6510_v7, %s12426_s8  ;;  %6473 = vrot.lane.b32.xlu1 %v6464_v20, %s12431_s24 }
0x1416   : > { %6522 = vrot.lane.b32.xlu1 %v6510_v7, %s12426_s8  ;;  %6593 = vrot.lane.b32.xlu0 %v6589_v22, %s12430_s21 }
0x141a   : > { %6520 = vrot.lane.b32.xlu1 %v6511_v40, %s12426_s8  ;;  %6609 = vrot.lane.b32.xlu0 %v11686_v18, %s12433_s27 }
0x141e   : > { %6611 = vrot.lane.b32.xlu1 %v6545_v61, %s12433_s27  ;;  %6524 = vrot.lane.b32.xlu0 %v6513_v59, %s12426_s8 }
0x1422   : > { %6641 = vrot.lane.b32.xlu1 %v6636_v10, %s12429_s20  ;;  %6639 = vrot.lane.b32.xlu0 %v6635_v47, %s12429_s20 }
0x1426   : > { %6980 = vrot.lane.b32.xlu1 %v6978_v24, %s12426_s8  ;;  %6808 = vrot.lane.b32.xlu0 %v6806_v1, %s12429_s20 }
0x142a   : > { %7010 = vrot.lane.b32.xlu1 %v7008_v34, %s12431_s24  ;;  %6884 = vrot.lane.b32.xlu0 %v6882_v38, %s12430_s21  ;;  %v9560_v38 = vld [vmem:[%s12282_s18] ss:$12 sps:$4 sm:$0xff]  }
0x142e   : > { %7056 = vrot.lane.b32.xlu1 %v7054_v50, %s12432_s6  ;;  %6931 = vrot.lane.b32.xlu0 %v6929_v27, %s12425_s2  ;;  %v9563_v50 = vld [vmem:[%s12282_s18 + $0x8] ss:$12 sps:$4 sm:$0xff]  }
0x1432   : > { %6853 = vrot.lane.b32.xlu1 %v11473_v28, %s12427_s7 }
0x1468   : > { %v6396_v44 = vpop.permute.xlu0 %6395 }
0x146a   : > { %v6428_v41 = vpop.permute.xlu1 %6427 }
0x146c   : > { %v6400_v56 = vpop.permute.xlu0 %6399 }
0x1470   : > { %v6426_v43 = vpop.permute.xlu0 %6425  ;;  %v6402_v37 = vpop.permute.xlu1 %6401 }
0x1471   : > { %v6433_v26 = vsel %vm3401_vm15, %v6426_v43, %v6428_v41  ;;  %v6404_v18 = vsel %vm3507_vm0, %v6400_v56, %v6402_v37 }
0x1472   : > { %6437 = vst.msk [vmem:[#allocation3 + $0x20] sm:$0xff] %vm3397_vm5, %v6433_v26  ;;  %6408 = vst.msk [vmem:[#allocation3 + $0x10] sm:$0xff] %vm3397_vm5, %v6404_v18 }
0x1474   : > { %v6432_v16 = vpop.permute.xlu0 %6431  ;;  %v6398_v21 = vpop.permute.xlu1 %6397 }
0x1475   : > { %v6434_v61 = vsel %vm3401_vm15, %v6430_v48, %v6432_v16  ;;  %v6403_v35 = vsel %vm3507_vm0, %v6396_v44, %v6398_v21 }
0x1476   : > { %6438 = vst.msk [vmem:[#allocation3 + $0x30] sm:$0xff] %vm3397_vm5, %v6434_v61  ;;  %6407 = vst.msk [vmem:[#allocation3] sm:$0xff] %vm3397_vm5, %v6403_v35 }
0x1478   : > { %v6472_v39 = vpop.permute.xlu0 %6471  ;;  %v6566_v53 = vpop.permute.xlu1 %6565 }
0x1479   : > { %6570 = vst.msk [vmem:[#allocation3 + $0xb0] sm:$0xff] %vm3397_vm5, %v6566_v53  ;;  %v6652_v3 = vld [vmem:[#allocation3 + $0x10] sm:$0xff] }
0x147c   : > { %v6478_v6 = vpop.permute.xlu0 %6477  ;;  %v6476_v8 = vpop.permute.xlu1 %6475 }
0x147d   : > { %v6480_v4 = vsel %vm3553_vm4, %v6476_v8, %v6478_v6  ;;  %v6651_v63 = vld [vmem:[#allocation3] sm:$0xff]  ;;  %v6654_v23 = vld [vmem:[#allocation3 + $0x30] sm:$0xff] }
0x147e   : > { %6484 = vst.msk [vmem:[#allocation3 + $0x50] sm:$0xff] %vm3397_vm5, %v6480_v4  ;;  %9147 = vmatpush3.bf16.msra.mxu0 %v6651_v63 }
0x147f   : > { %9148 = vmatprep.subr.bf16.mxu0 %v11714_v60  ;;  %v6653_v60 = vld [vmem:[#allocation3 + $0x20] sm:$0xff] }
0x1480   : > { %v6564_v52 = vpop.permute.xlu0 %6563  ;;  %v6596_v11 = vpop.permute.xlu1 %6595  ;;  %v6662_v22 = vld [vmem:[#allocation3 + $0xb0] sm:$0xff] }
0x1481   : > { %6569 = vst.msk [vmem:[#allocation3 + $0xa0] sm:$0xff] %vm3397_vm5, %v6564_v52  ;;  %6600 = vst.msk [vmem:[#allocation3 + $0xd0] sm:$0xff] %vm3397_vm5, %v6596_v11 }
0x1482   : > { %9149 = vmatpush3.bf16.msra.mxu0 %v6652_v3 }
0x1484   : > { %v6519_v51 = vpop.permute.xlu0 %6518  ;;  %v6474_v15 = vpop.permute.xlu1 %6473 }
0x1485   : > { %v6479_v17 = vsel %vm3553_vm4, %v6472_v39, %v6474_v15  ;;  %v6656_v47 = vld [vmem:[#allocation3 + $0x50] sm:$0xff] }
0x1486   : > { %6483 = vst.msk [vmem:[#allocation3 + $0x40] sm:$0xff] %vm3397_vm5, %v6479_v17 }
0x1488   : > { %v6594_v33 = vpop.permute.xlu0 %6593  ;;  %v6523_v7 = vpop.permute.xlu1 %6522  ;;  %v6661_v20 = vld [vmem:[#allocation3 + $0xa0] sm:$0xff]  ;;  %v6664_v55 = vld [vmem:[#allocation3 + $0xd0] sm:$0xff] }
0x1489   : > { %6599 = vst.msk [vmem:[#allocation3 + $0xc0] sm:$0xff] %vm3397_vm5, %v6594_v33  ;;  %9150 = vmatprep.subr.bf16.mxu0 %v6661_v20 }
0x148a   : > { %9151 = vmatpush3.bf16.msra.mxu0 %v6653_v60 }
0x148b   : > { %9152 = vmatprep.subr.bf16.mxu0 %v6662_v22 }
0x148c   : > { %v6610_v49 = vpop.permute.xlu0 %6609  ;;  %v6521_v40 = vpop.permute.xlu1 %6520 }
0x148d   : > { %6615 = vst.msk [vmem:[#allocation3 + $0xe0] sm:$0xff] %vm3397_vm5, %v6610_v49  ;;  %v6526_v29 = vsel %vm1073_vm1, %v6519_v51, %v6521_v40  ;;  %v6655_v36 = vld [vmem:[#allocation3 + $0x40] sm:$0xff] }
0x148e   : > { %6530 = vst.msk [vmem:[#allocation3 + $0x60] sm:$0xff] %vm3397_vm5, %v6526_v29  ;;  %9153 = vmatpush3.bf16.msra.mxu0 %v6654_v23 }
0x1490   : > { %v6525_v59 = vpop.permute.xlu0 %6524  ;;  %v6612_v12 = vpop.permute.xlu1 %6611  ;;  %v6663_v19 = vld [vmem:[#allocation3 + $0xc0] sm:$0xff] }
0x1491   : > { %v6527_v62 = vsel %vm1073_vm1, %v6523_v7, %v6525_v59  ;;  %6616 = vst.msk [vmem:[#allocation3 + $0xf0] sm:$0xff] %vm3397_vm5, %v6612_v12  ;;  %9154 = vmatprep.subr.bf16.mxu0 %v6663_v19 }
0x1492   : > { %6531 = vst.msk [vmem:[#allocation3 + $0x70] sm:$0xff] %vm3397_vm5, %v6527_v62  ;;  %9155 = vmatpush3.bf16.msra.mxu0 %v6655_v36 }
0x1493   : > { %9156 = vmatprep.subr.bf16.mxu0 %v6664_v55 }
0x1494   : > { %v6640_v25 = vpop.permute.xlu0 %6639  ;;  %v6642_v9 = vpop.permute.xlu1 %6641  ;;  %v6665_v10 = vld [vmem:[#allocation3 + $0xe0] sm:$0xff] }
0x1495   : > { %6645 = vst.msk [vmem:[#allocation3 + $0x100] sm:$0xff] %vm3397_vm5, %v6640_v25  ;;  %6646 = vst.msk [vmem:[#allocation3 + $0x110] sm:$0xff] %vm3397_vm5, %v6642_v9  ;;  %v6657_v24 = vld [vmem:[#allocation3 + $0x60] sm:$0xff] }
0x1496   : > { %9157 = vmatpush3.bf16.msra.mxu0 %v6656_v47 }
0x1497   : > { %9158 = vmatprep.subr.bf16.mxu0 %v6665_v10  ;;  %v9566_v10 = vld [vmem:[%s12469_s29 + $0x4] ss:$12 sps:$4 sm:$0xff]  }
0x1498   : > { %v11803_v57 = vpop.permute.xlu0 %6808  ;;  %v6666_v45 = vld [vmem:[#allocation3 + $0xf0] sm:$0xff]  ;;  %v6981_v41 = vpop.permute.xlu1 %6980 }
0x1499   : > { %v6814_v1 = vmul.bf16 %v11716_v32, %v11803_v57  ;;  %v6811_v58 = vmul.bf16 %v11803_v57, %v11473_v28  ;;  %v6658_v34 = vld [vmem:[#allocation3 + $0x70] sm:$0xff]  ;;  %v6984_v12 = vmul.bf16 %v6981_v41, %v11716_v32 }
0x149a   : > { %9159 = vmatpush3.bf16.msra.mxu0 %v6657_v24 }
0x149b   : > { %6825 = vrot.lane.b32.xlu1 %v6814_v1, %s12432_s6  ;;  %6819 = vrot.lane.b32.xlu0 %v6811_v58, %s12432_s6 }
0x149c   : > { %9160 = vmatprep.subr.bf16.mxu0 %v6666_v45  ;;  %v6667_v31 = vld [vmem:[#allocation3 + $0x100] sm:$0xff]  ;;  %v6668_v2 = vld [vmem:[#allocation3 + $0x110] sm:$0xff]  ;;  %v6885_v27 = vpop.permute.xlu0 %6884  ;;  %v7011_v56 = vpop.permute.xlu1 %7010 }
0x149d   : > { %9335 = vmatpush3.bf16.msra.mxu1 %v6667_v31  ;;  %v6887_v48 = vmul.bf16 %v6885_v27, %v11473_v28  ;;  %v6890_v44 = vmul.bf16 %v11716_v32, %v6885_v27  ;;  %v7014_v36 = vmul.bf16 %v7011_v56, %v11716_v32 }
0x149e   : > { %9161 = vmatpush3.bf16.msra.mxu0 %v6658_v34  ;;  %9336 = vmatprep.subr.bf16.mxu1 %v11814_v54 }
0x149f   : > { %6823 = vrot.lane.b32.xlu0 %v6811_v58, %s12432_s6  ;;  %9342 = vmatprep.subr.bf16.mxu0 %v11814_v54 }
0x14a0   : > { %v11833_v43 = vpop.permute.xlu1 %7056  ;;  %v6932_v37 = vpop.permute.xlu0 %6931 }
0x14a1   : > { %6720 = vmatmul.mubr.bf16.vlgmr.msra.gmra.mrb[52].mxu0 %v9560_v38  ;;  %9337 = vmatpush3.bf16.msra.mxu1 %v6668_v2  ;;  %v6934_v59 = vmul.bf16 %v6932_v37, %v11473_v28  ;;  %v6937_v55 = vmul.bf16 %v11716_v32, %v6932_v37 }
0x14a2   : > { %9346 = vmatprep.mubr.msk.bf16.mxu0 %vm12462_vm12, %v11814_v54 }
0x14a3   : > { %6849 = vrot.lane.b32.xlu0 %v11473_v28, %s12427_s7 }
0x14a4   : > { %9339 = vmatmul.mubr.msk.bf16.vlgmr.msra.gmra.mrb[76].mxu1 %vm1929_vm13, %v9563_v50  ;;  %v6854_v26 = vpop.permute.xlu1 %6853 }
0x14a5   : > { %7143 = vmatprep.mubr.bf16.mxu1 %v9566_v10 }
0x14a7   : > { %6855 = vrot.lane.b32.xlu0 %v11716_v32, %s12427_s7 }
0x14ab   : > { %6895 = vrot.lane.b32.xlu0 %v6887_v48, %s12431_s24 }
0x14af   : > { %6901 = vrot.lane.b32.xlu0 %v6890_v44, %s12431_s24 }
0x150d   : > { %v11835_v18 = vpop.permute.xlu0 %6819  ;;  %v6826_v16 = vpop.permute.xlu1 %6825 }
0x1511   : > { %v6824_v21 = vpop.permute.xlu0 %6823 }
0x1512   : > { %v6828_v61 = vsel %vm3507_vm0, %v6824_v21, %v6826_v16 }
0x1513   : > { %6832 = vst.msk [vmem:[#allocation3 + $0x10] sm:$0xff] %vm3397_vm5, %v6828_v61 }
0x1515   : > { %v6850_v35 = vpop.permute.xlu0 %6849 }
0x1519   : > { %v6856_v39 = vpop.permute.xlu0 %6855 }
0x151a   : > { %v6858_v53 = vsel %vm3401_vm15, %v6854_v26, %v6856_v39 }
0x151b   : > { %6862 = vst.msk [vmem:[#allocation3 + $0x30] sm:$0xff] %vm3397_vm5, %v6858_v53 }
0x151d   : > { %v6896_v24 = vpop.permute.xlu0 %6895 }
0x1521   : > { %v6902_v1 = vpop.permute.xlu0 %6901 }
0x1574   : > { %v9162_v6 = vpop.f32.mrb[52].mxu0 }
0x1575   : > { %v9163_v8 = vpop.f32.mrb[53].mxu0 }
0x1576   : > { %v9164_v4 = vadd.f32 %v9163_v8, %v9162_v6  ;;  %v9165_v63 = vpop.f32.mrb[54].mxu0  ;;  %v7078_v8 = vld [vmem:[#allocation3 + $0x30] sm:$0xff] }
0x1577   : > { %v9166_v52 = vpop.f32.mrb[55].mxu0  ;;  %v6762_v11 = vpop.f32.mrb[76].mxu1 }
0x1578   : > { %v9167_v3 = vadd.f32 %v9166_v52, %v9165_v63  ;;  %v6763_v51 = vadd.f32 %v9164_v4, %v6762_v11  ;;  %v9340_v15 = vpop.f32.mrb[77].mxu1 }
0x1579   : > { %v6765_v17 = vpop.f32.mrb[78].mxu1 }
0x157a   : > { %v6769_v33 = vmax.f32 %v6763_v51, 0.0  ;;  %v6766_v7 = vadd.f32 %v9167_v3, %v6765_v17  ;;  %v9341_v20 = vpop.f32.mrb[79].mxu1 }
0x157c   : > { %6783 = vst.msk [vmem:[#allocation2 + $0x8] sm:$0xff] %vm3397_vm5, %v6769_v33  ;;  %v6770_v60 = vmax.f32 %v6766_v7, 0.0 }
0x157e   : > { %6784 = vst.msk [vmem:[#allocation2 + $0x28] sm:$0xff] %vm3397_vm5, %v6770_v60 }
0x1583   : > { %v6956_v22 = vld [vmem:[#allocation2 + $0x8] sm:$0xff] }
0x1584   : > { %7624 = vst [vmem:[#allocation2 + $0x8] sm:$0xff] %v11814_v54 }
0x1585   : > { %v6957_v49 = vld [vmem:[#allocation2 + $0x28] sm:$0xff] }
0x1586   : > { %v6960_v40 = vpack.c.bf16 %v6957_v49, %v6956_v22  ;;  %7626 = vst [vmem:[#allocation2 + $0x28] sm:$0xff] %v11814_v54  ;;  %v9564_v49 = vld [vmem:[%s12469_s29] ss:$12 sps:$4 sm:$0xff]  }
0x1588   : > { %6962 = vst.msk [vmem:[#allocation3 + $0x80] sm:$0xff] %vm3397_vm5, %v6960_v40  ;;  %6851 = vrot.lane.b32.xlu1 %v6960_v40, %s12427_s7  ;;  %v6983_v29 = vmul.bf16 %v6981_v41, %v6960_v40  ;;  %v6812_v23 = vmul.bf16 %v6960_v40, %v11803_v57  ;;  %v7013_v62 = vmul.bf16 %v7011_v56, %v6960_v40  ;;  %v7084_v56 = vld [vmem:[#allocation3 + $0x90] sm:$0xff]  ;;  %s12479_s7 = smov 15  }
0x1589   : > { %v6888_v25 = vmul.bf16 %v6960_v40, %v6885_v27  ;;  %v7059_v9 = vmul.bf16 %v11833_v43, %v6960_v40  ;;  %v6935_v47 = vmul.bf16 %v6960_v40, %v6932_v37  ;;  %v7060_v57 = vmul.bf16 %v11833_v43, %v11716_v32  ;;  %v7076_v37 = vld [vmem:[#allocation3 + $0x10] sm:$0xff] }
0x158a   : > { %6987 = vrot.lane.b32.xlu0 %v6983_v29, %s12425_s2  ;;  %v9567_v29 = vld [vmem:[%s12469_s29 + $0x8] ss:$12 sps:$4 sm:$0xff]  }
0x158c   : > { %6821 = vrot.lane.b32.xlu1 %v6812_v23, %s12432_s6  ;;  %v7249_v23 = vld [vmem:[%s12470_s1] sm:$0xf]  ;;  %s12474_s6 = sld [smem:[#allocation27_spill]] }
0x158e   : > { %6942 = vrot.lane.b32.xlu0 %v6934_v59, %s12426_s8 }
0x158f   : > { %v7083_v19 = vld [vmem:[#allocation3 + $0x80] sm:$0xff] }
0x1590   : > { %9171 = vmatprep.subr.bf16.mxu1 %v7083_v19  ;;  %6989 = vrot.lane.b32.xlu1 %v6984_v12, %s12425_s2 }
0x1592   : > { %7017 = vrot.lane.b32.xlu0 %v7013_v62, %s12430_s21 }
0x1594   : > { %6899 = vrot.lane.b32.xlu1 %v6887_v48, %s12431_s24 }
0x1596   : > { %7033 = vrot.lane.b32.xlu0 %v6960_v40, %s12433_s27 }
0x1598   : > { %7019 = vrot.lane.b32.xlu1 %v7014_v36, %s12430_s21  ;;  %s12475_s21 = smov 64  }
0x159a   : > { %6948 = vrot.lane.b32.xlu0 %v6937_v55, %s12426_s8 }
0x159c   : > { %6897 = vrot.lane.b32.xlu1 %v6888_v25, %s12431_s24  ;;  %s12485_s24 = sld [smem:[#allocation23_spill]] }
0x159e   : > { %7063 = vrot.lane.b32.xlu0 %v7059_v9, %s12429_s20 }
0x15a0   : > { %6946 = vrot.lane.b32.xlu1 %v6934_v59, %s12426_s8  ;;  %v7254_v59 = vsel %vm906_vm3, %v7249_v23, 0 }
0x15a4   : > { %6944 = vrot.lane.b32.xlu1 %v6935_v47, %s12426_s8 }
0x15a8   : > { %7035 = vrot.lane.b32.xlu1 %v11716_v32, %s12433_s27 }
0x15ac   : > { %7065 = vrot.lane.b32.xlu1 %v7060_v57, %s12429_s20  ;;  %s838_s20 = scalar_lea.vmem %s12474_s6, %s12473_s28  ;;  %s12480_s6 = smov 17  }
0x15fa   : > { %v6852_v58 = vpop.permute.xlu1 %6851 }
0x15fb   : > { %v6857_v45 = vsel %vm3401_vm15, %v6850_v35, %v6852_v58 }
0x15fc   : > { %6861 = vst.msk [vmem:[#allocation3 + $0x20] sm:$0xff] %vm3397_vm5, %v6857_v45  ;;  %v6988_v31 = vpop.permute.xlu0 %6987 }
0x15fd   : > { %6993 = vst.msk [vmem:[#allocation3 + $0xa0] sm:$0xff] %vm3397_vm5, %v6988_v31 }
0x15fe   : > { %v6822_v34 = vpop.permute.xlu1 %6821 }
0x15ff   : > { %v6827_v38 = vsel %vm3507_vm0, %v11835_v18, %v6822_v34  ;;  %v9568_v34 = vld [vmem:[%s12471_s12] sm:$0xff]   ;;  %vm12483_vm0 = vcmask 1039360  }
0x1600   : > { %6831 = vst.msk [vmem:[#allocation3] sm:$0xff] %vm3397_vm5, %v6827_v38  ;;  %v6943_v2 = vpop.permute.xlu0 %6942 }
0x1602   : > { %v6990_v32 = vpop.permute.xlu1 %6989 }
0x1603   : > { %6994 = vst.msk [vmem:[#allocation3 + $0xb0] sm:$0xff] %vm3397_vm5, %v6990_v32  ;;  %v7077_v61 = vld [vmem:[#allocation3 + $0x20] sm:$0xff] }
0x1604   : > { %v7018_v50 = vpop.permute.xlu0 %7017  ;;  %v7085_v18 = vld [vmem:[#allocation3 + $0xa0] sm:$0xff] }
0x1605   : > { %7023 = vst.msk [vmem:[#allocation3 + $0xc0] sm:$0xff] %vm3397_vm5, %v7018_v50 }
0x1606   : > { %v6900_v27 = vpop.permute.xlu1 %6899 }
0x1607   : > { %v6904_v48 = vsel %vm3553_vm4, %v6900_v27, %v6902_v1  ;;  %v7075_v44 = vld [vmem:[#allocation3] sm:$0xff] }
0x1608   : > { %6908 = vst.msk [vmem:[#allocation3 + $0x50] sm:$0xff] %vm3397_vm5, %v6904_v48  ;;  %v7034_v41 = vpop.permute.xlu0 %7033  ;;  %9172 = vmatpush3.bf16.msra.mxu1 %v7075_v44 }
0x1609   : > { %7039 = vst.msk [vmem:[#allocation3 + $0xe0] sm:$0xff] %vm3397_vm5, %v7034_v41  ;;  %9173 = vmatprep.subr.bf16.mxu1 %v7084_v56 }
0x160a   : > { %v7020_v43 = vpop.permute.xlu1 %7019  ;;  %v7086_v39 = vld [vmem:[#allocation3 + $0xb0] sm:$0xff] }
0x160b   : > { %7024 = vst.msk [vmem:[#allocation3 + $0xd0] sm:$0xff] %vm3397_vm5, %v7020_v43 }
0x160c   : > { %v6949_v26 = vpop.permute.xlu0 %6948  ;;  %9174 = vmatpush3.bf16.msra.mxu1 %v7076_v37  ;;  %v7087_v4 = vld [vmem:[#allocation3 + $0xc0] sm:$0xff] }
0x160d   : > { %9175 = vmatprep.subr.bf16.mxu1 %v7085_v18 }
0x160e   : > { %v6898_v16 = vpop.permute.xlu1 %6897 }
0x160f   : > { %v6903_v21 = vsel %vm3553_vm4, %v6896_v24, %v6898_v16  ;;  %v7080_v17 = vld [vmem:[#allocation3 + $0x50] sm:$0xff]  ;;  %vm12484_vm4 = vcmask 121856  }
0x1610   : > { %6907 = vst.msk [vmem:[#allocation3 + $0x40] sm:$0xff] %vm3397_vm5, %v6903_v21  ;;  %v7064_v35 = vpop.permute.xlu0 %7063  ;;  %9176 = vmatpush3.bf16.msra.mxu1 %v7077_v61  ;;  %v7089_v33 = vld [vmem:[#allocation3 + $0xe0] sm:$0xff]  ;;  %vm12489_vm7 = vmmov %vm12484_vm4 }
0x1611   : > { %7069 = vst.msk [vmem:[#allocation3 + $0x100] sm:$0xff] %vm3397_vm5, %v7064_v35  ;;  %9177 = vmatprep.subr.bf16.mxu1 %v7086_v39  ;;  %vm12490_vm8 = vmmov %vm12484_vm4 }
0x1612   : > { %v6947_v53 = vpop.permute.xlu1 %6946  ;;  %v7088_v3 = vld [vmem:[#allocation3 + $0xd0] sm:$0xff] }
0x1613   : > { %v6951_v6 = vsel %vm1073_vm1, %v6947_v53, %v6949_v26 }
0x1614   : > { %6955 = vst.msk [vmem:[#allocation3 + $0x70] sm:$0xff] %vm3397_vm5, %v6951_v6  ;;  %9178 = vmatpush3.bf16.msra.mxu1 %v7078_v8 }
0x1615   : > { %9179 = vmatprep.subr.bf16.mxu1 %v7087_v4 }
0x1616   : > { %v6945_v63 = vpop.permute.xlu1 %6944 }
0x1617   : > { %v6950_v52 = vsel %vm1073_vm1, %v6943_v2, %v6945_v63  ;;  %v7079_v11 = vld [vmem:[#allocation3 + $0x40] sm:$0xff] }
0x1618   : > { %6954 = vst.msk [vmem:[#allocation3 + $0x60] sm:$0xff] %vm3397_vm5, %v6950_v52  ;;  %9180 = vmatpush3.bf16.msra.mxu1 %v7079_v11  ;;  %v7091_v51 = vld [vmem:[#allocation3 + $0x100] sm:$0xff] }
0x1619   : > { %9181 = vmatprep.subr.bf16.mxu1 %v7088_v3  ;;  %9343 = vmatpush3.bf16.msra.mxu0 %v7091_v51 }
0x161a   : > { %v7036_v15 = vpop.permute.xlu1 %7035  ;;  %9344 = vmatprep.subr.bf16.mxu0 %v11814_v54 }
0x161b   : > { %7040 = vst.msk [vmem:[#allocation3 + $0xf0] sm:$0xff] %vm3397_vm5, %v7036_v15  ;;  %v7082_v22 = vld [vmem:[#allocation3 + $0x70] sm:$0xff] }
0x161c   : > { %9182 = vmatpush3.bf16.msra.mxu1 %v7080_v17 }
0x161d   : > { %9183 = vmatprep.subr.bf16.mxu1 %v7089_v33 }
0x161e   : > { %v7066_v7 = vpop.permute.xlu1 %7065 }
0x161f   : > { %7070 = vst.msk [vmem:[#allocation3 + $0x110] sm:$0xff] %vm3397_vm5, %v7066_v7  ;;  %v7081_v20 = vld [vmem:[#allocation3 + $0x60] sm:$0xff] }
0x1620   : > { %9184 = vmatpush3.bf16.msra.mxu1 %v7081_v20  ;;  %v7704_v20 = vld [vmem:[%s12476_s3] sm:$0x11] }
0x1622   : > { %v7090_v60 = vld [vmem:[#allocation3 + $0xf0] sm:$0xff] }
0x1623   : > { %9185 = vmatprep.subr.bf16.mxu1 %v7090_v60 }
0x1624   : > { %9186 = vmatpush3.bf16.msra.mxu1 %v7082_v22 }
0x1625   : > { %9356 = vmatprep.subr.bf16.mxu1 %v11814_v54 }
0x1626   : > { %v7092_v40 = vld [vmem:[#allocation3 + $0x110] sm:$0xff] }
0x1627   : > { %7144 = vmatmul.mubr.bf16.vlgmr.msra.gmra.mrb[80].mxu1 %v9564_v49  ;;  %9345 = vmatpush3.bf16.msra.mxu0 %v7092_v40 }
0x1628   : > { %9350 = vmatprep.subr.bf16.mxu0 %v11814_v54  ;;  %9358 = vmatprep.mubr.msk.bf16.mxu1 %vm12462_vm12, %v11814_v54 }
0x1629   : > { %9357 = vmatpush3.bf16.msra.mxu1 %v7254_v59 }
0x162a   : > { %9347 = vmatmul.mubr.msk.bf16.vlgmr.msra.gmra.mrb[56].mxu0 %vm1929_vm13, %v9567_v29  ;;  %9368 = vmatprep.subr.bf16.mxu1 %v11814_v54  ;;  %v8972_v29 = vcombine.low %v7704_v20, %v7704_v20  ;;  %vm7649_vm13 = vcmask 654848  }
0x162b   : > { %9352 = vmatprep.mubr.msk.bf16.mxu0 %vm12462_vm12, %v11814_v54 }
0x16fa   : > { %v9187_v12 = vpop.f32.mrb[80].mxu1 }
0x16fb   : > { %v9188_v19 = vpop.f32.mrb[81].mxu1 }
0x16fc   : > { %v9189_v62 = vadd.f32 %v9188_v19, %v9187_v12  ;;  %v9190_v36 = vpop.f32.mrb[82].mxu1  ;;  %v7785_v12 = vld [vmem:[%s12476_s3] sm:$0x22] }
0x16fd   : > { %v9191_v55 = vpop.f32.mrb[83].mxu1  ;;  %v7186_v25 = vpop.f32.mrb[56].mxu0  ;;  %v7842_v19 = vld [vmem:[%s12476_s3] sm:$0x22] }
0x16fe   : > { %v9192_v9 = vadd.f32 %v9191_v55, %v9190_v36  ;;  %v7187_v47 = vadd.f32 %v9189_v62, %v7186_v25  ;;  %v9348_v10 = vpop.f32.mrb[57].mxu0  ;;  %v8973_v55 = vcombine.high %v7704_v20, %v7704_v20  ;;  %v7711_v25 = vpack.i.b16 %v8972_v29, %v8972_v29 }
0x16ff   : > { %v7189_v57 = vpop.f32.mrb[58].mxu0  ;;  %v7909_v10 = vld [vmem:[%s12476_s3] sm:$0x44] }
0x1700   : > { %v7190_v24 = vadd.f32 %v9192_v9, %v7189_v57  ;;  %v9349_v1 = vpop.f32.mrb[59].mxu0  ;;  %v7193_v58 = vmax.f32 %v7187_v47, 0.0  ;;  %v8974_v9 = vcombine.low %v7785_v12, %v7785_v12  ;;  %v8976_v47 = vcombine.low %v7842_v19, %v7842_v19 }
0x1701   : > { %v7718_v57 = vpack.i.b16 %v8973_v55, %v8973_v55  ;;  %v8977_v1 = vcombine.high %v7842_v19, %v7842_v19 }
0x1702   : > { %v7194_v45 = vmax.f32 %v7190_v24, 0.0  ;;  %v8975_v24 = vcombine.high %v7785_v12, %v7785_v12 }
0x1704   : > { %v7197_v31 = vpack.c.bf16 %v7194_v45, %v7193_v58 }
0x1706   : > { %7344 = vrot.lane.b32.xlu1 %v7197_v31, %s12451_s5  ;;  %7298 = vrot.lane.b32.xlu0 %v7197_v31, %s12433_s27  ;;  %s12472_s27 = smov 80  }
0x1707   : > { %9351 = vmatpush3.bf16.msra.mxu0 %v7197_v31  ;;  %9359 = vmatmul.mubr.msk.bf16.vlgmr.msra.gmra.mrb[84].mxu1 %vm3401_vm15, %v7197_v31 }
0x1708   : > { %9362 = vmatprep.subr.bf16.mxu0 %v11814_v54  ;;  %9369 = vmatpush3.bf16.msra.mxu1 %v7254_v59 }
0x1709   : > { %9370 = vmatprep.mubr.msk.bf16.mxu1 %vm12462_vm12, %v11814_v54  ;;  %9380 = vmatprep.subr.bf16.mxu1 %v11814_v54 }
0x170a   : > { %7436 = vrot.lane.b32.xlu1 %v7197_v31, %s12452_s0  ;;  %7390 = vrot.lane.b32.xlu0 %v7197_v31, %s9662_s13 }
0x170b   : > { %9353 = vmatmul.mubr.msk.bf16.vlgmr.msra.gmra.mrb[60].mxu0 %vm3025_vm10, %v9568_v34  ;;  %v7792_v34 = vpack.i.b16 %v8974_v9, %v8974_v9 }
0x170c   : > { %9363 = vmatpush3.bf16.msra.mxu0 %v7254_v59  ;;  %9364 = vmatprep.mubr.msk.bf16.mxu0 %vm12462_vm12, %v11814_v54 }
0x170d   : > { %9374 = vmatprep.subr.bf16.mxu0 %v11814_v54 }
0x170e   : > { %7528 = vrot.lane.b32.xlu1 %v7197_v31, %s12472_s27  ;;  %7482 = vrot.lane.b32.xlu0 %v7197_v31, %s9663_s9 }
0x1712   : > { %7574 = vrot.lane.b32.xlu0 %v7197_v31, %s9664_s30  ;;  %v7716_v31 = vrot.slane %v7711_v25, %v9826_v14 }
0x1778   : > { %v7345_v38 = vpop.permute.xlu1 %7344  ;;  %v7299_v2 = vpop.permute.xlu0 %7298 }
0x1779   : > { %9365 = vmatmul.mubr.msk.bf16.vlgmr.msra.gmra.mrb[64].mxu0 %vm3401_vm15, %v7299_v2  ;;  %9371 = vmatmul.mubr.msk.bf16.vlgmr.msra.gmra.mrb[88].mxu1 %vm3401_vm15, %v7345_v38  ;;  %v7849_v38 = vshrl.u32 %v8976_v47, 16  ;;  %v8978_v2 = vcombine.low %v7909_v10, %v7909_v10 }
0x177a   : > { %9375 = vmatpush3.bf16.msra.mxu0 %v7254_v59  ;;  %9381 = vmatpush3.bf16.msra.mxu1 %v7254_v59 }
0x177b   : > { %9376 = vmatprep.mubr.msk.bf16.mxu0 %vm12462_vm12, %v11814_v54  ;;  %9382 = vmatprep.mubr.msk.bf16.mxu1 %vm12462_vm12, %v11814_v54 }
0x177c   : > { %9386 = vmatprep.subr.bf16.mxu0 %v11814_v54  ;;  %9392 = vmatprep.subr.bf16.mxu1 %v11814_v54  ;;  %v7437_v32 = vpop.permute.xlu1 %7436  ;;  %v7391_v50 = vpop.permute.xlu0 %7390 }
0x1780   : > { %v7529_v27 = vpop.permute.xlu1 %7528  ;;  %v7483_v48 = vpop.permute.xlu0 %7482 }
0x1781   : > { %9377 = vmatmul.mubr.msk.bf16.vlgmr.msra.gmra.mrb[68].mxu0 %vm3401_vm15, %v7391_v50  ;;  %9383 = vmatmul.mubr.msk.bf16.vlgmr.msra.gmra.mrb[92].mxu1 %vm3401_vm15, %v7437_v32 }
0x1782   : > { %9387 = vmatpush3.bf16.msra.mxu0 %v7254_v59  ;;  %9393 = vmatpush3.bf16.msra.mxu1 %v7254_v59 }
0x1783   : > { %9388 = vmatprep.mubr.msk.bf16.mxu0 %vm12462_vm12, %v11814_v54  ;;  %9394 = vmatprep.mubr.msk.bf16.mxu1 %vm12462_vm12, %v11814_v54 }
0x1784   : > { %9398 = vmatprep.subr.bf16.mxu0 %v11814_v54  ;;  %v7575_v44 = vpop.permute.xlu0 %7574 }
0x1789   : > { %9389 = vmatmul.mubr.msk.bf16.vlgmr.msra.gmra.mrb[72].mxu0 %vm3401_vm15, %v7483_v48  ;;  %9395 = vmatmul.mubr.msk.bf16.vlgmr.msra.gmra.mrb[96].mxu1 %vm3401_vm15, %v7529_v27  ;;  %v7723_v27 = vrot.slane %v7718_v57, %v9826_v14  ;;  %v7799_v48 = vpack.i.b16 %v8975_v24, %v8975_v24 }
0x178a   : > { %9399 = vmatpush3.bf16.msra.mxu0 %v7254_v59  ;;  %9400 = vmatprep.mubr.msk.bf16.mxu0 %vm12462_vm12, %v11814_v54  ;;  %vm12486_vm12 = vcmask 138240  }
0x178b   : > { %vm12487_vm14 = vmmov %vm12486_vm12 }
0x178c   : > { %vm12488_vm6 = vmmov %vm12486_vm12 }
0x1791   : > { %9401 = vmatmul.mubr.msk.bf16.vlgmr.msra.gmra.mrb[76].mxu0 %vm3401_vm15, %v7575_v44  ;;  %v7857_v44 = vshrl.u32 %v8977_v1, 16 }
0x17da   : > { %v7290_v41 = vpop.f32.mrb[84].mxu1 }
0x17db   : > { %7628 = vst.msk [vmem:[#allocation2 + $0x8] sm:$0xff] %vm3025_vm10, %v7290_v41  ;;  %v9360_v56 = vpop.f32.mrb[85].mxu1  ;;  %v8979_v41 = vcombine.high %v7909_v10, %v7909_v10 }
0x17dc   : > { %v7293_v43 = vpop.f32.mrb[86].mxu1  ;;  %v7797_v56 = vrot.slane %v7792_v34, %v9824_v13 }
0x17dd   : > { %7629 = vst.msk [vmem:[#allocation2 + $0x28] sm:$0xff] %vm3025_vm10, %v7293_v43  ;;  %v9361_v37 = vpop.f32.mrb[87].mxu1  ;;  %v7850_v43 = vpack.i.b16 %v7849_v38, %v7849_v38 }
0x17de   : > { %v7240_v26 = vpop.f32.mrb[60].mxu0  ;;  %v7916_v37 = vshrl.u32 %v8978_v2, 16 }
0x17df   : > { %7247 = vst.msk [vmem:[%s838_s20] sm:$0xff] %vm3397_vm5, %v7240_v26  ;;  %v9354_v18 = vpop.f32.mrb[61].mxu0  ;;  %v7968_v26 = vld [vmem:[%s12476_s3] sm:$0x88] }
0x17e0   : > { %v7243_v16 = vpop.f32.mrb[62].mxu0  ;;  %v7804_v18 = vrot.slane %v7799_v48, %v9824_v13 }
0x17e1   : > { %7248 = vst.msk [vmem:[%s838_s20 + $0x8] sm:$0xff] %vm3397_vm5, %v7243_v16  ;;  %v9355_v21 = vpop.f32.mrb[63].mxu0  ;;  %v7858_v16 = vpack.i.b16 %v7857_v44, %v7857_v44  ;;  %vm12482_vm5 = vcmask 924672  }
0x17e2   : > { %v7924_v21 = vshrl.u32 %v8979_v41, 16 }
0x184c   : > { %v7337_v61 = vpop.f32.mrb[64].mxu0  ;;  %v7383_v35 = vpop.f32.mrb[88].mxu1 }
0x184d   : > { %v9372_v39 = vpop.f32.mrb[89].mxu1  ;;  %7632 = vrot.lane.b32.xlu1 %v7337_v61, %s12463_s4  ;;  %v9366_v53 = vpop.f32.mrb[65].mxu0  ;;  %v7855_v61 = vrot.slane %v7850_v43, %v9824_v13 }
0x184e   : > { %v7340_v6 = vpop.f32.mrb[66].mxu0  ;;  %v7386_v8 = vpop.f32.mrb[90].mxu1  ;;  %v8980_v39 = vcombine.low %v7968_v26, %v7968_v26  ;;  %v8050_v53 = vld [vmem:[%s12476_s3 + $0x8] sm:$0x11] }
0x184f   : > { %v9373_v4 = vpop.f32.mrb[91].mxu1  ;;  %7634 = vrot.lane.b32.xlu0 %v7340_v6, %s12463_s4  ;;  %v9367_v63 = vpop.f32.mrb[67].mxu0  ;;  %v7863_v6 = vrot.slane %v7858_v16, %v9824_v13 }
0x1850   : > { %v8981_v4 = vcombine.high %v7968_v26, %v7968_v26 }
0x1851   : > { %7643 = vrot.lane.b32.xlu1 %v7383_v35, %s12475_s21  ;;  %v7917_v35 = vpack.i.b16 %v7916_v37, %v7916_v37 }
0x1853   : > { %7645 = vrot.lane.b32.xlu0 %v7386_v8, %s12475_s21  ;;  %v7925_v8 = vpack.i.b16 %v7924_v21, %v7924_v21  ;;  %v7922_v63 = vrot.slane %v7917_v35, %v9843_v30 }
0x1854   : > { %v7429_v52 = vpop.f32.mrb[68].mxu0  ;;  %v7475_v11 = vpop.f32.mrb[92].mxu1 }
0x1855   : > { %7663 = vst.msk [vmem:[#allocation2 + $0x10] sm:$0xff] %vm3025_vm10, %v7475_v11  ;;  %v9384_v3 = vpop.f32.mrb[93].mxu1  ;;  %7654 = vrot.lane.b32.xlu1 %v7429_v52, %s12452_s0  ;;  %v9378_v51 = vpop.f32.mrb[69].mxu0  ;;  %v7975_v52 = vpack.i.b16 %v8980_v39, %v8980_v39  ;;  %v8982_v11 = vcombine.low %v8050_v53, %v8050_v53 }
0x1856   : > { %v7432_v15 = vpop.f32.mrb[70].mxu0  ;;  %v7478_v17 = vpop.f32.mrb[94].mxu1  ;;  %v7930_v3 = vrot.slane %v7925_v8, %v9843_v30  ;;  %v7982_v51 = vpack.i.b16 %v8981_v4, %v8981_v4 }
0x1857   : > { %7664 = vst.msk [vmem:[#allocation2 + $0x30] sm:$0xff] %vm3025_vm10, %v7478_v17  ;;  %v9385_v33 = vpop.f32.mrb[95].mxu1  ;;  %7656 = vrot.lane.b32.xlu0 %v7432_v15, %s12452_s0  ;;  %v9379_v7 = vpop.f32.mrb[71].mxu0  ;;  %v8983_v15 = vcombine.high %v8050_v53, %v8050_v53  ;;  %v7980_v17 = vrot.slane %v7975_v52, %v9867_v46 }
0x1858   : > { %v8057_v33 = vpack.i.b16 %v8982_v11, %v8982_v11  ;;  %v7987_v7 = vrot.slane %v7982_v51, %v9867_v46 }
0x1859   : > { %v8064_v20 = vpack.i.b16 %v8983_v15, %v8983_v15  ;;  %v12080_v15 = vld [vmem:[%s12485_s24] sm:$0xff] }
0x185c   : > { %v7521_v60 = vpop.f32.mrb[72].mxu0  ;;  %v7567_v22 = vpop.f32.mrb[96].mxu1 }
0x185d   : > { %v9396_v49 = vpop.f32.mrb[97].mxu1  ;;  %7667 = vrot.lane.b32.xlu1 %v7521_v60, %s12463_s4  ;;  %v9390_v40 = vpop.f32.mrb[73].mxu0  ;;  %v8062_v60 = vrot.slane %v8057_v33, %v9826_v14  ;;  %v8985_v33 = vcombine.high %v12080_v15, %v12080_v15 }
0x185e   : > { %v7524_v23 = vpop.f32.mrb[74].mxu0  ;;  %v7570_v59 = vpop.f32.mrb[98].mxu1 }
0x185f   : > { %v9397_v62 = vpop.f32.mrb[99].mxu1  ;;  %7669 = vrot.lane.b32.xlu0 %v7524_v23, %s12463_s4  ;;  %v9391_v36 = vpop.f32.mrb[75].mxu0  ;;  %s12477_s4 = smov 111   ;;  %8986 = vmatprep.mubr.msk.bf16.mxu1 %vm3025_vm10, %v8985_v33 }
0x1861   : > { %7677 = vrot.lane.b32.xlu1 %v7567_v22, %s12475_s21  ;;  %v8069_v22 = vrot.slane %v8064_v20, %v9826_v14  ;;  %v8186_v20 = vld [vmem:[%s12476_s3] sm:$0x11] }
0x1863   : > { %7679 = vrot.lane.b32.xlu0 %v7570_v59, %s12475_s21  ;;  %s12511_s21 = sld [smem:[#allocation28_spill]] }
0x1864   : > { %v7613_v58 = vpop.f32.mrb[76].mxu0 }
0x1865   : > { %7687 = vrot.lane.b32.xlu1 %v7613_v58, %s12452_s0  ;;  %v9402_v45 = vpop.f32.mrb[77].mxu0 }
0x1866   : > { %v7616_v32 = vpop.f32.mrb[78].mxu0 }
0x1867   : > { %7689 = vrot.lane.b32.xlu0 %v7616_v32, %s12452_s0  ;;  %v9403_v50 = vpop.f32.mrb[79].mxu0  ;;  %s12478_s0 = smov 113  }
0x1869   : > { %7726 = vrot.lane.b32.xlu1 %v7716_v31, %s12477_s4  ;;  %s843_s24 = scalar_lea.vmem %s12511_s21, %s12473_s28 }
0x186b   : > { %7728 = vrot.lane.b32.xlu0 %v7723_v27, %s12477_s4 }
0x186d   : > { %7807 = vrot.lane.b32.xlu1 %v7797_v56, %s12478_s0 }
0x186f   : > { %7809 = vrot.lane.b32.xlu0 %v7804_v18, %s12478_s0  ;;  %v12054_v18 = vpack.c.bf16 %v11814_v54, %v11814_v54 }
0x1871   : > { %7866 = vrot.lane.b32.xlu1 %v7855_v61, %s12425_s2 }
0x1873   : > { %7868 = vrot.lane.b32.xlu0 %v7863_v6, %s12425_s2 }
0x1875   : > { %7933 = vrot.lane.b32.xlu1 %v7922_v63, %s12426_s8 }
0x1877   : > { %7935 = vrot.lane.b32.xlu0 %v7930_v3, %s12426_s8 }
0x1879   : > { %7990 = vrot.lane.b32.xlu1 %v7980_v17, %s12479_s7 }
0x187b   : > { %7992 = vrot.lane.b32.xlu0 %v7987_v7, %s12479_s7 }
0x187d   : > { %8072 = vrot.lane.b32.xlu1 %v8062_v60, %s12480_s6  ;;  %v8267_v60 = vld [vmem:[%s12476_s3] sm:$0x22] }
0x187f   : > { %8074 = vrot.lane.b32.xlu0 %v8069_v22, %s12480_s6  ;;  %v8987_v22 = vcombine.low %v8186_v20, %v8186_v20 }
0x1883   : > { %7764 = vrot.lane.b32.xlu0 %v11473_v28, %s12443_s11 }
0x18bf   : > { %v7633_v49 = vpop.permute.xlu1 %7632 }
0x18c0   : > { %7639 = vst.msk [vmem:[#allocation2 + $0x8] sm:$0xff] %vm7638_vm2, %v7633_v49  ;;  %v8988_v49 = vcombine.high %v8186_v20, %v8186_v20 }
0x18c1   : > { %v7635_v40 = vpop.permute.xlu0 %7634 }
0x18c2   : > { %7640 = vst.msk [vmem:[#allocation2 + $0x28] sm:$0xff] %vm7638_vm2, %v7635_v40  ;;  %v8324_v40 = vld [vmem:[%s12476_s3] sm:$0x22] }
0x18c3   : > { %v7644_v29 = vpop.permute.xlu1 %7643 }
0x18c4   : > { %7650 = vst.msk [vmem:[#allocation2 + $0x8] sm:$0xff] %vm7649_vm13, %v7644_v29 }
0x18c5   : > { %v7646_v23 = vpop.permute.xlu0 %7645 }
0x18c6   : > { %7651 = vst.msk [vmem:[#allocation2 + $0x28] sm:$0xff] %vm7649_vm13, %v7646_v23  ;;  %v8989_v23 = vcombine.low %v8267_v60, %v8267_v60 }
0x18c7   : > { %v7655_v59 = vpop.permute.xlu1 %7654 }
0x18c8   : > { %7661 = vst.msk [vmem:[#allocation2 + $0x8] sm:$0xff] %vm7660_vm9, %v7655_v59  ;;  %v8990_v59 = vcombine.high %v8267_v60, %v8267_v60 }
0x18c9   : > { %v7657_v12 = vpop.permute.xlu0 %7656 }
0x18ca   : > { %7662 = vst.msk [vmem:[#allocation2 + $0x28] sm:$0xff] %vm7660_vm9, %v7657_v12  ;;  %v8991_v12 = vcombine.low %v8324_v40, %v8324_v40 }
0x18cf   : > { %v7668_v19 = vpop.permute.xlu1 %7667  ;;  %v7892_v62 = vld [vmem:[#allocation2 + $0x8] sm:$0xff] }
0x18d0   : > { %7673 = vst.msk [vmem:[#allocation2 + $0x10] sm:$0xff] %vm7638_vm2, %v7668_v19  ;;  %v8193_v19 = vpack.i.b16 %v8987_v22, %v8987_v22 }
0x18d1   : > { %v7894_v36 = vld [vmem:[#allocation2 + $0x28] sm:$0xff]  ;;  %v7670_v55 = vpop.permute.xlu0 %7669 }
0x18d2   : > { %v12023_v25 = vpack.c.bf16 %v7894_v36, %v7892_v62  ;;  %7674 = vst.msk [vmem:[#allocation2 + $0x30] sm:$0xff] %vm7638_vm2, %v7670_v55  ;;  %8175 = vst [vmem:[#allocation2 + $0x28] sm:$0xff] %v10336_v0  ;;  %v8200_v62 = vpack.i.b16 %v8988_v49, %v8988_v49  ;;  %v8992_v36 = vcombine.high %v8324_v40, %v8324_v40  ;;  %v8391_v55 = vld [vmem:[%s12476_s3] sm:$0x44] }
0x18d3   : > { %v7678_v9 = vpop.permute.xlu1 %7677  ;;  %vm12491_vm2 = vmmov %vm12483_vm0 }
0x18d4   : > { %7683 = vst.msk [vmem:[#allocation2 + $0x10] sm:$0xff] %vm7649_vm13, %v7678_v9  ;;  %7766 = vrot.lane.b32.xlu0 %v12023_v25, %s12443_s11 }
0x18d5   : > { %v7680_v47 = vpop.permute.xlu0 %7679 }
0x18d6   : > { %7684 = vst.msk [vmem:[#allocation2 + $0x30] sm:$0xff] %vm7649_vm13, %v7680_v47  ;;  %vm12492_vm13 = vmmov %vm12483_vm0 }
0x18d7   : > { %v7688_v10 = vpop.permute.xlu1 %7687 }
0x18d8   : > { %7693 = vst.msk [vmem:[#allocation2 + $0x10] sm:$0xff] %vm7660_vm9, %v7688_v10  ;;  %v8274_v10 = vpack.i.b16 %v8989_v23, %v8989_v23 }
0x18d9   : > { %v7690_v57 = vpop.permute.xlu0 %7689 }
0x18da   : > { %7694 = vst.msk [vmem:[#allocation2 + $0x30] sm:$0xff] %vm7660_vm9, %v7690_v57  ;;  %v8281_v57 = vpack.i.b16 %v8990_v59, %v8990_v59  ;;  %vm12493_vm9 = vmmov %vm12482_vm5 }
0x18db   : > { %v7727_v24 = vpop.permute.xlu1 %7726 }
0x18dc   : > { %v7734_v1 = vmul.bf16 %v7727_v24, %v11473_v28 }
0x18dd   : > { %v7729_v58 = vpop.permute.xlu0 %7728 }
0x18de   : > { %7740 = vrot.lane.b32.xlu1 %v7734_v1, %s12480_s6  ;;  %v7730_v2 = vsel %vm12481_vm11, %v7727_v24, %v7729_v58  ;;  %v8993_v24 = vcombine.low %v8391_v55, %v8391_v55  ;;  %v8994_v1 = vcombine.high %v8391_v55, %v8391_v55  ;;  %vm8034_vm11 = vcmask 916480  }
0x18df   : > { %v7808_v45 = vpop.permute.xlu1 %7807  ;;  %v7893_v34 = vld [vmem:[#allocation2 + $0x10] sm:$0xff]  ;;  %v7735_v27 = vmul.bf16 %v12023_v25, %v7730_v2 }
0x18e0   : > { %v7815_v31 = vmul.bf16 %v7808_v45, %v11473_v28  ;;  %v8398_v2 = vshrl.u32 %v8993_v24, 16 }
0x18e1   : > { %v7895_v38 = vld [vmem:[#allocation2 + $0x30] sm:$0xff]  ;;  %v7810_v32 = vpop.permute.xlu0 %7809 }
0x18e2   : > { %v12037_v50 = vpack.c.bf16 %v7895_v38, %v7893_v34  ;;  %7821 = vrot.lane.b32.xlu1 %v7815_v31, %s12479_s7  ;;  %8176 = vst [vmem:[#allocation2 + $0x30] sm:$0xff] %v10338_v42  ;;  %v7811_v44 = vsel %vm12482_vm5, %v7808_v45, %v7810_v32  ;;  %v8205_v45 = vrot.slane %v8200_v62, %v9826_v14  ;;  %v8331_v31 = vshrl.u32 %v8991_v12, 16 }
0x18e3   : > { %v7867_v41 = vpop.permute.xlu1 %7866  ;;  %v7816_v37 = vmul.bf16 %v12023_v25, %v7811_v44  ;;  %v8339_v34 = vshrl.u32 %v8992_v36, 16  ;;  %v8279_v38 = vrot.slane %v8274_v10, %v9824_v13 }
0x18e4   : > { %v7736_v48 = vmul.bf16 %v12037_v50, %v7729_v58  ;;  %v7817_v26 = vmul.bf16 %v12037_v50, %v7810_v32  ;;  %v7874_v61 = vmul.bf16 %v7867_v41, %v12054_v18  ;;  %v8198_v58 = vrot.slane %v8193_v19, %v9826_v14 }
0x18e5   : > { %v7869_v56 = vpop.permute.xlu0 %7868  ;;  %v8406_v32 = vshrl.u32 %v8994_v1, 16  ;;  %v8340_v44 = vpack.i.b16 %v8339_v34, %v8339_v34 }
0x18e6   : > { %v7870_v28 = vsel %vm12483_vm0, %v7867_v41, %v7869_v56  ;;  %7744 = vrot.lane.b32.xlu0 %v7736_v48, %s12480_s6  ;;  %7742 = vrot.lane.b32.xlu1 %v7735_v27, %s12480_s6  ;;  %v7876_v54 = vmul.bf16 %v12037_v50, %v7869_v56  ;;  %v8286_v27 = vrot.slane %v8281_v57, %v9824_v13  ;;  %v8450_v41 = vld [vmem:[%s12476_s3] sm:$0x88]  ;;  %vm12494_vm0 = vcmask 908288  }
0x18e7   : > { %v7875_v43 = vmul.bf16 %v12023_v25, %v7870_v28  ;;  %v7934_v16 = vpop.permute.xlu1 %7933  ;;  %v8332_v48 = vpack.i.b16 %v8331_v31, %v8331_v31  ;;  %v8399_v56 = vpack.i.b16 %v8398_v2, %v8398_v2  ;;  %v8407_v28 = vpack.i.b16 %v8406_v32, %v8406_v32 }
0x18e8   : > { %v7941_v35 = vmul.bf16 %v7934_v16, %v12023_v25 }
0x18e9   : > { %v7936_v21 = vpop.permute.xlu0 %7935 }
0x18ea   : > { %7823 = vrot.lane.b32.xlu1 %v7816_v37, %s12479_s7  ;;  %7882 = vrot.lane.b32.xlu0 %v7875_v43, %s12426_s8  ;;  %v7943_v39 = vmul.bf16 %v7936_v21, %v12054_v18  ;;  %v7937_v63 = vsel %vm1073_vm1, %v7934_v16, %v7936_v21  ;;  %v8995_v43 = vcombine.low %v8450_v41, %v8450_v41  ;;  %v8531_v21 = vld [vmem:[%s12476_s3 + $0x8] sm:$0x11] }
0x18eb   : > { %v7991_v53 = vpop.permute.xlu1 %7990  ;;  %v7942_v11 = vmul.bf16 %v7937_v63, %v12037_v50  ;;  %v8337_v37 = vrot.slane %v8332_v48, %v9824_v13  ;;  %v8996_v16 = vcombine.high %v8450_v41, %v8450_v41 }
0x18ec   : > { %v7998_v4 = vmul.bf16 %v7991_v53, %v12023_v25 }
0x18ed   : > { %v7993_v6 = vpop.permute.xlu0 %7992 }
0x18ee   : > { %7768 = vrot.lane.b32.xlu1 %v12037_v50, %s12443_s11  ;;  %7825 = vrot.lane.b32.xlu0 %v7817_v26, %s12479_s7  ;;  %v8000_v8 = vmul.bf16 %v7993_v6, %v12054_v18  ;;  %v7994_v52 = vsel %vm12484_vm4, %v7991_v53, %v7993_v6  ;;  %v8345_v26 = vrot.slane %v8340_v44, %v9824_v13  ;;  %vm12495_vm4 = vmmov %vm12494_vm0 }
0x18ef   : > { %v7999_v3 = vmul.bf16 %v7994_v52, %v12037_v50  ;;  %v8073_v17 = vpop.permute.xlu1 %8072  ;;  %v8457_v53 = vpack.i.b16 %v8995_v43, %v8995_v43  ;;  %v8464_v6 = vpack.i.b16 %v8996_v16, %v8996_v16 }
0x18f0   : > { %v8080_v9 = vmul.bf16 %v8073_v17, %v12023_v25 }
0x18f1   : > { %v8075_v51 = vpop.permute.xlu0 %8074  ;;  %v8462_v13 = vrot.slane %v8457_v53, %v9867_v46 }
0x18f2   : > { %7947 = vrot.lane.b32.xlu1 %v7941_v35, %s12425_s2  ;;  %7880 = vrot.lane.b32.xlu0 %v7874_v61, %s12426_s8  ;;  %v8076_v7 = vsel %vm12486_vm12, %v8073_v17, %v8075_v51  ;;  %v8082_v47 = vmul.bf16 %v8075_v51, %v12054_v18  ;;  %v8404_v61 = vrot.slane %v8399_v56, %v9843_v30  ;;  %vm12496_vm12 = vmmov %vm12494_vm0 }
0x18f3   : > { %v8081_v29 = vmul.bf16 %v8076_v7, %v12037_v50  ;;  %v8997_v35 = vcombine.low %v8531_v21, %v8531_v21  ;;  %v8984_v56 = vcombine.low %v12080_v15, %v12080_v15 }
0x18f6   : > { %7884 = vrot.lane.b32.xlu1 %v7876_v54, %s12426_s8  ;;  %7951 = vrot.lane.b32.xlu0 %v7943_v39, %s12425_s2  ;;  %v8998_v39 = vcombine.high %v8531_v21, %v8531_v21  ;;  %v8412_v54 = vrot.slane %v8407_v28, %v9843_v30 }
0x18f8   : > { %v8545_v63 = vpack.i.b16 %v8998_v39, %v8998_v39 }
0x18fa   : > { %8004 = vrot.lane.b32.xlu0 %v7998_v4, %s12478_s0  ;;  %8008 = vrot.lane.b32.xlu1 %v8000_v8, %s12478_s0  ;;  %v8538_v8 = vpack.i.b16 %v8997_v35, %v8997_v35  ;;  %v8469_v4 = vrot.slane %v8464_v6, %v9867_v46  ;;  %v8550_v30 = vrot.slane %v8545_v63, %v9826_v14 }
0x18fc   : > { %v8543_v52 = vrot.slane %v8538_v8, %v9826_v14 }
0x18fe   : > { %7949 = vrot.lane.b32.xlu1 %v7942_v11, %s12425_s2  ;;  %8006 = vrot.lane.b32.xlu0 %v7999_v3, %s12478_s0  ;;  %v7765_v11 = vpop.permute.xlu0 %7764 }
0x1902   : > { %8030 = vrot.lane.b32.xlu1 %v12037_v50, %s12451_s5  ;;  %8032 = vrot.lane.b32.xlu0 %v12054_v18, %s12451_s5 }
0x1906   : > { %8028 = vrot.lane.b32.xlu1 %v12023_v25, %s12451_s5  ;;  %8088 = vrot.lane.b32.xlu0 %v8081_v29, %s12477_s4 }
0x190a   : > { %8090 = vrot.lane.b32.xlu1 %v8082_v47, %s12477_s4  ;;  %8086 = vrot.lane.b32.xlu0 %v8080_v9, %s12477_s4 }
0x190e   : > { %8208 = vrot.lane.b32.xlu1 %v8198_v58, %s12477_s4  ;;  %8210 = vrot.lane.b32.xlu0 %v8205_v45, %s12477_s4 }
0x1912   : > { %8289 = vrot.lane.b32.xlu1 %v8279_v38, %s12478_s0  ;;  %8291 = vrot.lane.b32.xlu0 %v8286_v27, %s12478_s0 }
0x1916   : > { %8348 = vrot.lane.b32.xlu1 %v8337_v37, %s12425_s2  ;;  %8350 = vrot.lane.b32.xlu0 %v8345_v26, %s12425_s2 }
0x191a   : > { %8415 = vrot.lane.b32.xlu1 %v8404_v61, %s12426_s8  ;;  %8417 = vrot.lane.b32.xlu0 %v8412_v54, %s12426_s8 }
0x191e   : > { %8472 = vrot.lane.b32.xlu1 %v8462_v13, %s12479_s7  ;;  %8474 = vrot.lane.b32.xlu0 %v8469_v4, %s12479_s7 }
0x1922   : > { %8553 = vrot.lane.b32.xlu1 %v8543_v52, %s12480_s6  ;;  %8555 = vrot.lane.b32.xlu0 %v8550_v30, %s12480_s6 }
0x1926   : > { %8246 = vrot.lane.b32.xlu0 %v12054_v18, %s12443_s11 }
0x1946   : > { %v7767_v51 = vpop.permute.xlu0 %7766 }
0x1947   : > { %v7770_v29 = vsel %vm3025_vm10, %v7765_v11, %v7767_v51 }
0x1950   : > { %v7741_v3 = vpop.permute.xlu1 %7740 }
0x1954   : > { %v7822_v46 = vpop.permute.xlu1 %7821 }
0x1958   : > { %v7743_v17 = vpop.permute.xlu1 %7742  ;;  %v7745_v33 = vpop.permute.xlu0 %7744 }
0x1959   : > { %v7746_v7 = vsel %vm12487_vm14, %v7741_v3, %v7743_v17  ;;  %v7747_v20 = vsel %vm12488_vm6, %v7743_v17, %v7745_v33  ;;  %vm12497_vm14 = vmmov %vm12491_vm2 }
0x195a   : > { %8126 = vmatprep.subr.bf16.mxu1 %v7747_v20  ;;  %vm12498_vm6 = vmmov %vm12482_vm5 }
0x195b   : > { %8127 = vmatpush1.bf16.msra.mxu1 %v7746_v7 }
0x195c   : > { %v7824_v14 = vpop.permute.xlu1 %7823  ;;  %v7883_v60 = vpop.permute.xlu0 %7882 }
0x195d   : > { %v7827_v19 = vsel %vm12490_vm8, %v7822_v46, %v7824_v14  ;;  %vm12500_vm8 = vcmask 138240  }
0x1960   : > { %v7769_v22 = vpop.permute.xlu1 %7768  ;;  %v7826_v49 = vpop.permute.xlu0 %7825 }
0x1961   : > { %v7771_v40 = vsel %vm3025_vm10, %v7767_v51, %v7769_v22  ;;  %v7828_v23 = vsel %vm12489_vm7, %v7824_v14, %v7826_v49 }
0x1962   : > { %8128 = vmatprep.subr.bf16.mxu1 %v7771_v40 }
0x1963   : > { %8129 = vmatpush1.bf16.msra.mxu1 %v7770_v29 }
0x1964   : > { %v7948_v59 = vpop.permute.xlu1 %7947  ;;  %v7881_v12 = vpop.permute.xlu0 %7880  ;;  %8130 = vmatprep.subr.bf16.mxu1 %v7828_v23 }
0x1965   : > { %v7886_v9 = vsel %vm1073_vm1, %v7881_v12, %v7883_v60 }
0x1967   : > { %8131 = vmatpush1.bf16.msra.mxu1 %v7827_v19 }
0x1968   : > { %v7885_v62 = vpop.permute.xlu1 %7884  ;;  %v7952_v36 = vpop.permute.xlu0 %7951 }
0x1969   : > { %v7887_v55 = vsel %vm1073_vm1, %v7883_v60, %v7885_v62 }
0x196a   : > { %8132 = vmatprep.subr.bf16.mxu1 %v7887_v55 }
0x196b   : > { %8133 = vmatpush1.bf16.msra.mxu1 %v7886_v9 }
0x196c   : > { %v8009_v47 = vpop.permute.xlu1 %8008  ;;  %v8005_v10 = vpop.permute.xlu0 %8004  ;;  %8134 = vmatprep.subr.bf16.mxu1 %v12037_v50 }
0x196f   : > { %8135 = vmatpush1.bf16.msra.mxu1 %v12023_v25 }
0x1970   : > { %v7950_v57 = vpop.permute.xlu1 %7949  ;;  %v8007_v24 = vpop.permute.xlu0 %8006 }
0x1971   : > { %v7953_v1 = vsel %vm12491_vm2, %v7948_v59, %v7950_v57  ;;  %v7954_v58 = vsel %vm12492_vm13, %v7950_v57, %v7952_v36  ;;  %v8011_v45 = vsel %vm12493_vm9, %v8007_v24, %v8009_v47  ;;  %v8010_v38 = vsel %vm12482_vm5, %v8005_v10, %v8007_v24  ;;  %vm12501_vm2 = vmmov %vm12500_vm8 }
0x1972   : > { %8136 = vmatprep.subr.bf16.mxu1 %v7954_v58  ;;  %vm12502_vm13 = vmmov %vm12501_vm2 }
0x1973   : > { %8137 = vmatpush1.bf16.msra.mxu1 %v7953_v1  ;;  %vm12503_vm9 = vmmov %vm12489_vm7 }
0x1974   : > { %v8031_v31 = vpop.permute.xlu1 %8030  ;;  %v8033_v34 = vpop.permute.xlu0 %8032  ;;  %8138 = vmatprep.subr.bf16.mxu1 %v8011_v45  ;;  %vm12504_vm5 = vmmov %vm12489_vm7 }
0x1975   : > { %v8036_v50 = vsel %vm8034_vm11, %v8031_v31, %v8033_v34 }
0x1977   : > { %8139 = vmatpush1.bf16.msra.mxu1 %v8010_v38 }
0x1978   : > { %v8029_v25 = vpop.permute.xlu1 %8028  ;;  %v8089_v2 = vpop.permute.xlu0 %8088  ;;  %8140 = vmatprep.subr.bf16.mxu1 %v8036_v50 }
0x1979   : > { %v8035_v32 = vsel %vm8034_vm11, %v8029_v25, %v8031_v31 }
0x197b   : > { %8141 = vmatpush1.bf16.msra.mxu1 %v8035_v32 }
0x197c   : > { %v8091_v27 = vpop.permute.xlu1 %8090  ;;  %v8087_v48 = vpop.permute.xlu0 %8086 }
0x197d   : > { %v8093_v44 = vsel %vm12494_vm0, %v8089_v2, %v8091_v27  ;;  %v8092_v41 = vsel %vm12495_vm4, %v8087_v48, %v8089_v2  ;;  %vm12507_vm4 = vmmov %vm12498_vm6 }
0x197e   : > { %8142 = vmatprep.subr.bf16.mxu1 %v8093_v44 }
0x197f   : > { %8143 = vmatpush1.bf16.msra.mxu1 %v8092_v41 }
0x1980   : > { %v8209_v28 = vpop.permute.xlu1 %8208  ;;  %v8211_v16 = vpop.permute.xlu0 %8210 }
0x1981   : > { %v8216_v43 = vmul.bf16 %v8209_v28, %v12054_v18 }
0x1982   : > { %8159 = vmatmul.mubr.bf16.vlgmr.msra.gmra.mrb[100].mxu1 %v8984_v56 }
0x1983   : > { %8222 = vrot.lane.b32.xlu1 %v8216_v43, %s12480_s6  ;;  %8694 = vmatprep.mubr.bf16.mxu1 %v9619_v5 }
0x1984   : > { %v8290_v37 = vpop.permute.xlu1 %8289  ;;  %v8292_v61 = vpop.permute.xlu0 %8291 }
0x1985   : > { %v8297_v26 = vmul.bf16 %v8290_v37, %v12054_v18  ;;  %v8293_v52 = vsel %vm12498_vm6, %v8290_v37, %v8292_v61 }
0x1987   : > { %8303 = vrot.lane.b32.xlu1 %v8297_v26, %s12479_s7 }
0x1988   : > { %v8349_v13 = vpop.permute.xlu1 %8348  ;;  %v8351_v4 = vpop.permute.xlu0 %8350 }
0x1989   : > { %v8352_v63 = vsel %vm12497_vm14, %v8349_v13, %v8351_v4  ;;  %v8356_v33 = vmul.bf16 %v8349_v13, %v12054_v18 }
0x198c   : > { %v8416_v3 = vpop.permute.xlu1 %8415  ;;  %v8418_v51 = vpop.permute.xlu0 %8417 }
0x198d   : > { %v8425_v20 = vmul.bf16 %v8418_v51, %v12054_v18  ;;  %v8419_v22 = vsel %vm1073_vm1, %v8416_v3, %v8418_v51 }
0x1990   : > { %v8475_v14 = vpop.permute.xlu0 %8474  ;;  %v8473_v49 = vpop.permute.xlu1 %8472 }
0x1991   : > { %v8482_v60 = vmul.bf16 %v8475_v14, %v12054_v18  ;;  %v8476_v23 = vsel %vm12489_vm7, %v8473_v49, %v8475_v14 }
0x1994   : > { %v8554_v12 = vpop.permute.xlu1 %8553  ;;  %v8556_v19 = vpop.permute.xlu0 %8555 }
0x1995   : > { %v8557_v55 = vsel %vm12500_vm8, %v8554_v12, %v8556_v19  ;;  %v8563_v47 = vmul.bf16 %v8556_v19, %v12054_v18 }
0x1998   : > { %v8247_v24 = vpop.permute.xlu0 %8246 }
0x19f5   : > { %v8223_v57 = vpop.permute.xlu1 %8222 }
0x19f9   : > { %v8304_v1 = vpop.permute.xlu1 %8303 }
0x1a55   : > { %v8160_v21 = vpop.f32.mrb[100].mxu1 }
0x1a56   : > { %v8167_v35 = vmax.f32 %v8160_v21, 0.0  ;;  %v8162_v39 = vpop.f32.mrb[101].mxu1 }
0x1a57   : > { %v8168_v15 = vmax.f32 %v8162_v39, 0.0  ;;  %v8164_v54 = vpop.f32.mrb[102].mxu1 }
0x1a58   : > { %8173 = vst [vmem:[#allocation2 + $0x8] sm:$0xff] %v8167_v35  ;;  %v12168_v53 = vpack.c.bf16 %v10336_v0, %v8167_v35  ;;  %v8165_v6 = vpop.f32.mrb[103].mxu1  ;;  %v8212_v0 = vsel %vm12496_vm12, %v8209_v28, %v8211_v16 }
0x1a59   : > { %8174 = vst [vmem:[#allocation2 + $0x10] sm:$0xff] %v8168_v15  ;;  %v12171_v5 = vpack.c.bf16 %v10338_v42, %v8168_v15 }
0x1a5a   : > { %8248 = vrot.lane.b32.xlu0 %v12168_v53, %s12443_s11  ;;  %8380 = vst [vmem:[#allocation3 + $0x40] sm:$0xff] %v12168_v53  ;;  %v8217_v42 = vmul.bf16 %v12168_v53, %v8212_v0  ;;  %v8357_v30 = vmul.bf16 %v8352_v63, %v12168_v53  ;;  %v8298_v11 = vmul.bf16 %v12168_v53, %v8293_v52 }
0x1a5b   : > { %8250 = vrot.lane.b32.xlu1 %v12171_v5, %s12443_s11  ;;  %v8218_v8 = vmul.bf16 %v12171_v5, %v8211_v16  ;;  %8381 = vst [vmem:[#allocation3 + $0x48] sm:$0xff] %v12171_v5  ;;  %v8299_v46 = vmul.bf16 %v12171_v5, %v8292_v61  ;;  %v8423_v17 = vmul.bf16 %v8416_v3, %v12168_v53 }
0x1a5c   : > { %v8358_v7 = vmul.bf16 %v12171_v5, %v8351_v4  ;;  %v8480_v40 = vmul.bf16 %v8473_v49, %v12168_v53  ;;  %v8424_v29 = vmul.bf16 %v8419_v22, %v12171_v5  ;;  %v8481_v59 = vmul.bf16 %v8476_v23, %v12171_v5 }
0x1a5d   : > { %v8562_v9 = vmul.bf16 %v8557_v55, %v12171_v5  ;;  %v8561_v10 = vmul.bf16 %v8554_v12, %v12168_v53 }
0x1a5e   : > { %8226 = vrot.lane.b32.xlu0 %v8218_v8, %s12480_s6 }
0x1a5f   : > { %8224 = vrot.lane.b32.xlu1 %v8217_v42, %s12480_s6 }
0x1a62   : > { %8364 = vrot.lane.b32.xlu0 %v8357_v30, %s12426_s8 }
0x1a63   : > { %8305 = vrot.lane.b32.xlu1 %v8298_v11, %s12479_s7 }
0x1a66   : > { %8307 = vrot.lane.b32.xlu0 %v8299_v46, %s12479_s7  ;;  %s12499_s7 = sld [smem:[#allocation24_spill]] }
0x1a67   : > { %8429 = vrot.lane.b32.xlu1 %v8423_v17, %s12425_s2 }
0x1a6a   : > { %8362 = vrot.lane.b32.xlu0 %v8356_v33, %s12426_s8 }
0x1a6b   : > { %8366 = vrot.lane.b32.xlu1 %v8358_v7, %s12426_s8 }
0x1a6c   : > { %v12213_v62 = vld [vmem:[%s12499_s7] sm:$0xff] }
0x1a6d   : > { %v9000_v36 = vcombine.high %v12213_v62, %v12213_v62  ;;  %v8999_v11 = vcombine.low %v12213_v62, %v12213_v62 }
0x1a6e   : > { %8433 = vrot.lane.b32.xlu0 %v8425_v20, %s12425_s2 }
0x1a6f   : > { %8490 = vrot.lane.b32.xlu1 %v8482_v60, %s12478_s0  ;;  %9001 = vmatprep.mubr.msk.bf16.mxu0 %vm3025_vm10, %v9000_v36 }
0x1a72   : > { %8486 = vrot.lane.b32.xlu0 %v8480_v40, %s12478_s0 }
0x1a73   : > { %8431 = vrot.lane.b32.xlu1 %v8424_v29, %s12425_s2 }
0x1a76   : > { %8488 = vrot.lane.b32.xlu0 %v8481_v59, %s12478_s0 }
0x1a77   : > { %8512 = vrot.lane.b32.xlu1 %v12171_v5, %s12451_s5 }
0x1a7a   : > { %8514 = vrot.lane.b32.xlu0 %v12054_v18, %s12451_s5 }
0x1a7b   : > { %8510 = vrot.lane.b32.xlu1 %v12168_v53, %s12451_s5 }
0x1a7e   : > { %8569 = vrot.lane.b32.xlu0 %v8562_v9, %s12477_s4 }
0x1a7f   : > { %8571 = vrot.lane.b32.xlu1 %v8563_v47, %s12477_s4 }
0x1a82   : > { %8567 = vrot.lane.b32.xlu0 %v8561_v10, %s12477_s4  ;;  %s12510_s4 = sld [smem:[#allocation26_spill]] }
0x1a88   : > { %v8650_v22 = vld [vmem:[%s12510_s4] sm:$0xf] }
0x1acc   : > { %v8249_v58 = vpop.permute.xlu0 %8248 }
0x1acd   : > { %v8252_v45 = vsel %vm3025_vm10, %v8247_v24, %v8249_v58  ;;  %v8251_v31 = vpop.permute.xlu1 %8250 }
0x1ace   : > { %8256 = vst [vmem:[#allocation3 + $0x10] sm:$0xff] %v8252_v45  ;;  %v8253_v34 = vsel %vm3025_vm10, %v8249_v58, %v8251_v31  ;;  %vm12505_vm10 = vmmov %vm12497_vm14 }
0x1acf   : > { %vm12506_vm0 = vmmov %vm12505_vm10 }
0x1ad0   : > { %v8227_v38 = vpop.permute.xlu0 %8226  ;;  %vm12509_vm14 = vmmov %vm12496_vm12 }
0x1ad1   : > { %v8225_v18 = vpop.permute.xlu1 %8224 }
0x1ad2   : > { %v8228_v50 = vsel %vm12501_vm2, %v8223_v57, %v8225_v18  ;;  %v8229_v25 = vsel %vm12502_vm13, %v8225_v18, %v8227_v38 }
0x1ad3   : > { %8232 = vst [vmem:[#allocation3] sm:$0xff] %v8228_v50  ;;  %8607 = vmatprep.subr.bf16.mxu0 %v8229_v25 }
0x1ad4   : > { %v8365_v2 = vpop.permute.xlu0 %8364  ;;  %8608 = vmatpush1.bf16.msra.mxu0 %v8228_v50 }
0x1ad5   : > { %v8306_v32 = vpop.permute.xlu1 %8305  ;;  %8609 = vmatprep.subr.bf16.mxu0 %v8253_v34 }
0x1ad6   : > { %v8309_v27 = vsel %vm12503_vm9, %v8304_v1, %v8306_v32 }
0x1ad7   : > { %8313 = vst [vmem:[#allocation3 + $0x20] sm:$0xff] %v8309_v27 }
0x1ad8   : > { %v8308_v48 = vpop.permute.xlu0 %8307  ;;  %8610 = vmatpush1.bf16.msra.mxu0 %v8252_v45 }
0x1ad9   : > { %v8310_v44 = vsel %vm12504_vm5, %v8306_v32, %v8308_v48  ;;  %v8430_v41 = vpop.permute.xlu1 %8429 }
0x1ada   : > { %8611 = vmatprep.subr.bf16.mxu0 %v8310_v44 }
0x1adc   : > { %v8363_v56 = vpop.permute.xlu0 %8362  ;;  %8612 = vmatpush1.bf16.msra.mxu0 %v8309_v27 }
0x1add   : > { %v8368_v28 = vsel %vm1073_vm1, %v8363_v56, %v8365_v2  ;;  %v8367_v43 = vpop.permute.xlu1 %8366 }
0x1ade   : > { %8372 = vst [vmem:[#allocation3 + $0x30] sm:$0xff] %v8368_v28  ;;  %v8369_v37 = vsel %vm1073_vm1, %v8365_v2, %v8367_v43  ;;  %vm12508_vm1 = vmmov %vm12507_vm4 }
0x1adf   : > { %8613 = vmatprep.subr.bf16.mxu0 %v8369_v37 }
0x1ae0   : > { %v8434_v26 = vpop.permute.xlu0 %8433  ;;  %8614 = vmatpush1.bf16.msra.mxu0 %v8368_v28 }
0x1ae1   : > { %v8491_v16 = vpop.permute.xlu1 %8490  ;;  %8615 = vmatprep.subr.bf16.mxu0 %v12171_v5 }
0x1ae4   : > { %v8487_v21 = vpop.permute.xlu0 %8486  ;;  %8616 = vmatpush1.bf16.msra.mxu0 %v12168_v53 }
0x1ae5   : > { %v8432_v61 = vpop.permute.xlu1 %8431 }
0x1ae6   : > { %v8435_v35 = vsel %vm12505_vm10, %v8430_v41, %v8432_v61  ;;  %v8436_v39 = vsel %vm12506_vm0, %v8432_v61, %v8434_v26 }
0x1ae7   : > { %8439 = vst [vmem:[#allocation3 + $0x50] sm:$0xff] %v8435_v35  ;;  %8617 = vmatprep.subr.bf16.mxu0 %v8436_v39 }
0x1ae8   : > { %v8489_v15 = vpop.permute.xlu0 %8488  ;;  %8618 = vmatpush1.bf16.msra.mxu0 %v8435_v35 }
0x1ae9   : > { %v8492_v54 = vsel %vm12507_vm4, %v8487_v21, %v8489_v15  ;;  %v8493_v6 = vsel %vm12508_vm1, %v8489_v15, %v8491_v16  ;;  %v8513_v8 = vpop.permute.xlu1 %8512 }
0x1aea   : > { %8496 = vst [vmem:[#allocation3 + $0x60] sm:$0xff] %v8492_v54  ;;  %8619 = vmatprep.subr.bf16.mxu0 %v8493_v6 }
0x1aec   : > { %v8515_v5 = vpop.permute.xlu0 %8514  ;;  %8620 = vmatpush1.bf16.msra.mxu0 %v8492_v54 }
0x1aed   : > { %v8517_v53 = vsel %vm8034_vm11, %v8513_v8, %v8515_v5  ;;  %v8511_v0 = vpop.permute.xlu1 %8510 }
0x1aee   : > { %v8516_v13 = vsel %vm8034_vm11, %v8511_v0, %v8513_v8  ;;  %8621 = vmatprep.subr.bf16.mxu0 %v8517_v53 }
0x1aef   : > { %8520 = vst [vmem:[#allocation3 + $0x70] sm:$0xff] %v8516_v13 }
0x1af0   : > { %v8570_v4 = vpop.permute.xlu0 %8569  ;;  %8622 = vmatpush1.bf16.msra.mxu0 %v8516_v13 }
0x1af1   : > { %v8572_v63 = vpop.permute.xlu1 %8571 }
0x1af2   : > { %v8574_v42 = vsel %vm12496_vm12, %v8570_v4, %v8572_v63 }
0x1af3   : > { %8623 = vmatprep.subr.bf16.mxu0 %v8574_v42 }
0x1af4   : > { %v8568_v52 = vpop.permute.xlu0 %8567 }
0x1af5   : > { %v8573_v30 = vsel %vm12509_vm14, %v8568_v52, %v8570_v4 }
0x1af6   : > { %8577 = vst [vmem:[#allocation3 + $0x80] sm:$0xff] %v8573_v30  ;;  %8624 = vmatpush1.bf16.msra.mxu0 %v8573_v30 }
0x1af9   : > { %8640 = vmatmul.mubr.bf16.vlgmr.msra.gmra.mrb[80].mxu0 %v8999_v11 }
0x1bcc   : > { %v8641_v3 = vpop.f32.mrb[80].mxu0 }
0x1bcd   : > { %v8648_v51 = vmax.f32 %v8641_v3, 0.0  ;;  %v8643_v46 = vpop.f32.mrb[81].mxu0 }
0x1bce   : > { %v8649_v17 = vmax.f32 %v8643_v46, 0.0  ;;  %v8645_v33 = vpop.f32.mrb[82].mxu0 }
0x1bcf   : > { %v8651_v7 = vpack.c.bf16 %v8648_v51, %v8648_v51  ;;  %v8646_v20 = vpop.f32.mrb[83].mxu0 }
0x1bd0   : > { %v8652_v14 = vpack.c.bf16 %v8649_v17, %v8649_v17 }
0x1bd1   : > { %v8657_v60 = vsel %vm906_vm3, %v8651_v7, 0 }
0x1bd2   : > { %9002 = vmatprep.subr.msk.bf16.mxu1 %vm906_vm3, %v8652_v14 }
0x1bd3   : > { %8663 = vmatpush1.bf16.msra.mxu1 %v8657_v60 }
0x1bd6   : > { %9003 = vmatmul.mubr.msk.bf16.vlgmr.msra.gmra.mrb[104].mxu1 %vm3401_vm15, %v8650_v22 }
0x1ca9   : > { %v8696_v49 = vpop.f32.mrb[104].mxu1 }
0x1caa   : > { %8703 = vst [vmem:[%s843_s24] sm:$0xff] %v8696_v49  ;;  %v8698_v40 = vpop.f32.mrb[105].mxu1 }
0x1cab   : > { %8704 = vst [vmem:[%s843_s24 + $0x8] sm:$0xff] %v8698_v40  ;;  %v8700_v29 = vpop.f32.mrb[106].mxu1 }
0x1cac   : > { %v8701_v23 = vpop.f32.mrb[107].mxu1 }
0x1cad PF: > { %s12512_s23 = sld [smem:[#allocation4_spill]] }
0x1cb3   : > { %s38_s7 = sadd.s32 1, %s12512_s23  }
0x1cb4   : > { %p35_p4 = scmp.ge.s32.totalorder %s38_s7, 4  }
0x1cb6   :  { %37 = sbr.rel (!%p35_p4) target bundleno = 24 (0x18), region = 174 }

</bundles_post_ra>
